<compile_context>
chip_gen: v5e
topology: v5e:2x2
jax: 0.10.0
libtpu: 0.0.40
codegen_flags: <defaults>
</compile_context>

<pallas_src>
from functools import partial

import jax
import jax.numpy as jnp
from jax.experimental import pallas as pl
from jax.experimental.pallas import tpu as pltpu

EPS = 1e-5
KMAX = 7     # largest conv kernel in the merged weight
PAD = 3      # its SAME padding


# ---------------------------------------------------------------------------
# Fused kernel: one image per grid step.
# ---------------------------------------------------------------------------
def dense_layer_kernel(x_ref, w1_ref, s1_ref, b1_ref, b2_ref, wf_ref,
                       o_ref, buf_ref, col_ref, *, H, W):
    cmid = buf_ref.shape[0]
    MOUT = H * W                     # matmul lane width == output pixels (128-aligned)
    MARGIN = PAD * W + PAD           # flat zero margin absorbing vertical OOB taps

    # ---- BN1 -> ReLU -> 1x1 conv (BN2 scale pre-folded into w1) -> +shift -> ReLU
    x = x_ref[0]                                                    # (Cin, H*W)  f32
    z = jnp.maximum(x * s1_ref[...] + b1_ref[...], 0.0)
    y = jnp.dot(w1_ref[...], z.astype(w1_ref.dtype),
                preferred_element_type=jnp.float32)                 # (Cmid, H*W) f32
    y = jnp.maximum(y + b2_ref[...], 0.0)

    # ---- store y flanked by zero margins: one lane-dense body store + 2 tiny margins
    buf_ref[:, 0:MARGIN] = jnp.zeros((cmid, MARGIN), buf_ref.dtype)
    buf_ref[:, MARGIN + MOUT:MARGIN + MOUT + MARGIN] = jnp.zeros(
        (cmid, MARGIN), buf_ref.dtype)
    buf_ref[:, MARGIN:MARGIN + MOUT] = y

    # ---- im2col: materialize each of the 49 taps exactly once (aligned dense stores).
    #      tap (kh, kw): flat shift dh*W + dw of buf; horizontal wrap-around is masked
    #      with a per-kw lane predicate, vertical OOB rows read the zero margins.
    wpos = jax.lax.broadcasted_iota(jnp.int32, (1, MOUT), 1) % W    # w coord of each lane
    for kw in range(KMAX):
        dw = kw - PAD
        mask = None if dw == 0 else ((wpos + dw >= 0) & (wpos + dw < W))
        for kh in range(KMAX):
            dh = kh - PAD
            t = kh * KMAX + kw
            start = MARGIN + dh * W + dw
            patch = buf_ref[:, start:start + MOUT]                  # (Cmid, MOUT) f32
            if mask is not None:
                patch = jnp.where(mask, patch, 0.0)
            col_ref[t * cmid:(t + 1) * cmid, :] = patch.astype(col_ref.dtype)

    # ---- single fused large-K matmul: (Ctot, 49*Cmid) x (49*Cmid, H*W), f32 accum
    acc = jnp.dot(wf_ref[...], col_ref[...], preferred_element_type=jnp.float32)

    # ---- output is already channel-major and exactly H*W lanes: one dense store
    o_ref[0] = acc.astype(o_ref.dtype)


def fused_dense_layer(x_flat, w1t, s1, b1, b2, wf, *, H, W):
    N, cin, HW = x_flat.shape
    cmid = w1t.shape[0]
    ctot = wf.shape[0]
    bufw = HW + 2 * (PAD * W + PAD)
    kern = partial(dense_layer_kernel, H=H, W=W)
    return pl.pallas_call(
        kern,
        out_shape=jax.ShapeDtypeStruct((N, ctot, HW), jnp.float32),
        grid_spec=pltpu.PrefetchScalarGridSpec(
            num_scalar_prefetch=0,
            grid=(N,),
            in_specs=[
                pl.BlockSpec((1, cin, HW), lambda n: (n, 0, 0)),
                pl.BlockSpec((cmid, cin), lambda n: (0, 0)),
                pl.BlockSpec((cin, 1), lambda n: (0, 0)),
                pl.BlockSpec((cin, 1), lambda n: (0, 0)),
                pl.BlockSpec((cmid, 1), lambda n: (0, 0)),
                pl.BlockSpec((ctot, KMAX * KMAX * cmid), lambda n: (0, 0)),
            ],
            out_specs=pl.BlockSpec((1, ctot, HW), lambda n: (n, 0, 0)),
            scratch_shapes=[
                pltpu.VMEM((cmid, bufw), jnp.float32),               # margin-padded y
                pltpu.VMEM((KMAX * KMAX * cmid, HW), jnp.bfloat16),  # im2col stack
            ],
        ),
        compiler_params=pltpu.CompilerParams(dimension_semantics=("parallel",)),
    )(x_flat, w1t, s1, b1, b2, wf)


# ---------------------------------------------------------------------------
# Full forward: no transposes at all (input stays NCHW, output emitted NCHW).
# ---------------------------------------------------------------------------
@jax.jit
def my_dense_layer_forward(x_nchw, p):
    N, cin, H, W = x_nchw.shape
    x_flat = x_nchw.reshape(N, cin, H * W)             # free reshape, no transpose
    out = fused_dense_layer(x_flat, p["w1t"], p["s1"], p["b1"], p["b2"], p["wf"],
                            H=H, W=W)
    ctot = p["wf"].shape[0]
    # TODO(synk): training-mode dropout (drop_rate > 0) not implemented; identity in eval.
    return out.reshape(N, ctot, H, W)                  # already channel-major (NCHW)


# ---------------------------------------------------------------------------
# Parameters: raw (PyTorch-like) params for the reference, prepped/folded for the kernel.
# ---------------------------------------------------------------------------
def init_raw_params(key, num_input_features, growth_rate, bn_size):
    cin = num_input_features
    cmid = bn_size * growth_rate
    # Mirrors the PyTorch module: c3+c5+c7 != growth_rate if growth_rate % 6 != 0.
    c3 = int(growth_rate * 3 / 6)
    c5 = int(growth_rate * 2 / 6)
    c7 = int(growth_rate * 1 / 6)
    ks = jax.random.split(key, 12)
    return {
        "g1": jax.random.normal(ks[0], (cin,)) * 0.1 + 1.0,
        "b1": jax.random.normal(ks[1], (cin,)) * 0.1,
        "m1": jax.random.normal(ks[2], (cin,)) * 0.1,
        "v1": jnp.abs(jax.random.normal(ks[3], (cin,))) * 0.1 + 1.0,
        "g2": jax.random.normal(ks[4], (cmid,)) * 0.1 + 1.0,
        "b2": jax.random.normal(ks[5], (cmid,)) * 0.1,
        "m2": jax.random.normal(ks[6], (cmid,)) * 0.1,
        "v2": jnp.abs(jax.random.normal(ks[7], (cmid,))) * 0.1 + 1.0,
        "w1": jax.random.normal(ks[8], (cmid, cin, 1, 1)) * 0.1,   # OIHW
        "w3": jax.random.normal(ks[9], (c3, cmid, 3, 3)) * 0.05,
        "w5": jax.random.normal(ks[10], (c5, cmid, 5, 5)) * 0.05,
        "w7": jax.random.normal(ks[11], (c7, cmid, 7, 7)) * 0.05,
    }


def prepare_params(raw):
    s1 = raw["g1"] / jnp.sqrt(raw["v1"] + EPS)
    b1 = raw["b1"] - raw["m1"] * s1
    s2 = raw["g2"] / jnp.sqrt(raw["v2"] + EPS)
    b2 = raw["b2"] - raw["m2"] * s2

    w1 = raw["w1"][:, :, 0, 0]                       # (Cmid, Cin)
    w1t = w1 * s2[:, None]                           # fold BN2 scale into 1x1 conv
    cmid = w1.shape[0]
    c3, c5, c7 = raw["w3"].shape[0], raw["w5"].shape[0], raw["w7"].shape[0]
    ctot = c3 + c5 + c7

    # Merge the three convs into one zero-padded 7x7 weight, (kh, kw, O, I) layout.
    wc = jnp.zeros((KMAX, KMAX, ctot, cmid), jnp.float32)
    w3 = jnp.transpose(raw["w3"], (2, 3, 0, 1))      # (3,3,c3,Cmid)
    w5 = jnp.transpose(raw["w5"], (2, 3, 0, 1))
    w7 = jnp.transpose(raw["w7"], (2, 3, 0, 1))
    wc = wc.at[2:5, 2:5, 0:c3, :].set(w3)            # pad 1 -> offset 2 in 7x7 frame
    wc = wc.at[1:6, 1:6, c3:c3 + c5, :].set(w5)      # pad 2 -> offset 1
    wc = wc.at[0:7, 0:7, c3 + c5:, :].set(w7)        # pad 3 -> offset 0

    # Fuse all 49 taps into one large-K weight: wf[o, (kh*7+kw)*Cmid + i] = wc[kh,kw,o,i]
    wf = jnp.transpose(wc, (2, 0, 1, 3)).reshape(ctot, KMAX * KMAX * cmid)

    return {
        "w1t": w1t.astype(jnp.bfloat16),             # MXU operand -> bf16
        "s1": s1.reshape(-1, 1).astype(jnp.float32),
        "b1": b1.reshape(-1, 1).astype(jnp.float32),
        "b2": b2.reshape(-1, 1).astype(jnp.float32),
        "wf": wf.astype(jnp.bfloat16),               # MXU operand -> bf16
    }


# ---------------------------------------------------------------------------
# Pure-JAX reference (mirrors the PyTorch module, eval mode, f32).
# ---------------------------------------------------------------------------
def reference_forward(x_nchw, raw):
    x = jnp.transpose(x_nchw, (0, 2, 3, 1))                       # NHWC
    s1 = raw["g1"] / jnp.sqrt(raw["v1"] + EPS)
    x = jnp.maximum((x - raw["m1"]) * s1 + raw["b1"], 0.0)
    w1 = jnp.transpose(raw["w1"][:, :, 0, 0], (1, 0))             # (Cin, Cmid)
    y = jnp.einsum("nhwc,cd->nhwd", x, w1)
    s2 = raw["g2"] / jnp.sqrt(raw["v2"] + EPS)
    y = jnp.maximum((y - raw["m2"]) * s2 + raw["b2"], 0.0)

    def conv(a, w_oihw, pad):
        w = jnp.transpose(w_oihw, (2, 3, 1, 0))                   # HWIO
        return jax.lax.conv_general_dilated(
            a, w, (1, 1), [(pad, pad), (pad, pad)],
            dimension_numbers=("NHWC", "HWIO", "NHWC"))

    o = jnp.concatenate([conv(y, raw["w3"], 1),
                         conv(y, raw["w5"], 2),
                         conv(y, raw["w7"], 3)], axis=-1)
    return jnp.transpose(o, (0, 3, 1, 2))                         # NCHW


if __name__ == "__main__":
    key = jax.random.PRNGKey(0)
    # myDenseLayer(num_input_features=8, growth_rate=12, bn_size=4, drop_rate=0.0)
    num_input_features, growth_rate, bn_size = 8, 12, 4
    N, H, W = 2, 16, 16

    kx, kp = jax.random.split(key)
    x = jax.random.normal(kx, (N, num_input_features, H, W), dtype=jnp.float32)  # NCHW
    raw = init_raw_params(kp, num_input_features, growth_rate, bn_size)
    params = prepare_params(raw)

    out = jax.block_until_ready(my_dense_layer_forward(x, params))
    ref = jax.block_until_ready(reference_forward(x, raw))

    assert out.shape == ref.shape == (N, growth_rate, H, W), (out.shape, ref.shape)
    max_err = float(jnp.max(jnp.abs(out - ref)))
    # bf16 MXU operands with f32 accumulation: tolerance loosened per review guidance.
    assert jnp.allclose(out, ref, atol=3e-2, rtol=3e-2), max_err
    print("KERNEL_OK")
</pallas_src>

<mosaic_0001>
module attributes {stable_mosaic.version = 11 : i64} {
  func.func @dense_layer_kernel(%arg0: i32, %arg1: memref<1x8x256xf32, #tpu.memory_space<vmem>>, %arg2: memref<48x8xbf16, #tpu.memory_space<vmem>>, %arg3: memref<8x1xf32, #tpu.memory_space<vmem>>, %arg4: memref<8x1xf32, #tpu.memory_space<vmem>>, %arg5: memref<48x1xf32, #tpu.memory_space<vmem>>, %arg6: memref<12x2352xbf16, #tpu.memory_space<vmem>>, %arg7: memref<1x12x256xf32, #tpu.memory_space<vmem>>, %arg8: memref<48x358xf32, #tpu.memory_space<vmem>>, %arg9: memref<2352x256xbf16, #tpu.memory_space<vmem>>) attributes {dimension_semantics = [#tpu.dimension_semantics<parallel>], iteration_bounds = array<i64: 2>, scalar_prefetch = 0 : i64, scratch_operands = 2 : i64, tpu.core_type = #tpu.core_type<tc>, window_params = [{transform_indices = @transform_0, window_bounds = array<i64: 1, 8, 256>}, {pipeline_mode = #tpu.pipeline_mode<synchronous>, transform_indices = @transform_1, window_bounds = array<i64: 48, 8>}, {pipeline_mode = #tpu.pipeline_mode<synchronous>, transform_indices = @transform_2, window_bounds = array<i64: 8, 1>}, {pipeline_mode = #tpu.pipeline_mode<synchronous>, transform_indices = @transform_3, window_bounds = array<i64: 8, 1>}, {pipeline_mode = #tpu.pipeline_mode<synchronous>, transform_indices = @transform_4, window_bounds = array<i64: 48, 1>}, {pipeline_mode = #tpu.pipeline_mode<synchronous>, transform_indices = @transform_5, window_bounds = array<i64: 12, 2352>}, {transform_indices = @transform_6, window_bounds = array<i64: 1, 12, 256>}]} {
    %c0 = arith.constant 0 : index
    %c0_0 = arith.constant 0 : index
    %c0_1 = arith.constant 0 : index
    %0 = vector.load %arg1[%c0, %c0_0, %c0_1] : memref<1x8x256xf32, #tpu.memory_space<vmem>>, vector<1x8x256xf32>
    %1 = vector.shape_cast %0 : vector<1x8x256xf32> to vector<8x256xf32>
    %c0_2 = arith.constant 0 : index
    %c0_3 = arith.constant 0 : index
    %2 = vector.load %arg3[%c0_2, %c0_3] : memref<8x1xf32, #tpu.memory_space<vmem>>, vector<8x1xf32>
    %3 = vector.broadcast %2 : vector<8x1xf32> to vector<8x256xf32>
    %4 = arith.mulf %1, %3 : vector<8x256xf32>
    %c0_4 = arith.constant 0 : index
    %c0_5 = arith.constant 0 : index
    %5 = vector.load %arg4[%c0_4, %c0_5] : memref<8x1xf32, #tpu.memory_space<vmem>>, vector<8x1xf32>
    %6 = vector.broadcast %5 : vector<8x1xf32> to vector<8x256xf32>
    %7 = arith.addf %4, %6 : vector<8x256xf32>
    %cst = arith.constant 0.000000e+00 : f32
    %8 = vector.broadcast %cst : f32 to vector<8x256xf32>
    %9 = arith.maximumf %7, %8 : vector<8x256xf32>
    %c0_6 = arith.constant 0 : index
    %c0_7 = arith.constant 0 : index
    %10 = vector.load %arg2[%c0_6, %c0_7] : memref<48x8xbf16, #tpu.memory_space<vmem>>, vector<48x8xbf16>
    %11 = arith.truncf %9 : vector<8x256xf32> to vector<8x256xbf16>
    %cst_8 = arith.constant dense<0.000000e+00> : vector<48x256xf32>
    %12 = tpu.matmul %10, %11, %cst_8 {dimension_numbers = #tpu.dot_dimension_numbers<[1], [0], [0], [1], [0, 0, 1, 1], [], []>} : vector<48x8xbf16>, vector<8x256xbf16>, vector<48x256xf32> -> vector<48x256xf32>
    %c0_9 = arith.constant 0 : index
    %c0_10 = arith.constant 0 : index
    %13 = vector.load %arg5[%c0_9, %c0_10] : memref<48x1xf32, #tpu.memory_space<vmem>>, vector<48x1xf32>
    %14 = vector.broadcast %13 : vector<48x1xf32> to vector<48x256xf32>
    %15 = arith.addf %12, %14 : vector<48x256xf32>
    %cst_11 = arith.constant 0.000000e+00 : f32
    %16 = vector.broadcast %cst_11 : f32 to vector<48x256xf32>
    %17 = arith.maximumf %15, %16 : vector<48x256xf32>
    %cst_12 = arith.constant 0.000000e+00 : f32
    %18 = vector.broadcast %cst_12 : f32 to vector<48x51xf32>
    %c0_13 = arith.constant 0 : index
    %c0_14 = arith.constant 0 : index
    %19 = vector.load %arg8[%c0_13, %c0_14] : memref<48x358xf32, #tpu.memory_space<vmem>>, vector<48x51xf32>
    tpu.vector_store %arg8[%c0_13, %c0_14], %18 {strides = array<i32>} : memref<48x358xf32, #tpu.memory_space<vmem>>, vector<48x51xf32>,
    %cst_15 = arith.constant 0.000000e+00 : f32
    %20 = vector.broadcast %cst_15 : f32 to vector<48x51xf32>
    %c0_16 = arith.constant 0 : index
    %c307 = arith.constant 307 : index
    %21 = vector.load %arg8[%c0_16, %c307] : memref<48x358xf32, #tpu.memory_space<vmem>>, vector<48x51xf32>
    tpu.vector_store %arg8[%c0_16, %c307], %20 {strides = array<i32>} : memref<48x358xf32, #tpu.memory_space<vmem>>, vector<48x51xf32>,
    %c0_17 = arith.constant 0 : index
    %c51 = arith.constant 51 : index
    %22 = vector.load %arg8[%c0_17, %c51] : memref<48x358xf32, #tpu.memory_space<vmem>>, vector<48x256xf32>
    tpu.vector_store %arg8[%c0_17, %c51], %17 {strides = array<i32>} : memref<48x358xf32, #tpu.memory_space<vmem>>, vector<48x256xf32>,
    %23 = tpu.iota {dimensions = array<i32: 1>} : vector<1x256xi32>
    %c16_i32 = arith.constant 16 : i32
    %c0_i32 = arith.constant 0 : i32
    %24 = arith.cmpi eq, %c16_i32, %c0_i32 : i32
    %c1_i32 = arith.constant 1 : i32
    %25 = arith.select %24, %c1_i32, %c16_i32 : i32
    %26 = vector.broadcast %25 : i32 to vector<1x256xi32>
    %27 = arith.remsi %23, %26 : vector<1x256xi32>
    %c0_i32_18 = arith.constant 0 : i32
    %28 = vector.broadcast %c0_i32_18 : i32 to vector<1x256xi32>
    %29 = arith.cmpi ne, %27, %28 : vector<1x256xi32>
    %c0_i32_19 = arith.constant 0 : i32
    %30 = vector.broadcast %c0_i32_19 : i32 to vector<1x256xi32>
    %31 = arith.cmpi slt, %27, %30 : vector<1x256xi32>
    %c0_i32_20 = arith.constant 0 : i32
    %32 = arith.cmpi slt, %25, %c0_i32_20 : i32
    %33 = vector.broadcast %32 : i1 to vector<1x256xi1>
    %34 = vector.broadcast %33 : vector<1x256xi1> to vector<1x256xi1>
    %35 = arith.xori %31, %34 : vector<1x256xi1>
    %36 = arith.andi %35, %29 : vector<1x256xi1>
    %37 = vector.broadcast %25 : i32 to vector<1x256xi32>
    %38 = arith.addi %27, %37 : vector<1x256xi32>
    %39 = arith.select %36, %38, %27 : vector<1x256xi1>, vector<1x256xi32>
    %c-3_i32 = arith.constant -3 : i32
    %40 = vector.broadcast %c-3_i32 : i32 to vector<1x256xi32>
    %41 = arith.addi %39, %40 : vector<1x256xi32>
    %c0_i32_21 = arith.constant 0 : i32
    %42 = vector.broadcast %c0_i32_21 : i32 to vector<1x256xi32>
    %43 = arith.cmpi sge, %41, %42 : vector<1x256xi32>
    %c-3_i32_22 = arith.constant -3 : i32
    %44 = vector.broadcast %c-3_i32_22 : i32 to vector<1x256xi32>
    %45 = arith.addi %39, %44 : vector<1x256xi32>
    %c16_i32_23 = arith.constant 16 : i32
    %46 = vector.broadcast %c16_i32_23 : i32 to vector<1x256xi32>
    %47 = arith.cmpi slt, %45, %46 : vector<1x256xi32>
    %48 = arith.andi %43, %47 : vector<1x256xi1>
    %c0_24 = arith.constant 0 : index
    %c0_25 = arith.constant 0 : index
    %49 = vector.load %arg8[%c0_24, %c0_25] : memref<48x358xf32, #tpu.memory_space<vmem>>, vector<48x256xf32>
    %cst_26 = arith.constant 0.000000e+00 : f32
    %50 = vector.shape_cast %48 : vector<1x256xi1> to vector<1x256xi1>
    %51 = vector.broadcast %50 : vector<1x256xi1> to vector<48x256xi1>
    %52 = vector.broadcast %cst_26 : f32 to vector<48x256xf32>
    %53 = arith.select %51, %49, %52 : vector<48x256xi1>, vector<48x256xf32>
    %54 = arith.truncf %53 : vector<48x256xf32> to vector<48x256xbf16>
    %c0_27 = arith.constant 0 : index
    %c0_28 = arith.constant 0 : index
    %55 = vector.load %arg9[%c0_27, %c0_28] : memref<2352x256xbf16, #tpu.memory_space<vmem>>, vector<48x256xbf16>
    tpu.vector_store %arg9[%c0_27, %c0_28], %54 {strides = array<i32>} : memref<2352x256xbf16, #tpu.memory_space<vmem>>, vector<48x256xbf16>,
    %c0_29 = arith.constant 0 : index
    %c16 = arith.constant 16 : index
    %56 = vector.load %arg8[%c0_29, %c16] : memref<48x358xf32, #tpu.memory_space<vmem>>, vector<48x256xf32>
    %cst_30 = arith.constant 0.000000e+00 : f32
    %57 = vector.shape_cast %48 : vector<1x256xi1> to vector<1x256xi1>
    %58 = vector.broadcast %57 : vector<1x256xi1> to vector<48x256xi1>
    %59 = vector.broadcast %cst_30 : f32 to vector<48x256xf32>
    %60 = arith.select %58, %56, %59 : vector<48x256xi1>, vector<48x256xf32>
    %61 = arith.truncf %60 : vector<48x256xf32> to vector<48x256xbf16>
    %c336 = arith.constant 336 : index
    %c0_31 = arith.constant 0 : index
    %62 = vector.load %arg9[%c336, %c0_31] : memref<2352x256xbf16, #tpu.memory_space<vmem>>, vector<48x256xbf16>
    tpu.vector_store %arg9[%c336, %c0_31], %61 {strides = array<i32>} : memref<2352x256xbf16, #tpu.memory_space<vmem>>, vector<48x256xbf16>,
    %c0_32 = arith.constant 0 : index
    %c32 = arith.constant 32 : index
    %63 = vector.load %arg8[%c0_32, %c32] : memref<48x358xf32, #tpu.memory_space<vmem>>, vector<48x256xf32>
    %cst_33 = arith.constant 0.000000e+00 : f32
    %64 = vector.shape_cast %48 : vector<1x256xi1> to vector<1x256xi1>
    %65 = vector.broadcast %64 : vector<1x256xi1> to vector<48x256xi1>
    %66 = vector.broadcast %cst_33 : f32 to vector<48x256xf32>
    %67 = arith.select %65, %63, %66 : vector<48x256xi1>, vector<48x256xf32>
    %68 = arith.truncf %67 : vector<48x256xf32> to vector<48x256xbf16>
    %c672 = arith.constant 672 : index
    %c0_34 = arith.constant 0 : index
    %69 = vector.load %arg9[%c672, %c0_34] : memref<2352x256xbf16, #tpu.memory_space<vmem>>, vector<48x256xbf16>
    tpu.vector_store %arg9[%c672, %c0_34], %68 {strides = array<i32>} : memref<2352x256xbf16, #tpu.memory_space<vmem>>, vector<48x256xbf16>,
    %c0_35 = arith.constant 0 : index
    %c48 = arith.constant 48 : index
    %70 = vector.load %arg8[%c0_35, %c48] : memref<48x358xf32, #tpu.memory_space<vmem>>, vector<48x256xf32>
    %cst_36 = arith.constant 0.000000e+00 : f32
    %71 = vector.shape_cast %48 : vector<1x256xi1> to vector<1x256xi1>
    %72 = vector.broadcast %71 : vector<1x256xi1> to vector<48x256xi1>
    %73 = vector.broadcast %cst_36 : f32 to vector<48x256xf32>
    %74 = arith.select %72, %70, %73 : vector<48x256xi1>, vector<48x256xf32>
    %75 = arith.truncf %74 : vector<48x256xf32> to vector<48x256xbf16>
    %c1008 = arith.constant 1008 : index
    %c0_37 = arith.constant 0 : index
    %76 = vector.load %arg9[%c1008, %c0_37] : memref<2352x256xbf16, #tpu.memory_space<vmem>>, vector<48x256xbf16>
    tpu.vector_store %arg9[%c1008, %c0_37], %75 {strides = array<i32>} : memref<2352x256xbf16, #tpu.memory_space<vmem>>, vector<48x256xbf16>,
    %c0_38 = arith.constant 0 : index
    %c64 = arith.constant 64 : index
    %77 = vector.load %arg8[%c0_38, %c64] : memref<48x358xf32, #tpu.memory_space<vmem>>, vector<48x256xf32>
    %cst_39 = arith.constant 0.000000e+00 : f32
    %78 = vector.shape_cast %48 : vector<1x256xi1> to vector<1x256xi1>
    %79 = vector.broadcast %78 : vector<1x256xi1> to vector<48x256xi1>
    %80 = vector.broadcast %cst_39 : f32 to vector<48x256xf32>
    %81 = arith.select %79, %77, %80 : vector<48x256xi1>, vector<48x256xf32>
    %82 = arith.truncf %81 : vector<48x256xf32> to vector<48x256xbf16>
    %c1344 = arith.constant 1344 : index
    %c0_40 = arith.constant 0 : index
    %83 = vector.load %arg9[%c1344, %c0_40] : memref<2352x256xbf16, #tpu.memory_space<vmem>>, vector<48x256xbf16>
    tpu.vector_store %arg9[%c1344, %c0_40], %82 {strides = array<i32>} : memref<2352x256xbf16, #tpu.memory_space<vmem>>, vector<48x256xbf16>,
    %c0_41 = arith.constant 0 : index
    %c80 = arith.constant 80 : index
    %84 = vector.load %arg8[%c0_41, %c80] : memref<48x358xf32, #tpu.memory_space<vmem>>, vector<48x256xf32>
    %cst_42 = arith.constant 0.000000e+00 : f32
    %85 = vector.shape_cast %48 : vector<1x256xi1> to vector<1x256xi1>
    %86 = vector.broadcast %85 : vector<1x256xi1> to vector<48x256xi1>
    %87 = vector.broadcast %cst_42 : f32 to vector<48x256xf32>
    %88 = arith.select %86, %84, %87 : vector<48x256xi1>, vector<48x256xf32>
    %89 = arith.truncf %88 : vector<48x256xf32> to vector<48x256xbf16>
    %c1680 = arith.constant 1680 : index
    %c0_43 = arith.constant 0 : index
    %90 = vector.load %arg9[%c1680, %c0_43] : memref<2352x256xbf16, #tpu.memory_space<vmem>>, vector<48x256xbf16>
    tpu.vector_store %arg9[%c1680, %c0_43], %89 {strides = array<i32>} : memref<2352x256xbf16, #tpu.memory_space<vmem>>, vector<48x256xbf16>,
    %c0_44 = arith.constant 0 : index
    %c96 = arith.constant 96 : index
    %91 = vector.load %arg8[%c0_44, %c96] : memref<48x358xf32, #tpu.memory_space<vmem>>, vector<48x256xf32>
    %cst_45 = arith.constant 0.000000e+00 : f32
    %92 = vector.shape_cast %48 : vector<1x256xi1> to vector<1x256xi1>
    %93 = vector.broadcast %92 : vector<1x256xi1> to vector<48x256xi1>
    %94 = vector.broadcast %cst_45 : f32 to vector<48x256xf32>
    %95 = arith.select %93, %91, %94 : vector<48x256xi1>, vector<48x256xf32>
    %96 = arith.truncf %95 : vector<48x256xf32> to vector<48x256xbf16>
    %c2016 = arith.constant 2016 : index
    %c0_46 = arith.constant 0 : index
    %97 = vector.load %arg9[%c2016, %c0_46] : memref<2352x256xbf16, #tpu.memory_space<vmem>>, vector<48x256xbf16>
    tpu.vector_store %arg9[%c2016, %c0_46], %96 {strides = array<i32>} : memref<2352x256xbf16, #tpu.memory_space<vmem>>, vector<48x256xbf16>,
    %c-2_i32 = arith.constant -2 : i32
    %98 = vector.broadcast %c-2_i32 : i32 to vector<1x256xi32>
    %99 = arith.addi %39, %98 : vector<1x256xi32>
    %c0_i32_47 = arith.constant 0 : i32
    %100 = vector.broadcast %c0_i32_47 : i32 to vector<1x256xi32>
    %101 = arith.cmpi sge, %99, %100 : vector<1x256xi32>
    %c-2_i32_48 = arith.constant -2 : i32
    %102 = vector.broadcast %c-2_i32_48 : i32 to vector<1x256xi32>
    %103 = arith.addi %39, %102 : vector<1x256xi32>
    %c16_i32_49 = arith.constant 16 : i32
    %104 = vector.broadcast %c16_i32_49 : i32 to vector<1x256xi32>
    %105 = arith.cmpi slt, %103, %104 : vector<1x256xi32>
    %106 = arith.andi %101, %105 : vector<1x256xi1>
    %c0_50 = arith.constant 0 : index
    %c1 = arith.constant 1 : index
    %107 = vector.load %arg8[%c0_50, %c1] : memref<48x358xf32, #tpu.memory_space<vmem>>, vector<48x256xf32>
    %cst_51 = arith.constant 0.000000e+00 : f32
    %108 = vector.shape_cast %106 : vector<1x256xi1> to vector<1x256xi1>
    %109 = vector.broadcast %108 : vector<1x256xi1> to vector<48x256xi1>
    %110 = vector.broadcast %cst_51 : f32 to vector<48x256xf32>
    %111 = arith.select %109, %107, %110 : vector<48x256xi1>, vector<48x256xf32>
    %112 = arith.truncf %111 : vector<48x256xf32> to vector<48x256xbf16>
    %c48_52 = arith.constant 48 : index
    %c0_53 = arith.constant 0 : index
    %113 = vector.load %arg9[%c48_52, %c0_53] : memref<2352x256xbf16, #tpu.memory_space<vmem>>, vector<48x256xbf16>
    tpu.vector_store %arg9[%c48_52, %c0_53], %112 {strides = array<i32>} : memref<2352x256xbf16, #tpu.memory_space<vmem>>, vector<48x256xbf16>,
    %c0_54 = arith.constant 0 : index
    %c17 = arith.constant 17 : index
    %114 = vector.load %arg8[%c0_54, %c17] : memref<48x358xf32, #tpu.memory_space<vmem>>, vector<48x256xf32>
    %cst_55 = arith.constant 0.000000e+00 : f32
    %115 = vector.shape_cast %106 : vector<1x256xi1> to vector<1x256xi1>
    %116 = vector.broadcast %115 : vector<1x256xi1> to vector<48x256xi1>
    %117 = vector.broadcast %cst_55 : f32 to vector<48x256xf32>
    %118 = arith.select %116, %114, %117 : vector<48x256xi1>, vector<48x256xf32>
    %119 = arith.truncf %118 : vector<48x256xf32> to vector<48x256xbf16>
    %c384 = arith.constant 384 : index
    %c0_56 = arith.constant 0 : index
    %120 = vector.load %arg9[%c384, %c0_56] : memref<2352x256xbf16, #tpu.memory_space<vmem>>, vector<48x256xbf16>
    tpu.vector_store %arg9[%c384, %c0_56], %119 {strides = array<i32>} : memref<2352x256xbf16, #tpu.memory_space<vmem>>, vector<48x256xbf16>,
    %c0_57 = arith.constant 0 : index
    %c33 = arith.constant 33 : index
    %121 = vector.load %arg8[%c0_57, %c33] : memref<48x358xf32, #tpu.memory_space<vmem>>, vector<48x256xf32>
    %cst_58 = arith.constant 0.000000e+00 : f32
    %122 = vector.shape_cast %106 : vector<1x256xi1> to vector<1x256xi1>
    %123 = vector.broadcast %122 : vector<1x256xi1> to vector<48x256xi1>
    %124 = vector.broadcast %cst_58 : f32 to vector<48x256xf32>
    %125 = arith.select %123, %121, %124 : vector<48x256xi1>, vector<48x256xf32>
    %126 = arith.truncf %125 : vector<48x256xf32> to vector<48x256xbf16>
    %c720 = arith.constant 720 : index
    %c0_59 = arith.constant 0 : index
    %127 = vector.load %arg9[%c720, %c0_59] : memref<2352x256xbf16, #tpu.memory_space<vmem>>, vector<48x256xbf16>
    tpu.vector_store %arg9[%c720, %c0_59], %126 {strides = array<i32>} : memref<2352x256xbf16, #tpu.memory_space<vmem>>, vector<48x256xbf16>,
    %c0_60 = arith.constant 0 : index
    %c49 = arith.constant 49 : index
    %128 = vector.load %arg8[%c0_60, %c49] : memref<48x358xf32, #tpu.memory_space<vmem>>, vector<48x256xf32>
    %cst_61 = arith.constant 0.000000e+00 : f32
    %129 = vector.shape_cast %106 : vector<1x256xi1> to vector<1x256xi1>
    %130 = vector.broadcast %129 : vector<1x256xi1> to vector<48x256xi1>
    %131 = vector.broadcast %cst_61 : f32 to vector<48x256xf32>
    %132 = arith.select %130, %128, %131 : vector<48x256xi1>, vector<48x256xf32>
    %133 = arith.truncf %132 : vector<48x256xf32> to vector<48x256xbf16>
    %c1056 = arith.constant 1056 : index
    %c0_62 = arith.constant 0 : index
    %134 = vector.load %arg9[%c1056, %c0_62] : memref<2352x256xbf16, #tpu.memory_space<vmem>>, vector<48x256xbf16>
    tpu.vector_store %arg9[%c1056, %c0_62], %133 {strides = array<i32>} : memref<2352x256xbf16, #tpu.memory_space<vmem>>, vector<48x256xbf16>,
    %c0_63 = arith.constant 0 : index
    %c65 = arith.constant 65 : index
    %135 = vector.load %arg8[%c0_63, %c65] : memref<48x358xf32, #tpu.memory_space<vmem>>, vector<48x256xf32>
    %cst_64 = arith.constant 0.000000e+00 : f32
    %136 = vector.shape_cast %106 : vector<1x256xi1> to vector<1x256xi1>
    %137 = vector.broadcast %136 : vector<1x256xi1> to vector<48x256xi1>
    %138 = vector.broadcast %cst_64 : f32 to vector<48x256xf32>
    %139 = arith.select %137, %135, %138 : vector<48x256xi1>, vector<48x256xf32>
    %140 = arith.truncf %139 : vector<48x256xf32> to vector<48x256xbf16>
    %c1392 = arith.constant 1392 : index
    %c0_65 = arith.constant 0 : index
    %141 = vector.load %arg9[%c1392, %c0_65] : memref<2352x256xbf16, #tpu.memory_space<vmem>>, vector<48x256xbf16>
    tpu.vector_store %arg9[%c1392, %c0_65], %140 {strides = array<i32>} : memref<2352x256xbf16, #tpu.memory_space<vmem>>, vector<48x256xbf16>,
    %c0_66 = arith.constant 0 : index
    %c81 = arith.constant 81 : index
    %142 = vector.load %arg8[%c0_66, %c81] : memref<48x358xf32, #tpu.memory_space<vmem>>, vector<48x256xf32>
    %cst_67 = arith.constant 0.000000e+00 : f32
    %143 = vector.shape_cast %106 : vector<1x256xi1> to vector<1x256xi1>
    %144 = vector.broadcast %143 : vector<1x256xi1> to vector<48x256xi1>
    %145 = vector.broadcast %cst_67 : f32 to vector<48x256xf32>
    %146 = arith.select %144, %142, %145 : vector<48x256xi1>, vector<48x256xf32>
    %147 = arith.truncf %146 : vector<48x256xf32> to vector<48x256xbf16>
    %c1728 = arith.constant 1728 : index
    %c0_68 = arith.constant 0 : index
    %148 = vector.load %arg9[%c1728, %c0_68] : memref<2352x256xbf16, #tpu.memory_space<vmem>>, vector<48x256xbf16>
    tpu.vector_store %arg9[%c1728, %c0_68], %147 {strides = array<i32>} : memref<2352x256xbf16, #tpu.memory_space<vmem>>, vector<48x256xbf16>,
    %c0_69 = arith.constant 0 : index
    %c97 = arith.constant 97 : index
    %149 = vector.load %arg8[%c0_69, %c97] : memref<48x358xf32, #tpu.memory_space<vmem>>, vector<48x256xf32>
    %cst_70 = arith.constant 0.000000e+00 : f32
    %150 = vector.shape_cast %106 : vector<1x256xi1> to vector<1x256xi1>
    %151 = vector.broadcast %150 : vector<1x256xi1> to vector<48x256xi1>
    %152 = vector.broadcast %cst_70 : f32 to vector<48x256xf32>
    %153 = arith.select %151, %149, %152 : vector<48x256xi1>, vector<48x256xf32>
    %154 = arith.truncf %153 : vector<48x256xf32> to vector<48x256xbf16>
    %c2064 = arith.constant 2064 : index
    %c0_71 = arith.constant 0 : index
    %155 = vector.load %arg9[%c2064, %c0_71] : memref<2352x256xbf16, #tpu.memory_space<vmem>>, vector<48x256xbf16>
    tpu.vector_store %arg9[%c2064, %c0_71], %154 {strides = array<i32>} : memref<2352x256xbf16, #tpu.memory_space<vmem>>, vector<48x256xbf16>,
    %c-1_i32 = arith.constant -1 : i32
    %156 = vector.broadcast %c-1_i32 : i32 to vector<1x256xi32>
    %157 = arith.addi %39, %156 : vector<1x256xi32>
    %c0_i32_72 = arith.constant 0 : i32
    %158 = vector.broadcast %c0_i32_72 : i32 to vector<1x256xi32>
    %159 = arith.cmpi sge, %157, %158 : vector<1x256xi32>
    %c-1_i32_73 = arith.constant -1 : i32
    %160 = vector.broadcast %c-1_i32_73 : i32 to vector<1x256xi32>
    %161 = arith.addi %39, %160 : vector<1x256xi32>
    %c16_i32_74 = arith.constant 16 : i32
    %162 = vector.broadcast %c16_i32_74 : i32 to vector<1x256xi32>
    %163 = arith.cmpi slt, %161, %162 : vector<1x256xi32>
    %164 = arith.andi %159, %163 : vector<1x256xi1>
    %c0_75 = arith.constant 0 : index
    %c2 = arith.constant 2 : index
    %165 = vector.load %arg8[%c0_75, %c2] : memref<48x358xf32, #tpu.memory_space<vmem>>, vector<48x256xf32>
    %cst_76 = arith.constant 0.000000e+00 : f32
    %166 = vector.shape_cast %164 : vector<1x256xi1> to vector<1x256xi1>
    %167 = vector.broadcast %166 : vector<1x256xi1> to vector<48x256xi1>
    %168 = vector.broadcast %cst_76 : f32 to vector<48x256xf32>
    %169 = arith.select %167, %165, %168 : vector<48x256xi1>, vector<48x256xf32>
    %170 = arith.truncf %169 : vector<48x256xf32> to vector<48x256xbf16>
    %c96_77 = arith.constant 96 : index
    %c0_78 = arith.constant 0 : index
    %171 = vector.load %arg9[%c96_77, %c0_78] : memref<2352x256xbf16, #tpu.memory_space<vmem>>, vector<48x256xbf16>
    tpu.vector_store %arg9[%c96_77, %c0_78], %170 {strides = array<i32>} : memref<2352x256xbf16, #tpu.memory_space<vmem>>, vector<48x256xbf16>,
    %c0_79 = arith.constant 0 : index
    %c18 = arith.constant 18 : index
    %172 = vector.load %arg8[%c0_79, %c18] : memref<48x358xf32, #tpu.memory_space<vmem>>, vector<48x256xf32>
    %cst_80 = arith.constant 0.000000e+00 : f32
    %173 = vector.shape_cast %164 : vector<1x256xi1> to vector<1x256xi1>
    %174 = vector.broadcast %173 : vector<1x256xi1> to vector<48x256xi1>
    %175 = vector.broadcast %cst_80 : f32 to vector<48x256xf32>
    %176 = arith.select %174, %172, %175 : vector<48x256xi1>, vector<48x256xf32>
    %177 = arith.truncf %176 : vector<48x256xf32> to vector<48x256xbf16>
    %c432 = arith.constant 432 : index
    %c0_81 = arith.constant 0 : index
    %178 = vector.load %arg9[%c432, %c0_81] : memref<2352x256xbf16, #tpu.memory_space<vmem>>, vector<48x256xbf16>
    tpu.vector_store %arg9[%c432, %c0_81], %177 {strides = array<i32>} : memref<2352x256xbf16, #tpu.memory_space<vmem>>, vector<48x256xbf16>,
    %c0_82 = arith.constant 0 : index
    %c34 = arith.constant 34 : index
    %179 = vector.load %arg8[%c0_82, %c34] : memref<48x358xf32, #tpu.memory_space<vmem>>, vector<48x256xf32>
    %cst_83 = arith.constant 0.000000e+00 : f32
    %180 = vector.shape_cast %164 : vector<1x256xi1> to vector<1x256xi1>
    %181 = vector.broadcast %180 : vector<1x256xi1> to vector<48x256xi1>
    %182 = vector.broadcast %cst_83 : f32 to vector<48x256xf32>
    %183 = arith.select %181, %179, %182 : vector<48x256xi1>, vector<48x256xf32>
    %184 = arith.truncf %183 : vector<48x256xf32> to vector<48x256xbf16>
    %c768 = arith.constant 768 : index
    %c0_84 = arith.constant 0 : index
    %185 = vector.load %arg9[%c768, %c0_84] : memref<2352x256xbf16, #tpu.memory_space<vmem>>, vector<48x256xbf16>
    tpu.vector_store %arg9[%c768, %c0_84], %184 {strides = array<i32>} : memref<2352x256xbf16, #tpu.memory_space<vmem>>, vector<48x256xbf16>,
    %c0_85 = arith.constant 0 : index
    %c50 = arith.constant 50 : index
    %186 = vector.load %arg8[%c0_85, %c50] : memref<48x358xf32, #tpu.memory_space<vmem>>, vector<48x256xf32>
    %cst_86 = arith.constant 0.000000e+00 : f32
    %187 = vector.shape_cast %164 : vector<1x256xi1> to vector<1x256xi1>
    %188 = vector.broadcast %187 : vector<1x256xi1> to vector<48x256xi1>
    %189 = vector.broadcast %cst_86 : f32 to vector<48x256xf32>
    %190 = arith.select %188, %186, %189 : vector<48x256xi1>, vector<48x256xf32>
    %191 = arith.truncf %190 : vector<48x256xf32> to vector<48x256xbf16>
    %c1104 = arith.constant 1104 : index
    %c0_87 = arith.constant 0 : index
    %192 = vector.load %arg9[%c1104, %c0_87] : memref<2352x256xbf16, #tpu.memory_space<vmem>>, vector<48x256xbf16>
    tpu.vector_store %arg9[%c1104, %c0_87], %191 {strides = array<i32>} : memref<2352x256xbf16, #tpu.memory_space<vmem>>, vector<48x256xbf16>,
    %c0_88 = arith.constant 0 : index
    %c66 = arith.constant 66 : index
    %193 = vector.load %arg8[%c0_88, %c66] : memref<48x358xf32, #tpu.memory_space<vmem>>, vector<48x256xf32>
    %cst_89 = arith.constant 0.000000e+00 : f32
    %194 = vector.shape_cast %164 : vector<1x256xi1> to vector<1x256xi1>
    %195 = vector.broadcast %194 : vector<1x256xi1> to vector<48x256xi1>
    %196 = vector.broadcast %cst_89 : f32 to vector<48x256xf32>
    %197 = arith.select %195, %193, %196 : vector<48x256xi1>, vector<48x256xf32>
    %198 = arith.truncf %197 : vector<48x256xf32> to vector<48x256xbf16>
    %c1440 = arith.constant 1440 : index
    %c0_90 = arith.constant 0 : index
    %199 = vector.load %arg9[%c1440, %c0_90] : memref<2352x256xbf16, #tpu.memory_space<vmem>>, vector<48x256xbf16>
    tpu.vector_store %arg9[%c1440, %c0_90], %198 {strides = array<i32>} : memref<2352x256xbf16, #tpu.memory_space<vmem>>, vector<48x256xbf16>,
    %c0_91 = arith.constant 0 : index
    %c82 = arith.constant 82 : index
    %200 = vector.load %arg8[%c0_91, %c82] : memref<48x358xf32, #tpu.memory_space<vmem>>, vector<48x256xf32>
    %cst_92 = arith.constant 0.000000e+00 : f32
    %201 = vector.shape_cast %164 : vector<1x256xi1> to vector<1x256xi1>
    %202 = vector.broadcast %201 : vector<1x256xi1> to vector<48x256xi1>
    %203 = vector.broadcast %cst_92 : f32 to vector<48x256xf32>
    %204 = arith.select %202, %200, %203 : vector<48x256xi1>, vector<48x256xf32>
    %205 = arith.truncf %204 : vector<48x256xf32> to vector<48x256xbf16>
    %c1776 = arith.constant 1776 : index
    %c0_93 = arith.constant 0 : index
    %206 = vector.load %arg9[%c1776, %c0_93] : memref<2352x256xbf16, #tpu.memory_space<vmem>>, vector<48x256xbf16>
    tpu.vector_store %arg9[%c1776, %c0_93], %205 {strides = array<i32>} : memref<2352x256xbf16, #tpu.memory_space<vmem>>, vector<48x256xbf16>,
    %c0_94 = arith.constant 0 : index
    %c98 = arith.constant 98 : index
    %207 = vector.load %arg8[%c0_94, %c98] : memref<48x358xf32, #tpu.memory_space<vmem>>, vector<48x256xf32>
    %cst_95 = arith.constant 0.000000e+00 : f32
    %208 = vector.shape_cast %164 : vector<1x256xi1> to vector<1x256xi1>
    %209 = vector.broadcast %208 : vector<1x256xi1> to vector<48x256xi1>
    %210 = vector.broadcast %cst_95 : f32 to vector<48x256xf32>
    %211 = arith.select %209, %207, %210 : vector<48x256xi1>, vector<48x256xf32>
    %212 = arith.truncf %211 : vector<48x256xf32> to vector<48x256xbf16>
    %c2112 = arith.constant 2112 : index
    %c0_96 = arith.constant 0 : index
    %213 = vector.load %arg9[%c2112, %c0_96] : memref<2352x256xbf16, #tpu.memory_space<vmem>>, vector<48x256xbf16>
    tpu.vector_store %arg9[%c2112, %c0_96], %212 {strides = array<i32>} : memref<2352x256xbf16, #tpu.memory_space<vmem>>, vector<48x256xbf16>,
    %c0_97 = arith.constant 0 : index
    %c3 = arith.constant 3 : index
    %214 = vector.load %arg8[%c0_97, %c3] : memref<48x358xf32, #tpu.memory_space<vmem>>, vector<48x256xf32>
    %215 = arith.truncf %214 : vector<48x256xf32> to vector<48x256xbf16>
    %c144 = arith.constant 144 : index
    %c0_98 = arith.constant 0 : index
    %216 = vector.load %arg9[%c144, %c0_98] : memref<2352x256xbf16, #tpu.memory_space<vmem>>, vector<48x256xbf16>
    tpu.vector_store %arg9[%c144, %c0_98], %215 {strides = array<i32>} : memref<2352x256xbf16, #tpu.memory_space<vmem>>, vector<48x256xbf16>,
    %c0_99 = arith.constant 0 : index
    %c19 = arith.constant 19 : index
    %217 = vector.load %arg8[%c0_99, %c19] : memref<48x358xf32, #tpu.memory_space<vmem>>, vector<48x256xf32>
    %218 = arith.truncf %217 : vector<48x256xf32> to vector<48x256xbf16>
    %c480 = arith.constant 480 : index
    %c0_100 = arith.constant 0 : index
    %219 = vector.load %arg9[%c480, %c0_100] : memref<2352x256xbf16, #tpu.memory_space<vmem>>, vector<48x256xbf16>
    tpu.vector_store %arg9[%c480, %c0_100], %218 {strides = array<i32>} : memref<2352x256xbf16, #tpu.memory_space<vmem>>, vector<48x256xbf16>,
    %c0_101 = arith.constant 0 : index
    %c35 = arith.constant 35 : index
    %220 = vector.load %arg8[%c0_101, %c35] : memref<48x358xf32, #tpu.memory_space<vmem>>, vector<48x256xf32>
    %221 = arith.truncf %220 : vector<48x256xf32> to vector<48x256xbf16>
    %c816 = arith.constant 816 : index
    %c0_102 = arith.constant 0 : index
    %222 = vector.load %arg9[%c816, %c0_102] : memref<2352x256xbf16, #tpu.memory_space<vmem>>, vector<48x256xbf16>
    tpu.vector_store %arg9[%c816, %c0_102], %221 {strides = array<i32>} : memref<2352x256xbf16, #tpu.memory_space<vmem>>, vector<48x256xbf16>,
    %c0_103 = arith.constant 0 : index
    %c51_104 = arith.constant 51 : index
    %223 = vector.load %arg8[%c0_103, %c51_104] : memref<48x358xf32, #tpu.memory_space<vmem>>, vector<48x256xf32>
    %224 = arith.truncf %223 : vector<48x256xf32> to vector<48x256xbf16>
    %c1152 = arith.constant 1152 : index
    %c0_105 = arith.constant 0 : index
    %225 = vector.load %arg9[%c1152, %c0_105] : memref<2352x256xbf16, #tpu.memory_space<vmem>>, vector<48x256xbf16>
    tpu.vector_store %arg9[%c1152, %c0_105], %224 {strides = array<i32>} : memref<2352x256xbf16, #tpu.memory_space<vmem>>, vector<48x256xbf16>,
    %c0_106 = arith.constant 0 : index
    %c67 = arith.constant 67 : index
    %226 = vector.load %arg8[%c0_106, %c67] : memref<48x358xf32, #tpu.memory_space<vmem>>, vector<48x256xf32>
    %227 = arith.truncf %226 : vector<48x256xf32> to vector<48x256xbf16>
    %c1488 = arith.constant 1488 : index
    %c0_107 = arith.constant 0 : index
    %228 = vector.load %arg9[%c1488, %c0_107] : memref<2352x256xbf16, #tpu.memory_space<vmem>>, vector<48x256xbf16>
    tpu.vector_store %arg9[%c1488, %c0_107], %227 {strides = array<i32>} : memref<2352x256xbf16, #tpu.memory_space<vmem>>, vector<48x256xbf16>,
    %c0_108 = arith.constant 0 : index
    %c83 = arith.constant 83 : index
    %229 = vector.load %arg8[%c0_108, %c83] : memref<48x358xf32, #tpu.memory_space<vmem>>, vector<48x256xf32>
    %230 = arith.truncf %229 : vector<48x256xf32> to vector<48x256xbf16>
    %c1824 = arith.constant 1824 : index
    %c0_109 = arith.constant 0 : index
    %231 = vector.load %arg9[%c1824, %c0_109] : memref<2352x256xbf16, #tpu.memory_space<vmem>>, vector<48x256xbf16>
    tpu.vector_store %arg9[%c1824, %c0_109], %230 {strides = array<i32>} : memref<2352x256xbf16, #tpu.memory_space<vmem>>, vector<48x256xbf16>,
    %c0_110 = arith.constant 0 : index
    %c99 = arith.constant 99 : index
    %232 = vector.load %arg8[%c0_110, %c99] : memref<48x358xf32, #tpu.memory_space<vmem>>, vector<48x256xf32>
    %233 = arith.truncf %232 : vector<48x256xf32> to vector<48x256xbf16>
    %c2160 = arith.constant 2160 : index
    %c0_111 = arith.constant 0 : index
    %234 = vector.load %arg9[%c2160, %c0_111] : memref<2352x256xbf16, #tpu.memory_space<vmem>>, vector<48x256xbf16>
    tpu.vector_store %arg9[%c2160, %c0_111], %233 {strides = array<i32>} : memref<2352x256xbf16, #tpu.memory_space<vmem>>, vector<48x256xbf16>,
    %c1_i32_112 = arith.constant 1 : i32
    %235 = vector.broadcast %c1_i32_112 : i32 to vector<1x256xi32>
    %236 = arith.addi %39, %235 : vector<1x256xi32>
    %c0_i32_113 = arith.constant 0 : i32
    %237 = vector.broadcast %c0_i32_113 : i32 to vector<1x256xi32>
    %238 = arith.cmpi sge, %236, %237 : vector<1x256xi32>
    %c1_i32_114 = arith.constant 1 : i32
    %239 = vector.broadcast %c1_i32_114 : i32 to vector<1x256xi32>
    %240 = arith.addi %39, %239 : vector<1x256xi32>
    %c16_i32_115 = arith.constant 16 : i32
    %241 = vector.broadcast %c16_i32_115 : i32 to vector<1x256xi32>
    %242 = arith.cmpi slt, %240, %241 : vector<1x256xi32>
    %243 = arith.andi %238, %242 : vector<1x256xi1>
    %c0_116 = arith.constant 0 : index
    %c4 = arith.constant 4 : index
    %244 = vector.load %arg8[%c0_116, %c4] : memref<48x358xf32, #tpu.memory_space<vmem>>, vector<48x256xf32>
    %cst_117 = arith.constant 0.000000e+00 : f32
    %245 = vector.shape_cast %243 : vector<1x256xi1> to vector<1x256xi1>
    %246 = vector.broadcast %245 : vector<1x256xi1> to vector<48x256xi1>
    %247 = vector.broadcast %cst_117 : f32 to vector<48x256xf32>
    %248 = arith.select %246, %244, %247 : vector<48x256xi1>, vector<48x256xf32>
    %249 = arith.truncf %248 : vector<48x256xf32> to vector<48x256xbf16>
    %c192 = arith.constant 192 : index
    %c0_118 = arith.constant 0 : index
    %250 = vector.load %arg9[%c192, %c0_118] : memref<2352x256xbf16, #tpu.memory_space<vmem>>, vector<48x256xbf16>
    tpu.vector_store %arg9[%c192, %c0_118], %249 {strides = array<i32>} : memref<2352x256xbf16, #tpu.memory_space<vmem>>, vector<48x256xbf16>,
    %c0_119 = arith.constant 0 : index
    %c20 = arith.constant 20 : index
    %251 = vector.load %arg8[%c0_119, %c20] : memref<48x358xf32, #tpu.memory_space<vmem>>, vector<48x256xf32>
    %cst_120 = arith.constant 0.000000e+00 : f32
    %252 = vector.shape_cast %243 : vector<1x256xi1> to vector<1x256xi1>
    %253 = vector.broadcast %252 : vector<1x256xi1> to vector<48x256xi1>
    %254 = vector.broadcast %cst_120 : f32 to vector<48x256xf32>
    %255 = arith.select %253, %251, %254 : vector<48x256xi1>, vector<48x256xf32>
    %256 = arith.truncf %255 : vector<48x256xf32> to vector<48x256xbf16>
    %c528 = arith.constant 528 : index
    %c0_121 = arith.constant 0 : index
    %257 = vector.load %arg9[%c528, %c0_121] : memref<2352x256xbf16, #tpu.memory_space<vmem>>, vector<48x256xbf16>
    tpu.vector_store %arg9[%c528, %c0_121], %256 {strides = array<i32>} : memref<2352x256xbf16, #tpu.memory_space<vmem>>, vector<48x256xbf16>,
    %c0_122 = arith.constant 0 : index
    %c36 = arith.constant 36 : index
    %258 = vector.load %arg8[%c0_122, %c36] : memref<48x358xf32, #tpu.memory_space<vmem>>, vector<48x256xf32>
    %cst_123 = arith.constant 0.000000e+00 : f32
    %259 = vector.shape_cast %243 : vector<1x256xi1> to vector<1x256xi1>
    %260 = vector.broadcast %259 : vector<1x256xi1> to vector<48x256xi1>
    %261 = vector.broadcast %cst_123 : f32 to vector<48x256xf32>
    %262 = arith.select %260, %258, %261 : vector<48x256xi1>, vector<48x256xf32>
    %263 = arith.truncf %262 : vector<48x256xf32> to vector<48x256xbf16>
    %c864 = arith.constant 864 : index
    %c0_124 = arith.constant 0 : index
    %264 = vector.load %arg9[%c864, %c0_124] : memref<2352x256xbf16, #tpu.memory_space<vmem>>, vector<48x256xbf16>
    tpu.vector_store %arg9[%c864, %c0_124], %263 {strides = array<i32>} : memref<2352x256xbf16, #tpu.memory_space<vmem>>, vector<48x256xbf16>,
    %c0_125 = arith.constant 0 : index
    %c52 = arith.constant 52 : index
    %265 = vector.load %arg8[%c0_125, %c52] : memref<48x358xf32, #tpu.memory_space<vmem>>, vector<48x256xf32>
    %cst_126 = arith.constant 0.000000e+00 : f32
    %266 = vector.shape_cast %243 : vector<1x256xi1> to vector<1x256xi1>
    %267 = vector.broadcast %266 : vector<1x256xi1> to vector<48x256xi1>
    %268 = vector.broadcast %cst_126 : f32 to vector<48x256xf32>
    %269 = arith.select %267, %265, %268 : vector<48x256xi1>, vector<48x256xf32>
    %270 = arith.truncf %269 : vector<48x256xf32> to vector<48x256xbf16>
    %c1200 = arith.constant 1200 : index
    %c0_127 = arith.constant 0 : index
    %271 = vector.load %arg9[%c1200, %c0_127] : memref<2352x256xbf16, #tpu.memory_space<vmem>>, vector<48x256xbf16>
    tpu.vector_store %arg9[%c1200, %c0_127], %270 {strides = array<i32>} : memref<2352x256xbf16, #tpu.memory_space<vmem>>, vector<48x256xbf16>,
    %c0_128 = arith.constant 0 : index
    %c68 = arith.constant 68 : index
    %272 = vector.load %arg8[%c0_128, %c68] : memref<48x358xf32, #tpu.memory_space<vmem>>, vector<48x256xf32>
    %cst_129 = arith.constant 0.000000e+00 : f32
    %273 = vector.shape_cast %243 : vector<1x256xi1> to vector<1x256xi1>
    %274 = vector.broadcast %273 : vector<1x256xi1> to vector<48x256xi1>
    %275 = vector.broadcast %cst_129 : f32 to vector<48x256xf32>
    %276 = arith.select %274, %272, %275 : vector<48x256xi1>, vector<48x256xf32>
    %277 = arith.truncf %276 : vector<48x256xf32> to vector<48x256xbf16>
    %c1536 = arith.constant 1536 : index
    %c0_130 = arith.constant 0 : index
    %278 = vector.load %arg9[%c1536, %c0_130] : memref<2352x256xbf16, #tpu.memory_space<vmem>>, vector<48x256xbf16>
    tpu.vector_store %arg9[%c1536, %c0_130], %277 {strides = array<i32>} : memref<2352x256xbf16, #tpu.memory_space<vmem>>, vector<48x256xbf16>,
    %c0_131 = arith.constant 0 : index
    %c84 = arith.constant 84 : index
    %279 = vector.load %arg8[%c0_131, %c84] : memref<48x358xf32, #tpu.memory_space<vmem>>, vector<48x256xf32>
    %cst_132 = arith.constant 0.000000e+00 : f32
    %280 = vector.shape_cast %243 : vector<1x256xi1> to vector<1x256xi1>
    %281 = vector.broadcast %280 : vector<1x256xi1> to vector<48x256xi1>
    %282 = vector.broadcast %cst_132 : f32 to vector<48x256xf32>
    %283 = arith.select %281, %279, %282 : vector<48x256xi1>, vector<48x256xf32>
    %284 = arith.truncf %283 : vector<48x256xf32> to vector<48x256xbf16>
    %c1872 = arith.constant 1872 : index
    %c0_133 = arith.constant 0 : index
    %285 = vector.load %arg9[%c1872, %c0_133] : memref<2352x256xbf16, #tpu.memory_space<vmem>>, vector<48x256xbf16>
    tpu.vector_store %arg9[%c1872, %c0_133], %284 {strides = array<i32>} : memref<2352x256xbf16, #tpu.memory_space<vmem>>, vector<48x256xbf16>,
    %c0_134 = arith.constant 0 : index
    %c100 = arith.constant 100 : index
    %286 = vector.load %arg8[%c0_134, %c100] : memref<48x358xf32, #tpu.memory_space<vmem>>, vector<48x256xf32>
    %cst_135 = arith.constant 0.000000e+00 : f32
    %287 = vector.shape_cast %243 : vector<1x256xi1> to vector<1x256xi1>
    %288 = vector.broadcast %287 : vector<1x256xi1> to vector<48x256xi1>
    %289 = vector.broadcast %cst_135 : f32 to vector<48x256xf32>
    %290 = arith.select %288, %286, %289 : vector<48x256xi1>, vector<48x256xf32>
    %291 = arith.truncf %290 : vector<48x256xf32> to vector<48x256xbf16>
    %c2208 = arith.constant 2208 : index
    %c0_136 = arith.constant 0 : index
    %292 = vector.load %arg9[%c2208, %c0_136] : memref<2352x256xbf16, #tpu.memory_space<vmem>>, vector<48x256xbf16>
    tpu.vector_store %arg9[%c2208, %c0_136], %291 {strides = array<i32>} : memref<2352x256xbf16, #tpu.memory_space<vmem>>, vector<48x256xbf16>,
    %c2_i32 = arith.constant 2 : i32
    %293 = vector.broadcast %c2_i32 : i32 to vector<1x256xi32>
    %294 = arith.addi %39, %293 : vector<1x256xi32>
    %c0_i32_137 = arith.constant 0 : i32
    %295 = vector.broadcast %c0_i32_137 : i32 to vector<1x256xi32>
    %296 = arith.cmpi sge, %294, %295 : vector<1x256xi32>
    %c2_i32_138 = arith.constant 2 : i32
    %297 = vector.broadcast %c2_i32_138 : i32 to vector<1x256xi32>
    %298 = arith.addi %39, %297 : vector<1x256xi32>
    %c16_i32_139 = arith.constant 16 : i32
    %299 = vector.broadcast %c16_i32_139 : i32 to vector<1x256xi32>
    %300 = arith.cmpi slt, %298, %299 : vector<1x256xi32>
    %301 = arith.andi %296, %300 : vector<1x256xi1>
    %c0_140 = arith.constant 0 : index
    %c5 = arith.constant 5 : index
    %302 = vector.load %arg8[%c0_140, %c5] : memref<48x358xf32, #tpu.memory_space<vmem>>, vector<48x256xf32>
    %cst_141 = arith.constant 0.000000e+00 : f32
    %303 = vector.shape_cast %301 : vector<1x256xi1> to vector<1x256xi1>
    %304 = vector.broadcast %303 : vector<1x256xi1> to vector<48x256xi1>
    %305 = vector.broadcast %cst_141 : f32 to vector<48x256xf32>
    %306 = arith.select %304, %302, %305 : vector<48x256xi1>, vector<48x256xf32>
    %307 = arith.truncf %306 : vector<48x256xf32> to vector<48x256xbf16>
    %c240 = arith.constant 240 : index
    %c0_142 = arith.constant 0 : index
    %308 = vector.load %arg9[%c240, %c0_142] : memref<2352x256xbf16, #tpu.memory_space<vmem>>, vector<48x256xbf16>
    tpu.vector_store %arg9[%c240, %c0_142], %307 {strides = array<i32>} : memref<2352x256xbf16, #tpu.memory_space<vmem>>, vector<48x256xbf16>,
    %c0_143 = arith.constant 0 : index
    %c21 = arith.constant 21 : index
    %309 = vector.load %arg8[%c0_143, %c21] : memref<48x358xf32, #tpu.memory_space<vmem>>, vector<48x256xf32>
    %cst_144 = arith.constant 0.000000e+00 : f32
    %310 = vector.shape_cast %301 : vector<1x256xi1> to vector<1x256xi1>
    %311 = vector.broadcast %310 : vector<1x256xi1> to vector<48x256xi1>
    %312 = vector.broadcast %cst_144 : f32 to vector<48x256xf32>
    %313 = arith.select %311, %309, %312 : vector<48x256xi1>, vector<48x256xf32>
    %314 = arith.truncf %313 : vector<48x256xf32> to vector<48x256xbf16>
    %c576 = arith.constant 576 : index
    %c0_145 = arith.constant 0 : index
    %315 = vector.load %arg9[%c576, %c0_145] : memref<2352x256xbf16, #tpu.memory_space<vmem>>, vector<48x256xbf16>
    tpu.vector_store %arg9[%c576, %c0_145], %314 {strides = array<i32>} : memref<2352x256xbf16, #tpu.memory_space<vmem>>, vector<48x256xbf16>,
    %c0_146 = arith.constant 0 : index
    %c37 = arith.constant 37 : index
    %316 = vector.load %arg8[%c0_146, %c37] : memref<48x358xf32, #tpu.memory_space<vmem>>, vector<48x256xf32>
    %cst_147 = arith.constant 0.000000e+00 : f32
    %317 = vector.shape_cast %301 : vector<1x256xi1> to vector<1x256xi1>
    %318 = vector.broadcast %317 : vector<1x256xi1> to vector<48x256xi1>
    %319 = vector.broadcast %cst_147 : f32 to vector<48x256xf32>
    %320 = arith.select %318, %316, %319 : vector<48x256xi1>, vector<48x256xf32>
    %321 = arith.truncf %320 : vector<48x256xf32> to vector<48x256xbf16>
    %c912 = arith.constant 912 : index
    %c0_148 = arith.constant 0 : index
    %322 = vector.load %arg9[%c912, %c0_148] : memref<2352x256xbf16, #tpu.memory_space<vmem>>, vector<48x256xbf16>
    tpu.vector_store %arg9[%c912, %c0_148], %321 {strides = array<i32>} : memref<2352x256xbf16, #tpu.memory_space<vmem>>, vector<48x256xbf16>,
    %c0_149 = arith.constant 0 : index
    %c53 = arith.constant 53 : index
    %323 = vector.load %arg8[%c0_149, %c53] : memref<48x358xf32, #tpu.memory_space<vmem>>, vector<48x256xf32>
    %cst_150 = arith.constant 0.000000e+00 : f32
    %324 = vector.shape_cast %301 : vector<1x256xi1> to vector<1x256xi1>
    %325 = vector.broadcast %324 : vector<1x256xi1> to vector<48x256xi1>
    %326 = vector.broadcast %cst_150 : f32 to vector<48x256xf32>
    %327 = arith.select %325, %323, %326 : vector<48x256xi1>, vector<48x256xf32>
    %328 = arith.truncf %327 : vector<48x256xf32> to vector<48x256xbf16>
    %c1248 = arith.constant 1248 : index
    %c0_151 = arith.constant 0 : index
    %329 = vector.load %arg9[%c1248, %c0_151] : memref<2352x256xbf16, #tpu.memory_space<vmem>>, vector<48x256xbf16>
    tpu.vector_store %arg9[%c1248, %c0_151], %328 {strides = array<i32>} : memref<2352x256xbf16, #tpu.memory_space<vmem>>, vector<48x256xbf16>,
    %c0_152 = arith.constant 0 : index
    %c69 = arith.constant 69 : index
    %330 = vector.load %arg8[%c0_152, %c69] : memref<48x358xf32, #tpu.memory_space<vmem>>, vector<48x256xf32>
    %cst_153 = arith.constant 0.000000e+00 : f32
    %331 = vector.shape_cast %301 : vector<1x256xi1> to vector<1x256xi1>
    %332 = vector.broadcast %331 : vector<1x256xi1> to vector<48x256xi1>
    %333 = vector.broadcast %cst_153 : f32 to vector<48x256xf32>
    %334 = arith.select %332, %330, %333 : vector<48x256xi1>, vector<48x256xf32>
    %335 = arith.truncf %334 : vector<48x256xf32> to vector<48x256xbf16>
    %c1584 = arith.constant 1584 : index
    %c0_154 = arith.constant 0 : index
    %336 = vector.load %arg9[%c1584, %c0_154] : memref<2352x256xbf16, #tpu.memory_space<vmem>>, vector<48x256xbf16>
    tpu.vector_store %arg9[%c1584, %c0_154], %335 {strides = array<i32>} : memref<2352x256xbf16, #tpu.memory_space<vmem>>, vector<48x256xbf16>,
    %c0_155 = arith.constant 0 : index
    %c85 = arith.constant 85 : index
    %337 = vector.load %arg8[%c0_155, %c85] : memref<48x358xf32, #tpu.memory_space<vmem>>, vector<48x256xf32>
    %cst_156 = arith.constant 0.000000e+00 : f32
    %338 = vector.shape_cast %301 : vector<1x256xi1> to vector<1x256xi1>
    %339 = vector.broadcast %338 : vector<1x256xi1> to vector<48x256xi1>
    %340 = vector.broadcast %cst_156 : f32 to vector<48x256xf32>
    %341 = arith.select %339, %337, %340 : vector<48x256xi1>, vector<48x256xf32>
    %342 = arith.truncf %341 : vector<48x256xf32> to vector<48x256xbf16>
    %c1920 = arith.constant 1920 : index
    %c0_157 = arith.constant 0 : index
    %343 = vector.load %arg9[%c1920, %c0_157] : memref<2352x256xbf16, #tpu.memory_space<vmem>>, vector<48x256xbf16>
    tpu.vector_store %arg9[%c1920, %c0_157], %342 {strides = array<i32>} : memref<2352x256xbf16, #tpu.memory_space<vmem>>, vector<48x256xbf16>,
    %c0_158 = arith.constant 0 : index
    %c101 = arith.constant 101 : index
    %344 = vector.load %arg8[%c0_158, %c101] : memref<48x358xf32, #tpu.memory_space<vmem>>, vector<48x256xf32>
    %cst_159 = arith.constant 0.000000e+00 : f32
    %345 = vector.shape_cast %301 : vector<1x256xi1> to vector<1x256xi1>
    %346 = vector.broadcast %345 : vector<1x256xi1> to vector<48x256xi1>
    %347 = vector.broadcast %cst_159 : f32 to vector<48x256xf32>
    %348 = arith.select %346, %344, %347 : vector<48x256xi1>, vector<48x256xf32>
    %349 = arith.truncf %348 : vector<48x256xf32> to vector<48x256xbf16>
    %c2256 = arith.constant 2256 : index
    %c0_160 = arith.constant 0 : index
    %350 = vector.load %arg9[%c2256, %c0_160] : memref<2352x256xbf16, #tpu.memory_space<vmem>>, vector<48x256xbf16>
    tpu.vector_store %arg9[%c2256, %c0_160], %349 {strides = array<i32>} : memref<2352x256xbf16, #tpu.memory_space<vmem>>, vector<48x256xbf16>,
    %c3_i32 = arith.constant 3 : i32
    %351 = vector.broadcast %c3_i32 : i32 to vector<1x256xi32>
    %352 = arith.addi %39, %351 : vector<1x256xi32>
    %c0_i32_161 = arith.constant 0 : i32
    %353 = vector.broadcast %c0_i32_161 : i32 to vector<1x256xi32>
    %354 = arith.cmpi sge, %352, %353 : vector<1x256xi32>
    %c3_i32_162 = arith.constant 3 : i32
    %355 = vector.broadcast %c3_i32_162 : i32 to vector<1x256xi32>
    %356 = arith.addi %39, %355 : vector<1x256xi32>
    %c16_i32_163 = arith.constant 16 : i32
    %357 = vector.broadcast %c16_i32_163 : i32 to vector<1x256xi32>
    %358 = arith.cmpi slt, %356, %357 : vector<1x256xi32>
    %359 = arith.andi %354, %358 : vector<1x256xi1>
    %c0_164 = arith.constant 0 : index
    %c6 = arith.constant 6 : index
    %360 = vector.load %arg8[%c0_164, %c6] : memref<48x358xf32, #tpu.memory_space<vmem>>, vector<48x256xf32>
    %cst_165 = arith.constant 0.000000e+00 : f32
    %361 = vector.shape_cast %359 : vector<1x256xi1> to vector<1x256xi1>
    %362 = vector.broadcast %361 : vector<1x256xi1> to vector<48x256xi1>
    %363 = vector.broadcast %cst_165 : f32 to vector<48x256xf32>
    %364 = arith.select %362, %360, %363 : vector<48x256xi1>, vector<48x256xf32>
    %365 = arith.truncf %364 : vector<48x256xf32> to vector<48x256xbf16>
    %c288 = arith.constant 288 : index
    %c0_166 = arith.constant 0 : index
    %366 = vector.load %arg9[%c288, %c0_166] : memref<2352x256xbf16, #tpu.memory_space<vmem>>, vector<48x256xbf16>
    tpu.vector_store %arg9[%c288, %c0_166], %365 {strides = array<i32>} : memref<2352x256xbf16, #tpu.memory_space<vmem>>, vector<48x256xbf16>,
    %c0_167 = arith.constant 0 : index
    %c22 = arith.constant 22 : index
    %367 = vector.load %arg8[%c0_167, %c22] : memref<48x358xf32, #tpu.memory_space<vmem>>, vector<48x256xf32>
    %cst_168 = arith.constant 0.000000e+00 : f32
    %368 = vector.shape_cast %359 : vector<1x256xi1> to vector<1x256xi1>
    %369 = vector.broadcast %368 : vector<1x256xi1> to vector<48x256xi1>
    %370 = vector.broadcast %cst_168 : f32 to vector<48x256xf32>
    %371 = arith.select %369, %367, %370 : vector<48x256xi1>, vector<48x256xf32>
    %372 = arith.truncf %371 : vector<48x256xf32> to vector<48x256xbf16>
    %c624 = arith.constant 624 : index
    %c0_169 = arith.constant 0 : index
    %373 = vector.load %arg9[%c624, %c0_169] : memref<2352x256xbf16, #tpu.memory_space<vmem>>, vector<48x256xbf16>
    tpu.vector_store %arg9[%c624, %c0_169], %372 {strides = array<i32>} : memref<2352x256xbf16, #tpu.memory_space<vmem>>, vector<48x256xbf16>,
    %c0_170 = arith.constant 0 : index
    %c38 = arith.constant 38 : index
    %374 = vector.load %arg8[%c0_170, %c38] : memref<48x358xf32, #tpu.memory_space<vmem>>, vector<48x256xf32>
    %cst_171 = arith.constant 0.000000e+00 : f32
    %375 = vector.shape_cast %359 : vector<1x256xi1> to vector<1x256xi1>
    %376 = vector.broadcast %375 : vector<1x256xi1> to vector<48x256xi1>
    %377 = vector.broadcast %cst_171 : f32 to vector<48x256xf32>
    %378 = arith.select %376, %374, %377 : vector<48x256xi1>, vector<48x256xf32>
    %379 = arith.truncf %378 : vector<48x256xf32> to vector<48x256xbf16>
    %c960 = arith.constant 960 : index
    %c0_172 = arith.constant 0 : index
    %380 = vector.load %arg9[%c960, %c0_172] : memref<2352x256xbf16, #tpu.memory_space<vmem>>, vector<48x256xbf16>
    tpu.vector_store %arg9[%c960, %c0_172], %379 {strides = array<i32>} : memref<2352x256xbf16, #tpu.memory_space<vmem>>, vector<48x256xbf16>,
    %c0_173 = arith.constant 0 : index
    %c54 = arith.constant 54 : index
    %381 = vector.load %arg8[%c0_173, %c54] : memref<48x358xf32, #tpu.memory_space<vmem>>, vector<48x256xf32>
    %cst_174 = arith.constant 0.000000e+00 : f32
    %382 = vector.shape_cast %359 : vector<1x256xi1> to vector<1x256xi1>
    %383 = vector.broadcast %382 : vector<1x256xi1> to vector<48x256xi1>
    %384 = vector.broadcast %cst_174 : f32 to vector<48x256xf32>
    %385 = arith.select %383, %381, %384 : vector<48x256xi1>, vector<48x256xf32>
    %386 = arith.truncf %385 : vector<48x256xf32> to vector<48x256xbf16>
    %c1296 = arith.constant 1296 : index
    %c0_175 = arith.constant 0 : index
    %387 = vector.load %arg9[%c1296, %c0_175] : memref<2352x256xbf16, #tpu.memory_space<vmem>>, vector<48x256xbf16>
    tpu.vector_store %arg9[%c1296, %c0_175], %386 {strides = array<i32>} : memref<2352x256xbf16, #tpu.memory_space<vmem>>, vector<48x256xbf16>,
    %c0_176 = arith.constant 0 : index
    %c70 = arith.constant 70 : index
    %388 = vector.load %arg8[%c0_176, %c70] : memref<48x358xf32, #tpu.memory_space<vmem>>, vector<48x256xf32>
    %cst_177 = arith.constant 0.000000e+00 : f32
    %389 = vector.shape_cast %359 : vector<1x256xi1> to vector<1x256xi1>
    %390 = vector.broadcast %389 : vector<1x256xi1> to vector<48x256xi1>
    %391 = vector.broadcast %cst_177 : f32 to vector<48x256xf32>
    %392 = arith.select %390, %388, %391 : vector<48x256xi1>, vector<48x256xf32>
    %393 = arith.truncf %392 : vector<48x256xf32> to vector<48x256xbf16>
    %c1632 = arith.constant 1632 : index
    %c0_178 = arith.constant 0 : index
    %394 = vector.load %arg9[%c1632, %c0_178] : memref<2352x256xbf16, #tpu.memory_space<vmem>>, vector<48x256xbf16>
    tpu.vector_store %arg9[%c1632, %c0_178], %393 {strides = array<i32>} : memref<2352x256xbf16, #tpu.memory_space<vmem>>, vector<48x256xbf16>,
    %c0_179 = arith.constant 0 : index
    %c86 = arith.constant 86 : index
    %395 = vector.load %arg8[%c0_179, %c86] : memref<48x358xf32, #tpu.memory_space<vmem>>, vector<48x256xf32>
    %cst_180 = arith.constant 0.000000e+00 : f32
    %396 = vector.shape_cast %359 : vector<1x256xi1> to vector<1x256xi1>
    %397 = vector.broadcast %396 : vector<1x256xi1> to vector<48x256xi1>
    %398 = vector.broadcast %cst_180 : f32 to vector<48x256xf32>
    %399 = arith.select %397, %395, %398 : vector<48x256xi1>, vector<48x256xf32>
    %400 = arith.truncf %399 : vector<48x256xf32> to vector<48x256xbf16>
    %c1968 = arith.constant 1968 : index
    %c0_181 = arith.constant 0 : index
    %401 = vector.load %arg9[%c1968, %c0_181] : memref<2352x256xbf16, #tpu.memory_space<vmem>>, vector<48x256xbf16>
    tpu.vector_store %arg9[%c1968, %c0_181], %400 {strides = array<i32>} : memref<2352x256xbf16, #tpu.memory_space<vmem>>, vector<48x256xbf16>,
    %c0_182 = arith.constant 0 : index
    %c102 = arith.constant 102 : index
    %402 = vector.load %arg8[%c0_182, %c102] : memref<48x358xf32, #tpu.memory_space<vmem>>, vector<48x256xf32>
    %cst_183 = arith.constant 0.000000e+00 : f32
    %403 = vector.shape_cast %359 : vector<1x256xi1> to vector<1x256xi1>
    %404 = vector.broadcast %403 : vector<1x256xi1> to vector<48x256xi1>
    %405 = vector.broadcast %cst_183 : f32 to vector<48x256xf32>
    %406 = arith.select %404, %402, %405 : vector<48x256xi1>, vector<48x256xf32>
    %407 = arith.truncf %406 : vector<48x256xf32> to vector<48x256xbf16>
    %c2304 = arith.constant 2304 : index
    %c0_184 = arith.constant 0 : index
    %408 = vector.load %arg9[%c2304, %c0_184] : memref<2352x256xbf16, #tpu.memory_space<vmem>>, vector<48x256xbf16>
    tpu.vector_store %arg9[%c2304, %c0_184], %407 {strides = array<i32>} : memref<2352x256xbf16, #tpu.memory_space<vmem>>, vector<48x256xbf16>,
    %c0_185 = arith.constant 0 : index
    %c0_186 = arith.constant 0 : index
    %409 = vector.load %arg6[%c0_185, %c0_186] : memref<12x2352xbf16, #tpu.memory_space<vmem>>, vector<12x2352xbf16>
    %c0_187 = arith.constant 0 : index
    %c0_188 = arith.constant 0 : index
    %410 = vector.load %arg9[%c0_187, %c0_188] : memref<2352x256xbf16, #tpu.memory_space<vmem>>, vector<2352x256xbf16>
    %cst_189 = arith.constant dense<0.000000e+00> : vector<12x256xf32>
    %411 = tpu.matmul %409, %410, %cst_189 {dimension_numbers = #tpu.dot_dimension_numbers<[1], [0], [0], [1], [0, 0, 1, 1], [], []>} : vector<12x2352xbf16>, vector<2352x256xbf16>, vector<12x256xf32> -> vector<12x256xf32>
    %c0_190 = arith.constant 0 : index
    %c0_191 = arith.constant 0 : index
    %c0_192 = arith.constant 0 : index
    %412 = vector.load %arg7[%c0_190, %c0_191, %c0_192] : memref<1x12x256xf32, #tpu.memory_space<vmem>>, vector<1x12x256xf32>
    %413 = vector.shape_cast %412 : vector<1x12x256xf32> to vector<12x256xf32>
    %414 = vector.shape_cast %411 : vector<12x256xf32> to vector<1x12x256xf32>
    tpu.vector_store %arg7[%c0_190, %c0_191, %c0_192], %414 {strides = array<i32>} : memref<1x12x256xf32, #tpu.memory_space<vmem>>, vector<1x12x256xf32>,
    return
  }
  func.func @transform_0(%arg0: i32) -> (i32, i32, i32) {
    %c0_i32 = arith.constant 0 : i32
    %c0_i32_0 = arith.constant 0 : i32
    %c0_i32_1 = arith.constant 0 : i32
    return %arg0, %c0_i32, %c0_i32_0 : i32, i32, i32
  }
  func.func @transform_1(%arg0: i32) -> (i32, i32) {
    %c0_i32 = arith.constant 0 : i32
    %c0_i32_0 = arith.constant 0 : i32
    %c0_i32_1 = arith.constant 0 : i32
    return %c0_i32, %c0_i32_0 : i32, i32
  }
  func.func @transform_2(%arg0: i32) -> (i32, i32) {
    %c0_i32 = arith.constant 0 : i32
    %c0_i32_0 = arith.constant 0 : i32
    %c0_i32_1 = arith.constant 0 : i32
    return %c0_i32, %c0_i32_0 : i32, i32
  }
  func.func @transform_3(%arg0: i32) -> (i32, i32) {
    %c0_i32 = arith.constant 0 : i32
    %c0_i32_0 = arith.constant 0 : i32
    %c0_i32_1 = arith.constant 0 : i32
    return %c0_i32, %c0_i32_0 : i32, i32
  }
  func.func @transform_4(%arg0: i32) -> (i32, i32) {
    %c0_i32 = arith.constant 0 : i32
    %c0_i32_0 = arith.constant 0 : i32
    %c0_i32_1 = arith.constant 0 : i32
    return %c0_i32, %c0_i32_0 : i32, i32
  }
  func.func @transform_5(%arg0: i32) -> (i32, i32) {
    %c0_i32 = arith.constant 0 : i32
    %c0_i32_0 = arith.constant 0 : i32
    %c0_i32_1 = arith.constant 0 : i32
    return %c0_i32, %c0_i32_0 : i32, i32
  }
  func.func @transform_6(%arg0: i32) -> (i32, i32, i32) {
    %c0_i32 = arith.constant 0 : i32
    %c0_i32_0 = arith.constant 0 : i32
    %c0_i32_1 = arith.constant 0 : i32
    return %arg0, %c0_i32, %c0_i32_0 : i32, i32, i32
  }
}

</mosaic_0001>

<bundles_post_ra>
// kernel: my_dense_layer_forward.1
= control target key start
LH: loop header
LB: loop body
LE: loop exit
PB: predicated region body
PF: predicated region fallthrough
CT: control target
= control target key end

     0   :  { %s12403_s21 = smov 0   ;;  %s16227_s0 = inlined_call_operand.vmem [shape: f32[2,8,256], index: 0, kind: input, shape index: {}]   ;;  %s16228_s1 = inlined_call_operand.vmem [shape: bf16[48,8], index: 1, kind: input, shape index: {}]   ;;  %s16229_s2 = inlined_call_operand.vmem [shape: f32[8,1], index: 2, kind: input, shape index: {}]   ;;  %s16230_s3 = inlined_call_operand.vmem [shape: f32[8,1], index: 3, kind: input, shape index: {}]   ;;  %s16231_s4 = inlined_call_operand.vmem [shape: f32[48,1], index: 4, kind: input, shape index: {}]   ;;  %s16232_s5 = inlined_call_operand.vmem [shape: bf16[12,2352], index: 5, kind: input, shape index: {}]   ;;  %s16233_s6 = inlined_call_operand.vmem [shape: f32[2,12,256], index: 6, kind: output, shape index: {}]  }
   0x1 LB: > { %s8793_s22 = sadd.s32 4294967295, %s12315_s21   ;;  %p8797_p0 = scmp.ge.s32.totalorder %s12315_s21, 1  ;;  %s12315_s21 = sphi %s12403_s21, %s16_s21  }
   0x2   : > { %p212_p1 = scmp.lt.s32.totalorder %s12315_s21, 3 }
   0x4   : > { %p213_p2 = pnand %p8797_p0, %p212_p1 }
   0x5   : > { %p242_p3 = scmp.lt.s32.totalorder (!%p213_p2), %s8793_s22, 1  ;;  %s12318_s27 = smov (!%p213_p2), 51  }
   0x6   : > { %216 = sbr.rel (%p213_p2) target bundleno = 2034 (0x7f2), region = 44  ;;  %s12320_s28 = smov (!%p213_p2), 112  }
   0x7   : > { %s12321_s29 = smov (!%p213_p2), 96   ;;  %s12322_s30 = smov (!%p213_p2), 80  }
   0x8   : > { %s12323_s7 = smov (!%p213_p2), 64   ;;  %s12324_s8 = smov (!%p213_p2), 48  }
   0x9   : > { %s12325_s9 = smov (!%p213_p2), 32   ;;  %s12326_s10 = smov (!%p213_p2), 127  }
   0xa   : > { %s12328_s12 = smov (!%p213_p2), 95   ;;  %s12329_s13 = smov (!%p213_p2), 79  }
   0xb   : > { %v255_v0 = vld [vmem:[%s16229_s2] sm:$0xff]  ;;  %v12317_v1 = vmov 0   ;;  %v282_v5 = vld [vmem:[%s16231_s4 + $0x8] sm:$0xff]  ;;  %s16354_s22 = smov (!%p242_p3, %s8793_s22), 1  ;;  %vm16234_vm0 = vcmask 1043456   ;;  %vm332_vm1 = vcmask 64512  }
   0xc   : > { %10453 = vset.pattern.permute.xlu0 %v12317_v1  ;;  %10454 = vset.pattern.permute.xlu1 %v12317_v1  ;;  %v263_v2 = vld [vmem:[%s16230_s3] sm:$0xff]  ;;  %v286_v6 = vld [vmem:[%s16231_s4 + $0x28] sm:$0xff]  ;;  %s10076_s11 = sshll.u32 %s16354_s22, 4  ;;  %v283_v22 = vld [vmem:[%s16231_s4 + $0x10] sm:$0xff]  ;;  %vm409_vm2 = vcmask 416768   ;;  %v12319_v41 = vmov 0.0  }
   0xd   : > { %258 = vperm.xlu0 %10453, %v255_v0   ;;  %10455 = vset.pattern.permute.xlu2 %v12317_v1  ;;  %v285_v3 = vld [vmem:[%s16231_s4 + $0x20] sm:$0xff]  ;;  %s246_s14 = scalar_lea.vmem %s16227_s0, %s10076_s11  ;;  %v284_v23 = vld [vmem:[%s16231_s4 + $0x18] sm:$0xff]  ;;  %v10079_v24 = vld [vmem:[%s16228_s1 + $0x8] sm:$0xff]  ;;  %410 = vst.msk [vmem:[#allocation2] sm:$0xff] %vm409_vm2, %v12319_v41  ;;  %vm416_vm3 = vcmask 834968   ;;  %vm483_vm4 = vcmask 1047960  }
   0xe   : > { %v281_v4 = vld [vmem:[%s16231_s4] sm:$0xff]  ;;  %v254_v9 = vld [vmem:[%s246_s14 + $0x8] sm:$0xff]  ;;  %299 = vperm.xlu2 %10455, %v283_v22   ;;  %v10080_v25 = vld [vmem:[%s16228_s1 + $0x10] sm:$0xff]  ;;  %411 = vst.msk [vmem:[#allocation2 + $0x18] sm:$0xff] %vm409_vm2, %v12319_v41  ;;  %s12327_s11 = smov 111   ;;  %s12331_s15 = smov 47  }
   0xf   : > { %289 = vperm.xlu1 %10454, %v281_v4   ;;  %v253_v8 = vld [vmem:[%s246_s14] sm:$0xff]  ;;  %412 = vst.msk [vmem:[#allocation2 + $0x30] sm:$0xff] %vm409_vm2, %v12319_v41  ;;  %s12330_s14 = smov 63   ;;  %s12332_s16 = smov 31   ;;  %vm649_vm7 = vcmask 916480   ;;  %vm770_vm8 = vcmask 785408  }
  0x10   : > { %v10078_v21 = vld [vmem:[%s16228_s1] sm:$0xff]  ;;  %413 = vst.msk [vmem:[#allocation2 + $0x48] sm:$0xff] %vm409_vm2, %v12319_v41  ;;  %s12333_s17 = smov 126   ;;  %s12334_s18 = smov 110   ;;  %vm891_vm9 = vcmask 654336   ;;  %vm1012_vm10 = vcmask 523264  }
  0x11   : > { %414 = vst.msk [vmem:[#allocation2 + $0x60] sm:$0xff] %vm409_vm2, %v12319_v41  ;;  %s12335_s19 = smov 94   ;;  %vm1133_vm11 = vcmask 392192   ;;  %vm16244_vm12 = vcmask 261120   ;;  %vm16243_vm13 = vcmask 1039360   ;;  %s12336_s20 = smov 78  }
  0x12   : > { %415 = vst.msk [vmem:[#allocation2 + $0x78] sm:$0xff] %vm409_vm2, %v12319_v41  ;;  %s12337_s23 = smov 62   ;;  %s12338_s24 = smov 46  }
  0x13   : > { %418 = vst.msk [vmem:[#allocation2 + $0x28] sm:$0xff] %vm416_vm3, %v12319_v41  ;;  %s12339_s25 = smov 30   ;;  %s12340_s26 = smov 125  }
  0x14   : > { %417 = vst.msk [vmem:[#allocation2 + $0x10] sm:$0xff] %vm416_vm3, %v12319_v41 }
  0x15   : > { %266 = vperm.xlu0 %10453, %v263_v2   ;;  %419 = vst.msk [vmem:[#allocation2 + $0x40] sm:$0xff] %vm416_vm3, %v12319_v41 }
  0x16   : > { %304 = vperm.xlu2 %10455, %v284_v23   ;;  %420 = vst.msk [vmem:[#allocation2 + $0x58] sm:$0xff] %vm416_vm3, %v12319_v41 }
  0x17   : > { %294 = vperm.xlu1 %10454, %v282_v5   ;;  %421 = vst.msk [vmem:[#allocation2 + $0x70] sm:$0xff] %vm416_vm3, %v12319_v41 }
  0x18   : > { %422 = vst.msk [vmem:[#allocation2 + $0x88] sm:$0xff] %vm416_vm3, %v12319_v41  ;;  %vm16238_vm3 = vcmask 646144  }
  0x1d   : > { %309 = vperm.xlu0 %10453, %v285_v3  }
  0x1f   : > { %314 = vperm.xlu1 %10454, %v286_v6  }
  0x68   : > { %v300_v40 = vpop.permute.xlu2 %299 }
  0x70   : > { %v305_v48 = vpop.permute.xlu2 %304 }
  0x7f   : > { %v259_v7 = vpop.permute.xlu0 %258 }
  0x80   : > { %v261_v10 = vmul.f32 %v259_v7, %v253_v8  ;;  %v262_v11 = vmul.f32 %v259_v7, %v254_v9  ;;  %v502_v7 = vlaneseq }
  0x81   : > { %v290_v26 = vpop.permute.xlu1 %289 }
  0x82   : > { %v503_v8 = vand.u32 127, %v502_v7 }
  0x84   : > { %v504_v9 = vadd.s32 128, %v503_v8 }
  0x87   : > { %v267_v12 = vpop.permute.xlu0 %266 }
  0x88   : > { %v269_v13 = vadd.f32 %v267_v12, %v261_v10  ;;  %v270_v14 = vadd.f32 %v267_v12, %v262_v11  ;;  %v12472_v10 = vand.u32 15, %v503_v8  ;;  %v12474_v11 = vand.u32 15, %v504_v9 }
  0x89   : > { %v295_v33 = vpop.permute.xlu1 %294 }
  0x8a   : > { %v271_v15 = vmax.f32 %v269_v13, 0.0  ;;  %v272_v16 = vmax.f32 %v270_v14, 0.0 }
  0x8c   : > { %v279_v17 = vpack.c.bf16 %v271_v15, %v271_v15  ;;  %v280_v18 = vpack.c.bf16 %v272_v16, %v272_v16 }
  0x8e   : > { %v344_v19 = vsel %vm16234_vm0, %v279_v17, 0  ;;  %v347_v20 = vsel %vm16234_vm0, %v280_v18, 0  ;;  %v12481_v17 = vadd.s32 4294967293, %v12472_v10  ;;  %v12485_v18 = vadd.s32 4294967293, %v12474_v11 }
  0x8f   : > { %356 = vmatpush.bf16.msra.mxu0 %v344_v19  ;;  %380 = vmatpush.bf16.msra.mxu1 %v347_v20  ;;  %v310_v55 = vpop.permute.xlu0 %309  ;;  %vm16236_vm0 = vcmask 384000  }
  0x90   : > { %vm531_vm5 = vcmp.ge.s32.totalorder %v12481_v17, 0  ;;  %vm532_vm6 = vcmp.ge.s32.totalorder %v12485_v18, 0 }
  0x91   : > { %v315_v62 = vpop.permute.xlu1 %314 }
  0x92   : > { %8814 = vmatmul.msk.bf16.vlgmr.msra.gmra.mxu0 %vm332_vm1, %v10078_v21  ;;  %8817 = vmatmul.msk.bf16.vlgmr.msra.gmra.mxu1 %vm332_vm1, %v10078_v21 }
  0xa2   : > { %8815 = vmatmul.msk.bf16.gmra.mxu0 %vm332_vm1, %v10079_v24  ;;  %8818 = vmatmul.msk.bf16.gmra.mxu1 %vm332_vm1, %v10079_v24 }
  0xb2   : > { %8816 = vmatmul.msk.bf16.gmra.mxu0 %vm332_vm1, %v10080_v25  ;;  %8819 = vmatmul.msk.bf16.gmra.mxu1 %vm332_vm1, %v10080_v25  ;;  %vm16242_vm1 = vcmask 908288  }
 0x10f   : > { %v358_v27 = vpop.f32.mrf.mxu0  ;;  %v382_v28 = vpop.f32.mrf.mxu1 }
 0x110   : > { %v359_v29 = vadd.f32 %v358_v27, %v290_v26  ;;  %v383_v30 = vadd.f32 %v382_v28, %v290_v26 }
 0x112   : > { %v397_v31 = vmax.f32 %v359_v29, 0.0  ;;  %v398_v32 = vmax.f32 %v383_v30, 0.0 }
 0x114   : > { %437 = vrot.lane.b32.xlu0 %v398_v32, %s12318_s27  ;;  %435 = vrot.lane.b32.xlu2 %v397_v31, %s12318_s27 }
 0x117   : > { %v360_v34 = vpop.f32.mrf.mxu0  ;;  %v384_v35 = vpop.f32.mrf.mxu1 }
 0x118   : > { %v361_v36 = vadd.f32 %v360_v34, %v295_v33  ;;  %v385_v37 = vadd.f32 %v384_v35, %v295_v33 }
 0x11a   : > { %v399_v38 = vmax.f32 %v361_v36, 0.0  ;;  %v400_v39 = vmax.f32 %v385_v37, 0.0 }
 0x11c   : > { %439 = vrot.lane.b32.xlu1 %v399_v38, %s12318_s27  ;;  %441 = vrot.lane.b32.xlu2 %v400_v39, %s12318_s27 }
 0x11f   : > { %v363_v42 = vpop.f32.mrf.mxu0  ;;  %v387_v43 = vpop.f32.mrf.mxu1 }
 0x120   : > { %v364_v44 = vadd.f32 %v363_v42, %v300_v40  ;;  %v388_v45 = vadd.f32 %v387_v43, %v300_v40 }
 0x122   : > { %v401_v46 = vmax.f32 %v364_v44, 0.0  ;;  %v402_v47 = vmax.f32 %v388_v45, 0.0 }
 0x124   : > { %443 = vrot.lane.b32.xlu0 %v401_v46, %s12318_s27  ;;  %445 = vrot.lane.b32.xlu1 %v402_v47, %s12318_s27 }
 0x127   : > { %v365_v49 = vpop.f32.mrf.mxu0  ;;  %v389_v50 = vpop.f32.mrf.mxu1 }
 0x128   : > { %v366_v51 = vadd.f32 %v365_v49, %v305_v48  ;;  %v390_v52 = vadd.f32 %v389_v50, %v305_v48 }
 0x12a   : > { %v403_v53 = vmax.f32 %v366_v51, 0.0  ;;  %v404_v54 = vmax.f32 %v390_v52, 0.0 }
 0x12c   : > { %447 = vrot.lane.b32.xlu2 %v403_v53, %s12318_s27  ;;  %449 = vrot.lane.b32.xlu0 %v404_v54, %s12318_s27 }
 0x12f   : > { %v368_v56 = vpop.f32.mrf.mxu0  ;;  %v392_v57 = vpop.f32.mrf.mxu1 }
 0x130   : > { %v369_v58 = vadd.f32 %v368_v56, %v310_v55  ;;  %v393_v59 = vadd.f32 %v392_v57, %v310_v55 }
 0x132   : > { %v405_v60 = vmax.f32 %v369_v58, 0.0  ;;  %v406_v61 = vmax.f32 %v393_v59, 0.0 }
 0x134   : > { %451 = vrot.lane.b32.xlu1 %v405_v60, %s12318_s27  ;;  %453 = vrot.lane.b32.xlu2 %v406_v61, %s12318_s27 }
 0x137   : > { %v370_v63 = vpop.f32.mrf.mxu0  ;;  %v394_v0 = vpop.f32.mrf.mxu1 }
 0x138   : > { %v371_v1 = vadd.f32 %v370_v63, %v315_v62  ;;  %v395_v2 = vadd.f32 %v394_v0, %v315_v62 }
 0x13a   : > { %v407_v3 = vmax.f32 %v371_v1, 0.0  ;;  %v408_v4 = vmax.f32 %v395_v2, 0.0 }
 0x13c   : > { %455 = vrot.lane.b32.xlu0 %v407_v3, %s12318_s27  ;;  %457 = vrot.lane.b32.xlu1 %v408_v4, %s12318_s27  ;;  %s12341_s27 = smov 109  }
 0x16e   : > { %v436_v5 = vpop.permute.xlu2 %435 }
 0x16f   : > { %484 = vst.msk [vmem:[#allocation2] sm:$0xff] %vm483_vm4, %v436_v5 }
 0x176   : > { %v442_v6 = vpop.permute.xlu2 %441  ;;  %v577_v15 = vld [vmem:[#allocation2] sm:$0xff] }
 0x177   : > { %489 = vst.msk [vmem:[#allocation2 + $0x28] sm:$0xff] %vm409_vm2, %v442_v6  ;;  %v12490_v19 = vld [vmem:[#allocation2] sm:$0xff] }
 0x178   : > { %v553_v25 = vsel %vm531_vm5, %v12490_v19, 0.0 }
 0x17e   : > { %v582_v23 = vld [vmem:[#allocation2 + $0x28] sm:$0xff] }
 0x186   : > { %v438_v12 = vpop.permute.xlu0 %437  ;;  %v448_v13 = vpop.permute.xlu2 %447 }
 0x187   : > { %v459_v14 = vsel %vm409_vm2, %v436_v5, %v438_v12  ;;  %486 = vst.msk [vmem:[#allocation2 + $0x10] sm:$0xff] %vm409_vm2, %v438_v12 }
 0x188   : > { %485 = vst [vmem:[#allocation2 + $0x8] sm:$0xff] %v459_v14  ;;  %v12478_v16 = vpack.i.bf16 %v459_v14, %v577_v15 }
 0x189   : > { %493 = vst.msk [vmem:[#allocation2 + $0x48] sm:$0xff] %vm483_vm4, %v448_v13 }
 0x18a   : > { %10457 = vrot.lane.b32.xlu2 %v12478_v16, %s12320_s28 }
 0x18e   : > { %v440_v20 = vpop.permute.xlu1 %439  ;;  %v454_v21 = vpop.permute.xlu2 %453  ;;  %v579_v31 = vld [vmem:[#allocation2 + $0x10] sm:$0xff] }
 0x18f   : > { %v460_v22 = vsel %vm409_vm2, %v440_v20, %v442_v6  ;;  %487 = vst.msk [vmem:[#allocation2 + $0x18] sm:$0xff] %vm483_vm4, %v440_v20  ;;  %v12495_v24 = vld [vmem:[#allocation2 + $0x8] sm:$0xff] }
 0x190   : > { %488 = vst [vmem:[#allocation2 + $0x20] sm:$0xff] %v460_v22  ;;  %v12500_v26 = vpack.i.bf16 %v582_v23, %v460_v22  ;;  %v12504_v27 = vpack.i.bf16 %v12495_v24, %v12490_v19  ;;  %v554_v28 = vsel %vm532_vm6, %v12495_v24, 0.0  ;;  %v3039_v29 = vpack.c.bf16 %v12495_v24, %v12490_v19  ;;  %v2425_v0 = vld [vmem:[#allocation2 + $0x48] sm:$0xff] }
 0x191   : > { %498 = vst.msk [vmem:[#allocation2 + $0x70] sm:$0xff] %vm409_vm2, %v454_v21  ;;  %v565_v30 = vpack.c.bf16 %v554_v28, %v553_v25  ;;  %v559_v3 = vsel %vm531_vm5, %v2425_v0, 0.0  ;;  %v3546_v8 = vld [vmem:[#allocation2 + $0x48] sm:$0xff] }
 0x192   : > { %10462 = vrot.lane.b32.xlu2 %v12478_v16, %s12321_s29  ;;  %10617 = vrot.lane.b32.xlu1 %v12500_v26, %s12320_s28 }
 0x193   : > { %571 = vst [vmem:[#allocation3] sm:$0xff] %v565_v30 }
 0x196   : > { %v580_v32 = vld [vmem:[#allocation2 + $0x18] sm:$0xff]  ;;  %v444_v33 = vpop.permute.xlu0 %443  ;;  %v446_v34 = vpop.permute.xlu1 %445 }
 0x197   : > { %v12516_v35 = vld [vmem:[#allocation2 + $0x18] sm:$0xff]  ;;  %v12518_v36 = vpack.i.bf16 %v580_v32, %v579_v31  ;;  %490 = vst.msk [vmem:[#allocation2 + $0x30] sm:$0xff] %vm483_vm4, %v444_v33  ;;  %v12522_v37 = vsel %vm409_vm2, %v444_v33, %v446_v34  ;;  %v12524_v38 = vld [vmem:[#allocation2 + $0x20] sm:$0xff] }
 0x198   : > { %v555_v39 = vsel %vm531_vm5, %v12516_v35, 0.0  ;;  %491 = vst [vmem:[#allocation2 + $0x38] sm:$0xff] %v12522_v37  ;;  %v556_v40 = vsel %vm532_vm6, %v12524_v38, 0.0  ;;  %v3041_v41 = vpack.c.bf16 %v12524_v38, %v12516_v35 }
 0x199   : > { %10537 = vrot.lane.b32.xlu0 %v12518_v36, %s12320_s28  ;;  %492 = vst.msk [vmem:[#allocation2 + $0x40] sm:$0xff] %vm409_vm2, %v446_v34  ;;  %v566_v42 = vpack.c.bf16 %v556_v40, %v555_v39 }
 0x19a   : > { %10467 = vrot.lane.b32.xlu2 %v12478_v16, %s12322_s30  ;;  %10622 = vrot.lane.b32.xlu1 %v12500_v26, %s12321_s29 }
 0x19b   : > { %572 = vst [vmem:[#allocation3 + $0x8] sm:$0xff] %v566_v42 }
 0x19e   : > { %v450_v43 = vpop.permute.xlu0 %449  ;;  %v2422_v61 = vld [vmem:[#allocation2 + $0x30] sm:$0xff] }
 0x19f   : > { %v12543_v44 = vsel %vm409_vm2, %v448_v13, %v450_v43  ;;  %495 = vst.msk [vmem:[#allocation2 + $0x58] sm:$0xff] %vm409_vm2, %v450_v43  ;;  %v2423_v62 = vld [vmem:[#allocation2 + $0x38] sm:$0xff]  ;;  %v557_v63 = vsel %vm531_vm5, %v2422_v61, 0.0  ;;  %v12660_v23 = vld [vmem:[#allocation2 + $0x30] sm:$0xff] }
 0x1a0   : > { %494 = vst [vmem:[#allocation2 + $0x50] sm:$0xff] %v12543_v44  ;;  %v558_v2 = vsel %vm532_vm6, %v2423_v62, 0.0  ;;  %v3545_v5 = vld [vmem:[#allocation2 + $0x40] sm:$0xff]  ;;  %v12614_v12 = vpack.i.bf16 %v2423_v62, %v2422_v61  ;;  %v12664_v32 = vpack.i.bf16 %v12522_v37, %v12660_v23 }
 0x1a1   : > { %10542 = vrot.lane.b32.xlu0 %v12518_v36, %s12321_s29  ;;  %v567_v6 = vpack.c.bf16 %v558_v2, %v557_v63  ;;  %v12600_v9 = vpack.i.bf16 %v3546_v8, %v3545_v5 }
 0x1a2   : > { %10472 = vrot.lane.b32.xlu2 %v12478_v16, %s12323_s7  ;;  %10627 = vrot.lane.b32.xlu1 %v12500_v26, %s12322_s30 }
 0x1a3   : > { %573 = vst [vmem:[#allocation3 + $0x10] sm:$0xff] %v567_v6 }
 0x1a6   : > { %v452_v45 = vpop.permute.xlu1 %451 }
 0x1a7   : > { %v463_v46 = vsel %vm409_vm2, %v452_v45, %v454_v21  ;;  %496 = vst.msk [vmem:[#allocation2 + $0x60] sm:$0xff] %vm483_vm4, %v452_v45  ;;  %v2426_v1 = vld [vmem:[#allocation2 + $0x50] sm:$0xff] }
 0x1a8   : > { %497 = vst [vmem:[#allocation2 + $0x68] sm:$0xff] %v463_v46  ;;  %v560_v4 = vsel %vm532_vm6, %v2426_v1, 0.0 }
 0x1a9   : > { %10547 = vrot.lane.b32.xlu0 %v12518_v36, %s12322_s30  ;;  %v568_v7 = vpack.c.bf16 %v560_v4, %v559_v3 }
 0x1aa   : > { %10477 = vrot.lane.b32.xlu2 %v12478_v16, %s12324_s8  ;;  %10632 = vrot.lane.b32.xlu1 %v12500_v26, %s12323_s7 }
 0x1ab   : > { %574 = vst [vmem:[#allocation3 + $0x18] sm:$0xff] %v568_v7 }
 0x1ae   : > { %v456_v47 = vpop.permute.xlu0 %455  ;;  %v458_v48 = vpop.permute.xlu1 %457  ;;  %v2428_v49 = vld [vmem:[#allocation2 + $0x60] sm:$0xff] }
 0x1af   : > { %499 = vst.msk [vmem:[#allocation2 + $0x78] sm:$0xff] %vm483_vm4, %v456_v47  ;;  %v464_v50 = vsel %vm409_vm2, %v456_v47, %v458_v48  ;;  %v2429_v51 = vld [vmem:[#allocation2 + $0x68] sm:$0xff]  ;;  %v561_v52 = vsel %vm531_vm5, %v2428_v49, 0.0  ;;  %vm16235_vm4 = vcmask 515072  }
 0x1b0   : > { %500 = vst [vmem:[#allocation2 + $0x80] sm:$0xff] %v464_v50  ;;  %v12565_v53 = vpack.i.bf16 %v2429_v51, %v2428_v49  ;;  %v562_v54 = vsel %vm532_vm6, %v2429_v51, 0.0 }
 0x1b1   : > { %501 = vst.msk [vmem:[#allocation2 + $0x88] sm:$0xff] %vm409_vm2, %v458_v48  ;;  %10552 = vrot.lane.b32.xlu0 %v12518_v36, %s12323_s7  ;;  %v569_v55 = vpack.c.bf16 %v562_v54, %v561_v52  ;;  %vm16239_vm2 = vcmask 777216  }
 0x1b2   : > { %10482 = vrot.lane.b32.xlu2 %v12478_v16, %s12325_s9  ;;  %10637 = vrot.lane.b32.xlu1 %v12500_v26, %s12324_s8 }
 0x1b3   : > { %575 = vst [vmem:[#allocation3 + $0x20] sm:$0xff] %v569_v55 }
 0x1b6   : > { %v2431_v56 = vld [vmem:[#allocation2 + $0x78] sm:$0xff] }
 0x1b7   : > { %v2432_v57 = vld [vmem:[#allocation2 + $0x80] sm:$0xff]  ;;  %v563_v58 = vsel %vm531_vm5, %v2431_v56, 0.0 }
 0x1b8   : > { %v564_v59 = vsel %vm532_vm6, %v2432_v57, 0.0  ;;  %v585_v57 = vld [vmem:[#allocation2 + $0x40] sm:$0xff] }
 0x1b9   : > { %10557 = vrot.lane.b32.xlu0 %v12518_v36, %s12324_s8  ;;  %v570_v60 = vpack.c.bf16 %v564_v59, %v563_v58  ;;  %v586_v58 = vld [vmem:[#allocation2 + $0x48] sm:$0xff] }
 0x1ba   : > { %10487 = vrot.lane.b32.xlu2 %v12478_v16, %s12326_s10  ;;  %10642 = vrot.lane.b32.xlu1 %v12500_v26, %s12325_s9 }
 0x1bb   : > { %576 = vst [vmem:[#allocation3 + $0x28] sm:$0xff] %v570_v60 }
 0x1c1   : > { %10562 = vrot.lane.b32.xlu0 %v12518_v36, %s12325_s9 }
 0x1c2   : > { %10492 = vrot.lane.b32.xlu2 %v12478_v16, %s12327_s11  ;;  %10647 = vrot.lane.b32.xlu1 %v12500_v26, %s12326_s10 }
 0x1c9   : > { %10567 = vrot.lane.b32.xlu0 %v12518_v36, %s12326_s10 }
 0x1ca   : > { %10497 = vrot.lane.b32.xlu2 %v12478_v16, %s12328_s12  ;;  %10652 = vrot.lane.b32.xlu1 %v12500_v26, %s12327_s11 }
 0x1d1   : > { %10572 = vrot.lane.b32.xlu0 %v12518_v36, %s12327_s11 }
 0x1d2   : > { %10502 = vrot.lane.b32.xlu2 %v12478_v16, %s12329_s13  ;;  %10657 = vrot.lane.b32.xlu1 %v12500_v26, %s12328_s12 }
 0x1d9   : > { %10577 = vrot.lane.b32.xlu0 %v12518_v36, %s12328_s12 }
 0x1da   : > { %10507 = vrot.lane.b32.xlu2 %v12478_v16, %s12330_s14  ;;  %10662 = vrot.lane.b32.xlu1 %v12500_v26, %s12329_s13 }
 0x1e1   : > { %10582 = vrot.lane.b32.xlu0 %v12518_v36, %s12329_s13 }
 0x1e2   : > { %10512 = vrot.lane.b32.xlu2 %v12478_v16, %s12331_s15  ;;  %10667 = vrot.lane.b32.xlu1 %v12500_v26, %s12330_s14 }
 0x1e4   : > { %v10458_v13 = vpop.permute.xlu2 %10457 }
 0x1e5   : > { %v10460_v25 = vunpack.i.h.bf16 %v10458_v13  ;;  %v10459_v28 = vunpack.i.l.bf16 %v10458_v13 }
 0x1e7   : > { %v650_v33 = vsel %vm649_vm7, %v10459_v28, %v10460_v25 }
 0x1e9   : > { %10587 = vrot.lane.b32.xlu0 %v12518_v36, %s12330_s14 }
 0x1ea   : > { %10517 = vrot.lane.b32.xlu2 %v12478_v16, %s12332_s16  ;;  %10672 = vrot.lane.b32.xlu1 %v12500_v26, %s12331_s15 }
 0x1ec   : > { %v12634_v14 = vpop.permute.xlu2 %10462 }
 0x1ed   : > { %v10465_v46 = vunpack.i.h.bf16 %v12634_v14  ;;  %v10464_v49 = vunpack.i.l.bf16 %v12634_v14 }
 0x1ef   : > { %v771_v59 = vsel %vm770_vm8, %v10464_v49, %v10465_v46 }
 0x1f0   : > { %v795_v2 = vsel %vm531_vm5, %v771_v59, 0.0 }
 0x1f1   : > { %10592 = vrot.lane.b32.xlu0 %v12518_v36, %s12331_s15 }
 0x1f2   : > { %10522 = vrot.lane.b32.xlu2 %v12478_v16, %s12333_s17  ;;  %10677 = vrot.lane.b32.xlu1 %v12500_v26, %s12332_s16 }
 0x1f4   : > { %v12642_v15 = vpop.permute.xlu2 %10467 }
 0x1f5   : > { %v10470_v3 = vunpack.i.h.bf16 %v12642_v15  ;;  %v10469_v6 = vunpack.i.l.bf16 %v12642_v15 }
 0x1f7   : > { %v892_v15 = vsel %vm891_vm9, %v10469_v6, %v10470_v3 }
 0x1f9   : > { %10597 = vrot.lane.b32.xlu0 %v12518_v36, %s12332_s16 }
 0x1fa   : > { %10527 = vrot.lane.b32.xlu2 %v12478_v16, %s12334_s18  ;;  %10682 = vrot.lane.b32.xlu1 %v12500_v26, %s12333_s17 }
 0x1fc   : > { %v12650_v20 = vpop.permute.xlu2 %10472 }
 0x201   : > { %10602 = vrot.lane.b32.xlu0 %v12518_v36, %s12333_s17 }
 0x202   : > { %10532 = vrot.lane.b32.xlu2 %v12478_v16, %s12335_s19  ;;  %10687 = vrot.lane.b32.xlu1 %v12500_v26, %s12334_s18  ;;  %v12672_v16 = vld [vmem:[#allocation2 + $0x58] sm:$0xff] }
 0x203   : > { %v12680_v45 = vpack.i.bf16 %v12672_v16, %v12543_v44 }
 0x204   : > { %v10618_v21 = vpop.permute.xlu1 %10617  ;;  %v12658_v22 = vpop.permute.xlu2 %10477 }
 0x205   : > { %v10620_v30 = vunpack.i.h.bf16 %v10618_v21  ;;  %v10619_v31 = vunpack.i.l.bf16 %v10618_v21 }
 0x207   : > { %v653_v42 = vsel %vm649_vm7, %v10619_v31, %v10620_v30 }
 0x208   : > { %v677_v44 = vsel %vm532_vm6, %v653_v42, 0.0  ;;  %v916_v42 = vsel %vm531_vm5, %v892_v15, 0.0 }
 0x209   : > { %10607 = vrot.lane.b32.xlu0 %v12518_v36, %s12334_s18 }
 0x20a   : > { %10697 = vrot.lane.b32.xlu2 %v12664_v32, %s12320_s28  ;;  %10692 = vrot.lane.b32.xlu1 %v12500_v26, %s12335_s19  ;;  %v674_v26 = vsel %vm531_vm5, %v650_v33, 0.0 }
 0x20b   : > { %v10538_v34 = vpop.permute.xlu0 %10537 }
 0x20c   : > { %v10540_v39 = vunpack.i.h.bf16 %v10538_v34  ;;  %v10539_v40 = vunpack.i.l.bf16 %v10538_v34  ;;  %v10623_v37 = vpop.permute.xlu1 %10622  ;;  %v12676_v43 = vpop.permute.xlu2 %10482 }
 0x20d   : > { %v10625_v55 = vunpack.i.h.bf16 %v10623_v37  ;;  %v10624_v56 = vunpack.i.l.bf16 %v10623_v37  ;;  %v10475_v37 = vunpack.i.h.bf16 %v12650_v20 }
 0x20e   : > { %v651_v47 = vsel %vm649_vm7, %v10460_v25, %v10539_v40  ;;  %v652_v48 = vsel %vm649_vm7, %v10540_v39, %v10619_v31 }
 0x20f   : > { %v675_v50 = vsel %vm532_vm6, %v651_v47, 0.0  ;;  %v676_v51 = vsel %vm531_vm5, %v652_v48, 0.0  ;;  %v774_v63 = vsel %vm770_vm8, %v10624_v56, %v10625_v55  ;;  %v10474_v47 = vunpack.i.l.bf16 %v12650_v20 }
 0x210   : > { %v686_v52 = vpack.c.bf16 %v675_v50, %v674_v26  ;;  %v687_v54 = vpack.c.bf16 %v677_v44, %v676_v51  ;;  %v798_v13 = vsel %vm532_vm6, %v774_v63, 0.0 }
 0x211   : > { %10612 = vrot.lane.b32.xlu0 %v12518_v36, %s12335_s19  ;;  %v12704_v36 = vpack.i.bf16 %v586_v58, %v585_v57  ;;  %v1013_v20 = vsel %vm1012_vm10, %v10474_v47, %v10475_v37 }
 0x212   : > { %692 = vst [vmem:[#allocation3 + $0x150] sm:$0xff] %v686_v52  ;;  %10702 = vrot.lane.b32.xlu2 %v12664_v32, %s12321_s29  ;;  %10847 = vrot.lane.b32.xlu1 %v12680_v45, %s12320_s28 }
 0x213   : > { %693 = vst [vmem:[#allocation3 + $0x158] sm:$0xff] %v687_v54  ;;  %v10543_v60 = vpop.permute.xlu0 %10542 }
 0x214   : > { %v10545_v61 = vunpack.i.h.bf16 %v10543_v60  ;;  %v10544_v62 = vunpack.i.l.bf16 %v10543_v60  ;;  %v10628_v0 = vpop.permute.xlu1 %10627  ;;  %v12702_v1 = vpop.permute.xlu2 %10487 }
 0x215   : > { %v10630_v25 = vunpack.i.h.bf16 %v10628_v0  ;;  %v10629_v28 = vunpack.i.l.bf16 %v10628_v0 }
 0x216   : > { %v772_v4 = vsel %vm770_vm8, %v10465_v46, %v10544_v62  ;;  %v773_v5 = vsel %vm770_vm8, %v10545_v61, %v10624_v56  ;;  %v1037_v61 = vsel %vm531_vm5, %v1013_v20, 0.0  ;;  %v10480_v62 = vunpack.i.h.bf16 %v12658_v22 }
 0x217   : > { %v796_v7 = vsel %vm532_vm6, %v772_v4, 0.0  ;;  %v797_v8 = vsel %vm531_vm5, %v773_v5, 0.0  ;;  %v895_v34 = vsel %vm891_vm9, %v10629_v28, %v10630_v25 }
 0x218   : > { %v807_v14 = vpack.c.bf16 %v796_v7, %v795_v2  ;;  %v808_v21 = vpack.c.bf16 %v798_v13, %v797_v8  ;;  %v919_v50 = vsel %vm532_vm6, %v895_v34, 0.0  ;;  %v10479_v2 = vunpack.i.l.bf16 %v12658_v22 }
 0x219   : > { %10772 = vrot.lane.b32.xlu0 %v12704_v36, %s12320_s28 }
 0x21a   : > { %813 = vst [vmem:[#allocation3 + $0x2a0] sm:$0xff] %v807_v14  ;;  %10707 = vrot.lane.b32.xlu2 %v12664_v32, %s12322_s30  ;;  %10852 = vrot.lane.b32.xlu1 %v12680_v45, %s12321_s29  ;;  %v1134_v14 = vsel %vm1133_vm11, %v10479_v2, %v10480_v62 }
 0x21b   : > { %814 = vst [vmem:[#allocation3 + $0x2a8] sm:$0xff] %v808_v21  ;;  %v10548_v30 = vpop.permute.xlu0 %10547 }
 0x21c   : > { %v10550_v31 = vunpack.i.h.bf16 %v10548_v30  ;;  %v10549_v33 = vunpack.i.l.bf16 %v10548_v30  ;;  %v10633_v39 = vpop.permute.xlu1 %10632  ;;  %v12726_v40 = vpop.permute.xlu2 %10492 }
 0x21d   : > { %v10635_v52 = vunpack.i.h.bf16 %v10633_v39  ;;  %v10634_v54 = vunpack.i.l.bf16 %v10633_v39 }
 0x21e   : > { %v893_v26 = vsel %vm891_vm9, %v10470_v3, %v10549_v33  ;;  %v894_v46 = vsel %vm891_vm9, %v10550_v31, %v10629_v28  ;;  %v10485_v31 = vunpack.i.h.bf16 %v12676_v43  ;;  %v10484_v33 = vunpack.i.l.bf16 %v12676_v43 }
 0x21f   : > { %v917_v48 = vsel %vm532_vm6, %v893_v26, 0.0  ;;  %v918_v49 = vsel %vm531_vm5, %v894_v46, 0.0  ;;  %v1016_v58 = vsel %vm1012_vm10, %v10634_v54, %v10635_v52 }
 0x220   : > { %v928_v51 = vpack.c.bf16 %v917_v48, %v916_v42  ;;  %v929_v44 = vpack.c.bf16 %v919_v50, %v918_v49  ;;  %v1040_v5 = vsel %vm532_vm6, %v1016_v58, 0.0  ;;  %v1158_v42 = vsel %vm531_vm5, %v1134_v14, 0.0 }
 0x221   : > { %10777 = vrot.lane.b32.xlu0 %v12704_v36, %s12321_s29  ;;  %v1255_v50 = vsel %vm16244_vm12, %v10484_v33, %v10485_v31  ;;  %v10490_v58 = vunpack.i.h.bf16 %v12702_v1 }
 0x222   : > { %934 = vst [vmem:[#allocation3 + $0x3f0] sm:$0xff] %v928_v51  ;;  %10712 = vrot.lane.b32.xlu2 %v12664_v32, %s12323_s7  ;;  %10857 = vrot.lane.b32.xlu1 %v12680_v45, %s12322_s30 }
 0x223   : > { %935 = vst [vmem:[#allocation3 + $0x3f8] sm:$0xff] %v929_v44  ;;  %v10553_v55 = vpop.permute.xlu0 %10552 }
 0x224   : > { %v10555_v56 = vunpack.i.h.bf16 %v10553_v55  ;;  %v10554_v57 = vunpack.i.l.bf16 %v10553_v55  ;;  %v10638_v59 = vpop.permute.xlu1 %10637  ;;  %v12748_v60 = vpop.permute.xlu2 %10497 }
 0x225   : > { %v10640_v8 = vunpack.i.h.bf16 %v10638_v59  ;;  %v10639_v13 = vunpack.i.l.bf16 %v10638_v59  ;;  %v10489_v59 = vunpack.i.l.bf16 %v12702_v1 }
 0x226   : > { %v1014_v63 = vsel %vm1012_vm10, %v10475_v37, %v10554_v57  ;;  %v1015_v0 = vsel %vm1012_vm10, %v10555_v56, %v10634_v54  ;;  %v1279_v56 = vsel %vm531_vm5, %v1255_v50, 0.0  ;;  %v12797_v57 = vadd.s32 4294967294, %v12472_v10 }
 0x227   : > { %v1038_v3 = vsel %vm532_vm6, %v1014_v63, 0.0  ;;  %v1039_v4 = vsel %vm531_vm5, %v1015_v0, 0.0  ;;  %v1137_v28 = vsel %vm1133_vm11, %v10639_v13, %v10640_v8 }
 0x228   : > { %v1049_v6 = vpack.c.bf16 %v1038_v3, %v1037_v61  ;;  %v1050_v7 = vpack.c.bf16 %v1040_v5, %v1039_v4  ;;  %v1161_v46 = vsel %vm532_vm6, %v1137_v28, 0.0  ;;  %v12810_v3 = vadd.s32 4294967294, %v12474_v11 }
 0x229   : > { %10782 = vrot.lane.b32.xlu0 %v12704_v36, %s12322_s30  ;;  %vm1305_vm14 = vcmp.ge.s32.totalorder %v12797_v57, 0 }
 0x22a   : > { %1055 = vst [vmem:[#allocation3 + $0x540] sm:$0xff] %v1049_v6  ;;  %10717 = vrot.lane.b32.xlu2 %v12664_v32, %s12324_s8  ;;  %10862 = vrot.lane.b32.xlu1 %v12680_v45, %s12323_s7  ;;  %vm1306_vm15 = vcmp.ge.s32.totalorder %v12810_v3, 0 }
 0x22b   : > { %1056 = vst [vmem:[#allocation3 + $0x548] sm:$0xff] %v1050_v7  ;;  %v10558_v22 = vpop.permute.xlu0 %10557  ;;  %v1388_v7 = vsel %vm16243_vm13, %v10489_v59, %v10490_v58 }
 0x22c   : > { %v10560_v21 = vunpack.i.h.bf16 %v10558_v22  ;;  %v10559_v25 = vunpack.i.l.bf16 %v10558_v22  ;;  %v10643_v15 = vpop.permute.xlu1 %10642  ;;  %v12770_v30 = vpop.permute.xlu2 %10502  ;;  %v1412_v28 = vsel %vm1305_vm14, %v1388_v7, 0.0 }
 0x22d   : > { %v10645_v49 = vunpack.i.h.bf16 %v10643_v15  ;;  %v10644_v43 = vunpack.i.l.bf16 %v10643_v15  ;;  %v10495_v15 = vunpack.i.h.bf16 %v12726_v40 }
 0x22e   : > { %v1135_v34 = vsel %vm1133_vm11, %v10480_v62, %v10559_v25  ;;  %v1136_v39 = vsel %vm1133_vm11, %v10560_v21, %v10639_v13 }
 0x22f   : > { %v1159_v37 = vsel %vm532_vm6, %v1135_v34, 0.0  ;;  %v1160_v26 = vsel %vm531_vm5, %v1136_v39, 0.0  ;;  %v1258_v54 = vsel %vm16244_vm12, %v10644_v43, %v10645_v49  ;;  %v10494_v34 = vunpack.i.l.bf16 %v12726_v40  ;;  %v1564_v40 = vld [vmem:[#allocation2 + $0x38] sm:$0xff]  ;;  %v1446_v49 = vld [vmem:[#allocation2 + $0x50] sm:$0xff] }
 0x230   : > { %v1170_v47 = vpack.c.bf16 %v1159_v37, %v1158_v42  ;;  %v1171_v48 = vpack.c.bf16 %v1161_v46, %v1160_v26  ;;  %v1282_v2 = vsel %vm532_vm6, %v1258_v54, 0.0 }
 0x231   : > { %10787 = vrot.lane.b32.xlu0 %v12704_v36, %s12323_s7 }
 0x232   : > { %1176 = vst [vmem:[#allocation3 + $0x690] sm:$0xff] %v1170_v47  ;;  %10722 = vrot.lane.b32.xlu2 %v12664_v32, %s12325_s9  ;;  %10867 = vrot.lane.b32.xlu1 %v12680_v45, %s12324_s8 }
 0x233   : > { %1177 = vst [vmem:[#allocation3 + $0x698] sm:$0xff] %v1171_v48  ;;  %v10563_v51 = vpop.permute.xlu0 %10562 }
 0x234   : > { %v10565_v44 = vunpack.i.h.bf16 %v10563_v51  ;;  %v10564_v52 = vunpack.i.l.bf16 %v10563_v51  ;;  %v10648_v20 = vpop.permute.xlu1 %10647  ;;  %v12792_v55 = vpop.permute.xlu2 %10507 }
 0x235   : > { %v10650_v6 = vunpack.i.h.bf16 %v10648_v20  ;;  %v10649_v1 = vunpack.i.l.bf16 %v10648_v20 }
 0x236   : > { %v1256_v61 = vsel %vm16244_vm12, %v10485_v31, %v10564_v52  ;;  %v1257_v62 = vsel %vm16244_vm12, %v10565_v44, %v10644_v43  ;;  %v1509_v43 = vsel %vm16242_vm1, %v10494_v34, %v10495_v15 }
 0x237   : > { %v1280_v63 = vsel %vm532_vm6, %v1256_v61, 0.0  ;;  %v1281_v0 = vsel %vm531_vm5, %v1257_v62, 0.0  ;;  %v1391_v14 = vsel %vm16243_vm13, %v10649_v1, %v10650_v6  ;;  %v10499_v62 = vunpack.i.l.bf16 %v12748_v60 }
 0x238   : > { %v1291_v4 = vpack.c.bf16 %v1280_v63, %v1279_v56  ;;  %v1292_v5 = vpack.c.bf16 %v1282_v2, %v1281_v0  ;;  %v1415_v37 = vsel %vm1306_vm15, %v1391_v14, 0.0  ;;  %v12847_v56 = vpack.i.bf16 %v1564_v40, %v12660_v23 }
 0x239   : > { %10792 = vrot.lane.b32.xlu0 %v12704_v36, %s12324_s8 }
 0x23a   : > { %1297 = vst [vmem:[#allocation3 + $0x7e0] sm:$0xff] %v1291_v4  ;;  %10727 = vrot.lane.b32.xlu2 %v12664_v32, %s12326_s10  ;;  %10872 = vrot.lane.b32.xlu1 %v12680_v45, %s12325_s9 }
 0x23b   : > { %1298 = vst [vmem:[#allocation3 + $0x7e8] sm:$0xff] %v1292_v5  ;;  %v10568_v8 = vpop.permute.xlu0 %10567 }
 0x23c   : > { %v10570_v13 = vunpack.i.h.bf16 %v10568_v8  ;;  %v10569_v22 = vunpack.i.l.bf16 %v10568_v8  ;;  %v10653_v21 = vpop.permute.xlu1 %10652  ;;  %v12822_v25 = vpop.permute.xlu2 %10512 }
 0x23d   : > { %v10655_v47 = vunpack.i.h.bf16 %v10653_v21  ;;  %v10654_v48 = vunpack.i.l.bf16 %v10653_v21  ;;  %v10505_v21 = vunpack.i.h.bf16 %v12770_v30 }
 0x23e   : > { %v1389_v31 = vsel %vm16243_vm13, %v10490_v58, %v10569_v22  ;;  %v1390_v33 = vsel %vm16243_vm13, %v10570_v13, %v10649_v1  ;;  %v10500_v58 = vunpack.i.h.bf16 %v12748_v60 }
 0x23f   : > { %v1413_v39 = vsel %vm1306_vm15, %v1389_v31, 0.0  ;;  %v1414_v42 = vsel %vm1305_vm14, %v1390_v33, 0.0  ;;  %v1512_v52 = vsel %vm16242_vm1, %v10654_v48, %v10655_v47  ;;  %v10504_v31 = vunpack.i.l.bf16 %v12770_v30 }
 0x240   : > { %v1424_v26 = vpack.c.bf16 %v1413_v39, %v1412_v28  ;;  %v1425_v46 = vpack.c.bf16 %v1415_v37, %v1414_v42  ;;  %v1630_v60 = vsel %vm16239_vm2, %v10499_v62, %v10500_v58 }
 0x241   : > { %10797 = vrot.lane.b32.xlu0 %v12704_v36, %s12325_s9  ;;  %v1654_v14 = vsel %vm1305_vm14, %v1630_v60, 0.0  ;;  %v1751_v30 = vsel %vm16238_vm3, %v10504_v31, %v10505_v21 }
 0x242   : > { %1430 = vst [vmem:[#allocation3 + $0x30] sm:$0xff] %v1424_v26  ;;  %10732 = vrot.lane.b32.xlu2 %v12664_v32, %s12327_s11  ;;  %10877 = vrot.lane.b32.xlu1 %v12680_v45, %s12326_s10  ;;  %v12850_v32 = vpack.i.bf16 %v12672_v16, %v1446_v49  ;;  %v1533_v45 = vsel %vm1305_vm14, %v1509_v43, 0.0  ;;  %v1536_v16 = vsel %vm1306_vm15, %v1512_v52, 0.0 }
 0x243   : > { %1431 = vst [vmem:[#allocation3 + $0x38] sm:$0xff] %v1425_v46  ;;  %v10573_v50 = vpop.permute.xlu0 %10572 }
 0x244   : > { %v10575_v51 = vunpack.i.h.bf16 %v10573_v50  ;;  %v10574_v44 = vunpack.i.l.bf16 %v10573_v50  ;;  %v10658_v54 = vpop.permute.xlu1 %10657  ;;  %v12844_v20 = vpop.permute.xlu2 %10517 }
 0x245   : > { %v10660_v4 = vunpack.i.h.bf16 %v10658_v54  ;;  %v10659_v5 = vunpack.i.l.bf16 %v10658_v54 }
 0x246   : > { %v1510_v59 = vsel %vm16242_vm1, %v10495_v15, %v10574_v44  ;;  %v1511_v61 = vsel %vm16242_vm1, %v10575_v51, %v10654_v48  ;;  %v1775_v51 = vsel %vm1305_vm14, %v1751_v30, 0.0  ;;  %v10510_v44 = vunpack.i.h.bf16 %v12792_v55 }
 0x247   : > { %v1534_v63 = vsel %vm1306_vm15, %v1510_v59, 0.0  ;;  %v1535_v23 = vsel %vm1305_vm14, %v1511_v61, 0.0  ;;  %v1633_v8 = vsel %vm16239_vm2, %v10659_v5, %v10660_v4 }
 0x248   : > { %v1545_v0 = vpack.c.bf16 %v1534_v63, %v1533_v45  ;;  %v1546_v2 = vpack.c.bf16 %v1536_v16, %v1535_v23  ;;  %v1657_v39 = vsel %vm1306_vm15, %v1633_v8, 0.0  ;;  %v10509_v45 = vunpack.i.l.bf16 %v12792_v55 }
 0x249   : > { %10802 = vrot.lane.b32.xlu0 %v12704_v36, %s12326_s10 }
 0x24a   : > { %1551 = vst [vmem:[#allocation3 + $0x180] sm:$0xff] %v1545_v0  ;;  %10737 = vrot.lane.b32.xlu2 %v12847_v56, %s12328_s12  ;;  %10882 = vrot.lane.b32.xlu1 %v12850_v32, %s12327_s11  ;;  %v1872_v55 = vsel %vm16235_vm4, %v10509_v45, %v10510_v44 }
 0x24b   : > { %1552 = vst [vmem:[#allocation3 + $0x188] sm:$0xff] %v1546_v2  ;;  %v10578_v6 = vpop.permute.xlu0 %10577 }
 0x24c   : > { %v10580_v1 = vunpack.i.h.bf16 %v10578_v6  ;;  %v10579_v7 = vunpack.i.l.bf16 %v10578_v6  ;;  %v10663_v13 = vpop.permute.xlu1 %10662  ;;  %v12872_v22 = vpop.permute.xlu2 %10522 }
 0x24d   : > { %v10665_v26 = vunpack.i.h.bf16 %v10663_v13  ;;  %v10664_v46 = vunpack.i.l.bf16 %v10663_v13 }
 0x24e   : > { %v1631_v28 = vsel %vm16239_vm2, %v10500_v58, %v10579_v7  ;;  %v1632_v15 = vsel %vm16239_vm2, %v10580_v1, %v10659_v5  ;;  %v1896_v1 = vsel %vm1305_vm14, %v1872_v55, 0.0  ;;  %v10515_v7 = vunpack.i.h.bf16 %v12822_v25 }
 0x24f   : > { %v1655_v33 = vsel %vm1306_vm15, %v1631_v28, 0.0  ;;  %v1656_v34 = vsel %vm1305_vm14, %v1632_v15, 0.0  ;;  %v1754_v49 = vsel %vm16238_vm3, %v10664_v46, %v10665_v26  ;;  %vm2367_vm2 = vcmask 900096  }
 0x250   : > { %v1666_v42 = vpack.c.bf16 %v1655_v33, %v1654_v14  ;;  %v1667_v37 = vpack.c.bf16 %v1657_v39, %v1656_v34  ;;  %v1778_v61 = vsel %vm1306_vm15, %v1754_v49, 0.0  ;;  %v10514_v14 = vunpack.i.l.bf16 %v12822_v25 }
 0x251   : > { %10807 = vrot.lane.b32.xlu0 %v12704_v36, %s12327_s11 }
 0x252   : > { %1672 = vst [vmem:[#allocation3 + $0x2d0] sm:$0xff] %v1666_v42  ;;  %10742 = vrot.lane.b32.xlu2 %v12847_v56, %s12329_s13  ;;  %10887 = vrot.lane.b32.xlu1 %v12850_v32, %s12328_s12  ;;  %v1993_v42 = vsel %vm16236_vm0, %v10514_v14, %v10515_v7 }
 0x253   : > { %1673 = vst [vmem:[#allocation3 + $0x2d8] sm:$0xff] %v1667_v37  ;;  %v10583_v47 = vpop.permute.xlu0 %10582 }
 0x254   : > { %v10585_v48 = vunpack.i.h.bf16 %v10583_v47  ;;  %v10584_v40 = vunpack.i.l.bf16 %v10583_v47  ;;  %v10668_v43 = vpop.permute.xlu1 %10667  ;;  %v12894_v50 = vpop.permute.xlu2 %10527 }
 0x255   : > { %v10670_v23 = vunpack.i.h.bf16 %v10668_v43  ;;  %v10669_v16 = vunpack.i.l.bf16 %v10668_v43 }
 0x256   : > { %v1752_v52 = vsel %vm16238_vm3, %v10505_v21, %v10584_v40  ;;  %v1753_v54 = vsel %vm16238_vm3, %v10585_v48, %v10664_v46  ;;  %v10520_v48 = vunpack.i.h.bf16 %v12844_v20  ;;  %v10519_v40 = vunpack.i.l.bf16 %v12844_v20 }
 0x257   : > { %v1776_v58 = vsel %vm1306_vm15, %v1752_v52, 0.0  ;;  %v1777_v59 = vsel %vm1305_vm14, %v1753_v54, 0.0  ;;  %v1875_v5 = vsel %vm16235_vm4, %v10669_v16, %v10670_v23 }
 0x258   : > { %v1787_v62 = vpack.c.bf16 %v1776_v58, %v1775_v51  ;;  %v1788_v63 = vpack.c.bf16 %v1778_v61, %v1777_v59  ;;  %v1899_v15 = vsel %vm1306_vm15, %v1875_v5, 0.0  ;;  %v2017_v51 = vsel %vm1305_vm14, %v1993_v42, 0.0 }
 0x259   : > { %10812 = vrot.lane.b32.xlu0 %v12704_v36, %s12328_s12  ;;  %v10525_v5 = vunpack.i.h.bf16 %v12872_v22 }
 0x25a   : > { %1793 = vst [vmem:[#allocation3 + $0x420] sm:$0xff] %v1787_v62  ;;  %10747 = vrot.lane.b32.xlu2 %v12847_v56, %s12330_s14  ;;  %10892 = vrot.lane.b32.xlu1 %v12850_v32, %s12329_s13 }
 0x25b   : > { %1794 = vst [vmem:[#allocation3 + $0x428] sm:$0xff] %v1788_v63  ;;  %v10588_v0 = vpop.permute.xlu0 %10587 }
 0x25c   : > { %v10590_v2 = vunpack.i.h.bf16 %v10588_v0  ;;  %v10589_v4 = vunpack.i.l.bf16 %v10588_v0  ;;  %v10673_v60 = vpop.permute.xlu1 %10672  ;;  %v12916_v6 = vpop.permute.xlu2 %10532 }
 0x25d   : > { %v10675_v34 = vunpack.i.h.bf16 %v10673_v60  ;;  %v10674_v39 = vunpack.i.l.bf16 %v10673_v60  ;;  %v10524_v60 = vunpack.i.l.bf16 %v12872_v22 }
 0x25e   : > { %v1873_v8 = vsel %vm16235_vm4, %v10510_v44, %v10589_v4  ;;  %v1874_v13 = vsel %vm16235_vm4, %v10590_v2, %v10669_v16  ;;  %vm16237_vm4 = vcmask 252928   ;;  %v12965_v4 = vadd.s32 4294967295, %v12472_v10 }
 0x25f   : > { %v1897_v21 = vsel %vm1306_vm15, %v1873_v8, 0.0  ;;  %v1898_v28 = vsel %vm1305_vm14, %v1874_v13, 0.0  ;;  %v1996_v46 = vsel %vm16236_vm0, %v10674_v39, %v10675_v34  ;;  %v2114_v61 = vsel %vm16237_vm4, %v10519_v40, %v10520_v48 }
 0x260   : > { %v1908_v31 = vpack.c.bf16 %v1897_v21, %v1896_v1  ;;  %v1909_v33 = vpack.c.bf16 %v1899_v15, %v1898_v28  ;;  %v2020_v54 = vsel %vm1306_vm15, %v1996_v46, 0.0  ;;  %v2138_v2 = vsel %vm1305_vm14, %v2114_v61, 0.0 }
 0x261   : > { %10817 = vrot.lane.b32.xlu0 %v12704_v36, %s12329_s13  ;;  %v12978_v21 = vadd.s32 4294967295, %v12474_v11 }
 0x262   : > { %1914 = vst [vmem:[#allocation3 + $0x570] sm:$0xff] %v1908_v31  ;;  %10752 = vrot.lane.b32.xlu2 %v12847_v56, %s12331_s15  ;;  %10897 = vrot.lane.b32.xlu1 %v12850_v32, %s12330_s14 }
 0x263   : > { %1915 = vst [vmem:[#allocation3 + $0x578] sm:$0xff] %v1909_v33  ;;  %v10593_v25 = vpop.permute.xlu0 %10592  ;;  %vm2165_vm3 = vcmp.ge.s32.totalorder %v12978_v21, 0 }
 0x264   : > { %v10595_v37 = vunpack.i.h.bf16 %v10593_v25  ;;  %v10594_v26 = vunpack.i.l.bf16 %v10593_v25  ;;  %v10678_v30 = vpop.permute.xlu1 %10677  ;;  %v12938_v47 = vpop.permute.xlu2 %10697 }
 0x265   : > { %v10680_v59 = vunpack.i.h.bf16 %v10678_v30  ;;  %v10679_v20 = vunpack.i.l.bf16 %v10678_v30  ;;  %v10530_v30 = vunpack.i.h.bf16 %v12894_v50 }
 0x266   : > { %v1994_v49 = vsel %vm16236_vm0, %v10515_v7, %v10594_v26  ;;  %v1995_v43 = vsel %vm16236_vm0, %v10595_v37, %v10674_v39  ;;  %vm16240_vm0 = vcmask 1031168  }
 0x267   : > { %v2018_v44 = vsel %vm1306_vm15, %v1994_v49, 0.0  ;;  %v2019_v52 = vsel %vm1305_vm14, %v1995_v43, 0.0  ;;  %v2117_v16 = vsel %vm16237_vm4, %v10679_v20, %v10680_v59  ;;  %v2247_v33 = vsel %vm16240_vm0, %v10524_v60, %v10525_v5  ;;  %v590_v59 = vld [vmem:[#allocation2 + $0x68] sm:$0xff] }
 0x268   : > { %v2029_v45 = vpack.c.bf16 %v2018_v44, %v2017_v51  ;;  %v2030_v58 = vpack.c.bf16 %v2020_v54, %v2019_v52  ;;  %v2141_v14 = vsel %vm1306_vm15, %v2117_v16, 0.0  ;;  %v10529_v49 = vunpack.i.l.bf16 %v12894_v50  ;;  %v589_v50 = vld [vmem:[#allocation2 + $0x60] sm:$0xff] }
 0x269   : > { %10822 = vrot.lane.b32.xlu0 %v12704_v36, %s12330_s14 }
 0x26a   : > { %2035 = vst [vmem:[#allocation3 + $0x6c0] sm:$0xff] %v2029_v45  ;;  %10757 = vrot.lane.b32.xlu2 %v12847_v56, %s12332_s16  ;;  %10902 = vrot.lane.b32.xlu1 %v12850_v32, %s12331_s15 }
 0x26b   : > { %2036 = vst [vmem:[#allocation3 + $0x6c8] sm:$0xff] %v2030_v58  ;;  %v10598_v62 = vpop.permute.xlu0 %10597 }
 0x26c   : > { %v10600_v63 = vunpack.i.h.bf16 %v10598_v62  ;;  %v10599_v23 = vunpack.i.l.bf16 %v10598_v62  ;;  %v10683_v55 = vpop.permute.xlu1 %10682  ;;  %v12960_v0 = vpop.permute.xlu2 %10702 }
 0x26d   : > { %v10685_v31 = vunpack.i.h.bf16 %v10683_v55  ;;  %v10684_v22 = vunpack.i.l.bf16 %v10683_v55 }
 0x26e   : > { %v2115_v1 = vsel %vm16237_vm4, %v10520_v48, %v10599_v23  ;;  %v2116_v7 = vsel %vm16237_vm4, %v10600_v63, %v10679_v20  ;;  %vm2164_vm4 = vcmp.ge.s32.totalorder %v12965_v4, 0  ;;  %v2368_v20 = vsel %vm2367_vm2, %v10529_v49, %v10530_v30 }
 0x26f   : > { %v2139_v8 = vsel %vm1306_vm15, %v2115_v1, 0.0  ;;  %v2140_v13 = vsel %vm1305_vm14, %v2116_v7, 0.0  ;;  %v2250_v42 = vsel %vm16240_vm0, %v10684_v22, %v10685_v31  ;;  %v2271_v46 = vsel %vm2164_vm4, %v2247_v33, 0.0  ;;  %v594_v33 = vld [vmem:[#allocation2 + $0x88] sm:$0xff] }
 0x270   : > { %v2150_v28 = vpack.c.bf16 %v2139_v8, %v2138_v2  ;;  %v2151_v15 = vpack.c.bf16 %v2141_v14, %v2140_v13  ;;  %v2274_v44 = vsel %vm2165_vm3, %v2250_v42, 0.0  ;;  %v13014_v2 = vpack.i.bf16 %v590_v59, %v589_v50 }
 0x271   : > { %10827 = vrot.lane.b32.xlu0 %v12704_v36, %s12331_s15  ;;  %v10534_v7 = vunpack.i.l.bf16 %v12916_v6 }
 0x272   : > { %2156 = vst [vmem:[#allocation3 + $0x810] sm:$0xff] %v2150_v28  ;;  %10762 = vrot.lane.b32.xlu2 %v12847_v56, %s12333_s17  ;;  %10907 = vrot.lane.b32.xlu1 %v12850_v32, %s12332_s16 }
 0x273   : > { %2157 = vst [vmem:[#allocation3 + $0x818] sm:$0xff] %v2151_v15  ;;  %v10603_v34 = vpop.permute.xlu0 %10602 }
 0x274   : > { %v10605_v39 = vunpack.i.h.bf16 %v10603_v34  ;;  %v10604_v25 = vunpack.i.l.bf16 %v10603_v34  ;;  %v10688_v37 = vpop.permute.xlu1 %10687  ;;  %v12990_v26 = vpop.permute.xlu2 %10707 }
 0x275   : > { %v10690_v45 = vunpack.i.h.bf16 %v10688_v37  ;;  %v10689_v58 = vunpack.i.l.bf16 %v10688_v37 }
 0x276   : > { %v2248_v48 = vsel %vm16240_vm0, %v10525_v5, %v10604_v25  ;;  %v2249_v40 = vsel %vm16240_vm0, %v10605_v39, %v10684_v22  ;;  %vm16241_vm0 = vcmask 769024   ;;  %v10535_v5 = vunpack.i.h.bf16 %v12916_v6  ;;  %v593_v6 = vld [vmem:[#allocation2 + $0x80] sm:$0xff] }
 0x277   : > { %v2272_v43 = vsel %vm2165_vm3, %v2248_v48, 0.0  ;;  %v2273_v51 = vsel %vm2164_vm4, %v2249_v40, 0.0  ;;  %v2371_v23 = vsel %vm2367_vm2, %v10689_v58, %v10690_v45  ;;  %v13038_v48 = vpack.i.bf16 %v594_v33, %v593_v6 }
 0x278   : > { %v2283_v52 = vpack.c.bf16 %v2272_v43, %v2271_v46  ;;  %v2284_v54 = vpack.c.bf16 %v2274_v44, %v2273_v51  ;;  %v2395_v14 = vsel %vm2165_vm3, %v2371_v23, 0.0  ;;  %v2489_v34 = vsel %vm16241_vm0, %v10534_v7, %v10535_v5 }
 0x279   : > { %10832 = vrot.lane.b32.xlu0 %v12704_v36, %s12332_s16  ;;  %v10700_v40 = vunpack.i.h.bf16 %v12938_v47  ;;  %v10699_v51 = vunpack.i.l.bf16 %v12938_v47 }
 0x27a   : > { %2289 = vst [vmem:[#allocation3 + $0x60] sm:$0xff] %v2283_v52  ;;  %10767 = vrot.lane.b32.xlu2 %v12847_v56, %s12334_s18  ;;  %10912 = vrot.lane.b32.xlu1 %v12850_v32, %s12333_s17  ;;  %v2392_v56 = vsel %vm2164_vm4, %v2368_v20, 0.0  ;;  %v592_v20 = vld [vmem:[#allocation2 + $0x78] sm:$0xff] }
 0x27b   : > { %2290 = vst [vmem:[#allocation3 + $0x68] sm:$0xff] %v2284_v54  ;;  %v10608_v61 = vpop.permute.xlu0 %10607  ;;  %v654_v47 = vsel %vm649_vm7, %v10699_v51, %v10700_v40  ;;  %v10709_v51 = vunpack.i.l.bf16 %v12990_v26 }
 0x27c   : > { %v10610_v62 = vunpack.i.h.bf16 %v10608_v61  ;;  %v10609_v63 = vunpack.i.l.bf16 %v10608_v61  ;;  %v10693_v16 = vpop.permute.xlu1 %10692  ;;  %v13012_v55 = vpop.permute.xlu2 %10712 }
 0x27d   : > { %v10695_v31 = vunpack.i.h.bf16 %v10693_v16  ;;  %v10694_v22 = vunpack.i.l.bf16 %v10693_v16  ;;  %v591_v16 = vld [vmem:[#allocation2 + $0x70] sm:$0xff] }
 0x27e   : > { %v2369_v60 = vsel %vm2367_vm2, %v10530_v30, %v10609_v63  ;;  %v2370_v1 = vsel %vm2367_vm2, %v10610_v62, %v10689_v58 }
 0x27f   : > { %v2393_v8 = vsel %vm2165_vm3, %v2369_v60, 0.0  ;;  %v2394_v13 = vsel %vm2164_vm4, %v2370_v1, 0.0  ;;  %v2492_v37 = vsel %vm16241_vm0, %v10694_v22, %v10695_v31  ;;  %v678_v60 = vsel %vm531_vm5, %v654_v47, 0.0 }
 0x280   : > { %v2404_v28 = vpack.c.bf16 %v2393_v8, %v2392_v56  ;;  %v2405_v15 = vpack.c.bf16 %v2395_v14, %v2394_v13  ;;  %v2516_v54 = vsel %vm2165_vm3, %v2492_v37, 0.0  ;;  %v10705_v1 = vunpack.i.h.bf16 %v12960_v0 }
 0x281   : > { %10837 = vrot.lane.b32.xlu0 %v12704_v36, %s12333_s17  ;;  %v10704_v13 = vunpack.i.l.bf16 %v12960_v0 }
 0x282   : > { %2410 = vst [vmem:[#allocation3 + $0x1b0] sm:$0xff] %v2404_v28  ;;  %10917 = vrot.lane.b32.xlu1 %v12850_v32, %s12334_s18  ;;  %10922 = vrot.lane.b32.xlu2 %v13014_v2, %s12320_s28  ;;  %v2513_v32 = vsel %vm2164_vm4, %v2489_v34, 0.0 }
 0x283   : > { %2411 = vst [vmem:[#allocation3 + $0x1b8] sm:$0xff] %v2405_v15  ;;  %v10613_v39 = vpop.permute.xlu0 %10612  ;;  %v775_v0 = vsel %vm770_vm8, %v10704_v13, %v10705_v1 }
 0x284   : > { %v10615_v25 = vunpack.i.h.bf16 %v10613_v39  ;;  %v10614_v42 = vunpack.i.l.bf16 %v10613_v39  ;;  %v10848_v46 = vpop.permute.xlu1 %10847  ;;  %v13036_v30 = vpop.permute.xlu2 %10717 }
 0x285   : > { %v10850_v50 = vunpack.i.h.bf16 %v10848_v46  ;;  %v10849_v59 = vunpack.i.l.bf16 %v10848_v46 }
 0x286   : > { %v2490_v49 = vsel %vm16241_vm0, %v10535_v5, %v10614_v42  ;;  %v2491_v43 = vsel %vm16241_vm0, %v10615_v25, %v10694_v22  ;;  %vm16245_vm0 = vcmask 777216  }
 0x287   : > { %v2514_v44 = vsel %vm2165_vm3, %v2490_v49, 0.0  ;;  %v2515_v52 = vsel %vm2164_vm4, %v2491_v43, 0.0  ;;  %v657_v23 = vsel %vm649_vm7, %v10849_v59, %v10850_v50 }
 0x288   : > { %v2525_v45 = vpack.c.bf16 %v2514_v44, %v2513_v32  ;;  %v2526_v58 = vpack.c.bf16 %v2516_v54, %v2515_v52  ;;  %v681_v15 = vsel %vm532_vm6, %v657_v23, 0.0  ;;  %v799_v32 = vsel %vm531_vm5, %v775_v0, 0.0 }
 0x289   : > { %10842 = vrot.lane.b32.xlu0 %v12704_v36, %s12334_s18  ;;  %v13062_v36 = vpack.i.bf16 %v592_v20, %v591_v16 }
 0x28a   : > { %2531 = vst [vmem:[#allocation3 + $0x300] sm:$0xff] %v2525_v45  ;;  %11082 = vrot.lane.b32.xlu1 %v13038_v48, %s12320_s28  ;;  %10927 = vrot.lane.b32.xlu2 %v13014_v2, %s12321_s29 }
 0x28b   : > { %2532 = vst [vmem:[#allocation3 + $0x308] sm:$0xff] %v2526_v58  ;;  %v10773_v61 = vpop.permute.xlu0 %10772 }
 0x28c   : > { %v10775_v62 = vunpack.i.h.bf16 %v10773_v61  ;;  %v10774_v63 = vunpack.i.l.bf16 %v10773_v61  ;;  %v10853_v56 = vpop.permute.xlu1 %10852  ;;  %v13060_v5 = vpop.permute.xlu2 %10722 }
 0x28d   : > { %v10855_v6 = vunpack.i.h.bf16 %v10853_v56  ;;  %v10854_v33 = vunpack.i.l.bf16 %v10853_v56  ;;  %v10715_v56 = vunpack.i.h.bf16 %v13012_v55 }
 0x28e   : > { %v655_v7 = vsel %vm649_vm7, %v10700_v40, %v10774_v63  ;;  %v656_v8 = vsel %vm649_vm7, %v10775_v62, %v10849_v59  ;;  %v10710_v40 = vunpack.i.h.bf16 %v12990_v26 }
 0x28f   : > { %v679_v14 = vsel %vm532_vm6, %v655_v7, 0.0  ;;  %v680_v28 = vsel %vm531_vm5, %v656_v8, 0.0  ;;  %v778_v42 = vsel %vm770_vm8, %v10854_v33, %v10855_v6  ;;  %v10714_v7 = vunpack.i.l.bf16 %v13012_v55 }
 0x290   : > { %v688_v31 = vpack.c.bf16 %v679_v14, %v678_v60  ;;  %v689_v22 = vpack.c.bf16 %v681_v15, %v680_v28  ;;  %v802_v54 = vsel %vm532_vm6, %v778_v42, 0.0  ;;  %v896_v26 = vsel %vm891_vm9, %v10709_v51, %v10710_v40 }
 0x291   : > { %11002 = vrot.lane.b32.xlu0 %v13062_v36, %s12320_s28  ;;  %v920_v16 = vsel %vm531_vm5, %v896_v26, 0.0  ;;  %v1017_v55 = vsel %vm1012_vm10, %v10714_v7, %v10715_v56  ;;  %s12342_s28 = smov 93  }
 0x292   : > { %694 = vst [vmem:[#allocation3 + $0x160] sm:$0xff] %v688_v31  ;;  %11087 = vrot.lane.b32.xlu1 %v13038_v48, %s12321_s29  ;;  %10932 = vrot.lane.b32.xlu2 %v13014_v2, %s12322_s30  ;;  %v1041_v42 = vsel %vm531_vm5, %v1017_v55, 0.0 }
 0x293   : > { %695 = vst [vmem:[#allocation3 + $0x168] sm:$0xff] %v689_v22  ;;  %v10778_v34 = vpop.permute.xlu0 %10777 }
 0x294   : > { %v10780_v39 = vunpack.i.h.bf16 %v10778_v34  ;;  %v10779_v25 = vunpack.i.l.bf16 %v10778_v34  ;;  %v10858_v37 = vpop.permute.xlu1 %10857  ;;  %v13084_v46 = vpop.permute.xlu2 %10727 }
 0x295   : > { %v10860_v50 = vunpack.i.h.bf16 %v10858_v37  ;;  %v10859_v59 = vunpack.i.l.bf16 %v10858_v37  ;;  %v10720_v37 = vunpack.i.h.bf16 %v13036_v30 }
 0x296   : > { %v776_v49 = vsel %vm770_vm8, %v10705_v1, %v10779_v25  ;;  %v777_v43 = vsel %vm770_vm8, %v10780_v39, %v10854_v33 }
 0x297   : > { %v800_v44 = vsel %vm532_vm6, %v776_v49, 0.0  ;;  %v801_v52 = vsel %vm531_vm5, %v777_v43, 0.0  ;;  %v899_v62 = vsel %vm891_vm9, %v10859_v59, %v10860_v50  ;;  %v10719_v49 = vunpack.i.l.bf16 %v13036_v30 }
 0x298   : > { %v809_v45 = vpack.c.bf16 %v800_v44, %v799_v32  ;;  %v810_v58 = vpack.c.bf16 %v802_v54, %v801_v52  ;;  %v923_v14 = vsel %vm532_vm6, %v899_v62, 0.0 }
 0x299   : > { %11007 = vrot.lane.b32.xlu0 %v13062_v36, %s12321_s29  ;;  %v1138_v30 = vsel %vm1133_vm11, %v10719_v49, %v10720_v37  ;;  %s12343_s29 = smov 77  }
 0x29a   : > { %815 = vst [vmem:[#allocation3 + $0x2b0] sm:$0xff] %v809_v45  ;;  %11092 = vrot.lane.b32.xlu1 %v13038_v48, %s12322_s30  ;;  %10937 = vrot.lane.b32.xlu2 %v13014_v2, %s12323_s7  ;;  %v1162_v62 = vsel %vm531_vm5, %v1138_v30, 0.0 }
 0x29b   : > { %816 = vst [vmem:[#allocation3 + $0x2b8] sm:$0xff] %v810_v58  ;;  %v10783_v20 = vpop.permute.xlu0 %10782 }
 0x29c   : > { %v10785_v47 = vunpack.i.h.bf16 %v10783_v20  ;;  %v10784_v61 = vunpack.i.l.bf16 %v10783_v20  ;;  %v10863_v63 = vpop.permute.xlu1 %10862  ;;  %v13106_v23 = vpop.permute.xlu2 %10732 }
 0x29d   : > { %v10865_v31 = vunpack.i.h.bf16 %v10863_v63  ;;  %v10864_v22 = vunpack.i.l.bf16 %v10863_v63  ;;  %v10725_v63 = vunpack.i.h.bf16 %v13060_v5 }
 0x29e   : > { %v897_v60 = vsel %vm891_vm9, %v10710_v40, %v10784_v61  ;;  %v898_v1 = vsel %vm891_vm9, %v10785_v47, %v10859_v59 }
 0x29f   : > { %v921_v8 = vsel %vm532_vm6, %v897_v60, 0.0  ;;  %v922_v13 = vsel %vm531_vm5, %v898_v1, 0.0  ;;  %v1020_v34 = vsel %vm1012_vm10, %v10864_v22, %v10865_v31  ;;  %v10724_v60 = vunpack.i.l.bf16 %v13060_v5 }
 0x2a0   : > { %v930_v28 = vpack.c.bf16 %v921_v8, %v920_v16  ;;  %v931_v15 = vpack.c.bf16 %v923_v14, %v922_v13  ;;  %v1044_v44 = vsel %vm532_vm6, %v1020_v34, 0.0 }
 0x2a1   : > { %11012 = vrot.lane.b32.xlu0 %v13062_v36, %s12322_s30  ;;  %v1259_v5 = vsel %vm16244_vm12, %v10724_v60, %v10725_v63  ;;  %s12344_s30 = smov 61  }
 0x2a2   : > { %936 = vst [vmem:[#allocation3 + $0x400] sm:$0xff] %v930_v28  ;;  %11097 = vrot.lane.b32.xlu1 %v13038_v48, %s12323_s7  ;;  %10942 = vrot.lane.b32.xlu2 %v13014_v2, %s12324_s8  ;;  %v1283_v34 = vsel %vm531_vm5, %v1259_v5, 0.0 }
 0x2a3   : > { %937 = vst [vmem:[#allocation3 + $0x408] sm:$0xff] %v931_v15  ;;  %v10788_v6 = vpop.permute.xlu0 %10787 }
 0x2a4   : > { %v10790_v33 = vunpack.i.h.bf16 %v10788_v6  ;;  %v10789_v0 = vunpack.i.l.bf16 %v10788_v6  ;;  %v10868_v39 = vpop.permute.xlu1 %10867  ;;  %v13128_v25 = vpop.permute.xlu2 %10737 }
 0x2a5   : > { %v10870_v45 = vunpack.i.h.bf16 %v10868_v39  ;;  %v10869_v58 = vunpack.i.l.bf16 %v10868_v39  ;;  %v10730_v39 = vunpack.i.h.bf16 %v13084_v46 }
 0x2a6   : > { %v1018_v32 = vsel %vm1012_vm10, %v10715_v56, %v10789_v0  ;;  %v1019_v40 = vsel %vm1012_vm10, %v10790_v33, %v10864_v22 }
 0x2a7   : > { %v1042_v43 = vsel %vm532_vm6, %v1018_v32, 0.0  ;;  %v1043_v51 = vsel %vm531_vm5, %v1019_v40, 0.0  ;;  %v1141_v20 = vsel %vm1133_vm11, %v10869_v58, %v10870_v45  ;;  %v10729_v32 = vunpack.i.l.bf16 %v13084_v46 }
 0x2a8   : > { %v1051_v52 = vpack.c.bf16 %v1042_v43, %v1041_v42  ;;  %v1052_v54 = vpack.c.bf16 %v1044_v44, %v1043_v51  ;;  %v1165_v8 = vsel %vm532_vm6, %v1141_v20, 0.0 }
 0x2a9   : > { %11017 = vrot.lane.b32.xlu0 %v13062_v36, %s12323_s7  ;;  %v1392_v46 = vsel %vm16243_vm13, %v10729_v32, %v10730_v39  ;;  %s12345_s7 = smov 45  }
 0x2aa   : > { %1057 = vst [vmem:[#allocation3 + $0x550] sm:$0xff] %v1051_v52  ;;  %11102 = vrot.lane.b32.xlu1 %v13038_v48, %s12324_s8  ;;  %10947 = vrot.lane.b32.xlu2 %v13014_v2, %s12325_s9  ;;  %v1416_v20 = vsel %vm1305_vm14, %v1392_v46, 0.0 }
 0x2ab   : > { %1058 = vst [vmem:[#allocation3 + $0x558] sm:$0xff] %v1052_v54  ;;  %v10793_v50 = vpop.permute.xlu0 %10792 }
 0x2ac   : > { %v10795_v59 = vunpack.i.h.bf16 %v10793_v50  ;;  %v10794_v26 = vunpack.i.l.bf16 %v10793_v50  ;;  %v10873_v47 = vpop.permute.xlu1 %10872  ;;  %v13150_v61 = vpop.permute.xlu2 %10742 }
 0x2ad   : > { %v10875_v28 = vunpack.i.h.bf16 %v10873_v47  ;;  %v10874_v15 = vunpack.i.l.bf16 %v10873_v47  ;;  %v10735_v47 = vunpack.i.h.bf16 %v13106_v23 }
 0x2ae   : > { %v1139_v16 = vsel %vm1133_vm11, %v10720_v37, %v10794_v26  ;;  %v1140_v56 = vsel %vm1133_vm11, %v10795_v59, %v10869_v58 }
 0x2af   : > { %v1163_v1 = vsel %vm532_vm6, %v1139_v16, 0.0  ;;  %v1164_v7 = vsel %vm531_vm5, %v1140_v56, 0.0  ;;  %v1262_v6 = vsel %vm16244_vm12, %v10874_v15, %v10875_v28  ;;  %v10734_v16 = vunpack.i.l.bf16 %v13106_v23 }
 0x2b0   : > { %v1172_v13 = vpack.c.bf16 %v1163_v1, %v1162_v62  ;;  %v1173_v14 = vpack.c.bf16 %v1165_v8, %v1164_v7  ;;  %v1286_v43 = vsel %vm532_vm6, %v1262_v6, 0.0 }
 0x2b1   : > { %11022 = vrot.lane.b32.xlu0 %v13062_v36, %s12324_s8  ;;  %v1513_v23 = vsel %vm16242_vm1, %v10734_v16, %v10735_v47  ;;  %s12346_s8 = smov 29  }
 0x2b2   : > { %1178 = vst [vmem:[#allocation3 + $0x6a0] sm:$0xff] %v1172_v13  ;;  %11107 = vrot.lane.b32.xlu1 %v13038_v48, %s12325_s9  ;;  %10952 = vrot.lane.b32.xlu2 %v13014_v2, %s12326_s10  ;;  %v1537_v6 = vsel %vm1305_vm14, %v1513_v23, 0.0 }
 0x2b3   : > { %1179 = vst [vmem:[#allocation3 + $0x6a8] sm:$0xff] %v1173_v14  ;;  %v10798_v31 = vpop.permute.xlu0 %10797 }
 0x2b4   : > { %v10800_v22 = vunpack.i.h.bf16 %v10798_v31  ;;  %v10799_v55 = vunpack.i.l.bf16 %v10798_v31  ;;  %v10878_v33 = vpop.permute.xlu1 %10877  ;;  %v13172_v0 = vpop.permute.xlu2 %10747 }
 0x2b5   : > { %v10880_v52 = vunpack.i.h.bf16 %v10878_v33  ;;  %v10879_v54 = vunpack.i.l.bf16 %v10878_v33  ;;  %v10740_v33 = vunpack.i.h.bf16 %v13128_v25 }
 0x2b6   : > { %v1260_v42 = vsel %vm16244_vm12, %v10725_v63, %v10799_v55  ;;  %v1261_v37 = vsel %vm16244_vm12, %v10800_v22, %v10874_v15  ;;  %vm16248_vm12 = vmmov %vm16245_vm0 }
 0x2b7   : > { %v1284_v40 = vsel %vm532_vm6, %v1260_v42, 0.0  ;;  %v1285_v49 = vsel %vm531_vm5, %v1261_v37, 0.0  ;;  %v1395_v50 = vsel %vm16243_vm13, %v10879_v54, %v10880_v52  ;;  %v10739_v42 = vunpack.i.l.bf16 %v13128_v25 }
 0x2b8   : > { %v1293_v51 = vpack.c.bf16 %v1284_v40, %v1283_v34  ;;  %v1294_v44 = vpack.c.bf16 %v1286_v43, %v1285_v49  ;;  %v1419_v1 = vsel %vm1306_vm15, %v1395_v50, 0.0 }
 0x2b9   : > { %11027 = vrot.lane.b32.xlu0 %v13062_v36, %s12325_s9  ;;  %v1634_v25 = vsel %vm16245_vm0, %v10739_v42, %v10740_v33  ;;  %s12347_s9 = smov 124  }
 0x2ba   : > { %1299 = vst [vmem:[#allocation3 + $0x7f0] sm:$0xff] %v1293_v51  ;;  %11112 = vrot.lane.b32.xlu1 %v13038_v48, %s12326_s10  ;;  %10957 = vrot.lane.b32.xlu2 %v13014_v2, %s12327_s11  ;;  %v1658_v50 = vsel %vm1305_vm14, %v1634_v25, 0.0 }
 0x2bb   : > { %1300 = vst [vmem:[#allocation3 + $0x7f8] sm:$0xff] %v1294_v44  ;;  %v10803_v45 = vpop.permute.xlu0 %10802 }
 0x2bc   : > { %v10805_v58 = vunpack.i.h.bf16 %v10803_v45  ;;  %v10804_v30 = vunpack.i.l.bf16 %v10803_v45  ;;  %v10883_v59 = vpop.permute.xlu1 %10882  ;;  %v13194_v26 = vpop.permute.xlu2 %10752 }
 0x2bd   : > { %v10885_v13 = vunpack.i.h.bf16 %v10883_v59  ;;  %v10884_v14 = vunpack.i.l.bf16 %v10883_v59  ;;  %v10745_v59 = vunpack.i.h.bf16 %v13150_v61 }
 0x2be   : > { %v1393_v62 = vsel %vm16243_vm13, %v10730_v39, %v10804_v30  ;;  %v1394_v63 = vsel %vm16243_vm13, %v10805_v58, %v10879_v54  ;;  %vm16247_vm13 = vmmov %vm16245_vm0 }
 0x2bf   : > { %v1417_v56 = vsel %vm1306_vm15, %v1393_v62, 0.0  ;;  %v1418_v60 = vsel %vm1305_vm14, %v1394_v63, 0.0  ;;  %v1516_v31 = vsel %vm16242_vm1, %v10884_v14, %v10885_v13  ;;  %v10744_v62 = vunpack.i.l.bf16 %v13150_v61 }
 0x2c0   : > { %v1426_v7 = vpack.c.bf16 %v1417_v56, %v1416_v20  ;;  %v1427_v8 = vpack.c.bf16 %v1419_v1, %v1418_v60  ;;  %v1540_v40 = vsel %vm1306_vm15, %v1516_v31, 0.0 }
 0x2c1   : > { %11032 = vrot.lane.b32.xlu0 %v13062_v36, %s12326_s10  ;;  %s12348_s10 = smov 108  }
 0x2c2   : > { %1432 = vst [vmem:[#allocation3 + $0x40] sm:$0xff] %v1426_v7  ;;  %11117 = vrot.lane.b32.xlu1 %v13038_v48, %s12327_s11  ;;  %10962 = vrot.lane.b32.xlu2 %v13014_v2, %s12328_s12 }
 0x2c3   : > { %1433 = vst [vmem:[#allocation3 + $0x48] sm:$0xff] %v1427_v8  ;;  %v10808_v28 = vpop.permute.xlu0 %10807 }
 0x2c4   : > { %v10810_v15 = vunpack.i.h.bf16 %v10808_v28  ;;  %v10809_v5 = vunpack.i.l.bf16 %v10808_v28  ;;  %v10888_v22 = vpop.permute.xlu1 %10887  ;;  %v13216_v55 = vpop.permute.xlu2 %10757 }
 0x2c5   : > { %v10890_v51 = vunpack.i.h.bf16 %v10888_v22  ;;  %v10889_v44 = vunpack.i.l.bf16 %v10888_v22  ;;  %v10750_v22 = vunpack.i.h.bf16 %v13172_v0 }
 0x2c6   : > { %v1514_v34 = vsel %vm16242_vm1, %v10735_v47, %v10809_v5  ;;  %v1515_v39 = vsel %vm16242_vm1, %v10810_v15, %v10884_v14  ;;  %vm16246_vm1 = vmmov %vm16245_vm0  ;;  %vm16249_vm0 = vcmask 646144  }
 0x2c7   : > { %v1538_v37 = vsel %vm1306_vm15, %v1514_v34, 0.0  ;;  %v1539_v32 = vsel %vm1305_vm14, %v1515_v39, 0.0  ;;  %v1637_v45 = vsel %vm16246_vm1, %v10889_v44, %v10890_v51  ;;  %v1755_v61 = vsel %vm16249_vm0, %v10744_v62, %v10745_v59  ;;  %vm16252_vm1 = vmmov %vm16249_vm0 }
 0x2c8   : > { %v1547_v49 = vpack.c.bf16 %v1538_v37, %v1537_v6  ;;  %v1548_v43 = vpack.c.bf16 %v1540_v40, %v1539_v32  ;;  %v1661_v56 = vsel %vm1306_vm15, %v1637_v45, 0.0  ;;  %v1779_v31 = vsel %vm1305_vm14, %v1755_v61, 0.0 }
 0x2c9   : > { %11037 = vrot.lane.b32.xlu0 %v13062_v36, %s12327_s11  ;;  %v10749_v34 = vunpack.i.l.bf16 %v13172_v0  ;;  %s12349_s11 = smov 92  }
 0x2ca   : > { %1553 = vst [vmem:[#allocation3 + $0x190] sm:$0xff] %v1547_v49  ;;  %11122 = vrot.lane.b32.xlu1 %v13038_v48, %s12328_s12  ;;  %10967 = vrot.lane.b32.xlu2 %v13014_v2, %s12329_s13 }
 0x2cb   : > { %1554 = vst [vmem:[#allocation3 + $0x198] sm:$0xff] %v1548_v43  ;;  %v10813_v52 = vpop.permute.xlu0 %10812 }
 0x2cc   : > { %v10815_v54 = vunpack.i.h.bf16 %v10813_v52  ;;  %v10814_v46 = vunpack.i.l.bf16 %v10813_v52  ;;  %v10893_v58 = vpop.permute.xlu1 %10892  ;;  %v13238_v30 = vpop.permute.xlu2 %10762 }
 0x2cd   : > { %v10895_v7 = vunpack.i.h.bf16 %v10893_v58  ;;  %v10894_v8 = vunpack.i.l.bf16 %v10893_v58  ;;  %v10755_v58 = vunpack.i.h.bf16 %v13194_v26 }
 0x2ce   : > { %v1635_v20 = vsel %vm16247_vm13, %v10740_v33, %v10814_v46  ;;  %v1636_v47 = vsel %vm16248_vm12, %v10815_v54, %v10889_v44  ;;  %vm16250_vm12 = vmmov %vm16249_vm0 }
 0x2cf   : > { %v1659_v63 = vsel %vm1306_vm15, %v1635_v20, 0.0  ;;  %v1660_v16 = vsel %vm1305_vm14, %v1636_v47, 0.0  ;;  %v1758_v28 = vsel %vm16250_vm12, %v10894_v8, %v10895_v7  ;;  %vm16251_vm13 = vmmov %vm16249_vm0  ;;  %vm16253_vm0 = vcmask 515072  }
 0x2d0   : > { %v1668_v60 = vpack.c.bf16 %v1659_v63, %v1658_v50  ;;  %v1669_v1 = vpack.c.bf16 %v1661_v56, %v1660_v16  ;;  %v1782_v37 = vsel %vm1306_vm15, %v1758_v28, 0.0  ;;  %v1876_v0 = vsel %vm16253_vm0, %v10749_v34, %v10750_v22  ;;  %vm16254_vm12 = vmmov %vm16253_vm0 }
 0x2d1   : > { %11042 = vrot.lane.b32.xlu0 %v13062_v36, %s12328_s12  ;;  %v1900_v45 = vsel %vm1305_vm14, %v1876_v0, 0.0  ;;  %v10754_v20 = vunpack.i.l.bf16 %v13194_v26  ;;  %s12350_s12 = smov 76  }
 0x2d2   : > { %1674 = vst [vmem:[#allocation3 + $0x2e0] sm:$0xff] %v1668_v60  ;;  %11127 = vrot.lane.b32.xlu1 %v13038_v48, %s12329_s13  ;;  %10972 = vrot.lane.b32.xlu2 %v13014_v2, %s12330_s14 }
 0x2d3   : > { %1675 = vst [vmem:[#allocation3 + $0x2e8] sm:$0xff] %v1669_v1  ;;  %v10818_v13 = vpop.permute.xlu0 %10817 }
 0x2d4   : > { %v10820_v14 = vunpack.i.h.bf16 %v10818_v13  ;;  %v10819_v23 = vunpack.i.l.bf16 %v10818_v13  ;;  %v10898_v15 = vpop.permute.xlu1 %10897  ;;  %v13260_v5 = vpop.permute.xlu2 %10767 }
 0x2d5   : > { %v10900_v49 = vunpack.i.h.bf16 %v10898_v15  ;;  %v10899_v43 = vunpack.i.l.bf16 %v10898_v15  ;;  %v10760_v15 = vunpack.i.h.bf16 %v13216_v55 }
 0x2d6   : > { %v1756_v6 = vsel %vm16251_vm13, %v10745_v59, %v10819_v23  ;;  %v1757_v33 = vsel %vm16252_vm1, %v10820_v14, %v10894_v8  ;;  %vm16255_vm13 = vmmov %vm16253_vm0 }
 0x2d7   : > { %v1780_v39 = vsel %vm1306_vm15, %v1756_v6, 0.0  ;;  %v1781_v42 = vsel %vm1305_vm14, %v1757_v33, 0.0  ;;  %v1879_v52 = vsel %vm16254_vm12, %v10899_v43, %v10900_v49  ;;  %vm16256_vm1 = vmmov %vm16253_vm0  ;;  %vm16257_vm0 = vcmask 384000  }
 0x2d8   : > { %v1789_v32 = vpack.c.bf16 %v1780_v39, %v1779_v31  ;;  %v1790_v40 = vpack.c.bf16 %v1782_v37, %v1781_v42  ;;  %v1903_v63 = vsel %vm1306_vm15, %v1879_v52, 0.0  ;;  %v1997_v26 = vsel %vm16257_vm0, %v10754_v20, %v10755_v58  ;;  %vm16258_vm12 = vmmov %vm16257_vm0 }
 0x2d9   : > { %11047 = vrot.lane.b32.xlu0 %v13062_v36, %s12329_s13  ;;  %v2021_v28 = vsel %vm1305_vm14, %v1997_v26, 0.0  ;;  %v10759_v6 = vunpack.i.l.bf16 %v13216_v55  ;;  %s12351_s13 = smov 60  }
 0x2da   : > { %1795 = vst [vmem:[#allocation3 + $0x430] sm:$0xff] %v1789_v32  ;;  %11132 = vrot.lane.b32.xlu1 %v13038_v48, %s12330_s14  ;;  %10977 = vrot.lane.b32.xlu2 %v13014_v2, %s12331_s15 }
 0x2db   : > { %1796 = vst [vmem:[#allocation3 + $0x438] sm:$0xff] %v1790_v40  ;;  %v10823_v51 = vpop.permute.xlu0 %10822 }
 0x2dc   : > { %v10825_v44 = vunpack.i.h.bf16 %v10823_v51  ;;  %v10824_v25 = vunpack.i.l.bf16 %v10823_v51  ;;  %v10903_v54 = vpop.permute.xlu1 %10902  ;;  %v13282_v46 = vpop.permute.xlu2 %10922 }
 0x2dd   : > { %v10905_v60 = vunpack.i.h.bf16 %v10903_v54  ;;  %v10904_v1 = vunpack.i.l.bf16 %v10903_v54  ;;  %v10765_v54 = vunpack.i.h.bf16 %v13238_v30 }
 0x2de   : > { %v1877_v50 = vsel %vm16255_vm13, %v10750_v22, %v10824_v25  ;;  %v1878_v59 = vsel %vm16256_vm1, %v10825_v44, %v10899_v43  ;;  %vm16259_vm13 = vmmov %vm16257_vm0 }
 0x2df   : > { %v1901_v47 = vsel %vm1306_vm15, %v1877_v50, 0.0  ;;  %v1902_v62 = vsel %vm1305_vm14, %v1878_v59, 0.0  ;;  %v2000_v13 = vsel %vm16258_vm12, %v10904_v1, %v10905_v60  ;;  %vm16260_vm1 = vmmov %vm16257_vm0  ;;  %vm16261_vm0 = vcmask 252928  }
 0x2e0   : > { %v1910_v16 = vpack.c.bf16 %v1901_v47, %v1900_v45  ;;  %v1911_v56 = vpack.c.bf16 %v1903_v63, %v1902_v62  ;;  %v2024_v39 = vsel %vm1306_vm15, %v2000_v13, 0.0  ;;  %v2118_v55 = vsel %vm16261_vm0, %v10759_v6, %v10760_v15  ;;  %vm16262_vm12 = vmmov %vm16261_vm0 }
 0x2e1   : > { %11052 = vrot.lane.b32.xlu0 %v13062_v36, %s12330_s14  ;;  %v2142_v52 = vsel %vm1305_vm14, %v2118_v55, 0.0  ;;  %v10764_v50 = vunpack.i.l.bf16 %v13238_v30  ;;  %s12352_s14 = smov 44  }
 0x2e2   : > { %1916 = vst [vmem:[#allocation3 + $0x580] sm:$0xff] %v1910_v16  ;;  %11137 = vrot.lane.b32.xlu1 %v13038_v48, %s12331_s15  ;;  %10982 = vrot.lane.b32.xlu2 %v13014_v2, %s12332_s16 }
 0x2e3   : > { %1917 = vst [vmem:[#allocation3 + $0x588] sm:$0xff] %v1911_v56  ;;  %v10828_v7 = vpop.permute.xlu0 %10827 }
 0x2e4   : > { %v10830_v8 = vunpack.i.h.bf16 %v10828_v7  ;;  %v10829_v61 = vunpack.i.l.bf16 %v10828_v7  ;;  %v10908_v14 = vpop.permute.xlu1 %10907  ;;  %v13304_v23 = vpop.permute.xlu2 %10927 }
 0x2e5   : > { %v10910_v32 = vunpack.i.h.bf16 %v10908_v14  ;;  %v10909_v40 = vunpack.i.l.bf16 %v10908_v14  ;;  %v10770_v14 = vunpack.i.h.bf16 %v13260_v5 }
 0x2e6   : > { %v1998_v31 = vsel %vm16259_vm13, %v10755_v58, %v10829_v61  ;;  %v1999_v22 = vsel %vm16260_vm1, %v10830_v8, %v10904_v1  ;;  %vm16263_vm13 = vmmov %vm16261_vm0 }
 0x2e7   : > { %v2022_v33 = vsel %vm1306_vm15, %v1998_v31, 0.0  ;;  %v2023_v34 = vsel %vm1305_vm14, %v1999_v22, 0.0  ;;  %v2121_v51 = vsel %vm16262_vm12, %v10909_v40, %v10910_v32  ;;  %vm16264_vm1 = vmmov %vm16261_vm0  ;;  %vm16265_vm0 = vcmask 1031168  }
 0x2e8   : > { %v2031_v42 = vpack.c.bf16 %v2022_v33, %v2021_v28  ;;  %v2032_v37 = vpack.c.bf16 %v2024_v39, %v2023_v34  ;;  %v2145_v47 = vsel %vm1306_vm15, %v2121_v51, 0.0  ;;  %v2251_v30 = vsel %vm16265_vm0, %v10764_v50, %v10765_v54  ;;  %vm16266_vm12 = vmmov %vm16265_vm0  ;;  %v12301_v51 = vld [vmem:[#allocation2 + $0x50] sm:$0xff] }
 0x2e9   : > { %11057 = vrot.lane.b32.xlu0 %v13062_v36, %s12331_s15  ;;  %v2275_v13 = vsel %vm2164_vm4, %v2251_v30, 0.0  ;;  %v8946_v30 = vld [vmem:[#allocation3 + $0x60] sm:$0xf]  ;;  %s12353_s15 = smov 28  }
 0x2ea   : > { %2037 = vst [vmem:[#allocation3 + $0x6d0] sm:$0xff] %v2031_v42  ;;  %11142 = vrot.lane.b32.xlu1 %v13038_v48, %s12332_s16  ;;  %10987 = vrot.lane.b32.xlu2 %v13014_v2, %s12333_s17 }
 0x2eb   : > { %2038 = vst [vmem:[#allocation3 + $0x6d8] sm:$0xff] %v2032_v37  ;;  %v10833_v49 = vpop.permute.xlu0 %10832 }
 0x2ec   : > { %v10835_v43 = vunpack.i.h.bf16 %v10833_v49  ;;  %v10834_v0 = vunpack.i.l.bf16 %v10833_v49  ;;  %v10913_v44 = vpop.permute.xlu1 %10912  ;;  %v13326_v25 = vpop.permute.xlu2 %10932 }
 0x2ed   : > { %v10915_v16 = vunpack.i.h.bf16 %v10913_v44  ;;  %v10914_v56 = vunpack.i.l.bf16 %v10913_v44 }
 0x2ee   : > { %v2119_v45 = vsel %vm16263_vm13, %v10760_v15, %v10834_v0  ;;  %v2120_v58 = vsel %vm16264_vm1, %v10835_v43, %v10909_v40  ;;  %vm16267_vm13 = vmmov %vm16265_vm0  ;;  %v10769_v15 = vunpack.i.l.bf16 %v13260_v5  ;;  %v2427_v5 = vld [vmem:[#allocation2 + $0x58] sm:$0xff] }
 0x2ef   : > { %v2143_v59 = vsel %vm1306_vm15, %v2119_v45, 0.0  ;;  %v2144_v20 = vsel %vm1305_vm14, %v2120_v58, 0.0  ;;  %v2254_v7 = vsel %vm16266_vm12, %v10914_v56, %v10915_v16  ;;  %vm16268_vm1 = vmmov %vm16265_vm0  ;;  %v13372_v44 = vpack.i.bf16 %v2427_v5, %v12301_v51 }
 0x2f0   : > { %v2152_v62 = vpack.c.bf16 %v2143_v59, %v2142_v52  ;;  %v2153_v63 = vpack.c.bf16 %v2145_v47, %v2144_v20  ;;  %v2278_v6 = vsel %vm2165_vm3, %v2254_v7, 0.0  ;;  %v2372_v37 = vsel %vm2367_vm2, %v10769_v15, %v10770_v14 }
 0x2f1   : > { %11062 = vrot.lane.b32.xlu0 %v13062_v36, %s12332_s16  ;;  %v10925_v52 = vunpack.i.h.bf16 %v13282_v46  ;;  %v10924_v58 = vunpack.i.l.bf16 %v13282_v46  ;;  %vm16273_vm0 = vcmask 1039360   ;;  %s12354_s16 = smov 123  }
 0x2f2   : > { %2158 = vst [vmem:[#allocation3 + $0x820] sm:$0xff] %v2152_v62  ;;  %11147 = vrot.lane.b32.xlu1 %v13038_v48, %s12333_s17  ;;  %10992 = vrot.lane.b32.xlu2 %v13014_v2, %s12334_s18  ;;  %vm16276_vm12 = vmmov %vm16273_vm0 }
 0x2f3   : > { %2159 = vst [vmem:[#allocation3 + $0x828] sm:$0xff] %v2153_v63  ;;  %v10838_v60 = vpop.permute.xlu0 %10837  ;;  %v658_v7 = vsel %vm649_vm7, %v10924_v58, %v10925_v52 }
 0x2f4   : > { %v10840_v1 = vunpack.i.h.bf16 %v10838_v60  ;;  %v10839_v26 = vunpack.i.l.bf16 %v10838_v60  ;;  %v10918_v8 = vpop.permute.xlu1 %10917  ;;  %v13348_v61 = vpop.permute.xlu2 %10937  ;;  %v2433_v60 = vld [vmem:[#allocation2 + $0x88] sm:$0xff] }
 0x2f5   : > { %v10920_v39 = vunpack.i.h.bf16 %v10918_v8  ;;  %v10919_v42 = vunpack.i.l.bf16 %v10918_v8 }
 0x2f6   : > { %v2252_v28 = vsel %vm16267_vm13, %v10765_v54, %v10839_v26  ;;  %v2253_v2 = vsel %vm16268_vm1, %v10840_v1, %v10914_v56  ;;  %v2424_v1 = vld [vmem:[#allocation2 + $0x40] sm:$0xff]  ;;  %v10113_v26 = vld [vmem:[#allocation3 + $0x64] sm:$0xf0]  ;;  %vm16277_vm13 = vcmask 908288  }
 0x2f7   : > { %v2276_v31 = vsel %vm2165_vm3, %v2252_v28, 0.0  ;;  %v2277_v22 = vsel %vm2164_vm4, %v2253_v2, 0.0  ;;  %v2375_v49 = vsel %vm2367_vm2, %v10919_v42, %v10920_v39  ;;  %v682_v39 = vsel %vm531_vm5, %v658_v7, 0.0  ;;  %vm16278_vm1 = vmmov %vm16277_vm13 }
 0x2f8   : > { %v2285_v33 = vpack.c.bf16 %v2276_v31, %v2275_v13  ;;  %v2286_v34 = vpack.c.bf16 %v2278_v6, %v2277_v22  ;;  %v2399_v20 = vsel %vm2165_vm3, %v2375_v49, 0.0  ;;  %v12302_v31 = vld [vmem:[#allocation2 + $0x48] sm:$0xff]  ;;  %v8947_v6 = vor.u32 %v10113_v26, %v8946_v30 }
 0x2f9   : > { %11067 = vrot.lane.b32.xlu0 %v13062_v36, %s12333_s17  ;;  %v13396_v22 = vpack.i.bf16 %v12302_v31, %v2424_v1  ;;  %v10934_v7 = vunpack.i.l.bf16 %v13326_v25  ;;  %s12355_s17 = smov 107  }
 0x2fa   : > { %2291 = vst [vmem:[#allocation3 + $0x70] sm:$0xff] %v2285_v33  ;;  %11152 = vrot.lane.b32.xlu1 %v13038_v48, %s12334_s18  ;;  %10997 = vrot.lane.b32.xlu2 %v12614_v12, %s12335_s19  ;;  %v2396_v48 = vsel %vm2164_vm4, %v2372_v37, 0.0  ;;  %v12303_v33 = vld [vmem:[#allocation2 + $0x80] sm:$0xff] }
 0x2fb   : > { %2292 = vst [vmem:[#allocation3 + $0x78] sm:$0xff] %v2286_v34  ;;  %v10843_v32 = vpop.permute.xlu0 %10842  ;;  %v13398_v34 = vpack.i.bf16 %v2433_v60, %v12303_v33  ;;  %v9074_v33 = vld [vmem:[#allocation3 + $0x160] sm:$0xf] }
 0x2fc   : > { %v10845_v40 = vunpack.i.h.bf16 %v10843_v32  ;;  %v10844_v55 = vunpack.i.l.bf16 %v10843_v32  ;;  %v11083_v43 = vpop.permute.xlu1 %11082  ;;  %v13370_v0 = vpop.permute.xlu2 %10942  ;;  %v10929_v32 = vunpack.i.l.bf16 %v13304_v23 }
 0x2fd   : > { %v11085_v63 = vunpack.i.h.bf16 %v11083_v43  ;;  %v11084_v16 = vunpack.i.l.bf16 %v11083_v43 }
 0x2fe   : > { %v2373_v54 = vsel %vm2367_vm2, %v10770_v14, %v10844_v55  ;;  %v2374_v45 = vsel %vm2367_vm2, %v10845_v40, %v10919_v42  ;;  %v10930_v42 = vunpack.i.h.bf16 %v13304_v23 }
 0x2ff   : > { %v2397_v50 = vsel %vm2165_vm3, %v2373_v54, 0.0  ;;  %v2398_v59 = vsel %vm2164_vm4, %v2374_v45, 0.0  ;;  %v661_v28 = vsel %vm649_vm7, %v11084_v16, %v11085_v63  ;;  %v12304_v63 = vld [vmem:[#allocation2 + $0x78] sm:$0xff] }
 0x300   : > { %v2406_v47 = vpack.c.bf16 %v2397_v50, %v2396_v48  ;;  %v2407_v62 = vpack.c.bf16 %v2399_v20, %v2398_v59  ;;  %v685_v49 = vsel %vm532_vm6, %v661_v28, 0.0  ;;  %v779_v23 = vsel %vm770_vm8, %v10929_v32, %v10930_v42  ;;  %v2430_v59 = vld [vmem:[#allocation2 + $0x70] sm:$0xff] }
 0x301   : > { %11072 = vrot.lane.b32.xlu0 %v13062_v36, %s12334_s18  ;;  %v8954_v56 = vld [vmem:[#allocation3 + $0x70] sm:$0xf]  ;;  %v803_v60 = vsel %vm531_vm5, %v779_v23, 0.0  ;;  %s12356_s18 = smov 91  }
 0x302   : > { %2412 = vst [vmem:[#allocation3 + $0x1c0] sm:$0xff] %v2406_v47  ;;  %v10115_v46 = vld [vmem:[#allocation3 + $0x74] sm:$0xf0]  ;;  %11157 = vrot.lane.b32.xlu1 %v13372_v44, %s12335_s19  ;;  %11162 = vrot.lane.b32.xlu2 %v12565_v53, %s12335_s19 }
 0x303   : > { %2413 = vst [vmem:[#allocation3 + $0x1c8] sm:$0xff] %v2407_v62  ;;  %v11003_v8 = vpop.permute.xlu0 %11002  ;;  %v8955_v13 = vor.u32 %v10115_v46, %v8954_v56  ;;  %v13422_v62 = vld [vmem:[#allocation2 + $0x28] sm:$0xff]  ;;  %v12305_v56 = vld [vmem:[#allocation2 + $0x20] sm:$0xff]  ;;  %v10935_v46 = vunpack.i.h.bf16 %v13326_v25 }
 0x304   : > { %v11005_v14 = vunpack.i.h.bf16 %v11003_v8  ;;  %v11004_v36 = vunpack.i.l.bf16 %v11003_v8  ;;  %v11088_v2 = vpop.permute.xlu1 %11087  ;;  %v13394_v15 = vpop.permute.xlu2 %10947  ;;  %v13427_v30 = vpack.i.bf16 %v13422_v62, %v12305_v56 }
 0x305   : > { %8202 = vmatpush.bf16.msra.mxu2 %v8955_v13  ;;  %v11090_v48 = vunpack.i.h.bf16 %v11088_v2  ;;  %v11089_v54 = vunpack.i.l.bf16 %v11088_v2 }
 0x306   : > { %v659_v5 = vsel %vm649_vm7, %v10925_v52, %v11004_v36  ;;  %v660_v37 = vsel %vm649_vm7, %v11005_v14, %v11084_v16  ;;  %v13424_v16 = vpack.i.bf16 %v12304_v63, %v2430_v59  ;;  %v10939_v59 = vunpack.i.l.bf16 %v13348_v61 }
 0x307   : > { %v683_v40 = vsel %vm532_vm6, %v659_v5, 0.0  ;;  %v684_v55 = vsel %vm531_vm5, %v660_v37, 0.0  ;;  %v782_v50 = vsel %vm770_vm8, %v11089_v54, %v11090_v48  ;;  %v12306_v48 = vld [vmem:[#allocation2 + $0x18] sm:$0xff]  ;;  %vm16269_vm7 = vcmask 261120  }
 0x308   : > { %v690_v43 = vpack.c.bf16 %v683_v40, %v682_v39  ;;  %v691_v51 = vpack.c.bf16 %v685_v49, %v684_v55  ;;  %v806_v14 = vsel %vm532_vm6, %v782_v50, 0.0  ;;  %v10145_v39 = vld [vmem:[#allocation3 + $0x164] sm:$0xf0]  ;;  %v13449_v49 = vld [vmem:[#allocation2 + $0x10] sm:$0xff] }
 0x309   : > { %11077 = vrot.lane.b32.xlu0 %v13396_v22, %s12335_s19  ;;  %8203 = vmatpush.bf16.msra.mxu2 %v8947_v6  ;;  %v9075_v23 = vor.u32 %v10145_v39, %v9074_v33  ;;  %v3040_v35 = vpack.c.bf16 %v13449_v49, %v13449_v49 }
 0x30a   : > { %696 = vst [vmem:[#allocation3 + $0x170] sm:$0xff] %v690_v43  ;;  %11172 = vrot.lane.b32.xlu1 %v13398_v34, %s12335_s19  ;;  %11177 = vrot.lane.b32.xlu2 %v12504_v27, %s12336_s20 }
 0x30b   : > { %697 = vst [vmem:[#allocation3 + $0x178] sm:$0xff] %v691_v51  ;;  %v11008_v52 = vpop.permute.xlu0 %11007 }
 0x30c   : > { %v11010_v45 = vunpack.i.h.bf16 %v11008_v52  ;;  %v11009_v58 = vunpack.i.l.bf16 %v11008_v52  ;;  %v11093_v20 = vpop.permute.xlu1 %11092  ;;  %v13420_v47 = vpop.permute.xlu2 %10952 }
 0x30d   : > { %v11095_v2 = vunpack.i.h.bf16 %v11093_v20  ;;  %v11094_v31 = vunpack.i.l.bf16 %v11093_v20 }
 0x30e   : > { %v780_v1 = vsel %vm770_vm8, %v10930_v42, %v11009_v58  ;;  %v781_v26 = vsel %vm770_vm8, %v11010_v45, %v11089_v54  ;;  %v900_v42 = vsel %vm891_vm9, %v10934_v7, %v10935_v46  ;;  %v13454_v54 = vpack.i.bf16 %v12306_v48, %v13449_v49  ;;  %vm16270_vm8 = vmmov %vm16269_vm7 }
 0x30f   : > { %v804_v8 = vsel %vm532_vm6, %v780_v1, 0.0  ;;  %v805_v13 = vsel %vm531_vm5, %v781_v26, 0.0  ;;  %v903_v55 = vsel %vm891_vm9, %v11094_v31, %v11095_v2  ;;  %v924_v52 = vsel %vm531_vm5, %v900_v42, 0.0 }
 0x310   : > { %v811_v36 = vpack.c.bf16 %v804_v8, %v803_v60  ;;  %v812_v28 = vpack.c.bf16 %v806_v14, %v805_v13  ;;  %v10940_v45 = vunpack.i.h.bf16 %v13348_v61  ;;  %v927_v56 = vsel %vm532_vm6, %v903_v55, 0.0  ;;  %v9066_v8 = vld [vmem:[#allocation3 + $0x150] sm:$0xf]  ;;  %v10143_v13 = vld [vmem:[#allocation3 + $0x154] sm:$0xf0] }
 0x311   : > { %11167 = vrot.lane.b32.xlu0 %v13424_v16, %s12335_s19  ;;  %v9082_v6 = vld [vmem:[#allocation3 + $0x170] sm:$0xf]  ;;  %v9067_v14 = vor.u32 %v10143_v13, %v9066_v8  ;;  %s12357_s19 = smov 75  }
 0x312   : > { %817 = vst [vmem:[#allocation3 + $0x2c0] sm:$0xff] %v811_v36  ;;  %v10147_v25 = vld [vmem:[#allocation3 + $0x174] sm:$0xf0]  ;;  %11187 = vrot.lane.b32.xlu1 %v13427_v30, %s12336_s20  ;;  %11192 = vrot.lane.b32.xlu2 %v12614_v12, %s12336_s20  ;;  %v1021_v61 = vsel %vm1012_vm10, %v10939_v59, %v10940_v45 }
 0x313   : > { %818 = vst [vmem:[#allocation3 + $0x2c8] sm:$0xff] %v812_v28  ;;  %v11013_v5 = vpop.permute.xlu0 %11012  ;;  %v9083_v37 = vor.u32 %v10147_v25, %v9082_v6  ;;  %v1045_v33 = vsel %vm531_vm5, %v1021_v61, 0.0  ;;  %v10945_v25 = vunpack.i.h.bf16 %v13370_v0 }
 0x314   : > { %v11015_v32 = vunpack.i.h.bf16 %v11013_v5  ;;  %v11014_v40 = vunpack.i.l.bf16 %v11013_v5  ;;  %v11098_v43 = vpop.permute.xlu1 %11097  ;;  %v13451_v51 = vpop.permute.xlu2 %10957  ;;  %v10944_v5 = vunpack.i.l.bf16 %v13370_v0 }
 0x315   : > { %8230 = vmatpush.bf16.msrb.mxu0 %v9083_v37  ;;  %v11100_v26 = vunpack.i.h.bf16 %v11098_v43  ;;  %v11099_v7 = vunpack.i.l.bf16 %v11098_v43 }
 0x316   : > { %v901_v58 = vsel %vm891_vm9, %v10935_v46, %v11014_v40  ;;  %v902_v50 = vsel %vm891_vm9, %v11015_v32, %v11094_v31  ;;  %v1142_v0 = vsel %vm1133_vm11, %v10944_v5, %v10945_v25  ;;  %v10955_v5 = vunpack.i.h.bf16 %v13420_v47  ;;  %vm16271_vm9 = vmmov %vm16269_vm7 }
 0x317   : > { %v925_v20 = vsel %vm532_vm6, %v901_v58, 0.0  ;;  %v926_v63 = vsel %vm531_vm5, %v902_v50, 0.0  ;;  %v1024_v2 = vsel %vm1012_vm10, %v11099_v7, %v11100_v26  ;;  %v10949_v26 = vunpack.i.l.bf16 %v13394_v15 }
 0x318   : > { %v932_v60 = vpack.c.bf16 %v925_v20, %v924_v52  ;;  %v933_v1 = vpack.c.bf16 %v927_v56, %v926_v63  ;;  %v1048_v40 = vsel %vm532_vm6, %v1024_v2, 0.0  ;;  %v1166_v63 = vsel %vm531_vm5, %v1142_v0, 0.0 }
 0x319   : > { %11182 = vrot.lane.b32.xlu0 %v13454_v54, %s12336_s20  ;;  %8231 = vmatpush.bf16.msrb.mxu0 %v9075_v23  ;;  %v10950_v56 = vunpack.i.h.bf16 %v13394_v15 }
 0x31a   : > { %938 = vst [vmem:[#allocation3 + $0x410] sm:$0xff] %v932_v60  ;;  %11202 = vrot.lane.b32.xlu1 %v13372_v44, %s12336_s20  ;;  %11207 = vrot.lane.b32.xlu2 %v12565_v53, %s12336_s20 }
 0x31b   : > { %939 = vst [vmem:[#allocation3 + $0x418] sm:$0xff] %v933_v1  ;;  %v11018_v46 = vpop.permute.xlu0 %11017  ;;  %v1263_v15 = vsel %vm16269_vm7, %v10949_v26, %v10950_v56 }
 0x31c   : > { %v11020_v36 = vunpack.i.h.bf16 %v11018_v46  ;;  %v11019_v28 = vunpack.i.l.bf16 %v11018_v46  ;;  %v11103_v31 = vpop.permute.xlu1 %11102  ;;  %v13476_v6 = vpop.permute.xlu2 %10962 }
 0x31d   : > { %8232 = vmatpush.bf16.msrb.mxu0 %v9067_v14  ;;  %v11105_v48 = vunpack.i.h.bf16 %v11103_v31  ;;  %v11104_v23 = vunpack.i.l.bf16 %v11103_v31 }
 0x31e   : > { %v1022_v39 = vsel %vm1012_vm10, %v10940_v45, %v11019_v28  ;;  %v1023_v42 = vsel %vm1012_vm10, %v11020_v36, %v11099_v7  ;;  %vm16272_vm10 = vmmov %vm16269_vm7 }
 0x31f   : > { %v1046_v37 = vsel %vm532_vm6, %v1022_v39, 0.0  ;;  %v1047_v32 = vsel %vm531_vm5, %v1023_v42, 0.0  ;;  %v1145_v50 = vsel %vm1133_vm11, %v11104_v23, %v11105_v48  ;;  %v1287_v42 = vsel %vm531_vm5, %v1263_v15, 0.0  ;;  %vm16279_vm7 = vmmov %vm16278_vm1 }
 0x320   : > { %v1053_v55 = vpack.c.bf16 %v1046_v37, %v1045_v33  ;;  %v1054_v43 = vpack.c.bf16 %v1048_v40, %v1047_v32  ;;  %v1169_v13 = vsel %vm532_vm6, %v1145_v50, 0.0  ;;  %v10954_v40 = vunpack.i.l.bf16 %v13420_v47 }
 0x321   : > { %11197 = vrot.lane.b32.xlu0 %v13396_v22, %s12336_s20 }
 0x322   : > { %1059 = vst [vmem:[#allocation3 + $0x560] sm:$0xff] %v1053_v55  ;;  %11217 = vrot.lane.b32.xlu1 %v13398_v34, %s12336_s20  ;;  %11222 = vrot.lane.b32.xlu2 %v12504_v27, %s12337_s23  ;;  %v1396_v17 = vsel %vm16273_vm0, %v10954_v40, %v10955_v5 }
 0x323   : > { %1060 = vst [vmem:[#allocation3 + $0x568] sm:$0xff] %v1054_v43  ;;  %v11023_v52 = vpop.permute.xlu0 %11022 }
 0x324   : > { %v11025_v45 = vunpack.i.h.bf16 %v11023_v52  ;;  %v11024_v58 = vunpack.i.l.bf16 %v11023_v52  ;;  %v11108_v59 = vpop.permute.xlu1 %11107  ;;  %v13498_v20 = vpop.permute.xlu2 %10967 }
 0x325   : > { %v11110_v14 = vunpack.i.h.bf16 %v11108_v59  ;;  %v11109_v36 = vunpack.i.l.bf16 %v11108_v59 }
 0x326   : > { %v1143_v60 = vsel %vm1133_vm11, %v10945_v25, %v11024_v58  ;;  %v1144_v1 = vsel %vm1133_vm11, %v11025_v45, %v11104_v23 }
 0x327   : > { %v1167_v7 = vsel %vm532_vm6, %v1143_v60, 0.0  ;;  %v1168_v8 = vsel %vm531_vm5, %v1144_v1, 0.0  ;;  %v1266_v33 = vsel %vm16270_vm8, %v11109_v36, %v11110_v14  ;;  %v10960_v60 = vunpack.i.h.bf16 %v13451_v51  ;;  %vm16280_vm8 = vmmov %vm16278_vm1 }
 0x328   : > { %v1174_v61 = vpack.c.bf16 %v1167_v7, %v1166_v63  ;;  %v1175_v46 = vpack.c.bf16 %v1169_v13, %v1168_v8  ;;  %v1290_v48 = vsel %vm532_vm6, %v1266_v33, 0.0  ;;  %v10959_v7 = vunpack.i.l.bf16 %v13451_v51 }
 0x329   : > { %11212 = vrot.lane.b32.xlu0 %v13424_v16, %s12336_s20  ;;  %s12358_s20 = smov 59  }
 0x32a   : > { %1180 = vst [vmem:[#allocation3 + $0x6b0] sm:$0xff] %v1174_v61  ;;  %11232 = vrot.lane.b32.xlu1 %v13427_v30, %s12337_s23  ;;  %11237 = vrot.lane.b32.xlu2 %v12614_v12, %s12337_s23  ;;  %v1517_v51 = vsel %vm16277_vm13, %v10959_v7, %v10960_v60 }
 0x32b   : > { %1181 = vst [vmem:[#allocation3 + $0x6b8] sm:$0xff] %v1175_v46  ;;  %v11028_v28 = vpop.permute.xlu0 %11027 }
 0x32c   : > { %v11030_v2 = vunpack.i.h.bf16 %v11028_v28  ;;  %v11029_v31 = vunpack.i.l.bf16 %v11028_v28  ;;  %v11113_v25 = vpop.permute.xlu1 %11112  ;;  %v13520_v39 = vpop.permute.xlu2 %10972 }
 0x32d   : > { %v11115_v52 = vunpack.i.h.bf16 %v11113_v25  ;;  %v11114_v45 = vunpack.i.l.bf16 %v11113_v25 }
 0x32e   : > { %v1264_v37 = vsel %vm16271_vm9, %v10950_v56, %v11029_v31  ;;  %v1265_v32 = vsel %vm16272_vm10, %v11030_v2, %v11109_v36  ;;  %v1420_v56 = vsel %vm1305_vm14, %v1396_v17, 0.0  ;;  %vm16281_vm9 = vcmask 777216  }
 0x32f   : > { %v1288_v55 = vsel %vm532_vm6, %v1264_v37, 0.0  ;;  %v1289_v43 = vsel %vm531_vm5, %v1265_v32, 0.0  ;;  %vm16274_vm5 = vmmov %vm16273_vm0  ;;  %v10965_v37 = vunpack.i.h.bf16 %v13476_v6 }
 0x330   : > { %v1295_v23 = vpack.c.bf16 %v1288_v55, %v1287_v42  ;;  %v1296_v0 = vpack.c.bf16 %v1290_v48, %v1289_v43  ;;  %v1399_v50 = vsel %vm16274_vm5, %v11114_v45, %v11115_v52  ;;  %vm16275_vm6 = vmmov %vm16273_vm0  ;;  %v10964_v55 = vunpack.i.l.bf16 %v13476_v6 }
 0x331   : > { %11227 = vrot.lane.b32.xlu0 %v13454_v54, %s12337_s23  ;;  %v1423_v61 = vsel %vm1306_vm15, %v1399_v50, 0.0  ;;  %vm16282_vm10 = vmmov %vm16281_vm9 }
 0x332   : > { %1301 = vst [vmem:[#allocation3 + $0x800] sm:$0xff] %v1295_v23  ;;  %11247 = vrot.lane.b32.xlu1 %v13372_v44, %s12337_s23  ;;  %11252 = vrot.lane.b32.xlu2 %v12565_v53, %s12337_s23  ;;  %v1638_v50 = vsel %vm16281_vm9, %v10964_v55, %v10965_v37  ;;  %vm16283_vm0 = vmmov %vm16281_vm9 }
 0x333   : > { %1302 = vst [vmem:[#allocation3 + $0x808] sm:$0xff] %v1296_v0  ;;  %v11033_v47 = vpop.permute.xlu0 %11032  ;;  %vm16284_vm5 = vmmov %vm16283_vm0 }
 0x334   : > { %v11035_v18 = vunpack.i.h.bf16 %v11033_v47  ;;  %v11034_v58 = vunpack.i.l.bf16 %v11033_v47  ;;  %v11118_v59 = vpop.permute.xlu1 %11117  ;;  %v13542_v63 = vpop.permute.xlu2 %10977 }
 0x335   : > { %v11120_v36 = vunpack.i.h.bf16 %v11118_v59  ;;  %v11119_v15 = vunpack.i.l.bf16 %v11118_v59 }
 0x336   : > { %v1397_v1 = vsel %vm16275_vm6, %v10955_v5, %v11034_v58  ;;  %v1398_v26 = vsel %vm16276_vm12, %v11035_v18, %v11114_v45  ;;  %v1541_v5 = vsel %vm1305_vm14, %v1517_v51, 0.0  ;;  %v8930_v18 = vld [vmem:[#allocation3 + $0x40] sm:$0xf]  ;;  %v10109_v58 = vld [vmem:[#allocation3 + $0x44] sm:$0xf0]  ;;  %vm16285_vm6 = vcmask 646144  }
 0x337   : > { %v1421_v8 = vsel %vm1306_vm15, %v1397_v1, 0.0  ;;  %v1422_v13 = vsel %vm1305_vm14, %v1398_v26, 0.0  ;;  %v1520_v33 = vsel %vm16278_vm1, %v11119_v15, %v11120_v36  ;;  %vm16286_vm12 = vmmov %vm16285_vm6 }
 0x338   : > { %v1428_v46 = vpack.c.bf16 %v1421_v8, %v1420_v56  ;;  %v1429_v14 = vpack.c.bf16 %v1423_v61, %v1422_v13  ;;  %v1544_v23 = vsel %vm1306_vm15, %v1520_v33, 0.0  ;;  %v8931_v13 = vor.u32 %v10109_v58, %v8930_v18  ;;  %vm16287_vm13 = vmmov %vm16285_vm6 }
 0x339   : > { %11242 = vrot.lane.b32.xlu0 %v13396_v22, %s12337_s23  ;;  %v1662_v61 = vsel %vm1305_vm14, %v1638_v50, 0.0  ;;  %vm16288_vm1 = vmmov %vm16285_vm6 }
 0x33a   : > { %1434 = vst [vmem:[#allocation3 + $0x50] sm:$0xff] %v1428_v46  ;;  %11262 = vrot.lane.b32.xlu1 %v13398_v34, %s12337_s23  ;;  %11267 = vrot.lane.b32.xlu2 %v12504_v27, %s12338_s24  ;;  %v10970_v46 = vunpack.i.h.bf16 %v13498_v20 }
 0x33b   : > { %1435 = vst [vmem:[#allocation3 + $0x58] sm:$0xff] %v1429_v14  ;;  %v11038_v28 = vpop.permute.xlu0 %11037 }
 0x33c   : > { %v11040_v2 = vunpack.i.h.bf16 %v11038_v28  ;;  %v11039_v31 = vunpack.i.l.bf16 %v11038_v28  ;;  %v11123_v25 = vpop.permute.xlu1 %11122  ;;  %v13564_v42 = vpop.permute.xlu2 %10982 }
 0x33d   : > { %v11125_v45 = vunpack.i.h.bf16 %v11123_v25  ;;  %v11124_v17 = vunpack.i.l.bf16 %v11123_v25 }
 0x33e   : > { %v1518_v32 = vsel %vm16279_vm7, %v10960_v60, %v11039_v31  ;;  %v1519_v40 = vsel %vm16280_vm8, %v11040_v2, %v11119_v15  ;;  %v10969_v15 = vunpack.i.l.bf16 %v13498_v20  ;;  %v10105_v20 = vld [vmem:[#allocation3 + $0x24] sm:$0xf0]  ;;  %vm16289_vm7 = vcmask 515072  }
 0x33f   : > { %v1542_v43 = vsel %vm1306_vm15, %v1518_v32, 0.0  ;;  %v1543_v48 = vsel %vm1305_vm14, %v1519_v40, 0.0  ;;  %v1641_v26 = vsel %vm16282_vm10, %v11124_v17, %v11125_v45  ;;  %v8922_v32 = vld [vmem:[#allocation3 + $0x30] sm:$0xf]  ;;  %v10107_v40 = vld [vmem:[#allocation3 + $0x34] sm:$0xf0]  ;;  %vm16290_vm8 = vmmov %vm16289_vm7 }
 0x340   : > { %v1549_v0 = vpack.c.bf16 %v1542_v43, %v1541_v5  ;;  %v1550_v52 = vpack.c.bf16 %v1544_v23, %v1543_v48  ;;  %v1665_v2 = vsel %vm1306_vm15, %v1641_v26, 0.0  ;;  %v8923_v43 = vor.u32 %v10107_v40, %v8922_v32  ;;  %vm16291_vm9 = vmmov %vm16289_vm7 }
 0x341   : > { %11257 = vrot.lane.b32.xlu0 %v13424_v16, %s12337_s23  ;;  %v8938_v47 = vld [vmem:[#allocation3 + $0x50] sm:$0xf]  ;;  %vm16292_vm10 = vmmov %vm16289_vm7  ;;  %s12359_s23 = smov 43  }
 0x342   : > { %1555 = vst [vmem:[#allocation3 + $0x1a0] sm:$0xff] %v1549_v0  ;;  %v10111_v6 = vld [vmem:[#allocation3 + $0x54] sm:$0xf0]  ;;  %11277 = vrot.lane.b32.xlu1 %v13427_v30, %s12338_s24  ;;  %11282 = vrot.lane.b32.xlu2 %v12614_v12, %s12338_s24 }
 0x343   : > { %1556 = vst [vmem:[#allocation3 + $0x1a8] sm:$0xff] %v1550_v52  ;;  %v11043_v59 = vpop.permute.xlu0 %11042  ;;  %v8939_v56 = vor.u32 %v10111_v6, %v8938_v47  ;;  %v8914_v52 = vld [vmem:[#allocation3 + $0x20] sm:$0xf]  ;;  %v10975_v6 = vunpack.i.h.bf16 %v13520_v39 }
 0x344   : > { %v11045_v60 = vunpack.i.h.bf16 %v11043_v59  ;;  %v11044_v1 = vunpack.i.l.bf16 %v11043_v59  ;;  %v11128_v7 = vpop.permute.xlu1 %11127  ;;  %v13586_v8 = vpop.permute.xlu2 %10987  ;;  %v8915_v47 = vor.u32 %v10105_v20, %v8914_v52  ;;  %v10974_v59 = vunpack.i.l.bf16 %v13520_v39  ;;  %v10101_v39 = vld [vmem:[#allocation3 + $0x4] sm:$0xf0] }
 0x345   : > { %8204 = vmatpush.bf16.msra.mxu2 %v8939_v56  ;;  %v11130_v25 = vunpack.i.h.bf16 %v11128_v7  ;;  %v11129_v5 = vunpack.i.l.bf16 %v11128_v7 }
 0x346   : > { %v1639_v14 = vsel %vm16283_vm0, %v10965_v37, %v11044_v1  ;;  %v1640_v36 = vsel %vm16284_vm5, %v11045_v60, %v11124_v17  ;;  %v1759_v37 = vsel %vm16285_vm6, %v10969_v15, %v10970_v46  ;;  %vm16293_vm0 = vcmask 384000  }
 0x347   : > { %v1663_v51 = vsel %vm1306_vm15, %v1639_v14, 0.0  ;;  %v1664_v28 = vsel %vm1305_vm14, %v1640_v36, 0.0  ;;  %v1762_v0 = vsel %vm16286_vm12, %v11129_v5, %v11130_v25  ;;  %v1783_v18 = vsel %vm1305_vm14, %v1759_v37, 0.0  ;;  %v8906_v14 = vld [vmem:[#allocation3 + $0x10] sm:$0xf]  ;;  %vm16294_vm5 = vmmov %vm16293_vm0 }
 0x348   : > { %v1670_v31 = vpack.c.bf16 %v1663_v51, %v1662_v61  ;;  %v1671_v33 = vpack.c.bf16 %v1665_v2, %v1664_v28  ;;  %v1786_v1 = vsel %vm1306_vm15, %v1762_v0, 0.0  ;;  %v10103_v36 = vld [vmem:[#allocation3 + $0x14] sm:$0xf0]  ;;  %vm16295_vm6 = vmmov %vm16293_vm0 }
 0x349   : > { %11272 = vrot.lane.b32.xlu0 %v13454_v54, %s12338_s24  ;;  %8205 = vmatpush.bf16.msra.mxu2 %v8931_v13  ;;  %v8907_v51 = vor.u32 %v10103_v36, %v8906_v14  ;;  %vm16296_vm12 = vmmov %vm16293_vm0 }
 0x34a   : > { %1676 = vst [vmem:[#allocation3 + $0x2f0] sm:$0xff] %v1670_v31  ;;  %11292 = vrot.lane.b32.xlu1 %v13372_v44, %s12338_s24  ;;  %11297 = vrot.lane.b32.xlu2 %v12565_v53, %s12338_s24 }
 0x34b   : > { %1677 = vst [vmem:[#allocation3 + $0x2f8] sm:$0xff] %v1671_v33  ;;  %v11048_v55 = vpop.permute.xlu0 %11047  ;;  %v8898_v33 = vld [vmem:[#allocation3] sm:$0xf] }
 0x34c   : > { %v11050_v48 = vunpack.i.h.bf16 %v11048_v55  ;;  %v11049_v23 = vunpack.i.l.bf16 %v11048_v55  ;;  %v11133_v45 = vpop.permute.xlu1 %11132  ;;  %v13608_v17 = vpop.permute.xlu2 %10992  ;;  %v8899_v32 = vor.u32 %v10101_v39, %v8898_v33  ;;  %v10979_v55 = vunpack.i.l.bf16 %v13542_v63 }
 0x34d   : > { %8206 = vmatpush.bf16.msra.mxu2 %v8923_v43  ;;  %v11135_v13 = vunpack.i.h.bf16 %v11133_v45  ;;  %v11134_v61 = vunpack.i.l.bf16 %v11133_v45  ;;  %v10995_v19 = vunpack.i.h.bf16 %v13608_v17 }
 0x34e   : > { %v1760_v58 = vsel %vm16287_vm13, %v10970_v46, %v11049_v23  ;;  %v1761_v50 = vsel %vm16288_vm1, %v11050_v48, %v11129_v5  ;;  %v1880_v46 = vsel %vm16289_vm7, %v10974_v59, %v10975_v6  ;;  %vm16297_vm13 = vcmask 252928  }
 0x34f   : > { %v1784_v56 = vsel %vm1306_vm15, %v1760_v58, 0.0  ;;  %v1785_v60 = vsel %vm1305_vm14, %v1761_v50, 0.0  ;;  %v1883_v31 = vsel %vm16290_vm8, %v11134_v61, %v11135_v13  ;;  %v1904_v40 = vsel %vm1305_vm14, %v1880_v46, 0.0  ;;  %vm16298_vm1 = vmmov %vm16297_vm13 }
 0x350   : > { %v1791_v26 = vpack.c.bf16 %v1784_v56, %v1783_v18  ;;  %v1792_v7 = vpack.c.bf16 %v1786_v1, %v1785_v60  ;;  %v1907_v23 = vsel %vm1306_vm15, %v1883_v31, 0.0  ;;  %v10985_v1 = vunpack.i.h.bf16 %v13564_v42  ;;  %vm16299_vm7 = vmmov %vm16298_vm1 }
 0x351   : > { %11287 = vrot.lane.b32.xlu0 %v13396_v22, %s12338_s24  ;;  %8207 = vmatpush.bf16.msra.mxu2 %v8915_v47  ;;  %vm16300_vm8 = vmmov %vm16298_vm1 }
 0x352   : > { %1797 = vst [vmem:[#allocation3 + $0x440] sm:$0xff] %v1791_v26  ;;  %11307 = vrot.lane.b32.xlu1 %v13398_v34, %s12338_s24  ;;  %11312 = vrot.lane.b32.xlu2 %v12504_v27, %s12339_s25  ;;  %v10980_v27 = vunpack.i.h.bf16 %v13542_v63  ;;  %v10984_v26 = vunpack.i.l.bf16 %v13564_v42 }
 0x353   : > { %1798 = vst [vmem:[#allocation3 + $0x448] sm:$0xff] %v1792_v7  ;;  %v11053_v15 = vpop.permute.xlu0 %11052 }
 0x354   : > { %v11055_v28 = vunpack.i.h.bf16 %v11053_v15  ;;  %v11054_v2 = vunpack.i.l.bf16 %v11053_v15  ;;  %v11138_v25 = vpop.permute.xlu1 %11137  ;;  %v13630_v5 = vpop.permute.xlu2 %10997  ;;  %v2001_v63 = vsel %vm16293_vm0, %v10979_v55, %v10980_v27  ;;  %v2122_v42 = vsel %vm16297_vm13, %v10984_v26, %v10985_v1 }
 0x355   : > { %8208 = vmatpush.bf16.msra.mxu2 %v8907_v51  ;;  %v11140_v45 = vunpack.i.h.bf16 %v11138_v25  ;;  %v11139_v47 = vunpack.i.l.bf16 %v11138_v25  ;;  %v2025_v60 = vsel %vm1305_vm14, %v2001_v63, 0.0  ;;  %v10990_v25 = vunpack.i.h.bf16 %v13586_v8 }
 0x356   : > { %v1881_v20 = vsel %vm16291_vm9, %v10975_v6, %v11054_v2  ;;  %v1882_v37 = vsel %vm16292_vm10, %v11055_v28, %v11134_v61 }
 0x357   : > { %v1905_v43 = vsel %vm1306_vm15, %v1881_v20, 0.0  ;;  %v1906_v48 = vsel %vm1305_vm14, %v1882_v37, 0.0  ;;  %v2004_v50 = vsel %vm16294_vm5, %v11139_v47, %v11140_v45 }
 0x358   : > { %v1912_v0 = vpack.c.bf16 %v1905_v43, %v1904_v40  ;;  %v1913_v52 = vpack.c.bf16 %v1907_v23, %v1906_v48  ;;  %v2028_v61 = vsel %vm1306_vm15, %v2004_v50, 0.0 }
 0x359   : > { %11302 = vrot.lane.b32.xlu0 %v13424_v16, %s12338_s24  ;;  %8209 = vmatpush.bf16.msra.mxu2 %v8899_v32  ;;  %v10989_v32 = vunpack.i.l.bf16 %v13586_v8  ;;  %s12360_s24 = smov 27  }
 0x35a   : > { %1918 = vst [vmem:[#allocation3 + $0x590] sm:$0xff] %v1912_v0  ;;  %11322 = vrot.lane.b32.xlu1 %v13427_v30, %s12339_s25  ;;  %11327 = vrot.lane.b32.xlu2 %v12614_v12, %s12339_s25 }
 0x35b   : > { %1919 = vst [vmem:[#allocation3 + $0x598] sm:$0xff] %v1913_v52  ;;  %v11058_v18 = vpop.permute.xlu0 %11057 }
 0x35c   : > { %v11060_v6 = vunpack.i.h.bf16 %v11058_v18  ;;  %v11059_v58 = vunpack.i.l.bf16 %v11058_v18  ;;  %v11143_v59 = vpop.permute.xlu1 %11142  ;;  %v13652_v56 = vpop.permute.xlu2 %11162 }
 0x35d   : > { %v11145_v39 = vunpack.i.h.bf16 %v11143_v59  ;;  %v11144_v46 = vunpack.i.l.bf16 %v11143_v59 }
 0x35e   : > { %v2002_v30 = vsel %vm16295_vm6, %v10980_v27, %v11059_v58  ;;  %v2003_v12 = vsel %vm16296_vm12, %v11060_v6, %v11139_v47  ;;  %v10994_v47 = vunpack.i.l.bf16 %v13608_v17  ;;  %v3029_v17 = vld [vmem:[#allocation2 + $0x40] sm:$0xff] }
 0x35f   : > { %v2026_v7 = vsel %vm1306_vm15, %v2002_v30, 0.0  ;;  %v2027_v13 = vsel %vm1305_vm14, %v2003_v12, 0.0  ;;  %v2125_v2 = vsel %vm16298_vm1, %v11144_v46, %v11145_v39  ;;  %v13727_v38 = vpack.c.bf16 %v3029_v17, %v3029_v17 }
 0x360   : > { %v2033_v14 = vpack.c.bf16 %v2026_v7, %v2025_v60  ;;  %v2034_v36 = vpack.c.bf16 %v2028_v61, %v2027_v13  ;;  %v2149_v20 = vsel %vm1306_vm15, %v2125_v2, 0.0  ;;  %v3030_v60 = vld [vmem:[#allocation2 + $0x48] sm:$0xff]  ;;  %v2376_v30 = vsel %vm2367_vm2, %v10994_v47, %v10995_v19 }
 0x361   : > { %11317 = vrot.lane.b32.xlu0 %v13454_v54, %s12339_s25  ;;  %v2146_v54 = vsel %vm1305_vm14, %v2122_v42, 0.0  ;;  %v10999_v42 = vunpack.i.l.bf16 %v13630_v5  ;;  %vm2609_vm1 = vcmask 637952  }
 0x362   : > { %2039 = vst [vmem:[#allocation3 + $0x6e0] sm:$0xff] %v2033_v14  ;;  %11337 = vrot.lane.b32.xlu1 %v13372_v44, %s12339_s25  ;;  %11342 = vrot.lane.b32.xlu2 %v12565_v53, %s12339_s25  ;;  %v2400_v14 = vsel %vm2164_vm4, %v2376_v30, 0.0 }
 0x363   : > { %2040 = vst [vmem:[#allocation3 + $0x6e8] sm:$0xff] %v2034_v36  ;;  %v11063_v15 = vpop.permute.xlu0 %11062  ;;  %v11000_v36 = vunpack.i.h.bf16 %v13630_v5  ;;  %v3028_v5 = vld [vmem:[#allocation2 + $0x38] sm:$0xff] }
 0x364   : > { %v11065_v51 = vunpack.i.h.bf16 %v11063_v15  ;;  %v11064_v28 = vunpack.i.l.bf16 %v11063_v15  ;;  %v11148_v31 = vpop.permute.xlu1 %11147  ;;  %v13674_v33 = vpop.permute.xlu2 %11177 }
 0x365   : > { %v11150_v43 = vunpack.i.h.bf16 %v11148_v31  ;;  %v11149_v48 = vunpack.i.l.bf16 %v11148_v31 }
 0x366   : > { %v2123_v44 = vsel %vm16299_vm7, %v10985_v1, %v11064_v28  ;;  %v2124_v53 = vsel %vm16300_vm8, %v11065_v51, %v11144_v46  ;;  %v3031_v1 = vld [vmem:[#allocation2 + $0x50] sm:$0xff] }
 0x367   : > { %v2147_v40 = vsel %vm1306_vm15, %v2123_v44, 0.0  ;;  %v2148_v27 = vsel %vm1305_vm14, %v2124_v53, 0.0  ;;  %vm16301_vm14 = vcmask 1031168   ;;  %v3035_v44 = vld [vmem:[#allocation2 + $0x70] sm:$0xff] }
 0x368   : > { %v2154_v37 = vpack.c.bf16 %v2147_v40, %v2146_v54  ;;  %v2155_v55 = vpack.c.bf16 %v2149_v20, %v2148_v27  ;;  %v2255_v57 = vsel %vm16301_vm14, %v10989_v32, %v10990_v25  ;;  %vm16302_vm15 = vmmov %vm16301_vm14  ;;  %v3027_v53 = vld [vmem:[#allocation2 + $0x30] sm:$0xff]  ;;  %v3034_v32 = vld [vmem:[#allocation2 + $0x68] sm:$0xff] }
 0x369   : > { %11332 = vrot.lane.b32.xlu0 %v13396_v22, %s12339_s25  ;;  %v2258_v0 = vsel %vm16302_vm15, %v11149_v48, %v11150_v43  ;;  %v2279_v45 = vsel %vm2164_vm4, %v2255_v57, 0.0  ;;  %vm16303_vm9 = vmmov %vm16301_vm14  ;;  %v13752_v57 = vpack.c.bf16 %v3028_v5, %v3027_v53  ;;  %v3129_v53 = vld [vmem:[#allocation2 + $0x20] sm:$0xff]  ;;  %vm2730_vm14 = vcmask 506880  }
 0x36a   : > { %2160 = vst [vmem:[#allocation3 + $0x830] sm:$0xff] %v2154_v37  ;;  %11352 = vrot.lane.b32.xlu1 %v13398_v34, %s12339_s25  ;;  %3063 = vrot.lane.b32.xlu2 %v3039_v29, %s12340_s26  ;;  %v3042_v34 = vpack.c.bf16 %v13422_v62, %v13422_v62  ;;  %vm16304_vm10 = vmmov %vm16303_vm9  ;;  %v2282_v62 = vsel %vm2165_vm3, %v2258_v0, 0.0  ;;  %v11165_v0 = vunpack.i.h.bf16 %v13652_v56  ;;  %vm2851_vm15 = vcmask 375808  }
 0x36b   : > { %2161 = vst [vmem:[#allocation3 + $0x838] sm:$0xff] %v2155_v55  ;;  %v11068_v3 = vpop.permute.xlu0 %11067 }
 0x36c   : > { %v11070_v8 = vunpack.i.h.bf16 %v11068_v3  ;;  %v11069_v23 = vunpack.i.l.bf16 %v11068_v3  ;;  %v11153_v52 = vpop.permute.xlu1 %11152  ;;  %v13698_v22 = vpop.permute.xlu2 %11192 }
 0x36d   : > { %v11155_v50 = vunpack.i.h.bf16 %v11153_v52  ;;  %v11154_v59 = vunpack.i.l.bf16 %v11153_v52 }
 0x36e   : > { %v2256_v24 = vsel %vm16303_vm9, %v10990_v25, %v11069_v23  ;;  %v2257_v29 = vsel %vm16304_vm10, %v11070_v8, %v11149_v48  ;;  %v3033_v25 = vld [vmem:[#allocation2 + $0x60] sm:$0xff]  ;;  %v13756_v8 = vpack.c.bf16 %v3035_v44, %v3035_v44  ;;  %vm2972_vm9 = vcmask 244736  }
 0x36f   : > { %v2280_v63 = vsel %vm2165_vm3, %v2256_v24, 0.0  ;;  %v2281_v18 = vsel %vm2164_vm4, %v2257_v29, 0.0  ;;  %v2379_v13 = vsel %vm2367_vm2, %v11154_v59, %v11155_v50  ;;  %v13754_v3 = vpack.c.bf16 %v3034_v32, %v3033_v25  ;;  %v3130_v25 = vld [vmem:[#allocation2 + $0x28] sm:$0xff]  ;;  %v3037_v44 = vld [vmem:[#allocation2 + $0x80] sm:$0xff] }
 0x370   : > { %v2287_v6 = vpack.c.bf16 %v2280_v63, %v2279_v45  ;;  %v2288_v58 = vpack.c.bf16 %v2282_v62, %v2281_v18  ;;  %v2403_v51 = vsel %vm2165_vm3, %v2379_v13, 0.0  ;;  %v11164_v45 = vunpack.i.l.bf16 %v13652_v56  ;;  %v3038_v56 = vld [vmem:[#allocation2 + $0x88] sm:$0xff] }
 0x371   : > { %11347 = vrot.lane.b32.xlu0 %v13424_v16, %s12339_s25  ;;  %v13782_v13 = vpack.c.bf16 %v3038_v56, %v3038_v56  ;;  %vm3101_vm10 = vcmask 1022976   ;;  %s12361_s25 = smov 122  }
 0x372   : > { %2293 = vst [vmem:[#allocation3 + $0x80] sm:$0xff] %v2287_v6  ;;  %3067 = vrot.lane.b32.xlu1 %v3041_v41, %s12340_s26  ;;  %3069 = vrot.lane.b32.xlu2 %v3042_v34, %s12340_s26  ;;  %v13729_v41 = vpack.c.bf16 %v3031_v1, %v3030_v60  ;;  %v3032_v6 = vld [vmem:[#allocation2 + $0x58] sm:$0xff] }
 0x373   : > { %2294 = vst [vmem:[#allocation3 + $0x88] sm:$0xff] %v2288_v58  ;;  %v11073_v12 = vpop.permute.xlu0 %11072  ;;  %v3126_v58 = vld [vmem:[#allocation2 + $0x8] sm:$0xff] }
 0x374   : > { %v11075_v26 = vunpack.i.h.bf16 %v11073_v12  ;;  %v11074_v7 = vunpack.i.l.bf16 %v11073_v12  ;;  %v11158_v16 = vpop.permute.xlu1 %11157  ;;  %v13723_v61 = vpop.permute.xlu2 %11207 }
 0x375   : > { %v11160_v31 = vunpack.i.h.bf16 %v11158_v16  ;;  %v11159_v54 = vunpack.i.l.bf16 %v11158_v16 }
 0x376   : > { %v2377_v39 = vsel %vm2367_vm2, %v10995_v19, %v11074_v7  ;;  %v2378_v46 = vsel %vm2367_vm2, %v11075_v26, %v11154_v59  ;;  %vm16305_vm2 = vcmask 769024   ;;  %v3125_v26 = vld [vmem:[#allocation2] sm:$0xff]  ;;  %v13780_v7 = vpack.c.bf16 %v3032_v6, %v3032_v6 }
 0x377   : > { %v2401_v15 = vsel %vm2165_vm3, %v2377_v39, 0.0  ;;  %v2402_v49 = vsel %vm2164_vm4, %v2378_v46, 0.0  ;;  %v2493_v40 = vsel %vm16305_vm2, %v10999_v42, %v11000_v36  ;;  %vm16306_vm0 = vmmov %vm16305_vm2  ;;  %v13784_v16 = vpack.c.bf16 %v3126_v58, %v3125_v26  ;;  %v3127_v58 = vld [vmem:[#allocation2 + $0x10] sm:$0xff] }
 0x378   : > { %v2408_v28 = vpack.c.bf16 %v2401_v15, %v2400_v14  ;;  %v2409_v2 = vpack.c.bf16 %v2403_v51, %v2402_v49  ;;  %v2496_v55 = vsel %vm16306_vm0, %v11159_v54, %v11160_v31  ;;  %v2517_v23 = vsel %vm2164_vm4, %v2493_v40, 0.0  ;;  %vm16307_vm5 = vmmov %vm16306_vm0 }
 0x379   : > { %3065 = vrot.lane.b32.xlu0 %v3040_v35, %s12340_s26  ;;  %vm16308_vm6 = vmmov %vm16306_vm0  ;;  %v2520_v29 = vsel %vm2165_vm3, %v2496_v55, 0.0  ;;  %v11180_v14 = vunpack.i.h.bf16 %v13674_v33  ;;  %v11179_v46 = vunpack.i.l.bf16 %v13674_v33  ;;  %v3036_v33 = vld [vmem:[#allocation2 + $0x78] sm:$0xff]  ;;  %v13836_v26 = vpack.c.bf16 %v3127_v58, %v3127_v58 }
 0x37a   : > { %2414 = vst [vmem:[#allocation3 + $0x1d0] sm:$0xff] %v2408_v28  ;;  %3073 = vrot.lane.b32.xlu1 %v13727_v38, %s12340_s26  ;;  %3075 = vrot.lane.b32.xlu2 %v13729_v41, %s12340_s26  ;;  %vm16309_vm12 = vmmov %vm16306_vm0  ;;  %vm16313_vm2 = vcmask 1043456  }
 0x37b   : > { %2415 = vst [vmem:[#allocation3 + $0x1d8] sm:$0xff] %v2409_v2  ;;  %v11078_v27 = vpop.permute.xlu0 %11077  ;;  %v2497_v50 = vsel %vm16309_vm12, %v11164_v45, %v11165_v0  ;;  %vm16310_vm13 = vmmov %vm16306_vm0  ;;  %v2610_v5 = vsel %vm2609_vm1, %v11179_v46, %v11180_v14  ;;  %v11209_v46 = vunpack.i.l.bf16 %v13723_v61 }
 0x37c   : > { %v11080_v20 = vunpack.i.h.bf16 %v11078_v27  ;;  %v11079_v37 = vunpack.i.l.bf16 %v11078_v27  ;;  %v11173_v43 = vpop.permute.xlu1 %11172  ;;  %v13750_v48 = vpop.permute.xlu2 %11222  ;;  %v2521_v35 = vsel %vm2164_vm4, %v2497_v50, 0.0  ;;  %vm16311_vm7 = vmmov %vm16306_vm0 }
 0x37d   : > { %v11175_v18 = vunpack.i.h.bf16 %v11173_v43  ;;  %v11174_v62 = vunpack.i.l.bf16 %v11173_v43  ;;  %vm16312_vm8 = vmmov %vm16306_vm0  ;;  %v13808_v43 = vpack.c.bf16 %v3037_v44, %v3036_v33 }
 0x37e   : > { %v2494_v52 = vsel %vm16307_vm5, %v11000_v36, %v11079_v37  ;;  %v2495_v34 = vsel %vm16308_vm6, %v11080_v20, %v11159_v54  ;;  %v3128_v54 = vld [vmem:[#allocation2 + $0x18] sm:$0xff]  ;;  %vm16316_vm0 = vmmov %vm16313_vm2  ;;  %vm3204_vm6 = vcmask 891904  }
 0x37f   : > { %v2518_v19 = vsel %vm2165_vm3, %v2494_v52, 0.0  ;;  %v2519_v24 = vsel %vm2164_vm4, %v2495_v34, 0.0  ;;  %v2500_v1 = vsel %vm16310_vm13, %v11174_v62, %v11175_v18  ;;  %v2634_v52 = vsel %vm2164_vm4, %v2610_v5, 0.0  ;;  %vm16317_vm5 = vmmov %vm16316_vm0 }
 0x380   : > { %v2527_v47 = vpack.c.bf16 %v2518_v19, %v2517_v23  ;;  %v2528_v63 = vpack.c.bf16 %v2520_v29, %v2519_v24  ;;  %v2524_v49 = vsel %vm2165_vm3, %v2500_v1, 0.0  ;;  %v13810_v23 = vpack.c.bf16 %v3129_v53, %v3128_v54  ;;  %vm16318_vm12 = vmmov %vm16316_vm0 }
 0x381   : > { %3071 = vrot.lane.b32.xlu0 %v13752_v57, %s12340_s26  ;;  %v11195_v34 = vunpack.i.h.bf16 %v13698_v22  ;;  %v11194_v24 = vunpack.i.l.bf16 %v13698_v22  ;;  %vm16319_vm13 = vmmov %vm16316_vm0 }
 0x382   : > { %2533 = vst [vmem:[#allocation3 + $0x310] sm:$0xff] %v2527_v47  ;;  %3079 = vrot.lane.b32.xlu1 %v13754_v3, %s12340_s26  ;;  %3081 = vrot.lane.b32.xlu2 %v13756_v8, %s12340_s26 }
 0x383   : > { %2534 = vst [vmem:[#allocation3 + $0x318] sm:$0xff] %v2528_v63  ;;  %v11168_v59 = vpop.permute.xlu0 %11167  ;;  %v2614_v22 = vsel %vm2609_vm1, %v11194_v24, %v11195_v34 }
 0x384   : > { %v11170_v17 = vunpack.i.h.bf16 %v11168_v59  ;;  %v11169_v60 = vunpack.i.l.bf16 %v11168_v59  ;;  %v11188_v30 = vpop.permute.xlu1 %11187  ;;  %v13778_v12 = vpop.permute.xlu2 %11237 }
 0x385   : > { %v11190_v2 = vunpack.i.h.bf16 %v11188_v30  ;;  %v11189_v31 = vunpack.i.l.bf16 %v11188_v30 }
 0x386   : > { %v2498_v36 = vsel %vm16311_vm7, %v11165_v0, %v11169_v60  ;;  %v2499_v39 = vsel %vm16312_vm8, %v11170_v17, %v11174_v62  ;;  %v13812_v0 = vpack.c.bf16 %v3130_v25, %v3130_v25  ;;  %vm16321_vm7 = vmmov %vm16316_vm0 }
 0x387   : > { %v2522_v42 = vsel %vm2165_vm3, %v2498_v36, 0.0  ;;  %v2523_v15 = vsel %vm2164_vm4, %v2499_v39, 0.0  ;;  %v2613_v20 = vsel %vm2609_vm1, %v11189_v31, %v11190_v2  ;;  %vm16322_vm8 = vmmov %vm16316_vm0 }
 0x388   : > { %v2529_v51 = vpack.c.bf16 %v2522_v42, %v2521_v35  ;;  %v2530_v28 = vpack.c.bf16 %v2524_v49, %v2523_v15  ;;  %v2637_v63 = vsel %vm2165_vm3, %v2613_v20, 0.0  ;;  %v2638_v35 = vsel %vm2164_vm4, %v2614_v22, 0.0 }
 0x389   : > { %3077 = vrot.lane.b32.xlu0 %v13780_v7, %s12340_s26 }
 0x38a   : > { %2535 = vst [vmem:[#allocation3 + $0x320] sm:$0xff] %v2529_v51  ;;  %3085 = vrot.lane.b32.xlu1 %v13782_v13, %s12340_s26  ;;  %3167 = vrot.lane.b32.xlu2 %v13784_v16, %s12341_s27 }
 0x38b   : > { %2536 = vst [vmem:[#allocation3 + $0x328] sm:$0xff] %v2530_v28  ;;  %v11183_v32 = vpop.permute.xlu0 %11182 }
 0x38c   : > { %v11185_v40 = vunpack.i.h.bf16 %v11183_v32  ;;  %v11184_v27 = vunpack.i.l.bf16 %v11183_v32  ;;  %v11203_v37 = vpop.permute.xlu1 %11202  ;;  %v13806_v55 = vpop.permute.xlu2 %11252 }
 0x38d   : > { %v11205_v6 = vunpack.i.h.bf16 %v11203_v37  ;;  %v11204_v56 = vunpack.i.l.bf16 %v11203_v37  ;;  %v11224_v37 = vunpack.i.l.bf16 %v13750_v48 }
 0x38e   : > { %v2611_v45 = vsel %vm2609_vm1, %v11180_v14, %v11184_v27  ;;  %v2612_v19 = vsel %vm2609_vm1, %v11185_v40, %v11189_v31  ;;  %v11210_v14 = vunpack.i.h.bf16 %v13723_v61  ;;  %v11225_v40 = vunpack.i.h.bf16 %v13750_v48 }
 0x38f   : > { %v2635_v29 = vsel %vm2165_vm3, %v2611_v45, 0.0  ;;  %v2636_v47 = vsel %vm2164_vm4, %v2612_v19, 0.0  ;;  %v2617_v60 = vsel %vm2609_vm1, %v11204_v56, %v11205_v6 }
 0x390   : > { %v2646_v18 = vpack.c.bf16 %v2635_v29, %v2634_v52  ;;  %v2647_v62 = vpack.c.bf16 %v2637_v63, %v2636_v47  ;;  %v2641_v49 = vsel %vm2165_vm3, %v2617_v60, 0.0  ;;  %v2618_v61 = vsel %vm2609_vm1, %v11209_v46, %v11210_v14 }
 0x391   : > { %3083 = vrot.lane.b32.xlu0 %v13808_v43, %s12340_s26  ;;  %v2642_v32 = vsel %vm2164_vm4, %v2618_v61, 0.0  ;;  %v2731_v48 = vsel %vm2730_vm14, %v11224_v37, %v11225_v40  ;;  %v11239_v60 = vunpack.i.l.bf16 %v13778_v12  ;;  %s12362_s26 = smov 106  }
 0x392   : > { %2652 = vst [vmem:[#allocation3 + $0x450] sm:$0xff] %v2646_v18  ;;  %3171 = vrot.lane.b32.xlu1 %v13810_v23, %s12341_s27  ;;  %3173 = vrot.lane.b32.xlu2 %v13812_v0, %s12341_s27  ;;  %v2755_v22 = vsel %vm2164_vm4, %v2731_v48, 0.0 }
 0x393   : > { %2653 = vst [vmem:[#allocation3 + $0x458] sm:$0xff] %v2647_v62  ;;  %v11198_v50 = vpop.permute.xlu0 %11197 }
 0x394   : > { %v11200_v59 = vunpack.i.h.bf16 %v11198_v50  ;;  %v11199_v17 = vunpack.i.l.bf16 %v11198_v50  ;;  %v11218_v1 = vpop.permute.xlu1 %11217  ;;  %v13834_v30 = vpop.permute.xlu2 %11267  ;;  %v11240_v50 = vunpack.i.h.bf16 %v13778_v12 }
 0x395   : > { %v11220_v2 = vunpack.i.h.bf16 %v11218_v1  ;;  %v11219_v31 = vunpack.i.l.bf16 %v11218_v1 }
 0x396   : > { %v2615_v36 = vsel %vm2609_vm1, %v11195_v34, %v11199_v17  ;;  %v2616_v39 = vsel %vm2609_vm1, %v11200_v59, %v11204_v56  ;;  %v2735_v12 = vsel %vm2730_vm14, %v11239_v60, %v11240_v50 }
 0x397   : > { %v2639_v42 = vsel %vm2165_vm3, %v2615_v36, 0.0  ;;  %v2640_v15 = vsel %vm2164_vm4, %v2616_v39, 0.0  ;;  %v2621_v44 = vsel %vm2609_vm1, %v11219_v31, %v11220_v2  ;;  %v2759_v61 = vsel %vm2164_vm4, %v2735_v12, 0.0 }
 0x398   : > { %v2648_v51 = vpack.c.bf16 %v2639_v42, %v2638_v35  ;;  %v2649_v28 = vpack.c.bf16 %v2641_v49, %v2640_v15  ;;  %v2645_v45 = vsel %vm2165_vm3, %v2621_v44, 0.0  ;;  %v11254_v44 = vunpack.i.l.bf16 %v13806_v55 }
 0x399   : > { %3169 = vrot.lane.b32.xlu0 %v13836_v26, %s12341_s27 }
 0x39a   : > { %2654 = vst [vmem:[#allocation3 + $0x460] sm:$0xff] %v2648_v51  ;;  %3177 = vrot.lane.b32.xlu1 %v13727_v38, %s12341_s27  ;;  %3179 = vrot.lane.b32.xlu2 %v13729_v41, %s12341_s27 }
 0x39b   : > { %2655 = vst [vmem:[#allocation3 + $0x468] sm:$0xff] %v2649_v28  ;;  %v11213_v54 = vpop.permute.xlu0 %11212 }
 0x39c   : > { %v11215_v25 = vunpack.i.h.bf16 %v11213_v54  ;;  %v11214_v33 = vunpack.i.l.bf16 %v11213_v54  ;;  %v11233_v53 = vpop.permute.xlu1 %11232  ;;  %v13858_v5 = vpop.permute.xlu2 %11282  ;;  %v11255_v54 = vunpack.i.h.bf16 %v13806_v55 }
 0x39d   : > { %v11235_v29 = vunpack.i.h.bf16 %v11233_v53  ;;  %v11234_v47 = vunpack.i.l.bf16 %v11233_v53 }
 0x39e   : > { %v2619_v27 = vsel %vm2609_vm1, %v11210_v14, %v11214_v33  ;;  %v2620_v20 = vsel %vm2609_vm1, %v11215_v25, %v11219_v31  ;;  %v2739_v55 = vsel %vm2730_vm14, %v11254_v44, %v11255_v54  ;;  %vm16320_vm1 = vmmov %vm16316_vm0 }
 0x39f   : > { %v2643_v52 = vsel %vm2165_vm3, %v2619_v27, 0.0  ;;  %v2644_v34 = vsel %vm2164_vm4, %v2620_v20, 0.0  ;;  %v2734_v6 = vsel %vm2730_vm14, %v11234_v47, %v11235_v29  ;;  %v2763_v48 = vsel %vm2164_vm4, %v2739_v55, 0.0 }
 0x3a0   : > { %v2650_v19 = vpack.c.bf16 %v2643_v52, %v2642_v32  ;;  %v2651_v24 = vpack.c.bf16 %v2645_v45, %v2644_v34  ;;  %v2758_v14 = vsel %vm2165_vm3, %v2734_v6, 0.0  ;;  %v11269_v6 = vunpack.i.l.bf16 %v13834_v30 }
 0x3a1   : > { %3175 = vrot.lane.b32.xlu0 %v13752_v57, %s12341_s27 }
 0x3a2   : > { %2656 = vst [vmem:[#allocation3 + $0x470] sm:$0xff] %v2650_v19  ;;  %3183 = vrot.lane.b32.xlu1 %v13754_v3, %s12341_s27  ;;  %3185 = vrot.lane.b32.xlu2 %v13756_v8, %s12341_s27 }
 0x3a3   : > { %2657 = vst [vmem:[#allocation3 + $0x478] sm:$0xff] %v2651_v24  ;;  %v11228_v63 = vpop.permute.xlu0 %11227 }
 0x3a4   : > { %v11230_v18 = vunpack.i.h.bf16 %v11228_v63  ;;  %v11229_v62 = vunpack.i.l.bf16 %v11228_v63  ;;  %v11248_v56 = vpop.permute.xlu1 %11247  ;;  %v13880_v58 = vpop.permute.xlu2 %11297  ;;  %v11270_v63 = vunpack.i.h.bf16 %v13834_v30 }
 0x3a5   : > { %v11250_v46 = vunpack.i.h.bf16 %v11248_v56  ;;  %v11249_v42 = vunpack.i.l.bf16 %v11248_v56 }
 0x3a6   : > { %v2732_v59 = vsel %vm2730_vm14, %v11225_v40, %v11229_v62  ;;  %v2733_v17 = vsel %vm2730_vm14, %v11230_v18, %v11234_v47  ;;  %v2852_v30 = vsel %vm2851_vm15, %v11269_v6, %v11270_v63 }
 0x3a7   : > { %v2756_v1 = vsel %vm2165_vm3, %v2732_v59, 0.0  ;;  %v2757_v35 = vsel %vm2164_vm4, %v2733_v17, 0.0  ;;  %v2738_v28 = vsel %vm2730_vm14, %v11249_v42, %v11250_v46  ;;  %v2876_v12 = vsel %vm2164_vm4, %v2852_v30, 0.0 }
 0x3a8   : > { %v2767_v36 = vpack.c.bf16 %v2756_v1, %v2755_v22  ;;  %v2768_v39 = vpack.c.bf16 %v2758_v14, %v2757_v35  ;;  %v2762_v40 = vsel %vm2165_vm3, %v2738_v28, 0.0  ;;  %v11284_v28 = vunpack.i.l.bf16 %v13858_v5 }
 0x3a9   : > { %3181 = vrot.lane.b32.xlu0 %v13780_v7, %s12341_s27 }
 0x3aa   : > { %2773 = vst [vmem:[#allocation3 + $0x5a0] sm:$0xff] %v2767_v36  ;;  %3189 = vrot.lane.b32.xlu1 %v13782_v13, %s12341_s27  ;;  %3270 = vrot.lane.b32.xlu2 %v13784_v16, %s12342_s28 }
 0x3ab   : > { %2774 = vst [vmem:[#allocation3 + $0x5a8] sm:$0xff] %v2768_v39  ;;  %v11243_v15 = vpop.permute.xlu0 %11242 }
 0x3ac   : > { %v11245_v49 = vunpack.i.h.bf16 %v11243_v15  ;;  %v11244_v51 = vunpack.i.l.bf16 %v11243_v15  ;;  %v11263_v2 = vpop.permute.xlu1 %11262  ;;  %v13902_v31 = vpop.permute.xlu2 %11312  ;;  %v11285_v15 = vunpack.i.h.bf16 %v13858_v5 }
 0x3ad   : > { %v11265_v37 = vunpack.i.h.bf16 %v11263_v2  ;;  %v11264_v52 = vunpack.i.l.bf16 %v11263_v2 }
 0x3ae   : > { %v2736_v25 = vsel %vm2730_vm14, %v11240_v50, %v11244_v51  ;;  %v2737_v33 = vsel %vm2730_vm14, %v11245_v49, %v11249_v42  ;;  %v2856_v5 = vsel %vm2851_vm15, %v11284_v28, %v11285_v15 }
 0x3af   : > { %v2760_v53 = vsel %vm2165_vm3, %v2736_v25, 0.0  ;;  %v2761_v32 = vsel %vm2164_vm4, %v2737_v33, 0.0  ;;  %v2742_v24 = vsel %vm2730_vm14, %v11264_v52, %v11265_v37  ;;  %v2880_v55 = vsel %vm2164_vm4, %v2856_v5, 0.0 }
 0x3b0   : > { %v2769_v27 = vpack.c.bf16 %v2760_v53, %v2759_v61  ;;  %v2770_v20 = vpack.c.bf16 %v2762_v40, %v2761_v32  ;;  %v2766_v50 = vsel %vm2165_vm3, %v2742_v24, 0.0  ;;  %v11299_v24 = vunpack.i.l.bf16 %v13880_v58 }
 0x3b1   : > { %3187 = vrot.lane.b32.xlu0 %v13808_v43, %s12341_s27  ;;  %s12363_s27 = smov 90  }
 0x3b2   : > { %2775 = vst [vmem:[#allocation3 + $0x5b0] sm:$0xff] %v2769_v27  ;;  %3274 = vrot.lane.b32.xlu1 %v13810_v23, %s12342_s28  ;;  %3276 = vrot.lane.b32.xlu2 %v13812_v0, %s12342_s28 }
 0x3b3   : > { %2776 = vst [vmem:[#allocation3 + $0x5b8] sm:$0xff] %v2770_v20  ;;  %v11258_v34 = vpop.permute.xlu0 %11257 }
 0x3b4   : > { %v11260_v45 = vunpack.i.h.bf16 %v11258_v34  ;;  %v11259_v19 = vunpack.i.l.bf16 %v11258_v34  ;;  %v11278_v29 = vpop.permute.xlu1 %11277  ;;  %v13924_v47 = vpop.permute.xlu2 %11327  ;;  %v11300_v34 = vunpack.i.h.bf16 %v13880_v58 }
 0x3b5   : > { %v11280_v60 = vunpack.i.h.bf16 %v11278_v29  ;;  %v11279_v1 = vunpack.i.l.bf16 %v11278_v29 }
 0x3b6   : > { %v2740_v18 = vsel %vm2730_vm14, %v11255_v54, %v11259_v19  ;;  %v2741_v62 = vsel %vm2730_vm14, %v11260_v45, %v11264_v52  ;;  %v2860_v58 = vsel %vm2851_vm15, %v11299_v24, %v11300_v34  ;;  %vm16323_vm14 = vmmov %vm16316_vm0 }
 0x3b7   : > { %v2764_v56 = vsel %vm2165_vm3, %v2740_v18, 0.0  ;;  %v2765_v22 = vsel %vm2164_vm4, %v2741_v62, 0.0  ;;  %v2855_v39 = vsel %vm2851_vm15, %v11279_v1, %v11280_v60  ;;  %v2884_v30 = vsel %vm2164_vm4, %v2860_v58, 0.0 }
 0x3b8   : > { %v2771_v59 = vpack.c.bf16 %v2764_v56, %v2763_v48  ;;  %v2772_v17 = vpack.c.bf16 %v2766_v50, %v2765_v22  ;;  %v2879_v54 = vsel %vm2165_vm3, %v2855_v39, 0.0  ;;  %v11314_v39 = vunpack.i.l.bf16 %v13902_v31 }
 0x3b9   : > { %3272 = vrot.lane.b32.xlu0 %v13836_v26, %s12342_s28 }
 0x3ba   : > { %2777 = vst [vmem:[#allocation3 + $0x5c0] sm:$0xff] %v2771_v59  ;;  %3280 = vrot.lane.b32.xlu1 %v13727_v38, %s12342_s28  ;;  %3282 = vrot.lane.b32.xlu2 %v13729_v41, %s12342_s28 }
 0x3bb   : > { %2778 = vst [vmem:[#allocation3 + $0x5c8] sm:$0xff] %v2772_v17  ;;  %v11273_v35 = vpop.permute.xlu0 %11272 }
 0x3bc   : > { %v11275_v14 = vunpack.i.h.bf16 %v11273_v35  ;;  %v11274_v36 = vunpack.i.l.bf16 %v11273_v35  ;;  %v11293_v46 = vpop.permute.xlu1 %11292  ;;  %v13946_v42 = vpop.permute.xlu2 %11342  ;;  %v11315_v35 = vunpack.i.h.bf16 %v13902_v31 }
 0x3bd   : > { %v11295_v44 = vunpack.i.h.bf16 %v11293_v46  ;;  %v11294_v53 = vunpack.i.l.bf16 %v11293_v46 }
 0x3be   : > { %v2853_v49 = vsel %vm2851_vm15, %v11270_v63, %v11274_v36  ;;  %v2854_v51 = vsel %vm2851_vm15, %v11275_v14, %v11279_v1  ;;  %v2973_v31 = vsel %vm2972_vm9, %v11314_v39, %v11315_v35 }
 0x3bf   : > { %v2877_v2 = vsel %vm2165_vm3, %v2853_v49, 0.0  ;;  %v2878_v61 = vsel %vm2164_vm4, %v2854_v51, 0.0  ;;  %v2859_v20 = vsel %vm2851_vm15, %v11294_v53, %v11295_v44  ;;  %v2997_v5 = vsel %vm2164_vm4, %v2973_v31, 0.0 }
 0x3c0   : > { %v2888_v25 = vpack.c.bf16 %v2877_v2, %v2876_v12  ;;  %v2889_v33 = vpack.c.bf16 %v2879_v54, %v2878_v61  ;;  %v2883_v63 = vsel %vm2165_vm3, %v2859_v20, 0.0  ;;  %v11329_v20 = vunpack.i.l.bf16 %v13924_v47 }
 0x3c1   : > { %3278 = vrot.lane.b32.xlu0 %v13752_v57, %s12342_s28 }
 0x3c2   : > { %2894 = vst [vmem:[#allocation3 + $0x6f0] sm:$0xff] %v2888_v25  ;;  %3286 = vrot.lane.b32.xlu1 %v13754_v3, %s12342_s28  ;;  %3288 = vrot.lane.b32.xlu2 %v13756_v8, %s12342_s28 }
 0x3c3   : > { %2895 = vst [vmem:[#allocation3 + $0x6f8] sm:$0xff] %v2889_v33  ;;  %v11288_v32 = vpop.permute.xlu0 %11287 }
 0x3c4   : > { %v11290_v40 = vunpack.i.h.bf16 %v11288_v32  ;;  %v11289_v27 = vunpack.i.l.bf16 %v11288_v32  ;;  %v11308_v37 = vpop.permute.xlu1 %11307  ;;  %v13968_v52 = vpop.permute.xlu2 %3063  ;;  %v11330_v32 = vunpack.i.h.bf16 %v13924_v47 }
 0x3c5   : > { %v11310_v6 = vunpack.i.h.bf16 %v11308_v37  ;;  %v11309_v56 = vunpack.i.l.bf16 %v11308_v37  ;;  %v3087_v21 = vrot.slane %v13968_v52, 4 }
 0x3c6   : > { %v2857_v45 = vsel %vm2851_vm15, %v11285_v15, %v11289_v27  ;;  %v2858_v19 = vsel %vm2851_vm15, %v11290_v40, %v11294_v53  ;;  %v2977_v47 = vsel %vm2972_vm9, %v11329_v20, %v11330_v32 }
 0x3c7   : > { %v2881_v29 = vsel %vm2165_vm3, %v2857_v45, 0.0  ;;  %v2882_v48 = vsel %vm2164_vm4, %v2858_v19, 0.0  ;;  %v2863_v17 = vsel %vm2851_vm15, %v11309_v56, %v11310_v6  ;;  %v3001_v58 = vsel %vm2164_vm4, %v2977_v47, 0.0 }
 0x3c8   : > { %v2890_v18 = vpack.c.bf16 %v2881_v29, %v2880_v55  ;;  %v2891_v62 = vpack.c.bf16 %v2883_v63, %v2882_v48  ;;  %v2887_v15 = vsel %vm2165_vm3, %v2863_v17, 0.0  ;;  %v11344_v17 = vunpack.i.l.bf16 %v13946_v42 }
 0x3c9   : > { %3284 = vrot.lane.b32.xlu0 %v13780_v7, %s12342_s28 }
 0x3ca   : > { %2896 = vst [vmem:[#allocation3 + $0x700] sm:$0xff] %v2890_v18  ;;  %3292 = vrot.lane.b32.xlu1 %v13782_v13, %s12342_s28  ;;  %3373 = vrot.lane.b32.xlu2 %v13784_v16, %s12343_s29 }
 0x3cb   : > { %2897 = vst [vmem:[#allocation3 + $0x708] sm:$0xff] %v2891_v62  ;;  %v11303_v22 = vpop.permute.xlu0 %11302 }
 0x3cc   : > { %v11305_v50 = vunpack.i.h.bf16 %v11303_v22  ;;  %v11304_v59 = vunpack.i.l.bf16 %v11303_v22  ;;  %v11323_v60 = vpop.permute.xlu1 %11322  ;;  %v13990_v1 = vpop.permute.xlu2 %3069  ;;  %v11345_v22 = vunpack.i.h.bf16 %v13946_v42 }
 0x3cd   : > { %v11325_v28 = vunpack.i.h.bf16 %v11323_v60  ;;  %v11324_v2 = vunpack.i.l.bf16 %v11323_v60  ;;  %v3090_v31 = vrot.slane %v13990_v1, 4 }
 0x3ce   : > { %v2861_v14 = vsel %vm2851_vm15, %v11300_v34, %v11304_v59  ;;  %v2862_v36 = vsel %vm2851_vm15, %v11305_v50, %v11309_v56  ;;  %v2981_v42 = vsel %vm2972_vm9, %v11344_v17, %v11345_v22  ;;  %vm3307_vm15 = vcmask 760832  }
 0x3cf   : > { %v2885_v46 = vsel %vm2165_vm3, %v2861_v14, 0.0  ;;  %v2886_v12 = vsel %vm2164_vm4, %v2862_v36, 0.0  ;;  %v2976_v33 = vsel %vm2972_vm9, %v11324_v2, %v11325_v28 }
 0x3d0   : > { %v2892_v49 = vpack.c.bf16 %v2885_v46, %v2884_v30  ;;  %v2893_v51 = vpack.c.bf16 %v2887_v15, %v2886_v12  ;;  %v3000_v34 = vsel %vm2165_vm3, %v2976_v33, 0.0 }
 0x3d1   : > { %3290 = vrot.lane.b32.xlu0 %v13808_v43, %s12342_s28  ;;  %s12364_s28 = smov 58  }
 0x3d2   : > { %2898 = vst [vmem:[#allocation3 + $0x710] sm:$0xff] %v2892_v49  ;;  %3377 = vrot.lane.b32.xlu1 %v13810_v23, %s12343_s29  ;;  %3379 = vrot.lane.b32.xlu2 %v13812_v0, %s12343_s29 }
 0x3d3   : > { %2899 = vst [vmem:[#allocation3 + $0x718] sm:$0xff] %v2893_v51  ;;  %v11318_v61 = vpop.permute.xlu0 %11317 }
 0x3d4   : > { %v11320_v54 = vunpack.i.h.bf16 %v11318_v61  ;;  %v11319_v25 = vunpack.i.l.bf16 %v11318_v61  ;;  %v11338_v44 = vpop.permute.xlu1 %11337  ;;  %v14012_v53 = vpop.permute.xlu2 %3075 }
 0x3d5   : > { %v11340_v24 = vunpack.i.h.bf16 %v11338_v44  ;;  %v11339_v29 = vunpack.i.l.bf16 %v11338_v44 }
 0x3d6   : > { %v2974_v40 = vsel %vm2972_vm9, %v11315_v35, %v11319_v25  ;;  %v2975_v27 = vsel %vm2972_vm9, %v11320_v54, %v11324_v2  ;;  %v3005_v54 = vsel %vm2164_vm4, %v2981_v42, 0.0 }
 0x3d7   : > { %v2998_v37 = vsel %vm2165_vm3, %v2974_v40, 0.0  ;;  %v2999_v55 = vsel %vm2164_vm4, %v2975_v27, 0.0  ;;  %v2980_v62 = vsel %vm2972_vm9, %v11339_v29, %v11340_v24 }
 0x3d8   : > { %v3009_v45 = vpack.c.bf16 %v2998_v37, %v2997_v5  ;;  %v3010_v19 = vpack.c.bf16 %v3000_v34, %v2999_v55  ;;  %v3004_v35 = vsel %vm2165_vm3, %v2980_v62, 0.0 }
 0x3d9   : > { %3375 = vrot.lane.b32.xlu0 %v13836_v26, %s12343_s29 }
 0x3da   : > { %3015 = vst [vmem:[#allocation3 + $0x840] sm:$0xff] %v3009_v45  ;;  %3383 = vrot.lane.b32.xlu1 %v13727_v38, %s12343_s29  ;;  %3385 = vrot.lane.b32.xlu2 %v13729_v41, %s12343_s29 }
 0x3db   : > { %3016 = vst [vmem:[#allocation3 + $0x848] sm:$0xff] %v3010_v19  ;;  %v11333_v48 = vpop.permute.xlu0 %11332 }
 0x3dc   : > { %v11335_v63 = vunpack.i.h.bf16 %v11333_v48  ;;  %v11334_v18 = vunpack.i.l.bf16 %v11333_v48  ;;  %v11353_v6 = vpop.permute.xlu1 %11352  ;;  %v14034_v56 = vpop.permute.xlu2 %3081 }
 0x3dd   : > { %v11355_v39 = vunpack.i.h.bf16 %v11353_v6  ;;  %v11354_v46 = vunpack.i.l.bf16 %v11353_v6 }
 0x3de   : > { %v2978_v50 = vsel %vm2972_vm9, %v11330_v32, %v11334_v18  ;;  %v2979_v59 = vsel %vm2972_vm9, %v11335_v63, %v11339_v29  ;;  %v3096_v18 = vrot.slane %v14034_v56, 4 }
 0x3df   : > { %v3002_v60 = vsel %vm2165_vm3, %v2978_v50, 0.0  ;;  %v3003_v30 = vsel %vm2164_vm4, %v2979_v59, 0.0  ;;  %v2984_v51 = vsel %vm2972_vm9, %v11354_v46, %v11355_v39  ;;  %v3093_v50 = vrot.slane %v14012_v53, 4 }
 0x3e0   : > { %v3011_v14 = vpack.c.bf16 %v3002_v60, %v3001_v58  ;;  %v3012_v36 = vpack.c.bf16 %v3004_v35, %v3003_v30  ;;  %v3008_v32 = vsel %vm2165_vm3, %v2984_v51, 0.0 }
 0x3e1   : > { %3381 = vrot.lane.b32.xlu0 %v13752_v57, %s12343_s29 }
 0x3e2   : > { %3017 = vst [vmem:[#allocation3 + $0x850] sm:$0xff] %v3011_v14  ;;  %3389 = vrot.lane.b32.xlu1 %v13754_v3, %s12343_s29  ;;  %3391 = vrot.lane.b32.xlu2 %v13756_v8, %s12343_s29 }
 0x3e3   : > { %3018 = vst [vmem:[#allocation3 + $0x858] sm:$0xff] %v3012_v36  ;;  %v11348_v12 = vpop.permute.xlu0 %11347 }
 0x3e4   : > { %v11350_v15 = vunpack.i.h.bf16 %v11348_v12  ;;  %v11349_v49 = vunpack.i.l.bf16 %v11348_v12  ;;  %v3068_v28 = vpop.permute.xlu1 %3067  ;;  %v14056_v2 = vpop.permute.xlu2 %3167 }
 0x3e5   : > { %v3089_v61 = vrot.slane %v3068_v28, 4 }
 0x3e6   : > { %v2982_v25 = vsel %vm2972_vm9, %v11345_v22, %v11349_v49  ;;  %v2983_v33 = vsel %vm2972_vm9, %v11350_v15, %v11354_v46  ;;  %v3191_v15 = vrot.slane %v14056_v2, 4  ;;  %vm16324_vm9 = vmmov %vm16316_vm0 }
 0x3e7   : > { %v3006_v44 = vsel %vm2165_vm3, %v2982_v25, 0.0  ;;  %v3007_v5 = vsel %vm2164_vm4, %v2983_v33, 0.0  ;;  %v3103_v1 = vsel %vm16313_vm2, %v3089_v61, %v3090_v31  ;;  %vm16314_vm3 = vmmov %vm16313_vm2 }
 0x3e8   : > { %v3013_v40 = vpack.c.bf16 %v3006_v44, %v3005_v54  ;;  %v3014_v27 = vpack.c.bf16 %v3008_v32, %v3007_v5  ;;  %v3104_v20 = vsel %vm3101_vm10, %v3068_v28, %v3103_v1  ;;  %vm16315_vm4 = vmmov %vm16313_vm2  ;;  %v14136_v5 = vld [vmem:[#allocation2 + $0x50] sm:$0xff] }
 0x3e9   : > { %3387 = vrot.lane.b32.xlu0 %v13780_v7, %s12343_s29  ;;  %3120 = vst [vmem:[#allocation3 + $0x98] sm:$0xff] %v3104_v20  ;;  %vm16326_vm2 = vmmov %vm16316_vm0 }
 0x3ea   : > { %3019 = vst [vmem:[#allocation3 + $0x860] sm:$0xff] %v3013_v40  ;;  %3395 = vrot.lane.b32.xlu1 %v13782_v13, %s12343_s29  ;;  %3476 = vrot.lane.b32.xlu2 %v13784_v16, %s12344_s30  ;;  %v12308_v40 = vld [vmem:[#allocation2 + $0x48] sm:$0xff] }
 0x3eb   : > { %3020 = vst [vmem:[#allocation3 + $0x868] sm:$0xff] %v3014_v27  ;;  %v3066_v4 = vpop.permute.xlu0 %3065  ;;  %v14145_v27 = vpack.c.bf16 %v14136_v5, %v12308_v40 }
 0x3ec   : > { %v3088_v37 = vrot.slane %v3066_v4, 4  ;;  %v3074_v55 = vpop.permute.xlu1 %3073  ;;  %v3174_v34 = vpop.permute.xlu2 %3173 }
 0x3ed   : > { %v3092_v47 = vrot.slane %v3074_v55, 4  ;;  %v3194_v46 = vrot.slane %v3174_v34, 4  ;;  %v14156_v55 = vld [vmem:[#allocation2 + $0x38] sm:$0xff] }
 0x3ee   : > { %v3100_v45 = vsel %vm16314_vm3, %v3087_v21, %v3088_v37  ;;  %v14154_v37 = vld [vmem:[#allocation2 + $0x30] sm:$0xff]  ;;  %vm16327_vm3 = vmmov %vm16316_vm0 }
 0x3ef   : > { %v3102_v19 = vsel %vm3101_vm10, %v13968_v52, %v3100_v45 }
 0x3f0   : > { %3119 = vst [vmem:[#allocation3 + $0x90] sm:$0xff] %v3102_v19  ;;  %v14160_v19 = vld [vmem:[#allocation2 + $0x60] sm:$0xff] }
 0x3f1   : > { %3393 = vrot.lane.b32.xlu0 %v13808_v43, %s12343_s29  ;;  %s12365_s29 = smov 74  }
 0x3f2   : > { %3480 = vrot.lane.b32.xlu1 %v13810_v23, %s12344_s30  ;;  %3482 = vrot.lane.b32.xlu2 %v13812_v0, %s12344_s30 }
 0x3f3   : > { %v3072_v24 = vpop.permute.xlu0 %3071 }
 0x3f4   : > { %v3091_v29 = vrot.slane %v3072_v24, 4  ;;  %v3080_v48 = vpop.permute.xlu1 %3079  ;;  %v14087_v63 = vpop.permute.xlu2 %3179 }
 0x3f5   : > { %v3095_v62 = vrot.slane %v3080_v48, 4  ;;  %v3197_v4 = vrot.slane %v14087_v63, 4 }
 0x3f6   : > { %v3105_v52 = vsel %vm16315_vm4, %v3091_v29, %v3092_v47  ;;  %vm16328_vm4 = vmmov %vm16316_vm0 }
 0x3f7   : > { %v3106_v6 = vsel %vm3101_vm10, %v3072_v24, %v3105_v52  ;;  %v3109_v58 = vsel %vm16316_vm0, %v3095_v62, %v3096_v18  ;;  %v14164_v24 = vld [vmem:[#allocation2 + $0x70] sm:$0xff] }
 0x3f8   : > { %3121 = vst [vmem:[#allocation3 + $0xa0] sm:$0xff] %v3106_v6  ;;  %v3110_v22 = vsel %vm3101_vm10, %v3080_v48, %v3109_v58  ;;  %v14171_v48 = vpack.c.bf16 %v14156_v55, %v14154_v37  ;;  %v14179_v62 = vpack.c.bf16 %v14164_v24, %v14164_v24 }
 0x3f9   : > { %3478 = vrot.lane.b32.xlu0 %v13836_v26, %s12344_s30  ;;  %3123 = vst [vmem:[#allocation3 + $0xb0] sm:$0xff] %v3110_v22 }
 0x3fa   : > { %3486 = vrot.lane.b32.xlu1 %v13727_v38, %s12344_s30  ;;  %3488 = vrot.lane.b32.xlu2 %v13729_v41, %s12344_s30 }
 0x3fb   : > { %v3078_v56 = vpop.permute.xlu0 %3077 }
 0x3fc   : > { %v3094_v59 = vrot.slane %v3078_v56, 4  ;;  %v3086_v17 = vpop.permute.xlu1 %3085  ;;  %v3186_v60 = vpop.permute.xlu2 %3185 }
 0x3fd   : > { %v3098_v14 = vrot.slane %v3086_v17, 4  ;;  %v3200_v33 = vrot.slane %v3186_v60, 4  ;;  %v14193_v60 = vld [vmem:[#allocation2 + $0x58] sm:$0xff] }
 0x3fe   : > { %v3107_v30 = vsel %vm16317_vm5, %v3093_v50, %v3094_v59  ;;  %v14190_v59 = vld [vmem:[#allocation2 + $0x88] sm:$0xff]  ;;  %vm3410_vm5 = vcmask 629760  }
 0x3ff   : > { %v3108_v35 = vsel %vm3101_vm10, %v14012_v53, %v3107_v30  ;;  %v14195_v30 = vld [vmem:[#allocation2 + $0x8] sm:$0xff] }
 0x400   : > { %3122 = vst [vmem:[#allocation3 + $0xa8] sm:$0xff] %v3108_v35 }
 0x401   : > { %3484 = vrot.lane.b32.xlu0 %v13752_v57, %s12344_s30 }
 0x402   : > { %3492 = vrot.lane.b32.xlu1 %v13754_v3, %s12344_s30  ;;  %3494 = vrot.lane.b32.xlu2 %v13756_v8, %s12344_s30 }
 0x403   : > { %v3084_v38 = vpop.permute.xlu0 %3083 }
 0x404   : > { %v3097_v41 = vrot.slane %v3084_v38, 4  ;;  %v3172_v36 = vpop.permute.xlu1 %3171  ;;  %v14110_v39 = vpop.permute.xlu2 %3270 }
 0x405   : > { %v3193_v42 = vrot.slane %v3172_v36, 4 }
 0x406   : > { %v3111_v53 = vsel %vm16318_vm12, %v3097_v41, %v3098_v14  ;;  %vm16330_vm12 = vmmov %vm16316_vm0 }
 0x407   : > { %v3112_v12 = vsel %vm3101_vm10, %v3084_v38, %v3111_v53  ;;  %v3206_v57 = vsel %vm16319_vm13, %v3193_v42, %v3194_v46  ;;  %v14200_v38 = vpack.c.bf16 %v14193_v60, %v14193_v60  ;;  %vm16325_vm10 = vmmov %vm16316_vm0  ;;  %v14206_v53 = vpack.c.bf16 %v14190_v59, %v14190_v59 }
 0x408   : > { %3124 = vst [vmem:[#allocation3 + $0xb8] sm:$0xff] %v3112_v12  ;;  %v3207_v3 = vsel %vm3204_vm6, %v3172_v36, %v3206_v57  ;;  %v14208_v12 = vld [vmem:[#allocation2] sm:$0xff]  ;;  %vm16331_vm13 = vmmov %vm16316_vm0 }
 0x409   : > { %3490 = vrot.lane.b32.xlu0 %v13780_v7, %s12344_s30  ;;  %3223 = vst [vmem:[#allocation3 + $0x1e8] sm:$0xff] %v3207_v3  ;;  %v3658_v3 = vpack.c.bf16 %v14195_v30, %v14208_v12 }
 0x40a   : > { %3498 = vrot.lane.b32.xlu1 %v13782_v13, %s12344_s30  ;;  %3579 = vrot.lane.b32.xlu2 %v13784_v16, %s12345_s7 }
 0x40b   : > { %v3170_v8 = vpop.permute.xlu0 %3169 }
 0x40c   : > { %v3192_v49 = vrot.slane %v3170_v8, 4  ;;  %v3178_v51 = vpop.permute.xlu1 %3177  ;;  %v14123_v28 = vpop.permute.xlu2 %3276 }
 0x40d   : > { %v3196_v61 = vrot.slane %v3178_v51, 4  ;;  %v3297_v56 = vrot.slane %v14123_v28, 4 }
 0x40e   : > { %v3203_v31 = vsel %vm16320_vm1, %v3191_v15, %v3192_v49  ;;  %v3294_v49 = vrot.slane %v14110_v39, 4  ;;  %vm16332_vm1 = vmmov %vm16316_vm0 }
 0x40f   : > { %v3205_v7 = vsel %vm3204_vm6, %v14056_v2, %v3203_v31  ;;  %v14218_v31 = vld [vmem:[#allocation2 + $0x78] sm:$0xff] }
 0x410   : > { %3222 = vst [vmem:[#allocation3 + $0x1e0] sm:$0xff] %v3205_v7  ;;  %v10161_v15 = vld [vmem:[#allocation3 + $0x1e4] sm:$0xf0]  ;;  %v14220_v7 = vld [vmem:[#allocation2 + $0x80] sm:$0xff] }
 0x411   : > { %3496 = vrot.lane.b32.xlu0 %v13808_v43, %s12344_s30  ;;  %s12366_s30 = smov 42  }
 0x412   : > { %3583 = vrot.lane.b32.xlu1 %v13810_v23, %s12345_s7  ;;  %3585 = vrot.lane.b32.xlu2 %v13812_v0, %s12345_s7  ;;  %v12307_v0 = vld [vmem:[#allocation2 + $0x40] sm:$0xff] }
 0x413   : > { %v3176_v13 = vpop.permute.xlu0 %3175  ;;  %v14142_v1 = vpack.c.bf16 %v12307_v0, %v12307_v0 }
 0x414   : > { %v3195_v16 = vrot.slane %v3176_v13, 4  ;;  %v3184_v54 = vpop.permute.xlu1 %3183  ;;  %v14134_v25 = vpop.permute.xlu2 %3282 }
 0x415   : > { %v3199_v44 = vrot.slane %v3184_v54, 4 }
 0x416   : > { %v3208_v2 = vsel %vm16321_vm7, %v3195_v16, %v3196_v61  ;;  %v14224_v61 = vld [vmem:[#allocation2 + $0x18] sm:$0xff]  ;;  %vm16333_vm7 = vmmov %vm16316_vm0 }
 0x417   : > { %v3209_v43 = vsel %vm3204_vm6, %v3176_v13, %v3208_v2  ;;  %v3212_v32 = vsel %vm16322_vm8, %v3199_v44, %v3200_v33  ;;  %v9138_v57 = vld [vmem:[#allocation3 + $0x1e0] sm:$0xf]  ;;  %v10159_v33 = vld [vmem:[#allocation3 + $0x1d4] sm:$0xf0]  ;;  %v14226_v44 = vld [vmem:[#allocation2 + $0x20] sm:$0xff] }
 0x418   : > { %3224 = vst [vmem:[#allocation3 + $0x1f0] sm:$0xff] %v3209_v43  ;;  %v3213_v23 = vsel %vm3204_vm6, %v3184_v54, %v3212_v32  ;;  %v9139_v28 = vor.u32 %v10161_v15, %v9138_v57  ;;  %v9130_v54 = vld [vmem:[#allocation3 + $0x1d0] sm:$0xf]  ;;  %v14229_v43 = vld [vmem:[#allocation2 + $0x28] sm:$0xff]  ;;  %v3660_v40 = vpack.c.bf16 %v14226_v44, %v14224_v61  ;;  %v10153_v57 = vld [vmem:[#allocation3 + $0x1a4] sm:$0xf0] }
 0x419   : > { %3581 = vrot.lane.b32.xlu0 %v13836_v26, %s12345_s7  ;;  %3226 = vst [vmem:[#allocation3 + $0x200] sm:$0xff] %v3213_v23  ;;  %v14162_v26 = vld [vmem:[#allocation2 + $0x68] sm:$0xff]  ;;  %v14235_v23 = vpack.c.bf16 %v14220_v7, %v14218_v31  ;;  %v9131_v0 = vor.u32 %v10159_v33, %v9130_v54  ;;  %vm16334_vm8 = vmmov %vm16316_vm0 }
 0x41a   : > { %3589 = vrot.lane.b32.xlu1 %v14142_v1, %s12345_s7  ;;  %3591 = vrot.lane.b32.xlu2 %v14145_v27, %s12345_s7  ;;  %v14175_v18 = vpack.c.bf16 %v14162_v26, %v14160_v19  ;;  %v10151_v54 = vld [vmem:[#allocation3 + $0x194] sm:$0xf0] }
 0x41b   : > { %v3182_v20 = vpop.permute.xlu0 %3181 }
 0x41c   : > { %v3198_v21 = vrot.slane %v3182_v20, 4  ;;  %v3190_v34 = vpop.permute.xlu1 %3189  ;;  %v14158_v45 = vpop.permute.xlu2 %3288  ;;  %v9122_v20 = vld [vmem:[#allocation3 + $0x1c0] sm:$0xf] }
 0x41d   : > { %v3202_v6 = vrot.slane %v3190_v34, 4 }
 0x41e   : > { %v3210_v29 = vsel %vm16323_vm14, %v3197_v4, %v3198_v21  ;;  %v10157_v4 = vld [vmem:[#allocation3 + $0x1c4] sm:$0xf0]  ;;  %v3661_v21 = vpack.c.bf16 %v14229_v43, %v14229_v43  ;;  %vm3513_vm14 = vcmask 498688  }
 0x41f   : > { %v3211_v47 = vsel %vm3204_vm6, %v14087_v63, %v3210_v29  ;;  %v9146_v41 = vld [vmem:[#allocation3 + $0x1f0] sm:$0xf] }
 0x420   : > { %3225 = vst [vmem:[#allocation3 + $0x1f8] sm:$0xff] %v3211_v47  ;;  %v9123_v47 = vor.u32 %v10157_v4, %v9122_v20 }
 0x421   : > { %3587 = vrot.lane.b32.xlu0 %v14171_v48, %s12345_s7 }
 0x422   : > { %3595 = vrot.lane.b32.xlu1 %v14175_v18, %s12345_s7  ;;  %3597 = vrot.lane.b32.xlu2 %v14179_v62, %s12345_s7 }
 0x423   : > { %v3188_v63 = vpop.permute.xlu0 %3187 }
 0x424   : > { %v3201_v52 = vrot.slane %v3188_v63, 4  ;;  %v3275_v58 = vpop.permute.xlu1 %3274  ;;  %v14187_v22 = vpop.permute.xlu2 %3373 }
 0x425   : > { %v3296_v50 = vrot.slane %v3275_v58, 4 }
 0x426   : > { %v3214_v17 = vsel %vm16324_vm9, %v3201_v52, %v3202_v6  ;;  %vm16336_vm9 = vmmov %vm16316_vm0 }
 0x427   : > { %v3215_v35 = vsel %vm3204_vm6, %v3188_v63, %v3214_v17  ;;  %v10163_v14 = vld [vmem:[#allocation3 + $0x1f4] sm:$0xf0]  ;;  %v3309_v36 = vsel %vm16325_vm10, %v3296_v50, %v3297_v56  ;;  %v14245_v63 = vld [vmem:[#allocation2 + $0x10] sm:$0xff]  ;;  %v9114_v56 = vld [vmem:[#allocation3 + $0x1b0] sm:$0xf] }
 0x428   : > { %3227 = vst [vmem:[#allocation3 + $0x208] sm:$0xff] %v3215_v35  ;;  %v9147_v46 = vor.u32 %v10163_v14, %v9146_v41  ;;  %v3310_v42 = vsel %vm3307_vm15, %v3275_v58, %v3309_v36  ;;  %v3303_v58 = vrot.slane %v14158_v45, 4  ;;  %v10155_v50 = vld [vmem:[#allocation3 + $0x1b4] sm:$0xf0]  ;;  %v3659_v14 = vpack.c.bf16 %v14245_v63, %v14245_v63  ;;  %v9106_v45 = vld [vmem:[#allocation3 + $0x1a0] sm:$0xf]  ;;  %vm16329_vm6 = vmmov %vm16316_vm0 }
 0x429   : > { %3593 = vrot.lane.b32.xlu0 %v14200_v38, %s12345_s7  ;;  %3326 = vst [vmem:[#allocation3 + $0x338] sm:$0xff] %v3310_v42  ;;  %vm16337_vm10 = vmmov %vm16316_vm0 }
 0x42a   : > { %8244 = vmatpush.bf16.msrb.mxu1 %v9147_v46  ;;  %3601 = vrot.lane.b32.xlu1 %v14206_v53, %s12345_s7  ;;  %v9115_v46 = vor.u32 %v10155_v50, %v9114_v56  ;;  %v3397_v50 = vrot.slane %v14187_v22, 4 }
 0x42b   : > { %v3273_v8 = vpop.permute.xlu0 %3272  ;;  %3682 = vrot.lane.b32.xlu2 %v3658_v3, %s12346_s8 }
 0x42c   : > { %v3295_v51 = vrot.slane %v3273_v8, 4  ;;  %v3281_v13 = vpop.permute.xlu1 %3280  ;;  %v14222_v16 = vpop.permute.xlu2 %3379  ;;  %v3300_v8 = vrot.slane %v14134_v25, 4 }
 0x42d   : > { %v3299_v29 = vrot.slane %v3281_v13, 4  ;;  %v9098_v13 = vld [vmem:[#allocation3 + $0x190] sm:$0xf] }
 0x42e   : > { %v3306_v2 = vsel %vm16326_vm2, %v3294_v49, %v3295_v51  ;;  %8245 = vmatpush.bf16.msrb.mxu1 %v9139_v28  ;;  %v9107_v49 = vor.u32 %v10153_v57, %v9106_v45  ;;  %vm16338_vm2 = vmmov %vm16316_vm0 }
 0x42f   : > { %v3308_v32 = vsel %vm3307_vm15, %v14110_v39, %v3306_v2 }
 0x430   : > { %3325 = vst [vmem:[#allocation3 + $0x330] sm:$0xff] %v3308_v32  ;;  %v10149_v32 = vld [vmem:[#allocation3 + $0x184] sm:$0xf0] }
 0x431   : > { %3599 = vrot.lane.b32.xlu0 %v14235_v23, %s12345_s7  ;;  %s12367_s7 = smov 26  }
 0x432   : > { %8246 = vmatpush.bf16.msrb.mxu1 %v9131_v0  ;;  %3686 = vrot.lane.b32.xlu1 %v3660_v40, %s12346_s8  ;;  %v9402_v0 = vld [vmem:[#allocation3 + $0x3f0] sm:$0xf]  ;;  %v10227_v40 = vld [vmem:[#allocation3 + $0x3f4] sm:$0xf0] }
 0x433   : > { %v3279_v39 = vpop.permute.xlu0 %3278  ;;  %3688 = vrot.lane.b32.xlu2 %v3661_v21, %s12346_s8 }
 0x434   : > { %v3298_v34 = vrot.slane %v3279_v39, 4  ;;  %v3287_v52 = vpop.permute.xlu1 %3286  ;;  %v14247_v6 = vpop.permute.xlu2 %3385 }
 0x435   : > { %v3302_v17 = vrot.slane %v3287_v52, 4 }
 0x436   : > { %v3311_v35 = vsel %vm16327_vm3, %v3298_v34, %v3299_v29  ;;  %8247 = vmatpush.bf16.msrb.mxu1 %v9123_v47  ;;  %v9403_v29 = vor.u32 %v10227_v40, %v9402_v0  ;;  %vm16339_vm3 = vmmov %vm16316_vm0 }
 0x437   : > { %v3312_v41 = vsel %vm3307_vm15, %v3279_v39, %v3311_v35  ;;  %v3315_v36 = vsel %vm16328_vm4, %v3302_v17, %v3303_v58  ;;  %vm16340_vm4 = vmmov %vm16316_vm0 }
 0x438   : > { %3327 = vst [vmem:[#allocation3 + $0x340] sm:$0xff] %v3312_v41  ;;  %v3316_v42 = vsel %vm3307_vm15, %v3287_v52, %v3315_v36 }
 0x439   : > { %3684 = vrot.lane.b32.xlu0 %v3659_v14, %s12346_s8  ;;  %3329 = vst [vmem:[#allocation3 + $0x350] sm:$0xff] %v3316_v42 }
 0x43a   : > { %8248 = vmatpush.bf16.msrb.mxu1 %v9115_v46  ;;  %3692 = vrot.lane.b32.xlu1 %v14142_v1, %s12346_s8  ;;  %v9099_v1 = vor.u32 %v10151_v54, %v9098_v13 }
 0x43b   : > { %v3285_v3 = vpop.permute.xlu0 %3284  ;;  %3694 = vrot.lane.b32.xlu2 %v14145_v27, %s12346_s8  ;;  %v9090_v27 = vld [vmem:[#allocation3 + $0x180] sm:$0xf] }
 0x43c   : > { %v3301_v15 = vrot.slane %v3285_v3, 4  ;;  %v3293_v51 = vpop.permute.xlu1 %3292  ;;  %v14262_v28 = vpop.permute.xlu2 %3391  ;;  %v14321_v3 = vpack.i.bf16 %v14193_v60, %v14136_v5 }
 0x43d   : > { %v3305_v21 = vrot.slane %v3293_v51, 4 }
 0x43e   : > { %v3313_v33 = vsel %vm16316_vm0, %v3300_v8, %v3301_v15  ;;  %8249 = vmatpush.bf16.msrb.mxu1 %v9107_v49  ;;  %v14327_v8 = vpack.i.bf16 %v14162_v26, %v14160_v19  ;;  %v14339_v19 = vpack.i.bf16 %v14190_v59, %v14220_v7 }
 0x43f   : > { %v3314_v2 = vsel %vm3307_vm15, %v14134_v25, %v3313_v33  ;;  %v9091_v25 = vor.u32 %v10149_v32, %v9090_v27 }
 0x440   : > { %3328 = vst [vmem:[#allocation3 + $0x348] sm:$0xff] %v3314_v2 }
 0x441   : > { %3690 = vrot.lane.b32.xlu0 %v14171_v48, %s12346_s8  ;;  %v3400_v48 = vrot.slane %v14222_v16, 4  ;;  %v14284_v16 = vpack.i.bf16 %v14195_v30, %v14208_v12  ;;  %v14296_v30 = vpack.i.bf16 %v14229_v43, %v14226_v44  ;;  %v3406_v44 = vrot.slane %v14262_v28, 4 }
 0x442   : > { %8250 = vmatpush.bf16.msrb.mxu1 %v9099_v1  ;;  %3698 = vrot.lane.b32.xlu1 %v14175_v18, %s12346_s8  ;;  %v14353_v1 = vpack.i.bf16 %v14218_v31, %v14164_v24 }
 0x443   : > { %v3291_v20 = vpop.permute.xlu0 %3290  ;;  %3700 = vrot.lane.b32.xlu2 %v14179_v62, %s12346_s8 }
 0x444   : > { %v3304_v4 = vrot.slane %v3291_v20, 4  ;;  %v3378_v39 = vpop.permute.xlu1 %3377  ;;  %v14273_v34 = vpop.permute.xlu2 %3476 }
 0x445   : > { %v3399_v47 = vrot.slane %v3378_v39, 4  ;;  %v3500_v40 = vrot.slane %v14273_v34, 4 }
 0x446   : > { %v3317_v52 = vsel %vm16329_vm6, %v3304_v4, %v3305_v21  ;;  %8251 = vmatpush.bf16.msrb.mxu1 %v9091_v25  ;;  %vm16342_vm6 = vmmov %vm16332_vm1 }
 0x447   : > { %v3318_v18 = vsel %vm3307_vm15, %v3291_v20, %v3317_v52  ;;  %v3412_v58 = vsel %vm16330_vm12, %v3399_v47, %v3400_v48  ;;  %vm16335_vm15 = vmmov %vm16316_vm0  ;;  %vm3616_vm0 = vcmask 367616  }
 0x448   : > { %3330 = vst [vmem:[#allocation3 + $0x358] sm:$0xff] %v3318_v18  ;;  %v3413_v62 = vsel %vm3410_vm5, %v3378_v39, %v3412_v58  ;;  %vm16343_vm12 = vmmov %vm16332_vm1 }
 0x449   : > { %3696 = vrot.lane.b32.xlu0 %v14200_v38, %s12346_s8  ;;  %3429 = vst [vmem:[#allocation3 + $0x488] sm:$0xff] %v3413_v62 }
 0x44a   : > { %8300 = vmatpush.bf16.msra.mxu1 %v9403_v29  ;;  %3704 = vrot.lane.b32.xlu1 %v14206_v53, %s12346_s8  ;;  %v14302_v53 = vpack.i.bf16 %v14156_v55, %v14154_v37  ;;  %v14315_v55 = vpack.i.bf16 %v14224_v61, %v14245_v63  ;;  %v3403_v63 = vrot.slane %v14247_v6, 4 }
 0x44b   : > { %v3376_v56 = vpop.permute.xlu0 %3375  ;;  %11357 = vrot.lane.b32.xlu2 %v14284_v16, %s12347_s9 }
 0x44c   : > { %v3398_v17 = vrot.slane %v3376_v56, 4  ;;  %v3384_v35 = vpop.permute.xlu1 %3383  ;;  %v3483_v41 = vpop.permute.xlu2 %3482 }
 0x44d   : > { %v3402_v36 = vrot.slane %v3384_v35, 4  ;;  %v3503_v33 = vrot.slane %v3483_v41, 4 }
 0x44e   : > { %v3409_v38 = vsel %vm16331_vm13, %v3397_v50, %v3398_v17  ;;  %vm16344_vm13 = vmmov %vm16332_vm1 }
 0x44f   : > { %v3411_v14 = vsel %vm3410_vm5, %v14187_v22, %v3409_v38 }
 0x450   : > { %3428 = vst [vmem:[#allocation3 + $0x480] sm:$0xff] %v3411_v14 }
 0x451   : > { %3702 = vrot.lane.b32.xlu0 %v14235_v23, %s12346_s8 }
 0x452   : > { %11367 = vrot.lane.b32.xlu1 %v14296_v30, %s12347_s9 }
 0x453   : > { %v3382_v12 = vpop.permute.xlu0 %3381  ;;  %11372 = vrot.lane.b32.xlu2 %v14302_v53, %s12347_s9 }
 0x454   : > { %v3401_v22 = vrot.slane %v3382_v12, 4  ;;  %v3390_v46 = vpop.permute.xlu1 %3389  ;;  %v14308_v42 = vpop.permute.xlu2 %3488 }
 0x455   : > { %v3405_v43 = vrot.slane %v3390_v46, 4  ;;  %v3506_v17 = vrot.slane %v14308_v42, 4 }
 0x456   : > { %v3414_v23 = vsel %vm16332_vm1, %v3401_v22, %v3402_v36 }
 0x457   : > { %v3415_v37 = vsel %vm3410_vm5, %v3382_v12, %v3414_v23  ;;  %v3418_v45 = vsel %vm16333_vm7, %v3405_v43, %v3406_v44  ;;  %vm16345_vm7 = vmmov %vm16332_vm1 }
 0x458   : > { %3430 = vst [vmem:[#allocation3 + $0x490] sm:$0xff] %v3415_v37  ;;  %v3419_v57 = vsel %vm3410_vm5, %v3390_v46, %v3418_v45 }
 0x459   : > { %11362 = vrot.lane.b32.xlu0 %v14315_v55, %s12347_s9  ;;  %3432 = vst [vmem:[#allocation3 + $0x4a0] sm:$0xff] %v3419_v57 }
 0x45a   : > { %11382 = vrot.lane.b32.xlu1 %v14321_v3, %s12347_s9 }
 0x45b   : > { %v3388_v61 = vpop.permute.xlu0 %3387  ;;  %11387 = vrot.lane.b32.xlu2 %v14327_v8, %s12347_s9 }
 0x45c   : > { %v3404_v15 = vrot.slane %v3388_v61, 4  ;;  %v3396_v5 = vpop.permute.xlu1 %3395  ;;  %v3495_v60 = vpop.permute.xlu2 %3494 }
 0x45d   : > { %v3408_v13 = vrot.slane %v3396_v5, 4  ;;  %v3509_v52 = vrot.slane %v3495_v60, 4 }
 0x45e   : > { %v3416_v49 = vsel %vm16334_vm8, %v3403_v63, %v3404_v15  ;;  %vm3719_vm8 = vcmask 236544  }
 0x45f   : > { %v3417_v51 = vsel %vm3410_vm5, %v14247_v6, %v3416_v49 }
 0x460   : > { %3431 = vst [vmem:[#allocation3 + $0x498] sm:$0xff] %v3417_v51 }
 0x461   : > { %11377 = vrot.lane.b32.xlu0 %v12600_v9, %s12347_s9 }
 0x462   : > { %11397 = vrot.lane.b32.xlu1 %v14339_v19, %s12347_s9 }
 0x463   : > { %v3394_v26 = vpop.permute.xlu0 %3393  ;;  %11402 = vrot.lane.b32.xlu2 %v14284_v16, %s12348_s10 }
 0x464   : > { %v3407_v28 = vrot.slane %v3394_v26, 4  ;;  %v3481_v54 = vpop.permute.xlu1 %3480  ;;  %v14347_v6 = vpop.permute.xlu2 %3579 }
 0x465   : > { %v3502_v59 = vrot.slane %v3481_v54, 4  ;;  %v3603_v15 = vrot.slane %v14347_v6, 4 }
 0x466   : > { %v3420_v7 = vsel %vm16335_vm15, %v3407_v28, %v3408_v13  ;;  %vm16347_vm15 = vmmov %vm16332_vm1 }
 0x467   : > { %v3421_v2 = vsel %vm3410_vm5, %v3394_v26, %v3420_v7  ;;  %v3515_v27 = vsel %vm16336_vm9, %v3502_v59, %v3503_v33  ;;  %vm16341_vm5 = vmmov %vm16332_vm1 }
 0x468   : > { %3433 = vst [vmem:[#allocation3 + $0x4a8] sm:$0xff] %v3421_v2  ;;  %v3516_v32 = vsel %vm3513_vm14, %v3481_v54, %v3515_v27  ;;  %vm16348_vm9 = vmmov %vm16332_vm1 }
 0x469   : > { %11392 = vrot.lane.b32.xlu0 %v14353_v1, %s12347_s9  ;;  %3532 = vst [vmem:[#allocation3 + $0x5d8] sm:$0xff] %v3516_v32 }
 0x46a   : > { %11412 = vrot.lane.b32.xlu1 %v14296_v30, %s12348_s10 }
 0x46b   : > { %v3479_v0 = vpop.permute.xlu0 %3478  ;;  %11417 = vrot.lane.b32.xlu2 %v14302_v53, %s12348_s10 }
 0x46c   : > { %v3501_v24 = vrot.slane %v3479_v0, 4  ;;  %v3487_v31 = vpop.permute.xlu1 %3486  ;;  %v3586_v20 = vpop.permute.xlu2 %3585 }
 0x46d   : > { %v3505_v48 = vrot.slane %v3487_v31, 4  ;;  %v3606_v43 = vrot.slane %v3586_v20, 4 }
 0x46e   : > { %v3512_v4 = vsel %vm16337_vm10, %v3500_v40, %v3501_v24  ;;  %vm16349_vm10 = vmmov %vm16332_vm1 }
 0x46f   : > { %v3514_v21 = vsel %vm3513_vm14, %v14273_v34, %v3512_v4 }
 0x470   : > { %3531 = vst [vmem:[#allocation3 + $0x5d0] sm:$0xff] %v3514_v21 }
 0x471   : > { %11407 = vrot.lane.b32.xlu0 %v14315_v55, %s12348_s10 }
 0x472   : > { %11427 = vrot.lane.b32.xlu1 %v14321_v3, %s12348_s10 }
 0x473   : > { %v3485_v25 = vpop.permute.xlu0 %3484  ;;  %11432 = vrot.lane.b32.xlu2 %v14327_v8, %s12348_s10 }
 0x474   : > { %v3504_v39 = vrot.slane %v3485_v25, 4  ;;  %v3493_v29 = vpop.permute.xlu1 %3492  ;;  %v14373_v47 = vpop.permute.xlu2 %3591 }
 0x475   : > { %v3508_v18 = vrot.slane %v3493_v29, 4  ;;  %v3609_v24 = vrot.slane %v14373_v47, 4 }
 0x476   : > { %v3517_v34 = vsel %vm16338_vm2, %v3504_v39, %v3505_v48  ;;  %vm16350_vm2 = vmmov %vm16332_vm1 }
 0x477   : > { %v3518_v58 = vsel %vm3513_vm14, %v3485_v25, %v3517_v34  ;;  %v3521_v62 = vsel %vm16339_vm3, %v3508_v18, %v3509_v52  ;;  %vm16351_vm3 = vmmov %vm16332_vm1 }
 0x478   : > { %3533 = vst [vmem:[#allocation3 + $0x5e0] sm:$0xff] %v3518_v58  ;;  %v3522_v56 = vsel %vm3513_vm14, %v3493_v29, %v3521_v62 }
 0x479   : > { %11422 = vrot.lane.b32.xlu0 %v12600_v9, %s12348_s10  ;;  %3535 = vst [vmem:[#allocation3 + $0x5f0] sm:$0xff] %v3522_v56 }
 0x47a   : > { %11442 = vrot.lane.b32.xlu1 %v14339_v19, %s12348_s10 }
 0x47b   : > { %v3491_v50 = vpop.permute.xlu0 %3490  ;;  %11447 = vrot.lane.b32.xlu2 %v14284_v16, %s12349_s11 }
 0x47c   : > { %v3507_v35 = vrot.slane %v3491_v50, 4  ;;  %v3499_v41 = vpop.permute.xlu1 %3498  ;;  %v3598_v38 = vpop.permute.xlu2 %3597 }
 0x47d   : > { %v3511_v46 = vrot.slane %v3499_v41, 4  ;;  %v3612_v59 = vrot.slane %v3598_v38, 4 }
 0x47e   : > { %v3519_v14 = vsel %vm16340_vm4, %v3506_v17, %v3507_v35  ;;  %vm16352_vm4 = vmmov %vm16332_vm1 }
 0x47f   : > { %v3520_v12 = vsel %vm3513_vm14, %v14308_v42, %v3519_v14 }
 0x480   : > { %3534 = vst [vmem:[#allocation3 + $0x5e8] sm:$0xff] %v3520_v12 }
 0x481   : > { %11437 = vrot.lane.b32.xlu0 %v14353_v1, %s12348_s10 }
 0x482   : > { %11457 = vrot.lane.b32.xlu1 %v14296_v30, %s12349_s11 }
 0x483   : > { %v3497_v22 = vpop.permute.xlu0 %3496  ;;  %11462 = vrot.lane.b32.xlu2 %v14302_v53, %s12349_s11 }
 0x484   : > { %v3510_v36 = vrot.slane %v3497_v22, 4  ;;  %v3584_v44 = vpop.permute.xlu1 %3583 }
 0x485   : > { %v3605_v23 = vrot.slane %v3584_v44, 4  ;;  %v14395_v37 = vpop.permute.xlu2 %3682 }
 0x486   : > { %v3523_v42 = vsel %vm16341_vm5, %v3510_v36, %v3511_v46  ;;  %v3706_v35 = vrot.slane %v14395_v37, 4 }
 0x487   : > { %v3524_v45 = vsel %vm3513_vm14, %v3497_v22, %v3523_v42  ;;  %v3618_v57 = vsel %vm16342_vm6, %v3605_v23, %v3606_v43  ;;  %vm16346_vm14 = vmmov %vm16332_vm1 }
 0x488   : > { %3536 = vst [vmem:[#allocation3 + $0x5f8] sm:$0xff] %v3524_v45  ;;  %v3619_v61 = vsel %vm3616_vm0, %v3584_v44, %v3618_v57 }
 0x489   : > { %11452 = vrot.lane.b32.xlu0 %v14315_v55, %s12349_s11  ;;  %3635 = vst [vmem:[#allocation3 + $0x728] sm:$0xff] %v3619_v61 }
 0x48a   : > { %11472 = vrot.lane.b32.xlu1 %v14321_v3, %s12349_s11 }
 0x48b   : > { %v3582_v63 = vpop.permute.xlu0 %3581  ;;  %11477 = vrot.lane.b32.xlu2 %v14327_v8, %s12349_s11 }
 0x48c   : > { %v3604_v5 = vrot.slane %v3582_v63, 4  ;;  %v3590_v60 = vpop.permute.xlu1 %3589 }
 0x48d   : > { %v3689_v49 = vpop.permute.xlu2 %3688  ;;  %v3608_v54 = vrot.slane %v3590_v60, 4 }
 0x48e   : > { %v3615_v51 = vsel %vm16343_vm12, %v3603_v15, %v3604_v5  ;;  %v3709_v18 = vrot.slane %v3689_v49, 4  ;;  %vm3948_vm12 = vcmask 883712  }
 0x48f   : > { %v3617_v26 = vsel %vm3616_vm0, %v14347_v6, %v3615_v51 }
 0x490   : > { %3634 = vst [vmem:[#allocation3 + $0x720] sm:$0xff] %v3617_v26 }
 0x491   : > { %11467 = vrot.lane.b32.xlu0 %v12600_v9, %s12349_s11 }
 0x492   : > { %11487 = vrot.lane.b32.xlu1 %v14339_v19, %s12349_s11 }
 0x493   : > { %v3588_v28 = vpop.permute.xlu0 %3587  ;;  %11492 = vrot.lane.b32.xlu2 %v14284_v16, %s12350_s12 }
 0x494   : > { %v3607_v13 = vrot.slane %v3588_v28, 4  ;;  %v3596_v33 = vpop.permute.xlu1 %3595 }
 0x495   : > { %v3611_v7 = vrot.slane %v3596_v33, 4  ;;  %v14417_v2 = vpop.permute.xlu2 %3694 }
 0x496   : > { %v3620_v6 = vsel %vm16344_vm13, %v3607_v13, %v3608_v54  ;;  %v3712_v15 = vrot.slane %v14417_v2, 4  ;;  %vm4069_vm13 = vcmask 752640  }
 0x497   : > { %v3621_v27 = vsel %vm3616_vm0, %v3588_v28, %v3620_v6  ;;  %v3624_v32 = vsel %vm16332_vm1, %v3611_v7, %v3612_v59  ;;  %v4366_v59 = vld [vmem:[#allocation2 + $0x30] sm:$0xff]  ;;  %v4367_v7 = vld [vmem:[#allocation2 + $0x38] sm:$0xff]  ;;  %vm4190_vm1 = vcmask 621568  }
 0x498   : > { %3636 = vst [vmem:[#allocation3 + $0x730] sm:$0xff] %v3621_v27  ;;  %v3625_v0 = vsel %vm3616_vm0, %v3596_v33, %v3624_v32 }
 0x499   : > { %11482 = vrot.lane.b32.xlu0 %v14353_v1, %s12349_s11  ;;  %3638 = vst [vmem:[#allocation3 + $0x740] sm:$0xff] %v3625_v0  ;;  %v14501_v0 = vpack.i.bf16 %v4367_v7, %v4366_v59 }
 0x49a   : > { %11502 = vrot.lane.b32.xlu1 %v14296_v30, %s12350_s12 }
 0x49b   : > { %v3594_v40 = vpop.permute.xlu0 %3593  ;;  %11507 = vrot.lane.b32.xlu2 %v14302_v53, %s12350_s12 }
 0x49c   : > { %v3610_v31 = vrot.slane %v3594_v40, 4  ;;  %v3602_v20 = vpop.permute.xlu1 %3601  ;;  %v4370_v40 = vld [vmem:[#allocation2 + $0x50] sm:$0xff] }
 0x49d   : > { %v3701_v4 = vpop.permute.xlu2 %3700  ;;  %v3614_v29 = vrot.slane %v3602_v20, 4 }
 0x49e   : > { %v3622_v21 = vsel %vm16345_vm7, %v3609_v24, %v3610_v31  ;;  %v3715_v23 = vrot.slane %v3701_v4, 4  ;;  %v4371_v24 = vld [vmem:[#allocation2 + $0x58] sm:$0xff]  ;;  %vm4311_vm7 = vcmask 490496  }
 0x49f   : > { %v3623_v25 = vsel %vm3616_vm0, %v14373_v47, %v3622_v21 }
 0x4a0   : > { %3637 = vst [vmem:[#allocation3 + $0x738] sm:$0xff] %v3623_v25 }
 0x4a1   : > { %11497 = vrot.lane.b32.xlu0 %v14315_v55, %s12350_s12 }
 0x4a2   : > { %11517 = vrot.lane.b32.xlu1 %v14321_v3, %s12350_s12 }
 0x4a3   : > { %v3600_v39 = vpop.permute.xlu0 %3599  ;;  %11522 = vrot.lane.b32.xlu2 %v14327_v8, %s12350_s12 }
 0x4a4   : > { %v3613_v48 = vrot.slane %v3600_v39, 4  ;;  %v3687_v52 = vpop.permute.xlu1 %3686 }
 0x4a5   : > { %v3708_v34 = vrot.slane %v3687_v52, 4  ;;  %v14439_v58 = vpop.permute.xlu2 %11357 }
 0x4a6   : > { %v3626_v47 = vsel %vm16346_vm14, %v3613_v48, %v3614_v29  ;;  %vm4553_vm14 = vcmask 228352  }
 0x4a7   : > { %v3627_v62 = vsel %vm3616_vm0, %v3600_v39, %v3626_v47  ;;  %v3721_v56 = vsel %vm16347_vm15, %v3708_v34, %v3709_v18  ;;  %vm3827_vm0 = vcmask 1014784   ;;  %v4372_v34 = vld [vmem:[#allocation2 + $0x60] sm:$0xff]  ;;  %vm4686_vm15 = vcmask 1006592  }
 0x4a8   : > { %3639 = vst [vmem:[#allocation3 + $0x748] sm:$0xff] %v3627_v62  ;;  %v3722_v50 = vsel %vm3719_vm8, %v3687_v52, %v3721_v56 }
 0x4a9   : > { %11512 = vrot.lane.b32.xlu0 %v12600_v9, %s12350_s12  ;;  %3738 = vst [vmem:[#allocation3 + $0x878] sm:$0xff] %v3722_v50 }
 0x4aa   : > { %11532 = vrot.lane.b32.xlu1 %v14339_v19, %s12350_s12 }
 0x4ab   : > { %v3685_v17 = vpop.permute.xlu0 %3684  ;;  %11537 = vrot.lane.b32.xlu2 %v14284_v16, %s12351_s13 }
 0x4ac   : > { %v3707_v41 = vrot.slane %v3685_v17, 4  ;;  %v3693_v38 = vpop.permute.xlu1 %3692 }
 0x4ad   : > { %v14452_v14 = vpop.permute.xlu2 %11372  ;;  %v3711_v44 = vrot.slane %v3693_v38, 4 }
 0x4ae   : > { %v3718_v12 = vsel %vm16348_vm9, %v3706_v35, %v3707_v41  ;;  %v11375_v29 = vunpack.i.h.bf16 %v14452_v14  ;;  %v11374_v47 = vunpack.i.l.bf16 %v14452_v14  ;;  %v4368_v14 = vld [vmem:[#allocation2 + $0x40] sm:$0xff] }
 0x4af   : > { %v3720_v22 = vsel %vm3719_vm8, %v14395_v37, %v3718_v12 }
 0x4b0   : > { %3737 = vst [vmem:[#allocation3 + $0x870] sm:$0xff] %v3720_v22  ;;  %v4376_v22 = vld [vmem:[#allocation2 + $0x80] sm:$0xff] }
 0x4b1   : > { %11527 = vrot.lane.b32.xlu0 %v14353_v1, %s12350_s12 }
 0x4b2   : > { %11547 = vrot.lane.b32.xlu1 %v14296_v30, %s12351_s13 }
 0x4b3   : > { %v3691_v36 = vpop.permute.xlu0 %3690  ;;  %11552 = vrot.lane.b32.xlu2 %v14302_v53, %s12351_s13 }
 0x4b4   : > { %v3710_v46 = vrot.slane %v3691_v36, 4  ;;  %v3699_v43 = vpop.permute.xlu1 %3698 }
 0x4b5   : > { %v3714_v42 = vrot.slane %v3699_v43, 4  ;;  %v14463_v45 = vpop.permute.xlu2 %11387 }
 0x4b6   : > { %v3723_v37 = vsel %vm16349_vm10, %v3710_v46, %v3711_v44  ;;  %v4377_v46 = vld [vmem:[#allocation2 + $0x88] sm:$0xff]  ;;  %v3832_v44 = vsel %vm3827_vm0, %v11374_v47, %v11375_v29 }
 0x4b7   : > { %v3724_v57 = vsel %vm3719_vm8, %v3691_v36, %v3723_v37  ;;  %v3727_v61 = vsel %vm16350_vm2, %v3714_v42, %v3715_v23  ;;  %v4369_v36 = vld [vmem:[#allocation2 + $0x48] sm:$0xff]  ;;  %vm4807_vm2 = vcmask 875520  }
 0x4b8   : > { %3739 = vst [vmem:[#allocation3 + $0x880] sm:$0xff] %v3724_v57  ;;  %v3728_v63 = vsel %vm3719_vm8, %v3699_v43, %v3727_v61  ;;  %v14537_v57 = vpack.i.bf16 %v4369_v36, %v4368_v14 }
 0x4b9   : > { %11542 = vrot.lane.b32.xlu0 %v14315_v55, %s12351_s13  ;;  %3741 = vst [vmem:[#allocation3 + $0x890] sm:$0xff] %v3728_v63  ;;  %v14541_v63 = vpack.i.bf16 %v4377_v46, %v4376_v22 }
 0x4ba   : > { %11562 = vrot.lane.b32.xlu1 %v14321_v3, %s12351_s13 }
 0x4bb   : > { %v3697_v53 = vpop.permute.xlu0 %3696  ;;  %11567 = vrot.lane.b32.xlu2 %v14327_v8, %s12351_s13 }
 0x4bc   : > { %v3713_v5 = vrot.slane %v3697_v53, 4  ;;  %v3705_v60 = vpop.permute.xlu1 %3704 }
 0x4bd   : > { %v14476_v49 = vpop.permute.xlu2 %11402  ;;  %v3717_v28 = vrot.slane %v3705_v60, 4 }
 0x4be   : > { %v3725_v51 = vsel %vm16351_vm3, %v3712_v15, %v3713_v5  ;;  %v11390_v15 = vunpack.i.h.bf16 %v14463_v45  ;;  %vm4928_vm3 = vcmask 744448  }
 0x4bf   : > { %v3726_v26 = vsel %vm3719_vm8, %v14417_v2, %v3725_v51  ;;  %v14491_v2 = vadd.s32 1, %v12472_v10  ;;  %v4482_v51 = vld [vmem:[#allocation2 + $0x8] sm:$0xff] }
 0x4c0   : > { %3740 = vst [vmem:[#allocation3 + $0x888] sm:$0xff] %v3726_v26  ;;  %v11389_v26 = vunpack.i.l.bf16 %v14463_v45  ;;  %v4375_v45 = vld [vmem:[#allocation2 + $0x78] sm:$0xff] }
 0x4c1   : > { %11557 = vrot.lane.b32.xlu0 %v12600_v9, %s12351_s13  ;;  %v11360_v9 = vunpack.i.h.bf16 %v14439_v58  ;;  %vm3747_vm5 = vcmp.lt.s32.totalorder %v14491_v2, 16 }
 0x4c2   : > { %11577 = vrot.lane.b32.xlu1 %v14339_v19, %s12351_s13  ;;  %v11359_v19 = vunpack.i.l.bf16 %v14439_v58  ;;  %v4373_v58 = vld [vmem:[#allocation2 + $0x68] sm:$0xff]  ;;  %v3856_v53 = vsel %vm3747_vm5, %v3832_v44, 0.0  ;;  %v4483_v44 = vld [vmem:[#allocation2 + $0x10] sm:$0xff] }
 0x4c3   : > { %v3703_v3 = vpop.permute.xlu0 %3702  ;;  %11582 = vrot.lane.b32.xlu2 %v14284_v16, %s12352_s14  ;;  %v14497_v16 = vadd.s32 1, %v12474_v11  ;;  %v14529_v12 = vpack.i.bf16 %v4373_v58, %v4372_v34  ;;  %v11404_v58 = vunpack.i.l.bf16 %v14476_v49 }
 0x4c4   : > { %v3716_v8 = vrot.slane %v3703_v3, 4  ;;  %v11368_v13 = vpop.permute.xlu1 %11367  ;;  %v3828_v31 = vsel %vm3827_vm0, %v11359_v19, %v11360_v9 }
 0x4c5   : > { %v14487_v54 = vpop.permute.xlu2 %11417  ;;  %v11370_v27 = vunpack.i.h.bf16 %v11368_v13  ;;  %v11369_v32 = vunpack.i.l.bf16 %v11368_v13  ;;  %vm3748_vm6 = vcmp.lt.s32.totalorder %v14497_v16, 16  ;;  %v3852_v48 = vsel %vm3747_vm5, %v3828_v31, 0.0 }
 0x4c6   : > { %v3729_v33 = vsel %vm16352_vm4, %v3716_v8, %v3717_v28  ;;  %vm5049_vm4 = vcmask 613376  }
 0x4c7   : > { %v3730_v6 = vsel %vm3719_vm8, %v3703_v3, %v3729_v33  ;;  %vm4432_vm8 = vcmask 359424  }
 0x4c8   : > { %3742 = vst [vmem:[#allocation3 + $0x898] sm:$0xff] %v3730_v6  ;;  %v4485_v6 = vld [vmem:[#allocation2 + $0x20] sm:$0xff] }
 0x4c9   : > { %11572 = vrot.lane.b32.xlu0 %v14353_v1, %s12351_s13  ;;  %v3831_v1 = vsel %vm3827_vm0, %v11369_v32, %v11370_v27  ;;  %v3836_v27 = vsel %vm3827_vm0, %v11389_v26, %v11390_v15 }
 0x4ca   : > { %11592 = vrot.lane.b32.xlu1 %v14296_v30, %s12352_s14  ;;  %v14513_v30 = vpack.i.bf16 %v4371_v24, %v4370_v40  ;;  %v3855_v50 = vsel %vm3748_vm6, %v3831_v1, 0.0 }
 0x4cb   : > { %v11363_v20 = vpop.permute.xlu0 %11362  ;;  %11597 = vrot.lane.b32.xlu2 %v14501_v0, %s12352_s14 }
 0x4cc   : > { %v11365_v4 = vunpack.i.h.bf16 %v11363_v20  ;;  %v11364_v21 = vunpack.i.l.bf16 %v11363_v20  ;;  %v11383_v25 = vpop.permute.xlu1 %11382  ;;  %v4374_v20 = vld [vmem:[#allocation2 + $0x70] sm:$0xff] }
 0x4cd   : > { %v14511_v39 = vpop.permute.xlu2 %11432  ;;  %v11385_v41 = vunpack.i.h.bf16 %v11383_v25  ;;  %v11384_v38 = vunpack.i.l.bf16 %v11383_v25  ;;  %v14565_v1 = vpack.i.bf16 %v4375_v45, %v4374_v20 }
 0x4ce   : > { %v3829_v52 = vsel %vm3827_vm0, %v11360_v9, %v11364_v21  ;;  %v3830_v18 = vsel %vm3827_vm0, %v11365_v4, %v11369_v32  ;;  %v4481_v9 = vld [vmem:[#allocation2] sm:$0xff]  ;;  %v4486_v21 = vld [vmem:[#allocation2 + $0x28] sm:$0xff] }
 0x4cf   : > { %v3853_v62 = vsel %vm3748_vm6, %v3829_v52, 0.0  ;;  %v3854_v56 = vsel %vm3747_vm5, %v3830_v18, 0.0  ;;  %v14557_v19 = vpack.i.bf16 %v4482_v51, %v4481_v9  ;;  %v11405_v52 = vunpack.i.h.bf16 %v14476_v49 }
 0x4d0   : > { %v3864_v17 = vpack.c.bf16 %v3853_v62, %v3852_v48  ;;  %v3865_v35 = vpack.c.bf16 %v3855_v50, %v3854_v56  ;;  %v14569_v48 = vpack.i.bf16 %v4486_v21, %v4485_v6 }
 0x4d1   : > { %11587 = vrot.lane.b32.xlu0 %v14315_v55, %s12352_s14  ;;  %v3835_v55 = vsel %vm3827_vm0, %v11384_v38, %v11385_v41  ;;  %v3949_v49 = vsel %vm3948_vm12, %v11404_v58, %v11405_v52 }
 0x4d2   : > { %3870 = vst [vmem:[#allocation3 + $0xc0] sm:$0xff] %v3864_v17  ;;  %11607 = vrot.lane.b32.xlu1 %v14513_v30, %s12352_s14  ;;  %v3859_v28 = vsel %vm3748_vm6, %v3835_v55, 0.0  ;;  %v3973_v55 = vsel %vm3747_vm5, %v3949_v49, 0.0 }
 0x4d3   : > { %3871 = vst [vmem:[#allocation3 + $0xc8] sm:$0xff] %v3865_v35  ;;  %v11378_v43 = vpop.permute.xlu0 %11377  ;;  %11612 = vrot.lane.b32.xlu2 %v14529_v12, %s12352_s14 }
 0x4d4   : > { %v11380_v23 = vunpack.i.h.bf16 %v11378_v43  ;;  %v11379_v42 = vunpack.i.l.bf16 %v11378_v43  ;;  %v11398_v37 = vpop.permute.xlu1 %11397 }
 0x4d5   : > { %v14539_v61 = vpop.permute.xlu2 %11447  ;;  %v11400_v59 = vunpack.i.h.bf16 %v11398_v37  ;;  %v11399_v7 = vunpack.i.l.bf16 %v11398_v37  ;;  %v11420_v37 = vunpack.i.h.bf16 %v14487_v54 }
 0x4d6   : > { %v3833_v5 = vsel %vm3827_vm0, %v11375_v29, %v11379_v42  ;;  %v3834_v60 = vsel %vm3827_vm0, %v11380_v23, %v11384_v38  ;;  %v3860_v29 = vsel %vm3747_vm5, %v3836_v27, 0.0  ;;  %v4484_v38 = vld [vmem:[#allocation2 + $0x18] sm:$0xff] }
 0x4d7   : > { %v3857_v3 = vsel %vm3748_vm6, %v3833_v5, 0.0  ;;  %v3858_v8 = vsel %vm3747_vm5, %v3834_v60, 0.0  ;;  %v3839_v31 = vsel %vm3827_vm0, %v11399_v7, %v11400_v59  ;;  %v14591_v23 = vpack.i.bf16 %v4484_v38, %v4483_v44 }
 0x4d8   : > { %v3866_v13 = vpack.c.bf16 %v3857_v3, %v3856_v53  ;;  %v3867_v33 = vpack.c.bf16 %v3859_v28, %v3858_v8  ;;  %v3863_v56 = vsel %vm3748_vm6, %v3839_v31, 0.0  ;;  %v11419_v5 = vunpack.i.l.bf16 %v14487_v54 }
 0x4d9   : > { %11602 = vrot.lane.b32.xlu0 %v14537_v57, %s12352_s14  ;;  %v11434_v31 = vunpack.i.l.bf16 %v14511_v39 }
 0x4da   : > { %3872 = vst [vmem:[#allocation3 + $0xd0] sm:$0xff] %v3866_v13  ;;  %11622 = vrot.lane.b32.xlu1 %v14541_v63, %s12352_s14  ;;  %v3953_v54 = vsel %vm3948_vm12, %v11419_v5, %v11420_v37 }
 0x4db   : > { %3873 = vst [vmem:[#allocation3 + $0xd8] sm:$0xff] %v3867_v33  ;;  %v11393_v32 = vpop.permute.xlu0 %11392  ;;  %11627 = vrot.lane.b32.xlu2 %v14557_v19, %s12353_s15  ;;  %v3977_v27 = vsel %vm3747_vm5, %v3953_v54, 0.0 }
 0x4dc   : > { %v11395_v40 = vunpack.i.h.bf16 %v11393_v32  ;;  %v11394_v24 = vunpack.i.l.bf16 %v11393_v32  ;;  %v11413_v4 = vpop.permute.xlu1 %11412  ;;  %v11435_v32 = vunpack.i.h.bf16 %v14511_v39 }
 0x4dd   : > { %v14567_v25 = vpop.permute.xlu2 %11462  ;;  %v11415_v35 = vunpack.i.h.bf16 %v11413_v4  ;;  %v11414_v41 = vunpack.i.l.bf16 %v11413_v4 }
 0x4de   : > { %v3837_v18 = vsel %vm3827_vm0, %v11390_v15, %v11394_v24  ;;  %v3838_v34 = vsel %vm3827_vm0, %v11395_v40, %v11399_v7  ;;  %v3957_v39 = vsel %vm3948_vm12, %v11434_v31, %v11435_v32  ;;  %v11464_v54 = vunpack.i.l.bf16 %v14567_v25 }
 0x4df   : > { %v3861_v47 = vsel %vm3748_vm6, %v3837_v18, 0.0  ;;  %v3862_v62 = vsel %vm3747_vm5, %v3838_v34, 0.0  ;;  %v3952_v46 = vsel %vm3948_vm12, %v11414_v41, %v11415_v35  ;;  %v3981_v35 = vsel %vm3747_vm5, %v3957_v39, 0.0 }
 0x4e0   : > { %v3868_v50 = vpack.c.bf16 %v3861_v47, %v3860_v29  ;;  %v3869_v17 = vpack.c.bf16 %v3863_v56, %v3862_v62  ;;  %v3976_v26 = vsel %vm3748_vm6, %v3952_v46, 0.0  ;;  %vm5170_vm0 = vcmask 482304  }
 0x4e1   : > { %11617 = vrot.lane.b32.xlu0 %v14565_v1, %s12352_s14 }
 0x4e2   : > { %3874 = vst [vmem:[#allocation3 + $0xe0] sm:$0xff] %v3868_v50  ;;  %11637 = vrot.lane.b32.xlu1 %v14569_v48, %s12353_s15 }
 0x4e3   : > { %3875 = vst [vmem:[#allocation3 + $0xe8] sm:$0xff] %v3869_v17  ;;  %v11408_v22 = vpop.permute.xlu0 %11407  ;;  %11642 = vrot.lane.b32.xlu2 %v14501_v0, %s12353_s15 }
 0x4e4   : > { %v11410_v14 = vunpack.i.h.bf16 %v11408_v22  ;;  %v11409_v36 = vunpack.i.l.bf16 %v11408_v22  ;;  %v11428_v43 = vpop.permute.xlu1 %11427  ;;  %v11449_v22 = vunpack.i.l.bf16 %v14539_v61 }
 0x4e5   : > { %v14593_v42 = vpop.permute.xlu2 %11477  ;;  %v11430_v28 = vunpack.i.h.bf16 %v11428_v43  ;;  %v11429_v13 = vunpack.i.l.bf16 %v11428_v43 }
 0x4e6   : > { %v3950_v53 = vsel %vm3948_vm12, %v11405_v52, %v11409_v36  ;;  %v3951_v15 = vsel %vm3948_vm12, %v11410_v14, %v11414_v41  ;;  %v11450_v41 = vunpack.i.h.bf16 %v14539_v61  ;;  %v11479_v39 = vunpack.i.l.bf16 %v14593_v42 }
 0x4e7   : > { %v3974_v60 = vsel %vm3748_vm6, %v3950_v53, 0.0  ;;  %v3975_v51 = vsel %vm3747_vm5, %v3951_v15, 0.0  ;;  %v3956_v9 = vsel %vm3948_vm12, %v11429_v13, %v11430_v28 }
 0x4e8   : > { %v3985_v3 = vpack.c.bf16 %v3974_v60, %v3973_v55  ;;  %v3986_v8 = vpack.c.bf16 %v3976_v26, %v3975_v51  ;;  %v3980_v21 = vsel %vm3748_vm6, %v3956_v9, 0.0  ;;  %v4070_v61 = vsel %vm4069_vm13, %v11449_v22, %v11450_v41 }
 0x4e9   : > { %11632 = vrot.lane.b32.xlu0 %v14591_v23, %s12353_s15 }
 0x4ea   : > { %3991 = vst [vmem:[#allocation3 + $0x210] sm:$0xff] %v3985_v3  ;;  %11652 = vrot.lane.b32.xlu1 %v14513_v30, %s12353_s15  ;;  %v4094_v3 = vsel %vm3747_vm5, %v4070_v61, 0.0 }
 0x4eb   : > { %3992 = vst [vmem:[#allocation3 + $0x218] sm:$0xff] %v3986_v8  ;;  %v11423_v33 = vpop.permute.xlu0 %11422  ;;  %11657 = vrot.lane.b32.xlu2 %v14529_v12, %s12353_s15  ;;  %v11465_v8 = vunpack.i.h.bf16 %v14567_v25 }
 0x4ec   : > { %v11425_v59 = vunpack.i.h.bf16 %v11423_v33  ;;  %v11424_v7 = vunpack.i.l.bf16 %v11423_v33  ;;  %v11443_v45 = vpop.permute.xlu1 %11442 }
 0x4ed   : > { %v14615_v6 = vpop.permute.xlu2 %11492  ;;  %v11445_v18 = vunpack.i.h.bf16 %v11443_v45  ;;  %v11444_v34 = vunpack.i.l.bf16 %v11443_v45  ;;  %v4074_v25 = vsel %vm4069_vm13, %v11464_v54, %v11465_v8 }
 0x4ee   : > { %v3954_v40 = vsel %vm3948_vm12, %v11420_v37, %v11424_v7  ;;  %v3955_v24 = vsel %vm3948_vm12, %v11425_v59, %v11429_v13  ;;  %v11494_v61 = vunpack.i.l.bf16 %v14615_v6 }
 0x4ef   : > { %v3978_v20 = vsel %vm3748_vm6, %v3954_v40, 0.0  ;;  %v3979_v4 = vsel %vm3747_vm5, %v3955_v24, 0.0  ;;  %v3960_v56 = vsel %vm3948_vm12, %v11444_v34, %v11445_v18 }
 0x4f0   : > { %v3987_v29 = vpack.c.bf16 %v3978_v20, %v3977_v27  ;;  %v3988_v52 = vpack.c.bf16 %v3980_v21, %v3979_v4  ;;  %v3984_v46 = vsel %vm3748_vm6, %v3960_v56, 0.0 }
 0x4f1   : > { %11647 = vrot.lane.b32.xlu0 %v14537_v57, %s12353_s15 }
 0x4f2   : > { %3993 = vst [vmem:[#allocation3 + $0x220] sm:$0xff] %v3987_v29  ;;  %11667 = vrot.lane.b32.xlu1 %v14541_v63, %s12353_s15  ;;  %v4098_v29 = vsel %vm3747_vm5, %v4074_v25, 0.0 }
 0x4f3   : > { %3994 = vst [vmem:[#allocation3 + $0x228] sm:$0xff] %v3988_v52  ;;  %v11438_v58 = vpop.permute.xlu0 %11437  ;;  %11672 = vrot.lane.b32.xlu2 %v14557_v19, %s12354_s16  ;;  %v11480_v52 = vunpack.i.h.bf16 %v14593_v42 }
 0x4f4   : > { %v11440_v47 = vunpack.i.h.bf16 %v11438_v58  ;;  %v11439_v62 = vunpack.i.l.bf16 %v11438_v58  ;;  %v11458_v50 = vpop.permute.xlu1 %11457 }
 0x4f5   : > { %v14637_v17 = vpop.permute.xlu2 %11507  ;;  %v11460_v55 = vunpack.i.h.bf16 %v11458_v50  ;;  %v11459_v37 = vunpack.i.l.bf16 %v11458_v50  ;;  %v4078_v42 = vsel %vm4069_vm13, %v11479_v39, %v11480_v52 }
 0x4f6   : > { %v3958_v38 = vsel %vm3948_vm12, %v11435_v32, %v11439_v62  ;;  %v3959_v49 = vsel %vm3948_vm12, %v11440_v47, %v11444_v34  ;;  %v11509_v25 = vunpack.i.l.bf16 %v14637_v17  ;;  %vm5545_vm12 = vcmask 998400  }
 0x4f7   : > { %v3982_v14 = vsel %vm3748_vm6, %v3958_v38, 0.0  ;;  %v3983_v36 = vsel %vm3747_vm5, %v3959_v49, 0.0  ;;  %v4073_v60 = vsel %vm4069_vm13, %v11459_v37, %v11460_v55 }
 0x4f8   : > { %v3989_v44 = vpack.c.bf16 %v3982_v14, %v3981_v35  ;;  %v3990_v43 = vpack.c.bf16 %v3984_v46, %v3983_v36  ;;  %v4097_v7 = vsel %vm3748_vm6, %v4073_v60, 0.0 }
 0x4f9   : > { %11662 = vrot.lane.b32.xlu0 %v14565_v1, %s12353_s15 }
 0x4fa   : > { %3995 = vst [vmem:[#allocation3 + $0x230] sm:$0xff] %v3989_v44  ;;  %11682 = vrot.lane.b32.xlu1 %v14569_v48, %s12354_s16  ;;  %v4102_v44 = vsel %vm3747_vm5, %v4078_v42, 0.0 }
 0x4fb   : > { %3996 = vst [vmem:[#allocation3 + $0x238] sm:$0xff] %v3990_v43  ;;  %v11453_v53 = vpop.permute.xlu0 %11452  ;;  %11687 = vrot.lane.b32.xlu2 %v14501_v0, %s12354_s16  ;;  %v11495_v43 = vunpack.i.h.bf16 %v14615_v6 }
 0x4fc   : > { %v11455_v15 = vunpack.i.h.bf16 %v11453_v53  ;;  %v11454_v5 = vunpack.i.l.bf16 %v11453_v53  ;;  %v11473_v51 = vpop.permute.xlu1 %11472 }
 0x4fd   : > { %v14659_v26 = vpop.permute.xlu2 %11522  ;;  %v11475_v27 = vunpack.i.h.bf16 %v11473_v51  ;;  %v11474_v32 = vunpack.i.l.bf16 %v11473_v51  ;;  %v4191_v6 = vsel %vm4190_vm1, %v11494_v61, %v11495_v43 }
 0x4fe   : > { %v4071_v28 = vsel %vm4069_vm13, %v11450_v41, %v11454_v5  ;;  %v4072_v13 = vsel %vm4069_vm13, %v11455_v15, %v11459_v37  ;;  %v11524_v42 = vunpack.i.l.bf16 %v14659_v26 }
 0x4ff   : > { %v4095_v33 = vsel %vm3748_vm6, %v4071_v28, 0.0  ;;  %v4096_v59 = vsel %vm3747_vm5, %v4072_v13, 0.0  ;;  %v4077_v20 = vsel %vm4069_vm13, %v11474_v32, %v11475_v27 }
 0x500   : > { %v4106_v9 = vpack.c.bf16 %v4095_v33, %v4094_v3  ;;  %v4107_v45 = vpack.c.bf16 %v4097_v7, %v4096_v59  ;;  %v4101_v62 = vsel %vm3748_vm6, %v4077_v20, 0.0 }
 0x501   : > { %11677 = vrot.lane.b32.xlu0 %v14591_v23, %s12354_s16 }
 0x502   : > { %4112 = vst [vmem:[#allocation3 + $0x360] sm:$0xff] %v4106_v9  ;;  %11697 = vrot.lane.b32.xlu1 %v14513_v30, %s12354_s16  ;;  %v4215_v9 = vsel %vm3747_vm5, %v4191_v6, 0.0 }
 0x503   : > { %4113 = vst [vmem:[#allocation3 + $0x368] sm:$0xff] %v4107_v45  ;;  %v11468_v40 = vpop.permute.xlu0 %11467  ;;  %11702 = vrot.lane.b32.xlu2 %v14529_v12, %s12354_s16  ;;  %v11510_v45 = vunpack.i.h.bf16 %v14637_v17 }
 0x504   : > { %v11470_v24 = vunpack.i.h.bf16 %v11468_v40  ;;  %v11469_v31 = vunpack.i.l.bf16 %v11468_v40  ;;  %v11488_v4 = vpop.permute.xlu1 %11487 }
 0x505   : > { %v14681_v21 = vpop.permute.xlu2 %11537  ;;  %v11490_v35 = vunpack.i.h.bf16 %v11488_v4  ;;  %v11489_v41 = vunpack.i.l.bf16 %v11488_v4  ;;  %v4195_v17 = vsel %vm4190_vm1, %v11509_v25, %v11510_v45 }
 0x506   : > { %v4075_v18 = vsel %vm4069_vm13, %v11465_v8, %v11469_v31  ;;  %v4076_v34 = vsel %vm4069_vm13, %v11470_v24, %v11474_v32  ;;  %v11539_v6 = vunpack.i.l.bf16 %v14681_v21 }
 0x507   : > { %v4099_v58 = vsel %vm3748_vm6, %v4075_v18, 0.0  ;;  %v4100_v47 = vsel %vm3747_vm5, %v4076_v34, 0.0  ;;  %v4081_v14 = vsel %vm4069_vm13, %v11489_v41, %v11490_v35 }
 0x508   : > { %v4108_v56 = vpack.c.bf16 %v4099_v58, %v4098_v29  ;;  %v4109_v50 = vpack.c.bf16 %v4101_v62, %v4100_v47  ;;  %v4105_v5 = vsel %vm3748_vm6, %v4081_v14, 0.0 }
 0x509   : > { %11692 = vrot.lane.b32.xlu0 %v14537_v57, %s12354_s16 }
 0x50a   : > { %4114 = vst [vmem:[#allocation3 + $0x370] sm:$0xff] %v4108_v56  ;;  %11712 = vrot.lane.b32.xlu1 %v14541_v63, %s12354_s16  ;;  %v4219_v56 = vsel %vm3747_vm5, %v4195_v17, 0.0 }
 0x50b   : > { %4115 = vst [vmem:[#allocation3 + $0x378] sm:$0xff] %v4109_v50  ;;  %v11483_v38 = vpop.permute.xlu0 %11482  ;;  %11717 = vrot.lane.b32.xlu2 %v14557_v19, %s12355_s17  ;;  %v11525_v50 = vunpack.i.h.bf16 %v14659_v26 }
 0x50c   : > { %v11485_v49 = vunpack.i.h.bf16 %v11483_v38  ;;  %v11484_v22 = vunpack.i.l.bf16 %v11483_v38  ;;  %v11503_v36 = vpop.permute.xlu1 %11502 }
 0x50d   : > { %v14703_v46 = vpop.permute.xlu2 %11552  ;;  %v11505_v3 = vunpack.i.h.bf16 %v11503_v36  ;;  %v11504_v8 = vunpack.i.l.bf16 %v11503_v36  ;;  %v4199_v26 = vsel %vm4190_vm1, %v11524_v42, %v11525_v50 }
 0x50e   : > { %v4079_v55 = vsel %vm4069_vm13, %v11480_v52, %v11484_v22  ;;  %v4080_v37 = vsel %vm4069_vm13, %v11485_v49, %v11489_v41  ;;  %v11554_v17 = vunpack.i.l.bf16 %v14703_v46  ;;  %vm5666_vm13 = vcmask 867328  }
 0x50f   : > { %v4103_v53 = vsel %vm3748_vm6, %v4079_v55, 0.0  ;;  %v4104_v15 = vsel %vm3747_vm5, %v4080_v37, 0.0  ;;  %v4194_v33 = vsel %vm4190_vm1, %v11504_v8, %v11505_v3 }
 0x510   : > { %v4110_v60 = vpack.c.bf16 %v4103_v53, %v4102_v44  ;;  %v4111_v51 = vpack.c.bf16 %v4105_v5, %v4104_v15  ;;  %v4218_v31 = vsel %vm3748_vm6, %v4194_v33, 0.0 }
 0x511   : > { %11707 = vrot.lane.b32.xlu0 %v14565_v1, %s12354_s16 }
 0x512   : > { %4116 = vst [vmem:[#allocation3 + $0x380] sm:$0xff] %v4110_v60  ;;  %11727 = vrot.lane.b32.xlu1 %v14569_v48, %s12355_s17  ;;  %v4223_v60 = vsel %vm3747_vm5, %v4199_v26, 0.0 }
 0x513   : > { %4117 = vst [vmem:[#allocation3 + $0x388] sm:$0xff] %v4111_v51  ;;  %v11498_v28 = vpop.permute.xlu0 %11497  ;;  %11732 = vrot.lane.b32.xlu2 %v14501_v0, %s12355_s17  ;;  %v11540_v51 = vunpack.i.h.bf16 %v14681_v21 }
 0x514   : > { %v11500_v13 = vunpack.i.h.bf16 %v11498_v28  ;;  %v11499_v54 = vunpack.i.l.bf16 %v11498_v28  ;;  %v11518_v59 = vpop.permute.xlu1 %11517 }
 0x515   : > { %v14725_v7 = vpop.permute.xlu2 %11567  ;;  %v11520_v29 = vunpack.i.h.bf16 %v11518_v59  ;;  %v11519_v52 = vunpack.i.l.bf16 %v11518_v59  ;;  %v4312_v21 = vsel %vm4311_vm7, %v11539_v6, %v11540_v51 }
 0x516   : > { %v4192_v27 = vsel %vm4190_vm1, %v11495_v43, %v11499_v54  ;;  %v4193_v32 = vsel %vm4190_vm1, %v11500_v13, %v11504_v8  ;;  %v11569_v26 = vunpack.i.l.bf16 %v14725_v7 }
 0x517   : > { %v4216_v40 = vsel %vm3748_vm6, %v4192_v27, 0.0  ;;  %v4217_v24 = vsel %vm3747_vm5, %v4193_v32, 0.0  ;;  %v4198_v58 = vsel %vm4190_vm1, %v11519_v52, %v11520_v29 }
 0x518   : > { %v4227_v20 = vpack.c.bf16 %v4216_v40, %v4215_v9  ;;  %v4228_v4 = vpack.c.bf16 %v4218_v31, %v4217_v24  ;;  %v4222_v22 = vsel %vm3748_vm6, %v4198_v58, 0.0 }
 0x519   : > { %11722 = vrot.lane.b32.xlu0 %v14591_v23, %s12355_s17 }
 0x51a   : > { %4233 = vst [vmem:[#allocation3 + $0x4b0] sm:$0xff] %v4227_v20  ;;  %11742 = vrot.lane.b32.xlu1 %v14513_v30, %s12355_s17  ;;  %v4336_v20 = vsel %vm3747_vm5, %v4312_v21, 0.0 }
 0x51b   : > { %4234 = vst [vmem:[#allocation3 + $0x4b8] sm:$0xff] %v4228_v4  ;;  %v11513_v18 = vpop.permute.xlu0 %11512  ;;  %11747 = vrot.lane.b32.xlu2 %v14529_v12, %s12355_s17  ;;  %v11555_v4 = vunpack.i.h.bf16 %v14703_v46 }
 0x51c   : > { %v11515_v34 = vunpack.i.h.bf16 %v11513_v18  ;;  %v11514_v39 = vunpack.i.l.bf16 %v11513_v18  ;;  %v11533_v47 = vpop.permute.xlu1 %11532 }
 0x51d   : > { %v14747_v62 = vpop.permute.xlu2 %11582  ;;  %v11535_v44 = vunpack.i.h.bf16 %v11533_v47  ;;  %v11534_v43 = vunpack.i.l.bf16 %v11533_v47  ;;  %v4316_v46 = vsel %vm4311_vm7, %v11554_v17, %v11555_v4 }
 0x51e   : > { %v4196_v35 = vsel %vm4190_vm1, %v11510_v45, %v11514_v39  ;;  %v4197_v41 = vsel %vm4190_vm1, %v11515_v34, %v11519_v52  ;;  %v11584_v21 = vunpack.i.l.bf16 %v14747_v62 }
 0x51f   : > { %v4220_v38 = vsel %vm3748_vm6, %v4196_v35, 0.0  ;;  %v4221_v49 = vsel %vm3747_vm5, %v4197_v41, 0.0  ;;  %v4202_v53 = vsel %vm4190_vm1, %v11534_v43, %v11535_v44 }
 0x520   : > { %v4229_v14 = vpack.c.bf16 %v4220_v38, %v4219_v56  ;;  %v4230_v36 = vpack.c.bf16 %v4222_v22, %v4221_v49  ;;  %v4226_v54 = vsel %vm3748_vm6, %v4202_v53, 0.0 }
 0x521   : > { %11737 = vrot.lane.b32.xlu0 %v14537_v57, %s12355_s17 }
 0x522   : > { %4235 = vst [vmem:[#allocation3 + $0x4c0] sm:$0xff] %v4229_v14  ;;  %11757 = vrot.lane.b32.xlu1 %v14541_v63, %s12355_s17  ;;  %v4340_v14 = vsel %vm3747_vm5, %v4316_v46, 0.0 }
 0x523   : > { %4236 = vst [vmem:[#allocation3 + $0x4c8] sm:$0xff] %v4230_v36  ;;  %v11528_v55 = vpop.permute.xlu0 %11527  ;;  %11762 = vrot.lane.b32.xlu2 %v14557_v19, %s12356_s18  ;;  %v11570_v36 = vunpack.i.h.bf16 %v14725_v7 }
 0x524   : > { %v11530_v37 = vunpack.i.h.bf16 %v11528_v55  ;;  %v11529_v61 = vunpack.i.l.bf16 %v11528_v55  ;;  %v11548_v15 = vpop.permute.xlu1 %11547 }
 0x525   : > { %v14769_v5 = vpop.permute.xlu2 %11597  ;;  %v11550_v9 = vunpack.i.h.bf16 %v11548_v15  ;;  %v11549_v45 = vunpack.i.l.bf16 %v11548_v15  ;;  %v4320_v7 = vsel %vm4311_vm7, %v11569_v26, %v11570_v36 }
 0x526   : > { %v4200_v3 = vsel %vm4190_vm1, %v11525_v50, %v11529_v61  ;;  %v4201_v8 = vsel %vm4190_vm1, %v11530_v37, %v11534_v43  ;;  %v11599_v46 = vunpack.i.l.bf16 %v14769_v5 }
 0x527   : > { %v4224_v28 = vsel %vm3748_vm6, %v4200_v3, 0.0  ;;  %v4225_v13 = vsel %vm3747_vm5, %v4201_v8, 0.0  ;;  %v4315_v40 = vsel %vm4311_vm7, %v11549_v45, %v11550_v9 }
 0x528   : > { %v4231_v33 = vpack.c.bf16 %v4224_v28, %v4223_v60  ;;  %v4232_v59 = vpack.c.bf16 %v4226_v54, %v4225_v13  ;;  %v4339_v39 = vsel %vm3748_vm6, %v4315_v40, 0.0 }
 0x529   : > { %11752 = vrot.lane.b32.xlu0 %v14565_v1, %s12355_s17 }
 0x52a   : > { %4237 = vst [vmem:[#allocation3 + $0x4d0] sm:$0xff] %v4231_v33  ;;  %11772 = vrot.lane.b32.xlu1 %v14569_v48, %s12356_s18  ;;  %v4344_v33 = vsel %vm3747_vm5, %v4320_v7, 0.0 }
 0x52b   : > { %4238 = vst [vmem:[#allocation3 + $0x4d8] sm:$0xff] %v4232_v59  ;;  %v11543_v27 = vpop.permute.xlu0 %11542  ;;  %11777 = vrot.lane.b32.xlu2 %v14501_v0, %s12356_s18  ;;  %v11585_v59 = vunpack.i.h.bf16 %v14747_v62 }
 0x52c   : > { %v11545_v32 = vunpack.i.h.bf16 %v11543_v27  ;;  %v11544_v25 = vunpack.i.l.bf16 %v11543_v27  ;;  %v11563_v24 = vpop.permute.xlu1 %11562 }
 0x52d   : > { %v14791_v31 = vpop.permute.xlu2 %11612  ;;  %v11565_v56 = vunpack.i.h.bf16 %v11563_v24  ;;  %v11564_v50 = vunpack.i.l.bf16 %v11563_v24  ;;  %v4433_v62 = vsel %vm4432_vm8, %v11584_v21, %v11585_v59 }
 0x52e   : > { %v4313_v29 = vsel %vm4311_vm7, %v11540_v51, %v11544_v25  ;;  %v4314_v52 = vsel %vm4311_vm7, %v11545_v32, %v11549_v45 }
 0x52f   : > { %v4337_v18 = vsel %vm3748_vm6, %v4313_v29, 0.0  ;;  %v4338_v34 = vsel %vm3747_vm5, %v4314_v52, 0.0  ;;  %v4319_v38 = vsel %vm4311_vm7, %v11564_v50, %v11565_v56 }
 0x530   : > { %v4348_v58 = vpack.c.bf16 %v4337_v18, %v4336_v20  ;;  %v4349_v47 = vpack.c.bf16 %v4339_v39, %v4338_v34  ;;  %v4343_v61 = vsel %vm3748_vm6, %v4319_v38, 0.0 }
 0x531   : > { %11767 = vrot.lane.b32.xlu0 %v14591_v23, %s12356_s18 }
 0x532   : > { %4354 = vst [vmem:[#allocation3 + $0x600] sm:$0xff] %v4348_v58  ;;  %11787 = vrot.lane.b32.xlu1 %v14513_v30, %s12356_s18  ;;  %v4457_v58 = vsel %vm3747_vm5, %v4433_v62, 0.0 }
 0x533   : > { %4355 = vst [vmem:[#allocation3 + $0x608] sm:$0xff] %v4349_v47  ;;  %v11558_v35 = vpop.permute.xlu0 %11557  ;;  %11792 = vrot.lane.b32.xlu2 %v14529_v12, %s12356_s18  ;;  %v11600_v47 = vunpack.i.h.bf16 %v14769_v5 }
 0x534   : > { %v11560_v41 = vunpack.i.h.bf16 %v11558_v35  ;;  %v11559_v42 = vunpack.i.l.bf16 %v11558_v35  ;;  %v11578_v49 = vpop.permute.xlu1 %11577 }
 0x535   : > { %v14813_v22 = vpop.permute.xlu2 %11627  ;;  %v11580_v60 = vunpack.i.h.bf16 %v11578_v49  ;;  %v11579_v51 = vunpack.i.l.bf16 %v11578_v49  ;;  %v4437_v5 = vsel %vm4432_vm8, %v11599_v46, %v11600_v47 }
 0x536   : > { %v4317_v44 = vsel %vm4311_vm7, %v11555_v4, %v11559_v42  ;;  %v4318_v43 = vsel %vm4311_vm7, %v11560_v41, %v11564_v50 }
 0x537   : > { %v4341_v55 = vsel %vm3748_vm6, %v4317_v44, 0.0  ;;  %v4342_v37 = vsel %vm3747_vm5, %v4318_v43, 0.0  ;;  %v4323_v28 = vsel %vm4311_vm7, %v11579_v51, %v11580_v60  ;;  %v11614_v60 = vunpack.i.l.bf16 %v14791_v31 }
 0x538   : > { %v4350_v53 = vpack.c.bf16 %v4341_v55, %v4340_v14  ;;  %v4351_v15 = vpack.c.bf16 %v4343_v61, %v4342_v37  ;;  %v4347_v25 = vsel %vm3748_vm6, %v4323_v28, 0.0  ;;  %v4461_v61 = vsel %vm3747_vm5, %v4437_v5, 0.0 }
 0x539   : > { %11782 = vrot.lane.b32.xlu0 %v14537_v57, %s12356_s18 }
 0x53a   : > { %4356 = vst [vmem:[#allocation3 + $0x610] sm:$0xff] %v4350_v53  ;;  %11802 = vrot.lane.b32.xlu1 %v14541_v63, %s12356_s18  ;;  %v11615_v53 = vunpack.i.h.bf16 %v14791_v31 }
 0x53b   : > { %4357 = vst [vmem:[#allocation3 + $0x618] sm:$0xff] %v4351_v15  ;;  %v11573_v3 = vpop.permute.xlu0 %11572  ;;  %11807 = vrot.lane.b32.xlu2 %v14557_v19, %s12357_s19 }
 0x53c   : > { %v11575_v8 = vunpack.i.h.bf16 %v11573_v3  ;;  %v11574_v6 = vunpack.i.l.bf16 %v11573_v3  ;;  %v11593_v13 = vpop.permute.xlu1 %11592  ;;  %v4441_v31 = vsel %vm4432_vm8, %v11614_v60, %v11615_v53  ;;  %v5107_v60 = vld [vmem:[#allocation2 + $0x48] sm:$0xff] }
 0x53d   : > { %v14835_v54 = vpop.permute.xlu2 %11642  ;;  %v11595_v20 = vunpack.i.h.bf16 %v11593_v13  ;;  %v11594_v4 = vunpack.i.l.bf16 %v11593_v13 }
 0x53e   : > { %v4321_v9 = vsel %vm4311_vm7, %v11570_v36, %v11574_v6  ;;  %v4322_v45 = vsel %vm4311_vm7, %v11575_v8, %v11579_v51  ;;  %v11644_v5 = vunpack.i.l.bf16 %v14835_v54 }
 0x53f   : > { %v4345_v27 = vsel %vm3748_vm6, %v4321_v9, 0.0  ;;  %v4346_v32 = vsel %vm3747_vm5, %v4322_v45, 0.0  ;;  %v4436_v18 = vsel %vm4432_vm8, %v11594_v4, %v11595_v20 }
 0x540   : > { %v4352_v40 = vpack.c.bf16 %v4345_v27, %v4344_v33  ;;  %v4353_v24 = vpack.c.bf16 %v4347_v25, %v4346_v32  ;;  %v4460_v41 = vsel %vm3748_vm6, %v4436_v18, 0.0  ;;  %v5104_v25 = vld [vmem:[#allocation2 + $0x30] sm:$0xff] }
 0x541   : > { %11797 = vrot.lane.b32.xlu0 %v14565_v1, %s12356_s18  ;;  %s10077_s18 = sshll.u32 %s16354_s22, 5 }
 0x542   : > { %4358 = vst [vmem:[#allocation3 + $0x620] sm:$0xff] %v4352_v40  ;;  %11817 = vrot.lane.b32.xlu1 %v14569_v48, %s12357_s19  ;;  %v5105_v40 = vld [vmem:[#allocation2 + $0x38] sm:$0xff] }
 0x543   : > { %4359 = vst [vmem:[#allocation3 + $0x628] sm:$0xff] %v4353_v24  ;;  %v11588_v29 = vpop.permute.xlu0 %11587  ;;  %11822 = vrot.lane.b32.xlu2 %v14501_v0, %s12357_s19  ;;  %v14917_v18 = vpack.i.bf16 %v5105_v40, %v5104_v25 }
 0x544   : > { %v11590_v52 = vunpack.i.h.bf16 %v11588_v29  ;;  %v11589_v17 = vunpack.i.l.bf16 %v11588_v29  ;;  %v11608_v34 = vpop.permute.xlu1 %11607 }
 0x545   : > { %v14857_v39 = vpop.permute.xlu2 %11657  ;;  %v11610_v49 = vunpack.i.h.bf16 %v11608_v34  ;;  %v11609_v14 = vunpack.i.l.bf16 %v11608_v34  ;;  %v5109_v34 = vld [vmem:[#allocation2 + $0x58] sm:$0xff] }
 0x546   : > { %v4434_v56 = vsel %vm4432_vm8, %v11585_v59, %v11589_v17  ;;  %v4435_v50 = vsel %vm4432_vm8, %v11590_v52, %v11594_v4 }
 0x547   : > { %v4458_v0 = vsel %vm3748_vm6, %v4434_v56, 0.0  ;;  %v4459_v35 = vsel %vm3747_vm5, %v4435_v50, 0.0  ;;  %v4440_v26 = vsel %vm4432_vm8, %v11609_v14, %v11610_v49  ;;  %v5110_v49 = vld [vmem:[#allocation2 + $0x60] sm:$0xff] }
 0x548   : > { %v4469_v42 = vpack.c.bf16 %v4458_v0, %v4457_v58  ;;  %v4470_v38 = vpack.c.bf16 %v4460_v41, %v4459_v35  ;;  %v4464_v7 = vsel %vm3748_vm6, %v4440_v26, 0.0  ;;  %v11645_v41 = vunpack.i.h.bf16 %v14835_v54  ;;  %v5106_v54 = vld [vmem:[#allocation2 + $0x40] sm:$0xff] }
 0x549   : > { %11812 = vrot.lane.b32.xlu0 %v14591_v23, %s12357_s19 }
 0x54a   : > { %4475 = vst [vmem:[#allocation3 + $0x750] sm:$0xff] %v4469_v42  ;;  %11832 = vrot.lane.b32.xlu1 %v14513_v30, %s12357_s19 }
 0x54b   : > { %4476 = vst [vmem:[#allocation3 + $0x758] sm:$0xff] %v4470_v38  ;;  %v11603_v36 = vpop.permute.xlu0 %11602  ;;  %11837 = vrot.lane.b32.xlu2 %v14529_v12, %s12357_s19 }
 0x54c   : > { %v11605_v44 = vunpack.i.h.bf16 %v11603_v36  ;;  %v11604_v43 = vunpack.i.l.bf16 %v11603_v36  ;;  %v11623_v55 = vpop.permute.xlu1 %11622 }
 0x54d   : > { %v14879_v37 = vpop.permute.xlu2 %11672  ;;  %v11625_v6 = vunpack.i.h.bf16 %v11623_v55  ;;  %v11624_v28 = vunpack.i.l.bf16 %v11623_v55 }
 0x54e   : > { %v4438_v30 = vsel %vm4432_vm8, %v11600_v47, %v11604_v43  ;;  %v4439_v15 = vsel %vm4432_vm8, %v11605_v44, %v11609_v14  ;;  %v5111_v14 = vld [vmem:[#allocation2 + $0x68] sm:$0xff] }
 0x54f   : > { %v4462_v12 = vsel %vm3748_vm6, %v4438_v30, 0.0  ;;  %v4463_v51 = vsel %vm3747_vm5, %v4439_v15, 0.0  ;;  %v4444_v9 = vsel %vm4432_vm8, %v11624_v28, %v11625_v6  ;;  %v14943_v30 = vpack.i.bf16 %v5111_v14, %v5110_v49  ;;  %v5114_v15 = vld [vmem:[#allocation2 + $0x80] sm:$0xff] }
 0x550   : > { %v4471_v3 = vpack.c.bf16 %v4462_v12, %v4461_v61  ;;  %v4472_v8 = vpack.c.bf16 %v4464_v7, %v4463_v51  ;;  %v4468_v4 = vsel %vm3748_vm6, %v4444_v9, 0.0  ;;  %v5115_v12 = vld [vmem:[#allocation2 + $0x88] sm:$0xff]  ;;  %v4558_v7 = vsel %vm4553_vm14, %v11644_v5, %v11645_v41 }
 0x551   : > { %11827 = vrot.lane.b32.xlu0 %v14537_v57, %s12357_s19  ;;  %v4465_v57 = vsel %vm3747_vm5, %v4441_v31, 0.0  ;;  %v11674_v49 = vunpack.i.l.bf16 %v14879_v37 }
 0x552   : > { %4477 = vst [vmem:[#allocation3 + $0x760] sm:$0xff] %v4471_v3  ;;  %11847 = vrot.lane.b32.xlu1 %v14541_v63, %s12357_s19  ;;  %v11630_v63 = vunpack.i.h.bf16 %v14813_v22 }
 0x553   : > { %4478 = vst [vmem:[#allocation3 + $0x768] sm:$0xff] %v4472_v8  ;;  %v11618_v13 = vpop.permute.xlu0 %11617  ;;  %11852 = vrot.lane.b32.xlu2 %v14557_v19, %s12358_s20  ;;  %v11629_v19 = vunpack.i.l.bf16 %v14813_v22  ;;  %v5108_v22 = vld [vmem:[#allocation2 + $0x50] sm:$0xff] }
 0x554   : > { %v11620_v33 = vunpack.i.h.bf16 %v11618_v13  ;;  %v11619_v59 = vunpack.i.l.bf16 %v11618_v13  ;;  %v11638_v45 = vpop.permute.xlu1 %11637  ;;  %v14927_v35 = vpack.i.bf16 %v5109_v34, %v5108_v22  ;;  %v14955_v13 = vpack.i.bf16 %v5115_v12, %v5114_v15  ;;  %v5224_v22 = vld [vmem:[#allocation2 + $0x28] sm:$0xff]  ;;  %v5222_v15 = vld [vmem:[#allocation2 + $0x18] sm:$0xff] }
 0x555   : > { %v14901_v21 = vpop.permute.xlu2 %11687  ;;  %v11640_v52 = vunpack.i.h.bf16 %v11638_v45  ;;  %v11639_v17 = vunpack.i.l.bf16 %v11638_v45  ;;  %v4554_v58 = vsel %vm4553_vm14, %v11629_v19, %v11630_v63 }
 0x556   : > { %v4442_v27 = vsel %vm4432_vm8, %v11615_v53, %v11619_v59  ;;  %v4443_v32 = vsel %vm4432_vm8, %v11620_v33, %v11624_v28  ;;  %v14951_v28 = vpack.i.bf16 %v5107_v60, %v5106_v54  ;;  %v11660_v33 = vunpack.i.h.bf16 %v14857_v39 }
 0x557   : > { %v4466_v24 = vsel %vm3748_vm6, %v4442_v27, 0.0  ;;  %v4467_v20 = vsel %vm3747_vm5, %v4443_v32, 0.0  ;;  %v4557_v46 = vsel %vm4553_vm14, %v11639_v17, %v11640_v52  ;;  %v11659_v59 = vunpack.i.l.bf16 %v14857_v39  ;;  %v5113_v52 = vld [vmem:[#allocation2 + $0x78] sm:$0xff] }
 0x558   : > { %v4473_v62 = vpack.c.bf16 %v4466_v24, %v4465_v57  ;;  %v4474_v29 = vpack.c.bf16 %v4468_v4, %v4467_v20  ;;  %v4581_v43 = vsel %vm3748_vm6, %v4557_v46, 0.0  ;;  %v5220_v57 = vld [vmem:[#allocation2 + $0x8] sm:$0xff]  ;;  %v5219_v20 = vld [vmem:[#allocation2] sm:$0xff]  ;;  %vm5787_vm8 = vcmask 736256  }
 0x559   : > { %11842 = vrot.lane.b32.xlu0 %v14565_v1, %s12357_s19  ;;  %v14971_v4 = vpack.i.bf16 %v5220_v57, %v5219_v20 }
 0x55a   : > { %4479 = vst [vmem:[#allocation3 + $0x770] sm:$0xff] %v4473_v62  ;;  %11862 = vrot.lane.b32.xlu1 %v14569_v48, %s12358_s20  ;;  %v4578_v48 = vsel %vm3747_vm5, %v4554_v58, 0.0  ;;  %v5223_v62 = vld [vmem:[#allocation2 + $0x20] sm:$0xff] }
 0x55b   : > { %4480 = vst [vmem:[#allocation3 + $0x778] sm:$0xff] %v4474_v29  ;;  %v11633_v47 = vpop.permute.xlu0 %11632  ;;  %11867 = vrot.lane.b32.xlu2 %v14917_v18, %s12358_s20  ;;  %v4562_v29 = vsel %vm4553_vm14, %v11659_v59, %v11660_v33  ;;  %v14979_v46 = vpack.i.bf16 %v5224_v22, %v5223_v62 }
 0x55c   : > { %v11635_v56 = vunpack.i.h.bf16 %v11633_v47  ;;  %v11634_v50 = vunpack.i.l.bf16 %v11633_v47  ;;  %v11653_v1 = vpop.permute.xlu1 %11652 }
 0x55d   : > { %v14925_v0 = vpop.permute.xlu2 %11702  ;;  %v11655_v61 = vunpack.i.h.bf16 %v11653_v1  ;;  %v11654_v53 = vunpack.i.l.bf16 %v11653_v1  ;;  %v4586_v1 = vsel %vm3747_vm5, %v4562_v29, 0.0 }
 0x55e   : > { %v4555_v42 = vsel %vm4553_vm14, %v11630_v63, %v11634_v50  ;;  %v4556_v38 = vsel %vm4553_vm14, %v11635_v56, %v11639_v17  ;;  %v4582_v63 = vsel %vm3747_vm5, %v4558_v7, 0.0  ;;  %v5112_v56 = vld [vmem:[#allocation2 + $0x70] sm:$0xff] }
 0x55f   : > { %v4579_v36 = vsel %vm3748_vm6, %v4555_v42, 0.0  ;;  %v4580_v44 = vsel %vm3747_vm5, %v4556_v38, 0.0  ;;  %v11675_v38 = vunpack.i.h.bf16 %v14879_v37 }
 0x560   : > { %v4590_v26 = vpack.c.bf16 %v4579_v36, %v4578_v48  ;;  %v4591_v55 = vpack.c.bf16 %v4581_v43, %v4580_v44  ;;  %v14984_v48 = vadd.s32 2, %v12472_v10 }
 0x561   : > { %11857 = vrot.lane.b32.xlu0 %v14591_v23, %s12358_s20  ;;  %v4561_v23 = vsel %vm4553_vm14, %v11654_v53, %v11655_v61  ;;  %v4687_v2 = vsel %vm4686_vm15, %v11674_v49, %v11675_v38 }
 0x562   : > { %4596 = vst [vmem:[#allocation3 + $0x8a0] sm:$0xff] %v4590_v26  ;;  %11877 = vrot.lane.b32.xlu1 %v14927_v35, %s12358_s20  ;;  %v4585_v25 = vsel %vm3748_vm6, %v4561_v23, 0.0  ;;  %v15001_v26 = vadd.s32 2, %v12474_v11  ;;  %vm4606_vm9 = vcmp.lt.s32.totalorder %v14984_v48, 16 }
 0x563   : > { %4597 = vst [vmem:[#allocation3 + $0x8a8] sm:$0xff] %v4591_v55  ;;  %v11648_v51 = vpop.permute.xlu0 %11647  ;;  %11882 = vrot.lane.b32.xlu2 %v14943_v30, %s12358_s20  ;;  %v4711_v23 = vsel %vm4606_vm9, %v4687_v2, 0.0 }
 0x564   : > { %v11650_v3 = vunpack.i.h.bf16 %v11648_v51  ;;  %v11649_v8 = vunpack.i.l.bf16 %v11648_v51  ;;  %v11668_v6 = vpop.permute.xlu1 %11667  ;;  %vm4607_vm10 = vcmp.lt.s32.totalorder %v15001_v26, 16  ;;  %v5221_v51 = vld [vmem:[#allocation2 + $0x10] sm:$0xff] }
 0x565   : > { %v14953_v31 = vpop.permute.xlu2 %11717  ;;  %v11670_v39 = vunpack.i.h.bf16 %v11668_v6  ;;  %v11669_v24 = vunpack.i.l.bf16 %v11668_v6  ;;  %v11690_v6 = vunpack.i.h.bf16 %v14901_v21 }
 0x566   : > { %v4559_v9 = vsel %vm4553_vm14, %v11645_v41, %v11649_v8  ;;  %v4560_v45 = vsel %vm4553_vm14, %v11650_v3, %v11654_v53  ;;  %v14986_v41 = vpack.i.bf16 %v5113_v52, %v5112_v56  ;;  %v15013_v3 = vpack.i.bf16 %v5222_v15, %v5221_v51 }
 0x567   : > { %v4583_v27 = vsel %vm3748_vm6, %v4559_v9, 0.0  ;;  %v4584_v32 = vsel %vm3747_vm5, %v4560_v45, 0.0  ;;  %v4565_v47 = vsel %vm4553_vm14, %v11669_v24, %v11670_v39  ;;  %v11689_v9 = vunpack.i.l.bf16 %v14901_v21 }
 0x568   : > { %v4592_v40 = vpack.c.bf16 %v4583_v27, %v4582_v63  ;;  %v4593_v19 = vpack.c.bf16 %v4585_v25, %v4584_v32  ;;  %v4589_v43 = vsel %vm3748_vm6, %v4565_v47, 0.0 }
 0x569   : > { %11872 = vrot.lane.b32.xlu0 %v14951_v28, %s12358_s20  ;;  %v4691_v21 = vsel %vm4686_vm15, %v11689_v9, %v11690_v6 }
 0x56a   : > { %4598 = vst [vmem:[#allocation3 + $0x8b0] sm:$0xff] %v4592_v40  ;;  %11892 = vrot.lane.b32.xlu1 %v14955_v13, %s12358_s20  ;;  %v4715_v52 = vsel %vm4606_vm9, %v4691_v21, 0.0 }
 0x56b   : > { %4599 = vst [vmem:[#allocation3 + $0x8b8] sm:$0xff] %v4593_v19  ;;  %v11663_v17 = vpop.permute.xlu0 %11662  ;;  %11897 = vrot.lane.b32.xlu2 %v14971_v4, %s12359_s23 }
 0x56c   : > { %v11665_v34 = vunpack.i.h.bf16 %v11663_v17  ;;  %v11664_v58 = vunpack.i.l.bf16 %v11663_v17  ;;  %v11683_v50 = vpop.permute.xlu1 %11682  ;;  %v11705_v17 = vunpack.i.h.bf16 %v14925_v0 }
 0x56d   : > { %v14988_v42 = vpop.permute.xlu2 %11732  ;;  %v11685_v53 = vunpack.i.h.bf16 %v11683_v50  ;;  %v11684_v37 = vunpack.i.l.bf16 %v11683_v50 }
 0x56e   : > { %v4563_v14 = vsel %vm4553_vm14, %v11660_v33, %v11664_v58  ;;  %v4564_v5 = vsel %vm4553_vm14, %v11665_v34, %v11669_v24  ;;  %v11704_v58 = vunpack.i.l.bf16 %v14925_v0  ;;  %vm6029_vm14 = vcmask 474112  }
 0x56f   : > { %v4587_v36 = vsel %vm3748_vm6, %v4563_v14, 0.0  ;;  %v4588_v44 = vsel %vm3747_vm5, %v4564_v5, 0.0  ;;  %v4690_v12 = vsel %vm4686_vm15, %v11684_v37, %v11685_v53  ;;  %vm5291_vm5 = vcmask 351232  }
 0x570   : > { %v4594_v55 = vpack.c.bf16 %v4587_v36, %v4586_v1  ;;  %v4595_v61 = vpack.c.bf16 %v4589_v43, %v4588_v44  ;;  %v4714_v63 = vsel %vm4607_vm10, %v4690_v12, 0.0  ;;  %v9010_v36 = vld [vmem:[#allocation3 + $0xe0] sm:$0xf]  ;;  %v10129_v44 = vld [vmem:[#allocation3 + $0xe4] sm:$0xf0]  ;;  %v4695_v43 = vsel %vm4686_vm15, %v11704_v58, %v11705_v17 }
 0x571   : > { %11887 = vrot.lane.b32.xlu0 %v14986_v41, %s12358_s20  ;;  %v11720_v12 = vunpack.i.h.bf16 %v14953_v31  ;;  %vm5412_vm6 = vcmask 220160  }
 0x572   : > { %4600 = vst [vmem:[#allocation3 + $0x8c0] sm:$0xff] %v4594_v55  ;;  %11907 = vrot.lane.b32.xlu1 %v14979_v46, %s12359_s23 }
 0x573   : > { %4601 = vst [vmem:[#allocation3 + $0x8c8] sm:$0xff] %v4595_v61  ;;  %v11678_v16 = vpop.permute.xlu0 %11677  ;;  %11912 = vrot.lane.b32.xlu2 %v14917_v18, %s12359_s23 }
 0x574   : > { %v11680_v54 = vunpack.i.h.bf16 %v11678_v16  ;;  %v11679_v60 = vunpack.i.l.bf16 %v11678_v16  ;;  %v11698_v7 = vpop.permute.xlu1 %11697  ;;  %v9011_v16 = vor.u32 %v10129_v44, %v9010_v36  ;;  %v10121_v44 = vld [vmem:[#allocation3 + $0xa4] sm:$0xf0] }
 0x575   : > { %v15015_v8 = vpop.permute.xlu2 %11747  ;;  %v11700_v25 = vunpack.i.h.bf16 %v11698_v7  ;;  %v11699_v40 = vunpack.i.l.bf16 %v11698_v7 }
 0x576   : > { %v4688_v33 = vsel %vm4686_vm15, %v11675_v38, %v11679_v60  ;;  %v4689_v59 = vsel %vm4686_vm15, %v11680_v54, %v11684_v37  ;;  %v4719_v60 = vsel %vm4606_vm9, %v4695_v43, 0.0 }
 0x577   : > { %v4712_v45 = vsel %vm4607_vm10, %v4688_v33, 0.0  ;;  %v4713_v57 = vsel %vm4606_vm9, %v4689_v59, 0.0  ;;  %v4694_v20 = vsel %vm4686_vm15, %v11699_v40, %v11700_v25  ;;  %v10125_v25 = vld [vmem:[#allocation3 + $0xc4] sm:$0xf0] }
 0x578   : > { %v4723_v27 = vpack.c.bf16 %v4712_v45, %v4711_v23  ;;  %v4724_v32 = vpack.c.bf16 %v4714_v63, %v4713_v57  ;;  %v4718_v50 = vsel %vm4607_vm10, %v4694_v20, 0.0  ;;  %v11719_v23 = vunpack.i.l.bf16 %v14953_v31  ;;  %v8994_v31 = vld [vmem:[#allocation3 + $0xc0] sm:$0xf] }
 0x579   : > { %11902 = vrot.lane.b32.xlu0 %v15013_v3, %s12359_s23 }
 0x57a   : > { %4729 = vst [vmem:[#allocation3 + $0xf0] sm:$0xff] %v4723_v27  ;;  %11922 = vrot.lane.b32.xlu1 %v14927_v35, %s12359_s23  ;;  %v9002_v27 = vld [vmem:[#allocation3 + $0xd0] sm:$0xf] }
 0x57b   : > { %4730 = vst [vmem:[#allocation3 + $0xf8] sm:$0xff] %v4724_v32  ;;  %v11693_v19 = vpop.permute.xlu0 %11692  ;;  %11927 = vrot.lane.b32.xlu2 %v14943_v30, %s12359_s23  ;;  %v10127_v32 = vld [vmem:[#allocation3 + $0xd4] sm:$0xf0] }
 0x57c   : > { %v11695_v39 = vunpack.i.h.bf16 %v11693_v19  ;;  %v11694_v24 = vunpack.i.l.bf16 %v11693_v19  ;;  %v11713_v62 = vpop.permute.xlu1 %11712  ;;  %v9003_v19 = vor.u32 %v10127_v32, %v9002_v27 }
 0x57d   : > { %v15037_v29 = vpop.permute.xlu2 %11762  ;;  %v11715_v49 = vunpack.i.h.bf16 %v11713_v62  ;;  %v11714_v14 = vunpack.i.l.bf16 %v11713_v62 }
 0x57e   : > { %v4692_v22 = vsel %vm4686_vm15, %v11690_v6, %v11694_v24  ;;  %v4693_v34 = vsel %vm4686_vm15, %v11695_v39, %v11699_v40  ;;  %v4808_v40 = vsel %vm4807_vm2, %v11719_v23, %v11720_v12 }
 0x57f   : > { %v4716_v47 = vsel %vm4607_vm10, %v4692_v22, 0.0  ;;  %v4717_v56 = vsel %vm4606_vm9, %v4693_v34, 0.0  ;;  %v4698_v15 = vsel %vm4686_vm15, %v11714_v14, %v11715_v49  ;;  %v4832_v22 = vsel %vm4606_vm9, %v4808_v40, 0.0  ;;  %v10195_v40 = vld [vmem:[#allocation3 + $0x2f4] sm:$0xf0] }
 0x580   : > { %v4725_v1 = vpack.c.bf16 %v4716_v47, %v4715_v52  ;;  %v4726_v38 = vpack.c.bf16 %v4718_v50, %v4717_v56  ;;  %v4722_v59 = vsel %vm4607_vm10, %v4698_v15, 0.0  ;;  %v8995_v52 = vor.u32 %v10125_v25, %v8994_v31  ;;  %v8970_v31 = vld [vmem:[#allocation3 + $0x90] sm:$0xf]  ;;  %v8962_v25 = vld [vmem:[#allocation3 + $0x80] sm:$0xf] }
 0x581   : > { %11917 = vrot.lane.b32.xlu0 %v14951_v28, %s12359_s23  ;;  %v9018_v5 = vld [vmem:[#allocation3 + $0xf0] sm:$0xf]  ;;  %v11735_v34 = vunpack.i.h.bf16 %v14988_v42  ;;  %v11734_v56 = vunpack.i.l.bf16 %v14988_v42 }
 0x582   : > { %4731 = vst [vmem:[#allocation3 + $0x100] sm:$0xff] %v4725_v1  ;;  %v10131_v0 = vld [vmem:[#allocation3 + $0xf4] sm:$0xf0]  ;;  %11937 = vrot.lane.b32.xlu1 %v14955_v13, %s12359_s23  ;;  %v8986_v42 = vld [vmem:[#allocation3 + $0xb0] sm:$0xf] }
 0x583   : > { %4732 = vst [vmem:[#allocation3 + $0x108] sm:$0xff] %v4726_v38  ;;  %v11708_v55 = vpop.permute.xlu0 %11707  ;;  %v9019_v61 = vor.u32 %v10131_v0, %v9018_v5  ;;  %11942 = vrot.lane.b32.xlu2 %v14971_v4, %s12360_s24  ;;  %v10123_v0 = vld [vmem:[#allocation3 + $0xb4] sm:$0xf0]  ;;  %v4812_v43 = vsel %vm4807_vm2, %v11734_v56, %v11735_v34 }
 0x584   : > { %v11710_v53 = vunpack.i.h.bf16 %v11708_v55  ;;  %v11709_v37 = vunpack.i.l.bf16 %v11708_v55  ;;  %v11728_v2 = vpop.permute.xlu1 %11727 }
 0x585   : > { %8216 = vmatpush.bf16.msra.mxu3 %v9019_v61  ;;  %v15059_v54 = vpop.permute.xlu2 %11777  ;;  %v11730_v57 = vunpack.i.h.bf16 %v11728_v2  ;;  %v11729_v63 = vunpack.i.l.bf16 %v11728_v2  ;;  %v8987_v61 = vor.u32 %v10123_v0, %v8986_v42  ;;  %v8978_v2 = vld [vmem:[#allocation3 + $0xa0] sm:$0xf] }
 0x586   : > { %v4696_v51 = vsel %vm4686_vm15, %v11705_v17, %v11709_v37  ;;  %v4697_v7 = vsel %vm4686_vm15, %v11710_v53, %v11714_v14  ;;  %vm5908_vm15 = vcmask 605184  }
 0x587   : > { %v4720_v6 = vsel %vm4607_vm10, %v4696_v51, 0.0  ;;  %v4721_v33 = vsel %vm4606_vm9, %v4697_v7, 0.0  ;;  %v4811_v20 = vsel %vm4807_vm2, %v11729_v63, %v11730_v57  ;;  %v4836_v51 = vsel %vm4606_vm9, %v4812_v43, 0.0 }
 0x588   : > { %v4727_v9 = vpack.c.bf16 %v4720_v6, %v4719_v60  ;;  %v4728_v45 = vpack.c.bf16 %v4722_v59, %v4721_v33  ;;  %v4835_v38 = vsel %vm4607_vm10, %v4811_v20, 0.0  ;;  %v8979_v60 = vor.u32 %v10121_v44, %v8978_v2 }
 0x589   : > { %11932 = vrot.lane.b32.xlu0 %v14986_v41, %s12359_s23  ;;  %8217 = vmatpush.bf16.msra.mxu3 %v9011_v16  ;;  %v11750_v7 = vunpack.i.h.bf16 %v15015_v8  ;;  %v11749_v33 = vunpack.i.l.bf16 %v15015_v8  ;;  %v9274_v8 = vld [vmem:[#allocation3 + $0x2f0] sm:$0xf]  ;;  %s16217_s23 = scalar_lea.vmem %s16233_s6, %s10077_s18 }
 0x58a   : > { %4733 = vst [vmem:[#allocation3 + $0x110] sm:$0xff] %v4727_v9  ;;  %11952 = vrot.lane.b32.xlu1 %v14979_v46, %s12360_s24 }
 0x58b   : > { %4734 = vst [vmem:[#allocation3 + $0x118] sm:$0xff] %v4728_v45  ;;  %v11723_v21 = vpop.permute.xlu0 %11722  ;;  %11957 = vrot.lane.b32.xlu2 %v14917_v18, %s12360_s24 }
 0x58c   : > { %v11725_v39 = vunpack.i.h.bf16 %v11723_v21  ;;  %v11724_v24 = vunpack.i.l.bf16 %v11723_v21  ;;  %v11743_v62 = vpop.permute.xlu1 %11742  ;;  %v10119_v21 = vld [vmem:[#allocation3 + $0x94] sm:$0xf0] }
 0x58d   : > { %8218 = vmatpush.bf16.msra.mxu3 %v9003_v19  ;;  %v15081_v17 = vpop.permute.xlu2 %11792  ;;  %v11745_v5 = vunpack.i.h.bf16 %v11743_v62  ;;  %v11744_v36 = vunpack.i.l.bf16 %v11743_v62  ;;  %v10117_v19 = vld [vmem:[#allocation3 + $0x84] sm:$0xf0]  ;;  %v8971_v20 = vor.u32 %v10119_v21, %v8970_v31  ;;  %v9250_v21 = vld [vmem:[#allocation3 + $0x2c0] sm:$0xf] }
 0x58e   : > { %v4809_v58 = vsel %vm4807_vm2, %v11720_v12, %v11724_v24  ;;  %v4810_v47 = vsel %vm4807_vm2, %v11725_v39, %v11729_v63  ;;  %v4816_v39 = vsel %vm4807_vm2, %v11749_v33, %v11750_v7 }
 0x58f   : > { %v4833_v50 = vsel %vm4607_vm10, %v4809_v58, 0.0  ;;  %v4834_v1 = vsel %vm4606_vm9, %v4810_v47, 0.0  ;;  %v4815_v15 = vsel %vm4807_vm2, %v11744_v36, %v11745_v5  ;;  %v8963_v58 = vor.u32 %v10117_v19, %v8962_v25  ;;  %v10189_v19 = vld [vmem:[#allocation3 + $0x2c4] sm:$0xf0] }
 0x590   : > { %v4844_v49 = vpack.c.bf16 %v4833_v50, %v4832_v22  ;;  %v4845_v14 = vpack.c.bf16 %v4835_v38, %v4834_v1  ;;  %v4839_v45 = vsel %vm4607_vm10, %v4815_v15, 0.0  ;;  %v9275_v47 = vor.u32 %v10195_v40, %v9274_v8 }
 0x591   : > { %11947 = vrot.lane.b32.xlu0 %v15013_v3, %s12360_s24  ;;  %8219 = vmatpush.bf16.msra.mxu3 %v8995_v52  ;;  %v4840_v50 = vsel %vm4606_vm9, %v4816_v39, 0.0  ;;  %v11765_v1 = vunpack.i.h.bf16 %v15037_v29  ;;  %v10187_v39 = vld [vmem:[#allocation3 + $0x2b4] sm:$0xf0] }
 0x592   : > { %4850 = vst [vmem:[#allocation3 + $0x240] sm:$0xff] %v4844_v49  ;;  %11967 = vrot.lane.b32.xlu1 %v14927_v35, %s12360_s24 }
 0x593   : > { %4851 = vst [vmem:[#allocation3 + $0x248] sm:$0xff] %v4845_v14  ;;  %v11738_v55 = vpop.permute.xlu0 %11737  ;;  %11972 = vrot.lane.b32.xlu2 %v14943_v30, %s12360_s24  ;;  %v11764_v14 = vunpack.i.l.bf16 %v15037_v29  ;;  %v9258_v29 = vld [vmem:[#allocation3 + $0x2d0] sm:$0xf] }
 0x594   : > { %v11740_v53 = vunpack.i.h.bf16 %v11738_v55  ;;  %v11739_v37 = vunpack.i.l.bf16 %v11738_v55  ;;  %v11758_v16 = vpop.permute.xlu1 %11757 }
 0x595   : > { %8220 = vmatpush.bf16.msra.mxu3 %v8987_v61  ;;  %v15103_v12 = vpop.permute.xlu2 %11807  ;;  %v11760_v27 = vunpack.i.h.bf16 %v11758_v16  ;;  %v11759_v32 = vunpack.i.l.bf16 %v11758_v16  ;;  %v9266_v61 = vld [vmem:[#allocation3 + $0x2e0] sm:$0xf]  ;;  %v4929_v15 = vsel %vm4928_vm3, %v11764_v14, %v11765_v1 }
 0x596   : > { %v4813_v23 = vsel %vm4807_vm2, %v11735_v34, %v11739_v37  ;;  %v4814_v6 = vsel %vm4807_vm2, %v11740_v53, %v11744_v36  ;;  %v10193_v53 = vld [vmem:[#allocation3 + $0x2e4] sm:$0xf0]  ;;  %v10191_v37 = vld [vmem:[#allocation3 + $0x2d4] sm:$0xf0] }
 0x597   : > { %v4837_v59 = vsel %vm4607_vm10, %v4813_v23, 0.0  ;;  %v4838_v9 = vsel %vm4606_vm9, %v4814_v6, 0.0  ;;  %v4819_v22 = vsel %vm4807_vm2, %v11759_v32, %v11760_v27  ;;  %v9259_v6 = vor.u32 %v10191_v37, %v9258_v29 }
 0x598   : > { %v4846_v57 = vpack.c.bf16 %v4837_v59, %v4836_v51  ;;  %v4847_v63 = vpack.c.bf16 %v4839_v45, %v4838_v9  ;;  %v4843_v0 = vsel %vm4607_vm10, %v4819_v22, 0.0  ;;  %v4953_v59 = vsel %vm4606_vm9, %v4929_v15, 0.0 }
 0x599   : > { %11962 = vrot.lane.b32.xlu0 %v14951_v28, %s12360_s24  ;;  %8221 = vmatpush.bf16.msra.mxu3 %v8979_v60  ;;  %v11780_v9 = vunpack.i.h.bf16 %v15059_v54 }
 0x59a   : > { %4852 = vst [vmem:[#allocation3 + $0x250] sm:$0xff] %v4846_v57  ;;  %11982 = vrot.lane.b32.xlu1 %v14955_v13, %s12360_s24 }
 0x59b   : > { %4853 = vst [vmem:[#allocation3 + $0x258] sm:$0xff] %v4847_v63  ;;  %v11753_v24 = vpop.permute.xlu0 %11752  ;;  %11987 = vrot.lane.b32.xlu2 %v14971_v4, %s12361_s25 }
 0x59c   : > { %v11755_v62 = vunpack.i.h.bf16 %v11753_v24  ;;  %v11754_v52 = vunpack.i.l.bf16 %v11753_v24  ;;  %v11773_v34 = vpop.permute.xlu1 %11772 }
 0x59d   : > { %8222 = vmatpush.bf16.msra.mxu3 %v8971_v20  ;;  %v15125_v56 = vpop.permute.xlu2 %11822  ;;  %v11775_v43 = vunpack.i.h.bf16 %v11773_v34  ;;  %v11774_v55 = vunpack.i.l.bf16 %v11773_v34  ;;  %v9251_v34 = vor.u32 %v10189_v19, %v9250_v21 }
 0x59e   : > { %v4817_v38 = vsel %vm4807_vm2, %v11750_v7, %v11754_v52  ;;  %v4818_v49 = vsel %vm4807_vm2, %v11755_v62, %v11759_v32  ;;  %v9267_v7 = vor.u32 %v10193_v53, %v9266_v61  ;;  %v10185_v61 = vld [vmem:[#allocation3 + $0x2a4] sm:$0xf0] }
 0x59f   : > { %v4841_v5 = vsel %vm4607_vm10, %v4817_v38, 0.0  ;;  %v4842_v36 = vsel %vm4606_vm9, %v4818_v49, 0.0  ;;  %v4932_v51 = vsel %vm4928_vm3, %v11774_v55, %v11775_v43 }
 0x5a0   : > { %v4848_v42 = vpack.c.bf16 %v4841_v5, %v4840_v50  ;;  %v4849_v44 = vpack.c.bf16 %v4843_v0, %v4842_v36  ;;  %v4956_v32 = vsel %vm4607_vm10, %v4932_v51, 0.0  ;;  %v11810_v51 = vunpack.i.h.bf16 %v15103_v12 }
 0x5a1   : > { %11977 = vrot.lane.b32.xlu0 %v14986_v41, %s12360_s24  ;;  %8223 = vmatpush.bf16.msra.mxu3 %v8963_v58 }
 0x5a2   : > { %4854 = vst [vmem:[#allocation3 + $0x260] sm:$0xff] %v4848_v42  ;;  %11997 = vrot.lane.b32.xlu1 %v14979_v46, %s12361_s25 }
 0x5a3   : > { %4855 = vst [vmem:[#allocation3 + $0x268] sm:$0xff] %v4849_v44  ;;  %v11768_v2 = vpop.permute.xlu0 %11767  ;;  %12002 = vrot.lane.b32.xlu2 %v14917_v18, %s12361_s25  ;;  %v11779_v18 = vunpack.i.l.bf16 %v15059_v54  ;;  %v9242_v54 = vld [vmem:[#allocation3 + $0x2b0] sm:$0xf] }
 0x5a4   : > { %v11770_v16 = vunpack.i.h.bf16 %v11768_v2  ;;  %v11769_v60 = vunpack.i.l.bf16 %v11768_v2  ;;  %v11788_v23 = vpop.permute.xlu1 %11787 }
 0x5a5   : > { %8272 = vmatpush.bf16.msrb.mxu3 %v9275_v47  ;;  %v15147_v33 = vpop.permute.xlu2 %11837  ;;  %v11790_v8 = vunpack.i.h.bf16 %v11788_v23  ;;  %v11789_v40 = vunpack.i.l.bf16 %v11788_v23  ;;  %v4933_v24 = vsel %vm4928_vm3, %v11779_v18, %v11780_v9  ;;  %v9243_v47 = vor.u32 %v10187_v39, %v9242_v54 }
 0x5a6   : > { %v4930_v45 = vsel %vm4928_vm3, %v11765_v1, %v11769_v60  ;;  %v4931_v57 = vsel %vm4928_vm3, %v11770_v16, %v11774_v55  ;;  %v11795_v1 = vunpack.i.h.bf16 %v15081_v17  ;;  %v9234_v55 = vld [vmem:[#allocation3 + $0x2a0] sm:$0xf] }
 0x5a7   : > { %v4954_v63 = vsel %vm4607_vm10, %v4930_v45, 0.0  ;;  %v4955_v27 = vsel %vm4606_vm9, %v4931_v57, 0.0  ;;  %v4936_v22 = vsel %vm4928_vm3, %v11789_v40, %v11790_v8  ;;  %v9235_v2 = vor.u32 %v10185_v61, %v9234_v55 }
 0x5a8   : > { %v4965_v31 = vpack.c.bf16 %v4954_v63, %v4953_v59  ;;  %v4966_v25 = vpack.c.bf16 %v4956_v32, %v4955_v27  ;;  %v4960_v36 = vsel %vm4607_vm10, %v4936_v22, 0.0 }
 0x5a9   : > { %8273 = vmatpush.bf16.msrb.mxu3 %v9267_v7  ;;  %11992 = vrot.lane.b32.xlu0 %v15013_v3, %s12361_s25 }
 0x5aa   : > { %4971 = vst [vmem:[#allocation3 + $0x390] sm:$0xff] %v4965_v31  ;;  %12012 = vrot.lane.b32.xlu1 %v15013_v3, %s12362_s26  ;;  %v4957_v3 = vsel %vm4606_vm9, %v4933_v24, 0.0  ;;  %v11824_v24 = vunpack.i.l.bf16 %v15125_v56 }
 0x5ab   : > { %4972 = vst [vmem:[#allocation3 + $0x398] sm:$0xff] %v4966_v25  ;;  %v11783_v20 = vpop.permute.xlu0 %11782  ;;  %12017 = vrot.lane.b32.xlu2 %v14979_v46, %s12362_s26  ;;  %v11794_v46 = vunpack.i.l.bf16 %v15081_v17 }
 0x5ac   : > { %v11785_v62 = vunpack.i.h.bf16 %v11783_v20  ;;  %v11784_v52 = vunpack.i.l.bf16 %v11783_v20  ;;  %v11803_v58 = vpop.permute.xlu1 %11802 }
 0x5ad   : > { %8274 = vmatpush.bf16.msrb.mxu3 %v9259_v6  ;;  %v15169_v50 = vpop.permute.xlu2 %11852  ;;  %v11805_v44 = vunpack.i.h.bf16 %v11803_v58  ;;  %v11804_v43 = vunpack.i.l.bf16 %v11803_v58  ;;  %v4937_v17 = vsel %vm4928_vm3, %v11794_v46, %v11795_v1  ;;  %v11809_v6 = vunpack.i.l.bf16 %v15103_v12 }
 0x5ae   : > { %v4934_v38 = vsel %vm4928_vm3, %v11780_v9, %v11784_v52  ;;  %v4935_v49 = vsel %vm4928_vm3, %v11785_v62, %v11789_v40  ;;  %v4961_v60 = vsel %vm4606_vm9, %v4937_v17, 0.0 }
 0x5af   : > { %v4958_v14 = vsel %vm4607_vm10, %v4934_v38, 0.0  ;;  %v4959_v5 = vsel %vm4606_vm9, %v4935_v49, 0.0  ;;  %v4940_v15 = vsel %vm4928_vm3, %v11804_v43, %v11805_v44  ;;  %v5050_v12 = vsel %vm5049_vm4, %v11809_v6, %v11810_v51  ;;  %v5722_v44 = vld [vmem:[#allocation2 + $0x38] sm:$0xff] }
 0x5b0   : > { %v4967_v0 = vpack.c.bf16 %v4958_v14, %v4957_v3  ;;  %v4968_v42 = vpack.c.bf16 %v4960_v36, %v4959_v5  ;;  %v4964_v45 = vsel %vm4607_vm10, %v4940_v15, 0.0  ;;  %v5074_v19 = vsel %vm4606_vm9, %v5050_v12, 0.0 }
 0x5b1   : > { %8275 = vmatpush.bf16.msrb.mxu3 %v9251_v34  ;;  %12007 = vrot.lane.b32.xlu0 %v14971_v4, %s12362_s26  ;;  %v11840_v5 = vunpack.i.h.bf16 %v15147_v33 }
 0x5b2   : > { %4973 = vst [vmem:[#allocation3 + $0x3a0] sm:$0xff] %v4967_v0  ;;  %12027 = vrot.lane.b32.xlu1 %v14986_v41, %s12361_s25 }
 0x5b3   : > { %4974 = vst [vmem:[#allocation3 + $0x3a8] sm:$0xff] %v4968_v42  ;;  %v11798_v53 = vpop.permute.xlu0 %11797  ;;  %12032 = vrot.lane.b32.xlu2 %v14955_v13, %s12361_s25  ;;  %v5721_v42 = vld [vmem:[#allocation2 + $0x30] sm:$0xff] }
 0x5b4   : > { %v11800_v29 = vunpack.i.h.bf16 %v11798_v53  ;;  %v11799_v37 = vunpack.i.l.bf16 %v11798_v53  ;;  %v11818_v4 = vpop.permute.xlu1 %11817  ;;  %v15251_v15 = vpack.i.bf16 %v5722_v44, %v5721_v42 }
 0x5b5   : > { %8276 = vmatpush.bf16.msrb.mxu3 %v9243_v47  ;;  %v15191_v16 = vpop.permute.xlu2 %11867  ;;  %v11820_v63 = vunpack.i.h.bf16 %v11818_v4  ;;  %v11819_v27 = vunpack.i.l.bf16 %v11818_v4 }
 0x5b6   : > { %v4938_v7 = vsel %vm4928_vm3, %v11795_v1, %v11799_v37  ;;  %v4939_v23 = vsel %vm4928_vm3, %v11800_v29, %v11804_v43 }
 0x5b7   : > { %v4962_v59 = vsel %vm4607_vm10, %v4938_v7, 0.0  ;;  %v4963_v9 = vsel %vm4606_vm9, %v4939_v23, 0.0  ;;  %v5053_v8 = vsel %vm5049_vm4, %v11819_v27, %v11820_v63  ;;  %v11854_v63 = vunpack.i.l.bf16 %v15169_v50 }
 0x5b8   : > { %v4969_v57 = vpack.c.bf16 %v4962_v59, %v4961_v60  ;;  %v4970_v18 = vpack.c.bf16 %v4964_v45, %v4963_v9  ;;  %v5077_v52 = vsel %vm4607_vm10, %v5053_v8, 0.0  ;;  %v11855_v45 = vunpack.i.h.bf16 %v15169_v50 }
 0x5b9   : > { %8277 = vmatpush.bf16.msrb.mxu3 %v9235_v2  ;;  %12022 = vrot.lane.b32.xlu0 %v14943_v30, %s12361_s25  ;;  %v5726_v2 = vld [vmem:[#allocation2 + $0x58] sm:$0xff] }
 0x5ba   : > { %4975 = vst [vmem:[#allocation3 + $0x3b0] sm:$0xff] %v4969_v57  ;;  %12042 = vrot.lane.b32.xlu1 %v14927_v35, %s12361_s25  ;;  %v11825_v35 = vunpack.i.h.bf16 %v15125_v56  ;;  %v5171_v50 = vsel %vm5170_vm0, %v11854_v63, %v11855_v45  ;;  %v5718_v63 = vld [vmem:[#allocation2 + $0x18] sm:$0xff] }
 0x5bb   : > { %4976 = vst [vmem:[#allocation3 + $0x3b8] sm:$0xff] %v4970_v18  ;;  %v11813_v32 = vpop.permute.xlu0 %11812  ;;  %12047 = vrot.lane.b32.xlu2 %v14943_v30, %s12363_s27 }
 0x5bc   : > { %v11815_v31 = vunpack.i.h.bf16 %v11813_v32  ;;  %v11814_v25 = vunpack.i.l.bf16 %v11813_v32  ;;  %v11833_v40 = vpop.permute.xlu1 %11832  ;;  %v5054_v56 = vsel %vm5049_vm4, %v11824_v24, %v11825_v35 }
 0x5bd   : > { %v15213_v21 = vpop.permute.xlu2 %11882  ;;  %v11835_v58 = vunpack.i.h.bf16 %v11833_v40  ;;  %v11834_v47 = vunpack.i.l.bf16 %v11833_v40 }
 0x5be   : > { %v5051_v54 = vsel %vm5049_vm4, %v11810_v51, %v11814_v25  ;;  %v5052_v39 = vsel %vm5049_vm4, %v11815_v31, %v11819_v27 }
 0x5bf   : > { %v5075_v20 = vsel %vm4607_vm10, %v5051_v54, 0.0  ;;  %v5076_v62 = vsel %vm4606_vm9, %v5052_v39, 0.0  ;;  %v5057_v49 = vsel %vm5049_vm4, %v11834_v47, %v11835_v58 }
 0x5c0   : > { %v5086_v22 = vpack.c.bf16 %v5075_v20, %v5074_v19  ;;  %v5087_v34 = vpack.c.bf16 %v5077_v52, %v5076_v62  ;;  %v5081_v61 = vsel %vm4607_vm10, %v5057_v49, 0.0  ;;  %v5723_v19 = vld [vmem:[#allocation2 + $0x40] sm:$0xff] }
 0x5c1   : > { %12037 = vrot.lane.b32.xlu0 %v14951_v28, %s12361_s25  ;;  %v5078_v28 = vsel %vm4606_vm9, %v5054_v56, 0.0  ;;  %v5716_v56 = vld [vmem:[#allocation2 + $0x8] sm:$0xff] }
 0x5c2   : > { %5092 = vst [vmem:[#allocation3 + $0x4e0] sm:$0xff] %v5086_v22  ;;  %12057 = vrot.lane.b32.xlu1 %v14955_v13, %s12363_s27  ;;  %v5195_v22 = vsel %vm4606_vm9, %v5171_v50, 0.0 }
 0x5c3   : > { %5093 = vst [vmem:[#allocation3 + $0x4e8] sm:$0xff] %v5087_v34  ;;  %v11828_v3 = vpop.permute.xlu0 %11827  ;;  %12062 = vrot.lane.b32.xlu2 %v14943_v30, %s12362_s26  ;;  %v11839_v30 = vunpack.i.l.bf16 %v15147_v33  ;;  %v5725_v33 = vld [vmem:[#allocation2 + $0x50] sm:$0xff]  ;;  %v11870_v34 = vunpack.i.h.bf16 %v15191_v16 }
 0x5c4   : > { %v11830_v1 = vunpack.i.h.bf16 %v11828_v3  ;;  %v11829_v38 = vunpack.i.l.bf16 %v11828_v3  ;;  %v11848_v46 = vpop.permute.xlu1 %11847  ;;  %v15261_v9 = vpack.i.bf16 %v5726_v2, %v5725_v33  ;;  %v11869_v3 = vunpack.i.l.bf16 %v15191_v16  ;;  %v5719_v16 = vld [vmem:[#allocation2 + $0x20] sm:$0xff] }
 0x5c5   : > { %v15235_v14 = vpop.permute.xlu2 %11897  ;;  %v11850_v29 = vunpack.i.h.bf16 %v11848_v46  ;;  %v11849_v37 = vunpack.i.l.bf16 %v11848_v46  ;;  %v5058_v4 = vsel %vm5049_vm4, %v11839_v30, %v11840_v5  ;;  %v11885_v2 = vunpack.i.h.bf16 %v15213_v21 }
 0x5c6   : > { %v5055_v36 = vsel %vm5049_vm4, %v11825_v35, %v11829_v38  ;;  %v5056_v0 = vsel %vm5049_vm4, %v11830_v1, %v11834_v47  ;;  %v5724_v35 = vld [vmem:[#allocation2 + $0x48] sm:$0xff]  ;;  %v5175_v44 = vsel %vm5170_vm0, %v11869_v3, %v11870_v34  ;;  %v11900_v50 = vunpack.i.h.bf16 %v15235_v14 }
 0x5c7   : > { %v5079_v43 = vsel %vm4607_vm10, %v5055_v36, 0.0  ;;  %v5080_v55 = vsel %vm4606_vm9, %v5056_v0, 0.0  ;;  %v5061_v23 = vsel %vm5049_vm4, %v11849_v37, %v11850_v29  ;;  %v15283_v52 = vpack.i.bf16 %v5724_v35, %v5723_v19  ;;  %v5715_v0 = vld [vmem:[#allocation2] sm:$0xff] }
 0x5c8   : > { %v5088_v17 = vpack.c.bf16 %v5079_v43, %v5078_v28  ;;  %v5089_v53 = vpack.c.bf16 %v5081_v61, %v5080_v55  ;;  %v5085_v32 = vsel %vm4607_vm10, %v5061_v23, 0.0  ;;  %v15301_v42 = vpack.i.bf16 %v5716_v56, %v5715_v0 }
 0x5c9   : > { %12052 = vrot.lane.b32.xlu0 %v14986_v41, %s12363_s27  ;;  %v5199_v33 = vsel %vm4606_vm9, %v5175_v44, 0.0  ;;  %v5848_v44 = vld [vmem:[#allocation2 + $0x60] sm:$0xff] }
 0x5ca   : > { %5094 = vst [vmem:[#allocation3 + $0x4f0] sm:$0xff] %v5088_v17  ;;  %12072 = vrot.lane.b32.xlu1 %v14955_v13, %s12362_s26  ;;  %v5082_v13 = vsel %vm4606_vm9, %v5058_v4, 0.0 }
 0x5cb   : > { %5095 = vst [vmem:[#allocation3 + $0x4f8] sm:$0xff] %v5089_v53  ;;  %v11843_v60 = vpop.permute.xlu0 %11842  ;;  %12077 = vrot.lane.b32.xlu2 %v15251_v15, %s12363_s27  ;;  %v5720_v53 = vld [vmem:[#allocation2 + $0x28] sm:$0xff] }
 0x5cc   : > { %v11845_v51 = vunpack.i.h.bf16 %v11843_v60  ;;  %v11844_v7 = vunpack.i.l.bf16 %v11843_v60  ;;  %v11863_v6 = vpop.permute.xlu1 %11862 }
 0x5cd   : > { %v15259_v59 = vpop.permute.xlu2 %11912  ;;  %v11865_v8 = vunpack.i.h.bf16 %v11863_v6  ;;  %v11864_v40 = vunpack.i.l.bf16 %v11863_v6 }
 0x5ce   : > { %v5059_v57 = vsel %vm5049_vm4, %v11840_v5, %v11844_v7  ;;  %v5060_v18 = vsel %vm5049_vm4, %v11845_v51, %v11849_v37  ;;  %v15311_v37 = vpack.i.bf16 %v5720_v53, %v5719_v16  ;;  %v11884_v51 = vunpack.i.l.bf16 %v15213_v21 }
 0x5cf   : > { %v5083_v27 = vsel %vm4607_vm10, %v5059_v57, 0.0  ;;  %v5084_v12 = vsel %vm4606_vm9, %v5060_v18, 0.0  ;;  %v5174_v20 = vsel %vm5170_vm0, %v11864_v40, %v11865_v8 }
 0x5d0   : > { %v5090_v31 = vpack.c.bf16 %v5083_v27, %v5082_v13  ;;  %v5091_v25 = vpack.c.bf16 %v5085_v32, %v5084_v12  ;;  %v5198_v49 = vsel %vm4607_vm10, %v5174_v20, 0.0  ;;  %v5179_v21 = vsel %vm5170_vm0, %v11884_v51, %v11885_v2  ;;  %v5853_v51 = vld [vmem:[#allocation2 + $0x88] sm:$0xff] }
 0x5d1   : > { %12067 = vrot.lane.b32.xlu0 %v14986_v41, %s12362_s26  ;;  %v5203_v35 = vsel %vm4606_vm9, %v5179_v21, 0.0 }
 0x5d2   : > { %5096 = vst [vmem:[#allocation3 + $0x500] sm:$0xff] %v5090_v31  ;;  %12087 = vrot.lane.b32.xlu1 %v15261_v9, %s12363_s27 }
 0x5d3   : > { %5097 = vst [vmem:[#allocation3 + $0x508] sm:$0xff] %v5091_v25  ;;  %v11858_v54 = vpop.permute.xlu0 %11857  ;;  %12092 = vrot.lane.b32.xlu2 %v15251_v15, %s12362_s26  ;;  %v5717_v25 = vld [vmem:[#allocation2 + $0x10] sm:$0xff] }
 0x5d4   : > { %v11860_v39 = vunpack.i.h.bf16 %v11858_v54  ;;  %v11859_v24 = vunpack.i.l.bf16 %v11858_v54  ;;  %v11878_v62 = vpop.permute.xlu1 %11877 }
 0x5d5   : > { %v15285_v41 = vpop.permute.xlu2 %11927  ;;  %v11880_v5 = vunpack.i.h.bf16 %v11878_v62  ;;  %v11879_v36 = vunpack.i.l.bf16 %v11878_v62 }
 0x5d6   : > { %v5172_v58 = vsel %vm5170_vm0, %v11855_v45, %v11859_v24  ;;  %v5173_v47 = vsel %vm5170_vm0, %v11860_v39, %v11864_v40  ;;  %v15333_v40 = vpack.i.bf16 %v5718_v63, %v5717_v25  ;;  %v11899_v24 = vunpack.i.l.bf16 %v15235_v14 }
 0x5d7   : > { %v5196_v1 = vsel %vm4607_vm10, %v5172_v58, 0.0  ;;  %v5197_v38 = vsel %vm4606_vm9, %v5173_v47, 0.0  ;;  %v5178_v61 = vsel %vm5170_vm0, %v11879_v36, %v11880_v5 }
 0x5d8   : > { %v5207_v46 = vpack.c.bf16 %v5196_v1, %v5195_v22  ;;  %v5208_v28 = vpack.c.bf16 %v5198_v49, %v5197_v38  ;;  %v5202_v6 = vsel %vm4607_vm10, %v5178_v61, 0.0  ;;  %v5292_v14 = vsel %vm5291_vm5, %v11899_v24, %v11900_v50 }
 0x5d9   : > { %12082 = vrot.lane.b32.xlu0 %v15283_v52, %s12363_s27  ;;  %v5316_v5 = vsel %vm4606_vm9, %v5292_v14, 0.0 }
 0x5da   : > { %5213 = vst [vmem:[#allocation3 + $0x630] sm:$0xff] %v5207_v46  ;;  %12102 = vrot.lane.b32.xlu1 %v15261_v9, %s12362_s26 }
 0x5db   : > { %5214 = vst [vmem:[#allocation3 + $0x638] sm:$0xff] %v5208_v28  ;;  %v11873_v30 = vpop.permute.xlu0 %11872  ;;  %12107 = vrot.lane.b32.xlu2 %v15301_v42, %s12363_s27 }
 0x5dc   : > { %v11875_v43 = vunpack.i.h.bf16 %v11873_v30  ;;  %v11874_v55 = vunpack.i.l.bf16 %v11873_v30  ;;  %v11893_v17 = vpop.permute.xlu1 %11892  ;;  %v5849_v30 = vld [vmem:[#allocation2 + $0x68] sm:$0xff] }
 0x5dd   : > { %v15309_v29 = vpop.permute.xlu2 %11942  ;;  %v11895_v57 = vunpack.i.h.bf16 %v11893_v17  ;;  %v11894_v18 = vunpack.i.l.bf16 %v11893_v17 }
 0x5de   : > { %v5176_v4 = vsel %vm5170_vm0, %v11870_v34, %v11874_v55  ;;  %v5177_v60 = vsel %vm5170_vm0, %v11875_v43, %v11879_v36  ;;  %v11915_v36 = vunpack.i.h.bf16 %v15259_v59  ;;  %v11914_v43 = vunpack.i.l.bf16 %v15259_v59  ;;  %v5852_v59 = vld [vmem:[#allocation2 + $0x80] sm:$0xff] }
 0x5df   : > { %v5200_v7 = vsel %vm4607_vm10, %v5176_v4, 0.0  ;;  %v5201_v23 = vsel %vm4606_vm9, %v5177_v60, 0.0  ;;  %v5182_v31 = vsel %vm5170_vm0, %v11894_v18, %v11895_v57  ;;  %v15373_v60 = vpack.i.bf16 %v5849_v30, %v5848_v44 }
 0x5e0   : > { %v5209_v13 = vpack.c.bf16 %v5200_v7, %v5199_v33  ;;  %v5210_v45 = vpack.c.bf16 %v5202_v6, %v5201_v23  ;;  %v5206_v22 = vsel %vm4607_vm10, %v5182_v31, 0.0  ;;  %v5296_v7 = vsel %vm5291_vm5, %v11914_v43, %v11915_v36 }
 0x5e1   : > { %12097 = vrot.lane.b32.xlu0 %v15283_v52, %s12362_s26  ;;  %v15383_v63 = vpack.i.bf16 %v5853_v51, %v5852_v59  ;;  %v5320_v21 = vsel %vm4606_vm9, %v5296_v7, 0.0  ;;  %v11929_v31 = vunpack.i.l.bf16 %v15285_v41 }
 0x5e2   : > { %5215 = vst [vmem:[#allocation3 + $0x640] sm:$0xff] %v5209_v13  ;;  %12117 = vrot.lane.b32.xlu1 %v15311_v37, %s12363_s27 }
 0x5e3   : > { %5216 = vst [vmem:[#allocation3 + $0x648] sm:$0xff] %v5210_v45  ;;  %v11888_v27 = vpop.permute.xlu0 %11887  ;;  %12122 = vrot.lane.b32.xlu2 %v15251_v15, %s12364_s28 }
 0x5e4   : > { %v11890_v12 = vunpack.i.h.bf16 %v11888_v27  ;;  %v11889_v32 = vunpack.i.l.bf16 %v11888_v27  ;;  %v11908_v8 = vpop.permute.xlu1 %11907  ;;  %v11930_v27 = vunpack.i.h.bf16 %v15285_v41 }
 0x5e5   : > { %v15335_v19 = vpop.permute.xlu2 %11957  ;;  %v11910_v47 = vunpack.i.h.bf16 %v11908_v8  ;;  %v11909_v56 = vunpack.i.l.bf16 %v11908_v8 }
 0x5e6   : > { %v5180_v54 = vsel %vm5170_vm0, %v11885_v2, %v11889_v32  ;;  %v5181_v39 = vsel %vm5170_vm0, %v11890_v12, %v11894_v18  ;;  %v5300_v41 = vsel %vm5291_vm5, %v11929_v31, %v11930_v27  ;;  %v11960_v51 = vunpack.i.h.bf16 %v15335_v19 }
 0x5e7   : > { %v5204_v20 = vsel %vm4607_vm10, %v5180_v54, 0.0  ;;  %v5205_v62 = vsel %vm4606_vm9, %v5181_v39, 0.0  ;;  %v5295_v49 = vsel %vm5291_vm5, %v11909_v56, %v11910_v47  ;;  %v5850_v47 = vld [vmem:[#allocation2 + $0x70] sm:$0xff] }
 0x5e8   : > { %v5211_v34 = vpack.c.bf16 %v5204_v20, %v5203_v35  ;;  %v5212_v58 = vpack.c.bf16 %v5206_v22, %v5205_v62  ;;  %v5319_v17 = vsel %vm4607_vm10, %v5295_v49, 0.0  ;;  %v5851_v20 = vld [vmem:[#allocation2 + $0x78] sm:$0xff] }
 0x5e9   : > { %12112 = vrot.lane.b32.xlu0 %v15333_v40, %s12363_s27  ;;  %v15405_v14 = vpack.i.bf16 %v5851_v20, %v5850_v47 }
 0x5ea   : > { %5217 = vst [vmem:[#allocation3 + $0x650] sm:$0xff] %v5211_v34  ;;  %12132 = vrot.lane.b32.xlu1 %v15261_v9, %s12364_s28 }
 0x5eb   : > { %5218 = vst [vmem:[#allocation3 + $0x658] sm:$0xff] %v5212_v58  ;;  %v11903_v3 = vpop.permute.xlu0 %11902  ;;  %12137 = vrot.lane.b32.xlu2 %v15301_v42, %s12364_s28 }
 0x5ec   : > { %v11905_v1 = vunpack.i.h.bf16 %v11903_v3  ;;  %v11904_v38 = vunpack.i.l.bf16 %v11903_v3  ;;  %v11923_v46 = vpop.permute.xlu1 %11922 }
 0x5ed   : > { %v15357_v28 = vpop.permute.xlu2 %11972  ;;  %v11925_v2 = vunpack.i.h.bf16 %v11923_v46  ;;  %v11924_v4 = vunpack.i.l.bf16 %v11923_v46 }
 0x5ee   : > { %v5293_v0 = vsel %vm5291_vm5, %v11900_v50, %v11904_v38  ;;  %v5294_v16 = vsel %vm5291_vm5, %v11905_v1, %v11909_v56  ;;  %v5324_v1 = vsel %vm4606_vm9, %v5300_v41, 0.0  ;;  %v11945_v38 = vunpack.i.h.bf16 %v15309_v29 }
 0x5ef   : > { %v5317_v55 = vsel %vm4607_vm10, %v5293_v0, 0.0  ;;  %v5318_v61 = vsel %vm4606_vm9, %v5294_v16, 0.0  ;;  %v5299_v45 = vsel %vm5291_vm5, %v11924_v4, %v11925_v2 }
 0x5f0   : > { %v5328_v53 = vpack.c.bf16 %v5317_v55, %v5316_v5  ;;  %v5329_v33 = vpack.c.bf16 %v5319_v17, %v5318_v61  ;;  %v5323_v35 = vsel %vm4607_vm10, %v5299_v45, 0.0  ;;  %v11944_v5 = vunpack.i.l.bf16 %v15309_v29 }
 0x5f1   : > { %12127 = vrot.lane.b32.xlu0 %v15283_v52, %s12364_s28 }
 0x5f2   : > { %5334 = vst [vmem:[#allocation3 + $0x780] sm:$0xff] %v5328_v53  ;;  %12147 = vrot.lane.b32.xlu1 %v15311_v37, %s12364_s28  ;;  %v5413_v29 = vsel %vm5412_vm6, %v11944_v5, %v11945_v38 }
 0x5f3   : > { %5335 = vst [vmem:[#allocation3 + $0x788] sm:$0xff] %v5329_v33  ;;  %v11918_v23 = vpop.permute.xlu0 %11917  ;;  %12152 = vrot.lane.b32.xlu2 %v15373_v60, %s12365_s29  ;;  %v5437_v59 = vsel %vm4606_vm9, %v5413_v29, 0.0 }
 0x5f4   : > { %v11920_v6 = vunpack.i.h.bf16 %v11918_v23  ;;  %v11919_v13 = vunpack.i.l.bf16 %v11918_v23  ;;  %v11938_v57 = vpop.permute.xlu1 %11937 }
 0x5f5   : > { %v15381_v18 = vpop.permute.xlu2 %11987  ;;  %v11940_v39 = vunpack.i.h.bf16 %v11938_v57  ;;  %v11939_v24 = vunpack.i.l.bf16 %v11938_v57 }
 0x5f6   : > { %v5297_v12 = vsel %vm5291_vm5, %v11915_v36, %v11919_v13  ;;  %v5298_v32 = vsel %vm5291_vm5, %v11920_v6, %v11924_v4  ;;  %v11959_v6 = vunpack.i.l.bf16 %v15335_v19 }
 0x5f7   : > { %v5321_v25 = vsel %vm4607_vm10, %v5297_v12, 0.0  ;;  %v5322_v8 = vsel %vm4606_vm9, %v5298_v32, 0.0  ;;  %v5303_v58 = vsel %vm5291_vm5, %v11939_v24, %v11940_v39 }
 0x5f8   : > { %v5330_v50 = vpack.c.bf16 %v5321_v25, %v5320_v21  ;;  %v5331_v54 = vpack.c.bf16 %v5323_v35, %v5322_v8  ;;  %v5327_v16 = vsel %vm4607_vm10, %v5303_v58, 0.0  ;;  %v5417_v19 = vsel %vm5412_vm6, %v11959_v6, %v11960_v51 }
 0x5f9   : > { %12142 = vrot.lane.b32.xlu0 %v15333_v40, %s12364_s28  ;;  %v5441_v39 = vsel %vm4606_vm9, %v5417_v19, 0.0 }
 0x5fa   : > { %5336 = vst [vmem:[#allocation3 + $0x790] sm:$0xff] %v5330_v50  ;;  %12162 = vrot.lane.b32.xlu1 %v15383_v63, %s12365_s29 }
 0x5fb   : > { %5337 = vst [vmem:[#allocation3 + $0x798] sm:$0xff] %v5331_v54  ;;  %v11933_v62 = vpop.permute.xlu0 %11932  ;;  %12167 = vrot.lane.b32.xlu2 %v15251_v15, %s12365_s29 }
 0x5fc   : > { %v11935_v22 = vunpack.i.h.bf16 %v11933_v62  ;;  %v11934_v34 = vunpack.i.l.bf16 %v11933_v62  ;;  %v11953_v56 = vpop.permute.xlu1 %11952  ;;  %v11974_v62 = vunpack.i.l.bf16 %v15357_v28 }
 0x5fd   : > { %v15407_v3 = vpop.permute.xlu2 %12002  ;;  %v11955_v43 = vunpack.i.h.bf16 %v11953_v56  ;;  %v11954_v55 = vunpack.i.l.bf16 %v11953_v56 }
 0x5fe   : > { %v5301_v49 = vsel %vm5291_vm5, %v11930_v27, %v11934_v34  ;;  %v5302_v46 = vsel %vm5291_vm5, %v11935_v22, %v11939_v24  ;;  %v11975_v24 = vunpack.i.h.bf16 %v15357_v28 }
 0x5ff   : > { %v5325_v36 = vsel %vm4607_vm10, %v5301_v49, 0.0  ;;  %v5326_v0 = vsel %vm4606_vm9, %v5302_v46, 0.0  ;;  %v5416_v33 = vsel %vm5412_vm6, %v11954_v55, %v11955_v43  ;;  %v11990_v43 = vunpack.i.h.bf16 %v15381_v18 }
 0x600   : > { %v5332_v44 = vpack.c.bf16 %v5325_v36, %v5324_v1  ;;  %v5333_v30 = vpack.c.bf16 %v5327_v16, %v5326_v0  ;;  %v5440_v57 = vsel %vm4607_vm10, %v5416_v33, 0.0  ;;  %v5421_v28 = vsel %vm5412_vm6, %v11974_v62, %v11975_v24 }
 0x601   : > { %12157 = vrot.lane.b32.xlu0 %v15405_v14, %s12365_s29  ;;  %v15474_v16 = vadd.s32 3, %v12472_v10 }
 0x602   : > { %5338 = vst [vmem:[#allocation3 + $0x7a0] sm:$0xff] %v5332_v44  ;;  %12177 = vrot.lane.b32.xlu1 %v15261_v9, %s12365_s29 }
 0x603   : > { %5339 = vst [vmem:[#allocation3 + $0x7a8] sm:$0xff] %v5333_v30  ;;  %v11948_v61 = vpop.permute.xlu0 %11947  ;;  %12182 = vrot.lane.b32.xlu2 %v15301_v42, %s12365_s29  ;;  %v5445_v30 = vsel %vm4606_vm9, %v5421_v28, 0.0  ;;  %vm5465_vm1 = vcmp.lt.s32.totalorder %v15474_v16, 16  ;;  %v10144_v16 = vld [vmem:[#allocation3 + $0x164] sm:$0xf] }
 0x604   : > { %v11950_v17 = vunpack.i.h.bf16 %v11948_v61  ;;  %v11949_v53 = vunpack.i.l.bf16 %v11948_v61  ;;  %v11968_v2 = vpop.permute.xlu1 %11967  ;;  %v11989_v61 = vunpack.i.l.bf16 %v15381_v18 }
 0x605   : > { %v15429_v4 = vpop.permute.xlu2 %12017  ;;  %v11970_v12 = vunpack.i.h.bf16 %v11968_v2  ;;  %v11969_v32 = vunpack.i.l.bf16 %v11968_v2 }
 0x606   : > { %v5414_v7 = vsel %vm5412_vm6, %v11945_v38, %v11949_v53  ;;  %v5415_v23 = vsel %vm5412_vm6, %v11950_v17, %v11954_v55  ;;  %v12019_v18 = vunpack.i.l.bf16 %v15429_v4  ;;  %v5546_v48 = vsel %vm5545_vm12, %v11989_v61, %v11990_v43 }
 0x607   : > { %v5438_v13 = vsel %vm4607_vm10, %v5414_v7, 0.0  ;;  %v5439_v45 = vsel %vm4606_vm9, %v5415_v23, 0.0  ;;  %v5420_v35 = vsel %vm5412_vm6, %v11969_v32, %v11970_v12  ;;  %v15491_v7 = vadd.s32 3, %v12474_v11 }
 0x608   : > { %v5449_v21 = vpack.c.bf16 %v5438_v13, %v5437_v59  ;;  %v5450_v27 = vpack.c.bf16 %v5440_v57, %v5439_v45  ;;  %v5444_v58 = vsel %vm4607_vm10, %v5420_v35, 0.0  ;;  %v12020_v23 = vunpack.i.h.bf16 %v15429_v4 }
 0x609   : > { %12172 = vrot.lane.b32.xlu0 %v15283_v52, %s12365_s29  ;;  %vm5466_vm7 = vcmp.lt.s32.totalorder %v15491_v7, 16 }
 0x60a   : > { %5455 = vst [vmem:[#allocation3 + $0x8d0] sm:$0xff] %v5449_v21  ;;  %12192 = vrot.lane.b32.xlu1 %v15311_v37, %s12365_s29  ;;  %v5670_v45 = vsel %vm5666_vm13, %v12019_v18, %v12020_v23 }
 0x60b   : > { %5456 = vst [vmem:[#allocation3 + $0x8d8] sm:$0xff] %v5450_v27  ;;  %v11963_v31 = vpop.permute.xlu0 %11962  ;;  %12197 = vrot.lane.b32.xlu2 %v15373_v60, %s12366_s30  ;;  %v5570_v27 = vsel %vm5465_vm1, %v5546_v48, 0.0  ;;  %v5694_v35 = vsel %vm5466_vm7, %v5670_v45, 0.0  ;;  %v9202_v45 = vld [vmem:[#allocation3 + $0x260] sm:$0xf] }
 0x60c   : > { %v11965_v25 = vunpack.i.h.bf16 %v11963_v31  ;;  %v11964_v8 = vunpack.i.l.bf16 %v11963_v31  ;;  %v11983_v50 = vpop.permute.xlu1 %11982 }
 0x60d   : > { %v15451_v54 = vpop.permute.xlu2 %12032  ;;  %v11985_v1 = vunpack.i.h.bf16 %v11983_v50  ;;  %v11984_v38 = vunpack.i.l.bf16 %v11983_v50 }
 0x60e   : > { %v5418_v20 = vsel %vm5412_vm6, %v11960_v51, %v11964_v8  ;;  %v5419_v41 = vsel %vm5412_vm6, %v11965_v25, %v11969_v32 }
 0x60f   : > { %v5442_v22 = vsel %vm4607_vm10, %v5418_v20, 0.0  ;;  %v5443_v34 = vsel %vm4606_vm9, %v5419_v41, 0.0  ;;  %v5424_v36 = vsel %vm5412_vm6, %v11984_v38, %v11985_v1  ;;  %v12035_v20 = vunpack.i.h.bf16 %v15451_v54 }
 0x610   : > { %v5451_v47 = vpack.c.bf16 %v5442_v22, %v5441_v39  ;;  %v5452_v56 = vpack.c.bf16 %v5444_v58, %v5443_v34  ;;  %v5448_v53 = vsel %vm4607_vm10, %v5424_v36, 0.0  ;;  %v12034_v41 = vunpack.i.l.bf16 %v15451_v54 }
 0x611   : > { %12187 = vrot.lane.b32.xlu0 %v15333_v40, %s12365_s29 }
 0x612   : > { %5457 = vst [vmem:[#allocation3 + $0x8e0] sm:$0xff] %v5451_v47  ;;  %12207 = vrot.lane.b32.xlu1 %v15383_v63, %s12366_s30  ;;  %v5557_v54 = vsel %vm5545_vm12, %v12034_v41, %v12035_v20  ;;  %v9194_v20 = vld [vmem:[#allocation3 + $0x250] sm:$0xf] }
 0x613   : > { %5458 = vst [vmem:[#allocation3 + $0x8e8] sm:$0xff] %v5452_v56  ;;  %v11978_v49 = vpop.permute.xlu0 %11977  ;;  %12212 = vrot.lane.b32.xlu2 %v15373_v60, %s12364_s28 }
 0x614   : > { %v11980_v46 = vunpack.i.h.bf16 %v11978_v49  ;;  %v11979_v5 = vunpack.i.l.bf16 %v11978_v49  ;;  %v11998_v0 = vpop.permute.xlu1 %11997 }
 0x615   : > { %v15476_v44 = vpop.permute.xlu2 %12047  ;;  %v12000_v59 = vunpack.i.h.bf16 %v11998_v0  ;;  %v11999_v51 = vunpack.i.l.bf16 %v11998_v0  ;;  %v5581_v0 = vsel %vm5466_vm7, %v5557_v54, 0.0 }
 0x616   : > { %v5422_v55 = vsel %vm5412_vm6, %v11975_v24, %v11979_v5  ;;  %v5423_v29 = vsel %vm5412_vm6, %v11980_v46, %v11984_v38 }
 0x617   : > { %v5446_v17 = vsel %vm4607_vm10, %v5422_v55, 0.0  ;;  %v5447_v10 = vsel %vm4606_vm9, %v5423_v29, 0.0  ;;  %v5549_v4 = vsel %vm5545_vm12, %v11999_v51, %v12000_v59  ;;  %vm6150_vm9 = vcmask 343040  }
 0x618   : > { %v5453_v33 = vpack.c.bf16 %v5446_v17, %v5445_v30  ;;  %v5454_v2 = vpack.c.bf16 %v5448_v53, %v5447_v10  ;;  %v5573_v25 = vsel %vm5466_vm7, %v5549_v4, 0.0  ;;  %vm6271_vm10 = vcmask 211968  }
 0x619   : > { %12202 = vrot.lane.b32.xlu0 %v15405_v14, %s12366_s30 }
 0x61a   : > { %5459 = vst [vmem:[#allocation3 + $0x8f0] sm:$0xff] %v5453_v33  ;;  %12222 = vrot.lane.b32.xlu1 %v15383_v63, %s12364_s28  ;;  %v12005_v33 = vunpack.i.h.bf16 %v15407_v3 }
 0x61b   : > { %5460 = vst [vmem:[#allocation3 + $0x8f8] sm:$0xff] %v5454_v2  ;;  %v11993_v26 = vpop.permute.xlu0 %11992  ;;  %12227 = vrot.lane.b32.xlu2 %v15251_v15, %s12366_s30  ;;  %v12004_v2 = vunpack.i.l.bf16 %v15407_v3 }
 0x61c   : > { %v11995_v11 = vunpack.i.h.bf16 %v11993_v26  ;;  %v11994_v6 = vunpack.i.l.bf16 %v11993_v26  ;;  %v12013_v13 = vpop.permute.xlu1 %12012 }
 0x61d   : > { %v12015_v57 = vunpack.i.h.bf16 %v12013_v13  ;;  %v15506_v21 = vpop.permute.xlu2 %12062  ;;  %v12014_v47 = vunpack.i.l.bf16 %v12013_v13  ;;  %v5550_v4 = vsel %vm5545_vm12, %v12004_v2, %v12005_v33 }
 0x61e   : > { %v5547_v12 = vsel %vm5545_vm12, %v11990_v43, %v11994_v6  ;;  %v5548_v32 = vsel %vm5545_vm12, %v11995_v11, %v11999_v51 }
 0x61f   : > { %v5571_v19 = vsel %vm5466_vm7, %v5547_v12, 0.0  ;;  %v5572_v31 = vsel %vm5465_vm1, %v5548_v32, 0.0  ;;  %v5669_v8 = vsel %vm5666_vm13, %v12015_v57, %v12019_v18  ;;  %v10177_v57 = vld [vmem:[#allocation3 + $0x264] sm:$0xf0]  ;;  %v8822_v12 = vld [vmem:[%s16232_s5] sm:$0xf] }
 0x620   : > { %v5582_v50 = vpack.c.bf16 %v5571_v19, %v5570_v27  ;;  %v5583_v39 = vpack.c.bf16 %v5573_v25, %v5572_v31  ;;  %v5693_v24 = vsel %vm5465_vm1, %v5669_v8, 0.0  ;;  %v10090_v32 = vld [vmem:[%s16232_s5 + $0x48] sm:$0x30] }
 0x621   : > { %12217 = vrot.lane.b32.xlu0 %v15405_v14, %s12364_s28  ;;  %v5704_v62 = vpack.c.bf16 %v5694_v35, %v5693_v24  ;;  %v15575_v35 = vor.u32 %v10090_v32, %v8822_v12  ;;  %v10169_v32 = vld [vmem:[#allocation3 + $0x224] sm:$0xf0] }
 0x622   : > { %5588 = vst [vmem:[#allocation3 + $0x120] sm:$0xff] %v5582_v50  ;;  %12237 = vrot.lane.b32.xlu1 %v15261_v9, %s12366_s30  ;;  %v12050_v50 = vunpack.i.h.bf16 %v15476_v44 }
 0x623   : > { %5589 = vst [vmem:[#allocation3 + $0x128] sm:$0xff] %v5583_v39  ;;  %v12008_v22 = vpop.permute.xlu0 %12007  ;;  %12242 = vrot.lane.b32.xlu2 %v15301_v42, %s12366_s30  ;;  %8210 = vmatmul.bf16.vlgmr.msra.gmra.mxu2 %v15575_v35 }
 0x624   : > { %v12010_v34 = vunpack.i.h.bf16 %v12008_v22  ;;  %v12009_v58 = vunpack.i.l.bf16 %v12008_v22  ;;  %5710 = vst [vmem:[#allocation3 + $0x278] sm:$0xff] %v5704_v62  ;;  %v12028_v56 = vpop.permute.xlu1 %12027 }
 0x625   : > { %v12030_v1 = vunpack.i.h.bf16 %v12028_v56  ;;  %v15539_v36 = vpop.permute.xlu2 %12077  ;;  %v12029_v10 = vunpack.i.l.bf16 %v12028_v56 }
 0x626   : > { %v5667_v38 = vsel %vm5666_vm13, %v12009_v58, %v12010_v34  ;;  %v5668_v28 = vsel %vm5666_vm13, %v12010_v34, %v12014_v47  ;;  %v10175_v58 = vld [vmem:[#allocation3 + $0x254] sm:$0xf0] }
 0x627   : > { %v5691_v49 = vsel %vm5465_vm1, %v5667_v38, 0.0  ;;  %v5692_v46 = vsel %vm5466_vm7, %v5668_v28, 0.0  ;;  %v5556_v5 = vsel %vm5545_vm12, %v12030_v1, %v12034_v41  ;;  %v12049_v41 = vunpack.i.l.bf16 %v15476_v44 }
 0x628   : > { %v5703_v30 = vpack.c.bf16 %v5692_v46, %v5691_v49  ;;  %v5580_v43 = vsel %vm5465_vm1, %v5556_v5, 0.0  ;;  %v9195_v49 = vor.u32 %v10175_v58, %v9194_v20  ;;  %v9186_v46 = vld [vmem:[#allocation3 + $0x240] sm:$0xf]  ;;  %v10173_v5 = vld [vmem:[#allocation3 + $0x244] sm:$0xf0]  ;;  %v12079_v20 = vunpack.i.l.bf16 %v15539_v36 }
 0x629   : > { %12232 = vrot.lane.b32.xlu0 %v15283_v52, %s12366_s30  ;;  %v5587_v55 = vpack.c.bf16 %v5581_v0, %v5580_v43  ;;  %v5796_v0 = vsel %vm5787_vm8, %v12049_v41, %v12050_v50 }
 0x62a   : > { %5709 = vst [vmem:[#allocation3 + $0x270] sm:$0xff] %v5703_v30  ;;  %12252 = vrot.lane.b32.xlu1 %v15311_v37, %s12366_s30 }
 0x62b   : > { %v12023_v29 = vpop.permute.xlu0 %12022  ;;  %5593 = vst [vmem:[#allocation3 + $0x148] sm:$0xff] %v5587_v55  ;;  %12257 = vrot.lane.b32.xlu2 %v15373_v60, %s12367_s7  ;;  %v10179_v3 = vld [vmem:[#allocation3 + $0x274] sm:$0xf0]  ;;  %v8824_v55 = vld [vmem:[%s16232_s5 + $0x4c] sm:$0x30] }
 0x62c   : > { %v12025_v61 = vunpack.i.h.bf16 %v12023_v29  ;;  %v12024_v17 = vunpack.i.l.bf16 %v12023_v29  ;;  %v12043_v53 = vpop.permute.xlu1 %12042 }
 0x62d   : > { %v12045_v60 = vunpack.i.h.bf16 %v12043_v53  ;;  %v12044_v26 = vunpack.i.l.bf16 %v12043_v53  ;;  %v15561_v11 = vpop.permute.xlu2 %12092  ;;  %v9187_v53 = vor.u32 %v10173_v5, %v9186_v46  ;;  %v9034_v5 = vld [vmem:[#allocation3 + $0x110] sm:$0xf] }
 0x62e   : > { %v5554_v59 = vsel %vm5545_vm12, %v12024_v17, %v12025_v61  ;;  %v5555_v51 = vsel %vm5545_vm12, %v12025_v61, %v12029_v10 }
 0x62f   : > { %v5578_v23 = vsel %vm5465_vm1, %v5554_v59, 0.0  ;;  %v5579_v18 = vsel %vm5466_vm7, %v5555_v51, 0.0  ;;  %v5553_v25 = vsel %vm5545_vm12, %v12044_v26, %v12045_v60  ;;  %v9178_v51 = vld [vmem:[#allocation3 + $0x230] sm:$0xf] }
 0x630   : > { %v5586_v48 = vpack.c.bf16 %v5579_v18, %v5578_v23  ;;  %v5577_v34 = vsel %vm5466_vm7, %v5553_v25, 0.0  ;;  %v5820_v23 = vsel %vm5465_vm1, %v5796_v0, 0.0  ;;  %v10135_v0 = vld [vmem:[#allocation3 + $0x114] sm:$0xf0] }
 0x631   : > { %12247 = vrot.lane.b32.xlu0 %v15333_v40, %s12366_s30  ;;  %v9210_v6 = vld [vmem:[#allocation3 + $0x270] sm:$0xf] }
 0x632   : > { %5592 = vst [vmem:[#allocation3 + $0x140] sm:$0xff] %v5586_v48  ;;  %v9211_v13 = vor.u32 %v10179_v3, %v9210_v6  ;;  %12267 = vrot.lane.b32.xlu1 %v15383_v63, %s12367_s7  ;;  %v5574_v63 = vsel %vm5465_vm1, %v5550_v4, 0.0  ;;  %v10141_v44 = vld [vmem:[#allocation3 + $0x144] sm:$0xf0] }
 0x633   : > { %v12038_v27 = vpop.permute.xlu0 %12037  ;;  %12272 = vrot.lane.b32.xlu2 %v15251_v15, %s12367_s7  ;;  %v9203_v15 = vor.u32 %v10177_v57, %v9202_v45  ;;  %v9170_v45 = vld [vmem:[#allocation3 + $0x220] sm:$0xf] }
 0x634   : > { %v12040_v19 = vunpack.i.h.bf16 %v12038_v27  ;;  %v12039_v31 = vunpack.i.l.bf16 %v12038_v27  ;;  %8258 = vmatpush.bf16.msrb.mxu2 %v9211_v13  ;;  %v12058_v8 = vpop.permute.xlu1 %12057  ;;  %v9171_v41 = vor.u32 %v10169_v32, %v9170_v45  ;;  %v10091_v32 = vld [vmem:[%s16232_s5 + $0x50] sm:$0x30] }
 0x635   : > { %v12060_v54 = vunpack.i.h.bf16 %v12058_v8  ;;  %v12059_v1 = vunpack.i.l.bf16 %v12058_v8  ;;  %v15595_v43 = vpop.permute.xlu2 %12107 }
 0x636   : > { %v5551_v39 = vsel %vm5545_vm12, %v12005_v33, %v12039_v31  ;;  %v5552_v24 = vsel %vm5545_vm12, %v12040_v19, %v12044_v26  ;;  %v12064_v33 = vunpack.i.l.bf16 %v15506_v21 }
 0x637   : > { %v5575_v62 = vsel %vm5466_vm7, %v5551_v39, 0.0  ;;  %v5576_v22 = vsel %vm5465_vm1, %v5552_v24, 0.0  ;;  %v12080_v24 = vunpack.i.h.bf16 %v15539_v36 }
 0x638   : > { %v5584_v47 = vpack.c.bf16 %v5575_v62, %v5574_v63  ;;  %v5585_v56 = vpack.c.bf16 %v5577_v34, %v5576_v22  ;;  %8259 = vmatpush.bf16.msrb.mxu2 %v9203_v15  ;;  %v10137_v15 = vld [vmem:[#allocation3 + $0x124] sm:$0xf0] }
 0x639   : > { %12262 = vrot.lane.b32.xlu0 %v15405_v14, %s12367_s7  ;;  %v9058_v38 = vld [vmem:[#allocation3 + $0x140] sm:$0xf]  ;;  %v10081_v14 = vld [vmem:[%s16232_s5 + $0x4] sm:$0xf] }
 0x63a   : > { %5590 = vst [vmem:[#allocation3 + $0x130] sm:$0xff] %v5584_v47  ;;  %v9059_v28 = vor.u32 %v10141_v44, %v9058_v38  ;;  %12282 = vrot.lane.b32.xlu1 %v15261_v9, %s12367_s7  ;;  %v5799_v9 = vsel %vm5787_vm8, %v12059_v1, %v12060_v54  ;;  %v15606_v10 = vor.u32 %v10081_v14, %v8824_v55  ;;  %v9162_v47 = vld [vmem:[#allocation3 + $0x210] sm:$0xf]  ;;  %v15641_v54 = vld [vmem:[#allocation3 + $0x474] sm:$0xf0] }
 0x63b   : > { %5591 = vst [vmem:[#allocation3 + $0x138] sm:$0xff] %v5585_v56  ;;  %v12053_v30 = vpop.permute.xlu0 %12052  ;;  %12287 = vrot.lane.b32.xlu2 %v15301_v42, %s12367_s7  ;;  %v12065_v42 = vunpack.i.h.bf16 %v15506_v21  ;;  %v5823_v60 = vsel %vm5466_vm7, %v5799_v9, 0.0  ;;  %v10171_v21 = vld [vmem:[#allocation3 + $0x234] sm:$0xf0]  ;;  %v15639_v56 = vld [vmem:[#allocation3 + $0x470] sm:$0xf] }
 0x63c   : > { %v12055_v29 = vunpack.i.h.bf16 %v12053_v30  ;;  %v12054_v61 = vunpack.i.l.bf16 %v12053_v30  ;;  %8233 = vmatpush.bf16.msrb.mxu0 %v9059_v28  ;;  %8260 = vmatpush.bf16.msrb.mxu2 %v9195_v49  ;;  %v12073_v17 = vpop.permute.xlu1 %12072  ;;  %v9179_v12 = vor.u32 %v10171_v21, %v9178_v51  ;;  %v10167_v28 = vld [vmem:[#allocation3 + $0x214] sm:$0xf0]  ;;  %v10165_v30 = vld [vmem:[#allocation3 + $0x204] sm:$0xf0]  ;;  %v9026_v55 = vld [vmem:[#allocation3 + $0x100] sm:$0xf] }
 0x63d   : > { %8224 = vmatmul.bf16.vlgmr.msra.gmra.mxu3 %v15606_v10  ;;  %v12075_v3 = vunpack.i.h.bf16 %v12073_v17  ;;  %v12074_v4 = vunpack.i.l.bf16 %v12073_v17  ;;  %v5675_v57 = vsel %vm5666_vm13, %v12064_v33, %v12065_v42  ;;  %v9163_v17 = vor.u32 %v10167_v28, %v9162_v47  ;;  %v9338_v51 = vld [vmem:[#allocation3 + $0x370] sm:$0xf] }
 0x63e   : > { %v5797_v2 = vsel %vm5787_vm8, %v12050_v50, %v12054_v61  ;;  %v5798_v59 = vsel %vm5787_vm8, %v12055_v29, %v12059_v1  ;;  %v5699_v39 = vsel %vm5465_vm1, %v5675_v57, 0.0  ;;  %v10133_v29 = vld [vmem:[#allocation3 + $0x104] sm:$0xf0]  ;;  %v5792_v61 = vsel %vm5787_vm8, %v12079_v20, %v12080_v24 }
 0x63f   : > { %v5821_v18 = vsel %vm5466_vm7, %v5797_v2, 0.0  ;;  %v5822_v48 = vsel %vm5465_vm1, %v5798_v59, 0.0  ;;  %v5678_v63 = vsel %vm5666_vm13, %v12074_v4, %v12075_v3  ;;  %v9035_v2 = vor.u32 %v10135_v0, %v9034_v5 }
 0x640   : > { %v5828_v26 = vpack.c.bf16 %v5821_v18, %v5820_v23  ;;  %v5829_v6 = vpack.c.bf16 %v5823_v60, %v5822_v48  ;;  %8261 = vmatpush.bf16.msrb.mxu2 %v9187_v53  ;;  %v5702_v38 = vsel %vm5466_vm7, %v5678_v63, 0.0  ;;  %v8838_v23 = vld [vmem:[%s16232_s5 + $0x10] sm:$0xf]  ;;  %v10092_v18 = vld [vmem:[%s16232_s5 + $0x58] sm:$0x30]  ;;  %v9027_v21 = vor.u32 %v10133_v29, %v9026_v55 }
 0x641   : > { %12277 = vrot.lane.b32.xlu0 %v15283_v52, %s12367_s7  ;;  %v9050_v13 = vld [vmem:[#allocation3 + $0x130] sm:$0xf]  ;;  %v9042_v52 = vld [vmem:[#allocation3 + $0x120] sm:$0xf]  ;;  %v5816_v45 = vsel %vm5465_vm1, %v5792_v61, 0.0  ;;  %v12095_v57 = vunpack.i.h.bf16 %v15561_v11  ;;  %v15681_v63 = vor.u32 %v10092_v18, %v8838_v23  ;;  %v12110_v29 = vunpack.i.h.bf16 %v15595_v43 }
 0x642   : > { %5834 = vst [vmem:[#allocation3 + $0x3e0] sm:$0xff] %v5828_v26  ;;  %v10139_v27 = vld [vmem:[#allocation3 + $0x134] sm:$0xf0]  ;;  %12297 = vrot.lane.b32.xlu1 %v15311_v37, %s12367_s7  ;;  %v15633_v37 = vpop.permute.xlu2 %12122  ;;  %v9043_v44 = vor.u32 %v10137_v15, %v9042_v52 }
 0x643   : > { %5835 = vst [vmem:[#allocation3 + $0x3e8] sm:$0xff] %v5829_v6  ;;  %v12068_v19 = vpop.permute.xlu0 %12067  ;;  %v9051_v31 = vor.u32 %v10139_v27, %v9050_v13  ;;  %v10211_v6 = vld [vmem:[#allocation3 + $0x374] sm:$0xf0]  ;;  %v10082_v13 = vld [vmem:[%s16232_s5 + $0xc] sm:$0xf]  ;;  %v12094_v27 = vunpack.i.l.bf16 %v15561_v11 }
 0x644   : > { %v12070_v25 = vunpack.i.h.bf16 %v12068_v19  ;;  %v12069_v8 = vunpack.i.l.bf16 %v12068_v19  ;;  %8262 = vmatpush.bf16.msrb.mxu2 %v9179_v12  ;;  %v15627_v50 = vpop.permute.xlu1 %12087  ;;  %v8832_v19 = vld [vmem:[%s16232_s5 + $0x54] sm:$0x30]  ;;  %v10207_v61 = vld [vmem:[#allocation3 + $0x354] sm:$0xf0] }
 0x645   : > { %8234 = vmatpush.bf16.msrb.mxu0 %v9051_v31  ;;  %v12090_v34 = vunpack.i.h.bf16 %v15627_v50  ;;  %v12089_v58 = vunpack.i.l.bf16 %v15627_v50 }
 0x646   : > { %v5676_v62 = vsel %vm5666_vm13, %v12065_v42, %v12069_v8  ;;  %v5677_v22 = vsel %vm5666_vm13, %v12070_v25, %v12074_v4  ;;  %v9154_v42 = vld [vmem:[#allocation3 + $0x200] sm:$0xf]  ;;  %v8830_v4 = vld [vmem:[%s16232_s5 + $0x8] sm:$0xf] }
 0x647   : > { %v5700_v36 = vsel %vm5466_vm7, %v5676_v62, 0.0  ;;  %v5701_v1 = vsel %vm5465_vm1, %v5677_v22, 0.0  ;;  %v5795_v9 = vsel %vm5787_vm8, %v12089_v58, %v12090_v34  ;;  %v9155_v26 = vor.u32 %v10165_v30, %v9154_v42  ;;  %v9458_v62 = vld [vmem:[#allocation3 + $0x460] sm:$0xf]  ;;  %v10241_v22 = vld [vmem:[#allocation3 + $0x464] sm:$0xf0] }
 0x648   : > { %v5707_v49 = vpack.c.bf16 %v5700_v36, %v5699_v39  ;;  %v5708_v46 = vpack.c.bf16 %v5702_v38, %v5701_v1  ;;  %8263 = vmatpush.bf16.msrb.mxu2 %v9171_v41  ;;  %v5819_v12 = vsel %vm5466_vm7, %v5795_v9, 0.0  ;;  %v15689_v39 = vor.u32 %v10082_v13, %v8832_v19  ;;  %v9450_v34 = vld [vmem:[#allocation3 + $0x450] sm:$0xf]  ;;  %v10239_v38 = vld [vmem:[#allocation3 + $0x454] sm:$0xf0] }
 0x649   : > { %12292 = vrot.lane.b32.xlu0 %v15333_v40, %s12367_s7  ;;  %8235 = vmatpush.bf16.msrb.mxu0 %v9043_v44  ;;  %v9394_v14 = vld [vmem:[#allocation3 + $0x3e0] sm:$0xf]  ;;  %v9467_v40 = vor.u32 %v15641_v54, %v15639_v56  ;;  %v10209_v54 = vld [vmem:[#allocation3 + $0x364] sm:$0xf0]  ;;  %v5671_v36 = vsel %vm5666_vm13, %v12094_v27, %v12095_v57  ;;  %v9451_v9 = vor.u32 %v10239_v38, %v9450_v34  ;;  %v10203_v38 = vld [vmem:[#allocation3 + $0x334] sm:$0xf0] }
 0x64a   : > { %5713 = vst [vmem:[#allocation3 + $0x290] sm:$0xff] %v5707_v49  ;;  %v10225_v53 = vld [vmem:[#allocation3 + $0x3e4] sm:$0xf0]  ;;  %v15687_v15 = vpop.permute.xlu2 %12137  ;;  %v9330_v56 = vld [vmem:[#allocation3 + $0x360] sm:$0xf]  ;;  %8252 = vmatmul.bf16.vlgmr.msrb.gmra.mxu1 %v15689_v39  ;;  %v5695_v55 = vsel %vm5465_vm1, %v5671_v36, 0.0 }
 0x64b   : > { %5714 = vst [vmem:[#allocation3 + $0x298] sm:$0xff] %v5708_v46  ;;  %v12083_v33 = vpop.permute.xlu0 %12082  ;;  %v9395_v59 = vor.u32 %v10225_v53, %v9394_v14  ;;  %v9459_v46 = vor.u32 %v10241_v22, %v9458_v62  ;;  %v9331_v30 = vor.u32 %v10209_v54, %v9330_v56  ;;  %v9314_v19 = vld [vmem:[#allocation3 + $0x340] sm:$0xf]  ;;  %v12124_v62 = vunpack.i.l.bf16 %v15633_v37  ;;  %v10233_v54 = vld [vmem:[#allocation3 + $0x424] sm:$0xf0] }
 0x64c   : > { %v12085_v48 = vunpack.i.h.bf16 %v12083_v33  ;;  %v12084_v60 = vunpack.i.l.bf16 %v12083_v33  ;;  %8264 = vmatpush.bf16.msrb.mxu2 %v9163_v17  ;;  %v12103_v3 = vpop.permute.xlu1 %12102  ;;  %v12109_v17 = vunpack.i.l.bf16 %v15595_v43  ;;  %v9426_v56 = vld [vmem:[#allocation3 + $0x420] sm:$0xf] }
 0x64d   : > { %8236 = vmatpush.bf16.msrb.mxu0 %v9035_v2  ;;  %8301 = vmatpush.bf16.msra.mxu1 %v9395_v59  ;;  %v12105_v8 = vunpack.i.h.bf16 %v12103_v3  ;;  %v12104_v50 = vunpack.i.l.bf16 %v12103_v3  ;;  %v10205_v3 = vld [vmem:[#allocation3 + $0x344] sm:$0xf0] }
 0x64e   : > { %v5793_v31 = vsel %vm5787_vm8, %v12080_v24, %v12084_v60  ;;  %v5794_v25 = vsel %vm5787_vm8, %v12085_v48, %v12089_v58  ;;  %v9339_v24 = vor.u32 %v10211_v6, %v9338_v51  ;;  %v15691_v58 = vor.u32 %v10091_v32, %v8830_v4  ;;  %v9322_v51 = vld [vmem:[#allocation3 + $0x350] sm:$0xf]  ;;  %v9442_v60 = vld [vmem:[#allocation3 + $0x440] sm:$0xf] }
 0x64f   : > { %v5817_v11 = vsel %vm5466_vm7, %v5793_v31, 0.0  ;;  %v5818_v52 = vsel %vm5465_vm1, %v5794_v25, 0.0  ;;  %v5674_v28 = vsel %vm5666_vm13, %v12104_v50, %v12105_v8  ;;  %v9323_v43 = vor.u32 %v10207_v61, %v9322_v51  ;;  %v9434_v4 = vld [vmem:[#allocation3 + $0x430] sm:$0xf]  ;;  %v10083_v61 = vld [vmem:[%s16232_s5 + $0x14] sm:$0xf] }
 0x650   : > { %v5826_v20 = vpack.c.bf16 %v5817_v11, %v5816_v45  ;;  %v5827_v41 = vpack.c.bf16 %v5819_v12, %v5818_v52  ;;  %8265 = vmatpush.bf16.msrb.mxu2 %v9155_v26  ;;  %v5698_v33 = vsel %vm5466_vm7, %v5674_v28, 0.0  ;;  %v5788_v13 = vsel %vm5787_vm8, %v12109_v17, %v12110_v29  ;;  %v9298_v28 = vld [vmem:[#allocation3 + $0x320] sm:$0xf] }
 0x651   : > { %8237 = vmatpush.bf16.msrb.mxu0 %v9027_v21  ;;  %v9226_v47 = vld [vmem:[#allocation3 + $0x290] sm:$0xf]  ;;  %v10237_v21 = vld [vmem:[#allocation3 + $0x444] sm:$0xf0]  ;;  %v9315_v11 = vor.u32 %v10205_v3, %v9314_v19 }
 0x652   : > { %5832 = vst [vmem:[#allocation3 + $0x3d0] sm:$0xff] %v5826_v20  ;;  %v10183_v1 = vld [vmem:[#allocation3 + $0x294] sm:$0xf0]  ;;  %v15710_v26 = vpop.permute.xlu2 %12152  ;;  %v9443_v31 = vor.u32 %v10237_v21, %v9442_v60  ;;  %v12125_v20 = vunpack.i.h.bf16 %v15633_v37  ;;  %v9290_v21 = vld [vmem:[#allocation3 + $0x310] sm:$0xf] }
 0x653   : > { %5833 = vst [vmem:[#allocation3 + $0x3d8] sm:$0xff] %v5827_v41  ;;  %v12098_v44 = vpop.permute.xlu0 %12097  ;;  %v9227_v49 = vor.u32 %v10183_v1, %v9226_v47  ;;  %8266 = vmatmul.bf16.vlgmr.msrb.gmra.mxu2 %v15681_v63  ;;  %v9306_v41 = vld [vmem:[#allocation3 + $0x330] sm:$0xf] }
 0x654   : > { %8314 = vmatpush.bf16.msra.mxu2 %v9467_v40  ;;  %v12100_v5 = vunpack.i.h.bf16 %v12098_v44  ;;  %v12099_v0 = vunpack.i.l.bf16 %v12098_v44  ;;  %v12118_v14 = vpop.permute.xlu1 %12117  ;;  %8238 = vmatmul.bf16.vlgmr.msrb.gmra.mxu0 %v15691_v58  ;;  %v6034_v17 = vsel %vm6029_vm14, %v12124_v62, %v12125_v20  ;;  %v15747_v19 = vld [vmem:[#allocation3 + $0x570] sm:$0xf] }
 0x655   : > { %8286 = vmatpush.bf16.msra.mxu0 %v9339_v24  ;;  %8278 = vmatpush.bf16.msrb.mxu3 %v9227_v49  ;;  %v12120_v40 = vunpack.i.h.bf16 %v12118_v14  ;;  %v12119_v23 = vunpack.i.l.bf16 %v12118_v14  ;;  %v10259_v14 = vld [vmem:[#allocation3 + $0x4f4] sm:$0xf0] }
 0x656   : > { %v5672_v53 = vsel %vm5666_vm13, %v12095_v57, %v12099_v0  ;;  %v5673_v42 = vsel %vm5666_vm13, %v12100_v5, %v12104_v50  ;;  %v10235_v57 = vld [vmem:[#allocation3 + $0x434] sm:$0xf0]  ;;  %v5812_v50 = vsel %vm5465_vm1, %v5788_v13, 0.0  ;;  %v9307_v5 = vor.u32 %v10203_v38, %v9306_v41  ;;  %v10201_v0 = vld [vmem:[#allocation3 + $0x324] sm:$0xf0] }
 0x657   : > { %v5696_v2 = vsel %vm5466_vm7, %v5672_v53, 0.0  ;;  %v5697_v59 = vsel %vm5465_vm1, %v5673_v42, 0.0  ;;  %v5791_v12 = vsel %vm5787_vm8, %v12119_v23, %v12120_v40  ;;  %v9435_v24 = vor.u32 %v10235_v57, %v9434_v4  ;;  %v10231_v42 = vld [vmem:[#allocation3 + $0x414] sm:$0xf0]  ;;  %v9522_v57 = vld [vmem:[#allocation3 + $0x4e0] sm:$0xf] }
 0x658   : > { %8315 = vmatpush.bf16.msra.mxu2 %v9459_v46  ;;  %v5705_v18 = vpack.c.bf16 %v5696_v2, %v5695_v55  ;;  %v5706_v48 = vpack.c.bf16 %v5698_v33, %v5697_v59  ;;  %v5815_v47 = vsel %vm5466_vm7, %v5791_v12, 0.0  ;;  %v9418_v55 = vld [vmem:[#allocation3 + $0x410] sm:$0xf]  ;;  %v9299_v40 = vor.u32 %v10201_v0, %v9298_v28  ;;  %v9282_v12 = vld [vmem:[#allocation3 + $0x300] sm:$0xf] }
 0x659   : > { %8287 = vmatpush.bf16.msra.mxu0 %v9331_v30  ;;  %v9386_v6 = vld [vmem:[#allocation3 + $0x3d0] sm:$0xf]  ;;  %v6058_v4 = vsel %vm5465_vm1, %v6034_v17, 0.0  ;;  %v12140_v13 = vunpack.i.h.bf16 %v15687_v15  ;;  %v10229_v41 = vld [vmem:[#allocation3 + $0x404] sm:$0xf0] }
 0x65a   : > { %5711 = vst [vmem:[#allocation3 + $0x280] sm:$0xff] %v5705_v18  ;;  %v10223_v45 = vld [vmem:[#allocation3 + $0x3d4] sm:$0xf0]  ;;  %v9530_v30 = vld [vmem:[#allocation3 + $0x4f0] sm:$0xf]  ;;  %v15737_v33 = vpop.permute.xlu2 %12167 }
 0x65b   : > { %5712 = vst [vmem:[#allocation3 + $0x288] sm:$0xff] %v5706_v48  ;;  %v12113_v27 = vpop.permute.xlu0 %12112  ;;  %v9387_v32 = vor.u32 %v10223_v45, %v9386_v6  ;;  %v10199_v6 = vld [vmem:[#allocation3 + $0x314] sm:$0xf0]  ;;  %v9419_v45 = vor.u32 %v10231_v42, %v9418_v55  ;;  %v8846_v38 = vld [vmem:[%s16232_s5 + $0x18] sm:$0xf] }
 0x65c   : > { %8316 = vmatpush.bf16.msra.mxu2 %v9451_v9  ;;  %v12115_v25 = vunpack.i.h.bf16 %v12113_v27  ;;  %v12114_v8 = vunpack.i.l.bf16 %v12113_v27  ;;  %v15714_v52 = vpop.permute.xlu1 %12132  ;;  %v8840_v9 = vld [vmem:[%s16232_s5 + $0x5c] sm:$0x30]  ;;  %v10257_v27 = vld [vmem:[#allocation3 + $0x4e4] sm:$0xf0]  ;;  %v10093_v55 = vld [vmem:[%s16232_s5 + $0x60] sm:$0x30] }
 0x65d   : > { %8288 = vmatpush.bf16.msra.mxu0 %v9323_v43  ;;  %8302 = vmatpush.bf16.msra.mxu1 %v9387_v32  ;;  %v12135_v44 = vunpack.i.h.bf16 %v15714_v52  ;;  %v12134_v37 = vunpack.i.l.bf16 %v15714_v52  ;;  %v9531_v43 = vor.u32 %v10259_v14, %v9530_v30  ;;  %v15740_v60 = vor.u32 %v10083_v61, %v8840_v9  ;;  %v10197_v32 = vld [vmem:[#allocation3 + $0x304] sm:$0xf0] }
 0x65e   : > { %v5789_v22 = vsel %vm5787_vm8, %v12110_v29, %v12114_v8  ;;  %v5790_v34 = vsel %vm5787_vm8, %v12115_v25, %v12119_v23  ;;  %v9427_v23 = vor.u32 %v10233_v54, %v9426_v56  ;;  %v12139_v25 = vunpack.i.l.bf16 %v15687_v15 }
 0x65f   : > { %v5813_v36 = vsel %vm5466_vm7, %v5789_v22, 0.0  ;;  %v5814_v1 = vsel %vm5465_vm1, %v5790_v34, 0.0  ;;  %v6037_v59 = vsel %vm6029_vm14, %v12134_v37, %v12135_v44  ;;  %v9370_v44 = vld [vmem:[#allocation3 + $0x3b0] sm:$0xf]  ;;  %v9283_v30 = vor.u32 %v10197_v32, %v9282_v12  ;;  %v10273_v12 = vld [vmem:[#allocation3 + $0x564] sm:$0xf0] }
 0x660   : > { %8317 = vmatpush.bf16.msra.mxu2 %v9443_v31  ;;  %v5824_v49 = vpack.c.bf16 %v5813_v36, %v5812_v50  ;;  %v5825_v46 = vpack.c.bf16 %v5815_v47, %v5814_v1  ;;  %v15749_v31 = vld [vmem:[#allocation3 + $0x574] sm:$0xf0]  ;;  %v6061_v52 = vsel %vm5466_vm7, %v6037_v59, 0.0  ;;  %v9410_v50 = vld [vmem:[#allocation3 + $0x400] sm:$0xf]  ;;  %v9291_v36 = vor.u32 %v10199_v6, %v9290_v21 }
 0x661   : > { %8289 = vmatpush.bf16.msra.mxu0 %v9315_v11  ;;  %v9218_v29 = vld [vmem:[#allocation3 + $0x280] sm:$0xf]  ;;  %v10255_v47 = vld [vmem:[#allocation3 + $0x4d4] sm:$0xf0]  ;;  %v9523_v1 = vor.u32 %v10257_v27, %v9522_v57  ;;  %v9595_v14 = vor.u32 %v15749_v31, %v15747_v19  ;;  %v9411_v17 = vor.u32 %v10229_v41, %v9410_v50  ;;  %v10253_v6 = vld [vmem:[#allocation3 + $0x4c4] sm:$0xf0] }
 0x662   : > { %5830 = vst [vmem:[#allocation3 + $0x3c0] sm:$0xff] %v5824_v49  ;;  %v10181_v53 = vld [vmem:[#allocation3 + $0x284] sm:$0xf0]  ;;  %v8854_v49 = vld [vmem:[%s16232_s5 + $0x20] sm:$0xf] }
 0x663   : > { %5831 = vst [vmem:[#allocation3 + $0x3c8] sm:$0xff] %v5825_v46  ;;  %v12128_v2 = vpop.permute.xlu0 %12127  ;;  %v9219_v51 = vor.u32 %v10181_v53, %v9218_v29  ;;  %v10094_v46 = vld [vmem:[%s16232_s5 + $0x68] sm:$0x30]  ;;  %v9506_v21 = vld [vmem:[#allocation3 + $0x4c0] sm:$0xf] }
 0x664   : > { %8318 = vmatpush.bf16.msra.mxu2 %v9435_v24  ;;  %v12130_v18 = vunpack.i.h.bf16 %v12128_v2  ;;  %v12129_v48 = vunpack.i.l.bf16 %v12128_v2  ;;  %v15742_v3 = vpop.permute.xlu1 %12147  ;;  %v9586_v27 = vld [vmem:[#allocation3 + $0x560] sm:$0xf]  ;;  %v9578_v50 = vld [vmem:[#allocation3 + $0x550] sm:$0xf]  ;;  %v10271_v41 = vld [vmem:[#allocation3 + $0x554] sm:$0xf0] }
 0x665   : > { %8290 = vmatpush.bf16.msra.mxu0 %v9307_v5  ;;  %8279 = vmatpush.bf16.msrb.mxu3 %v9219_v51  ;;  %v12150_v22 = vunpack.i.h.bf16 %v15742_v3  ;;  %v12149_v34 = vunpack.i.l.bf16 %v15742_v3  ;;  %v6030_v5 = vsel %vm6029_vm14, %v12139_v25, %v12140_v13  ;;  %v12154_v3 = vunpack.i.l.bf16 %v15710_v26 }
 0x666   : > { %v6035_v8 = vsel %vm6029_vm14, %v12125_v20, %v12129_v48  ;;  %v6036_v11 = vsel %vm6029_vm14, %v12130_v18, %v12134_v37  ;;  %v9514_v20 = vld [vmem:[#allocation3 + $0x4d0] sm:$0xf]  ;;  %v10219_v37 = vld [vmem:[#allocation3 + $0x3b4] sm:$0xf0]  ;;  %v12155_v18 = vunpack.i.h.bf16 %v15710_v26  ;;  %v15788_v48 = vpop.permute.xlu2 %12182  ;;  %v9507_v25 = vor.u32 %v10253_v6, %v9506_v21 }
 0x667   : > { %v6059_v24 = vsel %vm5466_vm7, %v6035_v8, 0.0  ;;  %v6060_v62 = vsel %vm5465_vm1, %v6036_v11, 0.0  ;;  %v6033_v61 = vsel %vm6029_vm14, %v12149_v34, %v12150_v22  ;;  %v9515_v53 = vor.u32 %v10255_v47, %v9514_v20  ;;  %v9362_v8 = vld [vmem:[#allocation3 + $0x3a0] sm:$0xf]  ;;  %v10217_v11 = vld [vmem:[#allocation3 + $0x3a4] sm:$0xf0] }
 0x668   : > { %8319 = vmatpush.bf16.msra.mxu2 %v9427_v23  ;;  %v6068_v56 = vpack.c.bf16 %v6059_v24, %v6058_v4  ;;  %v6069_v54 = vpack.c.bf16 %v6061_v52, %v6060_v62  ;;  %8280 = vmatmul.bf16.vlgmr.msrb.gmra.mxu3 %v15740_v60  ;;  %v9371_v59 = vor.u32 %v10219_v37, %v9370_v44  ;;  %v6054_v23 = vsel %vm5465_vm1, %v6030_v5, 0.0  ;;  %v9498_v52 = vld [vmem:[#allocation3 + $0x4b0] sm:$0xf]  ;;  %v10251_v22 = vld [vmem:[#allocation3 + $0x4b4] sm:$0xf0] }
 0x669   : > { %8291 = vmatpush.bf16.msra.mxu0 %v9299_v40  ;;  %8328 = vmatpush.bf16.msra.mxu3 %v9531_v43  ;;  %v9378_v28 = vld [vmem:[#allocation3 + $0x3c0] sm:$0xf]  ;;  %v15783_v40 = vor.u32 %v10094_v46, %v8854_v49  ;;  %v15790_v43 = vor.u32 %v10093_v55, %v8846_v38  ;;  %v6057_v57 = vsel %vm5466_vm7, %v6033_v61, 0.0  ;;  %v9587_v24 = vor.u32 %v10273_v12, %v9586_v27  ;;  %v9482_v21 = vld [vmem:[#allocation3 + $0x490] sm:$0xf] }
 0x66a   : > { %6074 = vst [vmem:[#allocation3 + $0x670] sm:$0xff] %v6068_v56  ;;  %v10221_v0 = vld [vmem:[#allocation3 + $0x3c4] sm:$0xf0]  ;;  %v5917_v20 = vsel %vm5908_vm15, %v12154_v3, %v12155_v18  ;;  %v10215_v56 = vld [vmem:[#allocation3 + $0x394] sm:$0xf0]  ;;  %v12170_v5 = vunpack.i.h.bf16 %v15737_v33 }
 0x66b   : > { %6075 = vst [vmem:[#allocation3 + $0x678] sm:$0xff] %v6069_v54  ;;  %v12143_v29 = vpop.permute.xlu0 %12142  ;;  %v9379_v9 = vor.u32 %v10221_v0, %v9378_v28  ;;  %v9499_v28 = vor.u32 %v10251_v22, %v9498_v52  ;;  %v5941_v46 = vsel %vm5465_vm1, %v5917_v20, 0.0  ;;  %v9579_v0 = vor.u32 %v10271_v41, %v9578_v50  ;;  %v9570_v55 = vld [vmem:[#allocation3 + $0x540] sm:$0xf]  ;;  %v10247_v6 = vld [vmem:[#allocation3 + $0x494] sm:$0xf0] }
 0x66c   : > { %8320 = vmatpush.bf16.msra.mxu2 %v9419_v45  ;;  %v12145_v42 = vunpack.i.h.bf16 %v12143_v29  ;;  %v12144_v2 = vunpack.i.l.bf16 %v12143_v29  ;;  %v15781_v51 = vpop.permute.xlu1 %12162  ;;  %v12169_v29 = vunpack.i.l.bf16 %v15737_v33  ;;  %v10291_v3 = vld [vmem:[#allocation3 + $0x5f4] sm:$0xf0]  ;;  %v9346_v27 = vld [vmem:[#allocation3 + $0x380] sm:$0xf]  ;;  %v10213_v12 = vld [vmem:[#allocation3 + $0x384] sm:$0xf0] }
 0x66d   : > { %8292 = vmatpush.bf16.msra.mxu0 %v9291_v36  ;;  %8329 = vmatpush.bf16.msra.mxu3 %v9523_v1  ;;  %v12165_v15 = vunpack.i.h.bf16 %v15781_v51  ;;  %v12164_v26 = vunpack.i.l.bf16 %v15781_v51  ;;  %v9363_v1 = vor.u32 %v10217_v11, %v9362_v8  ;;  %v9483_v8 = vor.u32 %v10247_v6, %v9482_v21  ;;  %v10303_v11 = vld [vmem:[#allocation3 + $0x654] sm:$0xf0] }
 0x66e   : > { %8303 = vmatpush.bf16.msra.mxu1 %v9379_v9  ;;  %v6031_v4 = vsel %vm6029_vm14, %v12140_v13, %v12144_v2  ;;  %v6032_v45 = vsel %vm6029_vm14, %v12145_v42, %v12149_v34  ;;  %v9354_v34 = vld [vmem:[#allocation3 + $0x390] sm:$0xf]  ;;  %v10269_v42 = vld [vmem:[#allocation3 + $0x544] sm:$0xf0]  ;;  %v15819_v2 = vpop.permute.xlu2 %12197  ;;  %v9347_v41 = vor.u32 %v10213_v12, %v9346_v27 }
 0x66f   : > { %v6055_v32 = vsel %vm5466_vm7, %v6031_v4, 0.0  ;;  %v6056_v19 = vsel %vm5465_vm1, %v6032_v45, 0.0  ;;  %v5920_v36 = vsel %vm5908_vm15, %v12164_v26, %v12165_v15 }
 0x670   : > { %8321 = vmatpush.bf16.msra.mxu2 %v9411_v17  ;;  %v6066_v13 = vpack.c.bf16 %v6055_v32, %v6054_v23  ;;  %v6067_v31 = vpack.c.bf16 %v6057_v57, %v6056_v19  ;;  %v5944_v17 = vsel %vm5466_vm7, %v5920_v36, 0.0  ;;  %v9706_v32 = vld [vmem:[#allocation3 + $0x650] sm:$0xf]  ;;  %v9571_v19 = vor.u32 %v10269_v42, %v9570_v55  ;;  %v8856_v55 = vld [vmem:[%s16232_s5 + $0x6c] sm:$0x30] }
 0x671   : > { %8293 = vmatpush.bf16.msra.mxu0 %v9283_v30  ;;  %8330 = vmatpush.bf16.msra.mxu3 %v9515_v53  ;;  %v9722_v62 = vld [vmem:[#allocation3 + $0x670] sm:$0xf]  ;;  %v9355_v30 = vor.u32 %v10215_v56, %v9354_v34  ;;  %v9490_v53 = vld [vmem:[#allocation3 + $0x4a0] sm:$0xf] }
 0x672   : > { %8304 = vmatpush.bf16.msra.mxu1 %v9371_v59  ;;  %6072 = vst [vmem:[#allocation3 + $0x660] sm:$0xff] %v6066_v13  ;;  %v10307_v47 = vld [vmem:[#allocation3 + $0x674] sm:$0xf0]  ;;  %v9786_v56 = vld [vmem:[#allocation3 + $0x6f0] sm:$0xf] }
 0x673   : > { %8322 = vmatmul.bf16.vlgmr.msra.gmra.mxu2 %v15783_v40  ;;  %6073 = vst [vmem:[#allocation3 + $0x668] sm:$0xff] %v6067_v31  ;;  %v12158_v54 = vpop.permute.xlu0 %12157  ;;  %v9723_v38 = vor.u32 %v10307_v47, %v9722_v62  ;;  %v8848_v13 = vld [vmem:[%s16232_s5 + $0x64] sm:$0x30]  ;;  %v5913_v31 = vsel %vm5908_vm15, %v12169_v29, %v12170_v5  ;;  %v9658_v62 = vld [vmem:[#allocation3 + $0x5f0] sm:$0xf] }
 0x674   : > { %8294 = vmatmul.bf16.vlgmr.msra.gmra.mxu0 %v15790_v43  ;;  %v12160_v44 = vunpack.i.h.bf16 %v12158_v54  ;;  %v12159_v37 = vunpack.i.l.bf16 %v12158_v54  ;;  %v15809_v49 = vpop.permute.xlu1 %12177  ;;  %v9659_v20 = vor.u32 %v10291_v3, %v9658_v62  ;;  %v10323_v54 = vld [vmem:[#allocation3 + $0x6f4] sm:$0xf0]  ;;  %v10245_v29 = vld [vmem:[#allocation3 + $0x484] sm:$0xf0]  ;;  %v12200_v62 = vunpack.i.h.bf16 %v15819_v2 }
 0x675   : > { %8342 = vmatpush.bf16.msrb.mxu0 %v9595_v14  ;;  %8331 = vmatpush.bf16.msra.mxu3 %v9507_v25  ;;  %v10249_v14 = vld [vmem:[#allocation3 + $0x4a4] sm:$0xf0]  ;;  %v12180_v23 = vunpack.i.h.bf16 %v15809_v49  ;;  %v9787_v6 = vor.u32 %v10323_v54, %v9786_v56  ;;  %v12199_v56 = vunpack.i.l.bf16 %v15819_v2 }
 0x676   : > { %8305 = vmatpush.bf16.msra.mxu1 %v9363_v1  ;;  %8370 = vmatpush.bf16.msrb.mxu2 %v9723_v38  ;;  %v5918_v61 = vsel %vm5908_vm15, %v12155_v18, %v12159_v37  ;;  %v5919_v9 = vsel %vm5908_vm15, %v12160_v44, %v12164_v26  ;;  %v12179_v18 = vunpack.i.l.bf16 %v15809_v49  ;;  %v9491_v57 = vor.u32 %v10249_v14, %v9490_v53  ;;  %v10084_v26 = vld [vmem:[%s16232_s5 + $0x1c] sm:$0xf]  ;;  %v9474_v37 = vld [vmem:[#allocation3 + $0x480] sm:$0xf]  ;;  %v10085_v14 = vld [vmem:[%s16232_s5 + $0x24] sm:$0xf]  ;;  %v15864_v21 = vpop.permute.xlu2 %12212 }
 0x677   : > { %v5942_v59 = vsel %vm5466_vm7, %v5918_v61, 0.0  ;;  %v5943_v51 = vsel %vm5465_vm1, %v5919_v9, 0.0  ;;  %v15837_v47 = vor.u32 %v10084_v26, %v8848_v13  ;;  %v5937_v1 = vsel %vm5465_vm1, %v5913_v31, 0.0  ;;  %v9650_v61 = vld [vmem:[#allocation3 + $0x5e0] sm:$0xf] }
 0x678   : > { %v5949_v4 = vpack.c.bf16 %v5942_v59, %v5941_v46  ;;  %v5950_v45 = vpack.c.bf16 %v5944_v17, %v5943_v51  ;;  %v5916_v50 = vsel %vm5908_vm15, %v12179_v18, %v12180_v23  ;;  %v12185_v38 = vunpack.i.h.bf16 %v15788_v48  ;;  %v9642_v23 = vld [vmem:[#allocation3 + $0x5d0] sm:$0xf]  ;;  %v10287_v13 = vld [vmem:[#allocation3 + $0x5d4] sm:$0xf0] }
 0x679   : > { %8343 = vmatpush.bf16.msrb.mxu0 %v9587_v24  ;;  %8332 = vmatpush.bf16.msra.mxu3 %v9499_v28  ;;  %v9714_v15 = vld [vmem:[#allocation3 + $0x660] sm:$0xf]  ;;  %v9707_v44 = vor.u32 %v10303_v11, %v9706_v32  ;;  %v10289_v28 = vld [vmem:[#allocation3 + $0x5e4] sm:$0xf0]  ;;  %v12184_v49 = vunpack.i.l.bf16 %v15788_v48  ;;  %v9475_v59 = vor.u32 %v10245_v29, %v9474_v37  ;;  %v15866_v3 = vor.u32 %v10085_v14, %v8856_v55  ;;  %v10319_v37 = vld [vmem:[#allocation3 + $0x6d4] sm:$0xf0] }
 0x67a   : > { %8306 = vmatpush.bf16.msra.mxu1 %v9355_v30  ;;  %5955 = vst [vmem:[#allocation3 + $0x530] sm:$0xff] %v5949_v4  ;;  %v10305_v25 = vld [vmem:[#allocation3 + $0x664] sm:$0xf0]  ;;  %v5940_v30 = vsel %vm5466_vm7, %v5916_v50, 0.0  ;;  %v9651_v51 = vor.u32 %v10289_v28, %v9650_v61  ;;  %v9643_v11 = vor.u32 %v10287_v13, %v9642_v23  ;;  %v9626_v14 = vld [vmem:[#allocation3 + $0x5b0] sm:$0xf] }
 0x67b   : > { %5956 = vst [vmem:[#allocation3 + $0x538] sm:$0xff] %v5950_v45  ;;  %v12173_v52 = vpop.permute.xlu0 %12172  ;;  %v9715_v24 = vor.u32 %v10305_v25, %v9714_v15  ;;  %v9698_v45 = vld [vmem:[#allocation3 + $0x640] sm:$0xf]  ;;  %v5909_v27 = vsel %vm5908_vm15, %v12184_v49, %v12185_v38  ;;  %v10321_v32 = vld [vmem:[#allocation3 + $0x6e4] sm:$0xf0] }
 0x67c   : > { %v12175_v22 = vunpack.i.h.bf16 %v12173_v52  ;;  %v12174_v34 = vunpack.i.l.bf16 %v12173_v52  ;;  %v15839_v36 = vpop.permute.xlu1 %12192  ;;  %v9634_v52 = vld [vmem:[#allocation3 + $0x5c0] sm:$0xf]  ;;  %v10285_v50 = vld [vmem:[#allocation3 + $0x5c4] sm:$0xf0]  ;;  %v10283_v55 = vld [vmem:[#allocation3 + $0x5b4] sm:$0xf0] }
 0x67d   : > { %8344 = vmatpush.bf16.msrb.mxu0 %v9579_v0  ;;  %8333 = vmatpush.bf16.msra.mxu3 %v9491_v57  ;;  %v12195_v9 = vunpack.i.h.bf16 %v15839_v36  ;;  %v12194_v17 = vunpack.i.l.bf16 %v15839_v36  ;;  %v10301_v57 = vld [vmem:[#allocation3 + $0x644] sm:$0xf0]  ;;  %v9682_v61 = vld [vmem:[#allocation3 + $0x620] sm:$0xf] }
 0x67e   : > { %8307 = vmatpush.bf16.msra.mxu1 %v9347_v41  ;;  %8371 = vmatpush.bf16.msrb.mxu2 %v9715_v24  ;;  %v5914_v46 = vsel %vm5908_vm15, %v12170_v5, %v12174_v34  ;;  %v5915_v0 = vsel %vm5908_vm15, %v12175_v22, %v12179_v18  ;;  %v9778_v18 = vld [vmem:[#allocation3 + $0x6e0] sm:$0xf]  ;;  %v5933_v24 = vsel %vm5465_vm1, %v5909_v27, 0.0  ;;  %v9690_v34 = vld [vmem:[#allocation3 + $0x630] sm:$0xf] }
 0x67f   : > { %v5938_v33 = vsel %vm5466_vm7, %v5914_v46, 0.0  ;;  %v5939_v5 = vsel %vm5465_vm1, %v5915_v0, 0.0  ;;  %v5912_v15 = vsel %vm5908_vm15, %v12194_v17, %v12195_v9  ;;  %v9779_v22 = vor.u32 %v10321_v32, %v9778_v18  ;;  %v10297_v9 = vld [vmem:[#allocation3 + $0x624] sm:$0xf0]  ;;  %v9618_v27 = vld [vmem:[#allocation3 + $0x5a0] sm:$0xf] }
 0x680   : > { %v5947_v53 = vpack.c.bf16 %v5938_v33, %v5937_v1  ;;  %v5948_v42 = vpack.c.bf16 %v5940_v30, %v5939_v5  ;;  %v5936_v1 = vsel %vm5466_vm7, %v5912_v15, 0.0  ;;  %v9635_v30 = vor.u32 %v10285_v50, %v9634_v52  ;;  %v9762_v33 = vld [vmem:[#allocation3 + $0x6c0] sm:$0xf]  ;;  %v9754_v32 = vld [vmem:[#allocation3 + $0x6b0] sm:$0xf] }
 0x681   : > { %8345 = vmatpush.bf16.msrb.mxu0 %v9571_v19  ;;  %8334 = vmatpush.bf16.msra.mxu3 %v9483_v8  ;;  %v9562_v4 = vld [vmem:[#allocation3 + $0x530] sm:$0xf]  ;;  %v9699_v8 = vor.u32 %v10301_v57, %v9698_v45  ;;  %v9683_v45 = vor.u32 %v10297_v9, %v9682_v61  ;;  %v9627_v57 = vor.u32 %v10283_v55, %v9626_v14  ;;  %v15904_v52 = vld [vmem:[#allocation3 + $0x580] sm:$0xf]  ;;  %v15906_v50 = vld [vmem:[#allocation3 + $0x584] sm:$0xf0] }
 0x682   : > { %8356 = vmatpush.bf16.msrb.mxu1 %v9659_v20  ;;  %8372 = vmatpush.bf16.msrb.mxu2 %v9707_v44  ;;  %5953 = vst [vmem:[#allocation3 + $0x520] sm:$0xff] %v5947_v53  ;;  %v10267_v12 = vld [vmem:[#allocation3 + $0x534] sm:$0xf0]  ;;  %v9770_v44 = vld [vmem:[#allocation3 + $0x6d0] sm:$0xf]  ;;  %v9603_v9 = vor.u32 %v15906_v50, %v15904_v52 }
 0x683   : > { %8308 = vmatmul.bf16.vlgmr.msra.gmra.mxu1 %v15837_v47  ;;  %5954 = vst [vmem:[#allocation3 + $0x528] sm:$0xff] %v5948_v42  ;;  %v12188_v19 = vpop.permute.xlu0 %12187  ;;  %v9563_v26 = vor.u32 %v10267_v12, %v9562_v4  ;;  %v10299_v20 = vld [vmem:[#allocation3 + $0x634] sm:$0xf0]  ;;  %v9771_v5 = vor.u32 %v10319_v37, %v9770_v44  ;;  %v10317_v42 = vld [vmem:[#allocation3 + $0x6c4] sm:$0xf0] }
 0x684   : > { %v12190_v31 = vunpack.i.h.bf16 %v12188_v19  ;;  %v12189_v25 = vunpack.i.l.bf16 %v12188_v19  ;;  %v15872_v41 = vpop.permute.xlu1 %12207  ;;  %v9691_v0 = vor.u32 %v10299_v20, %v9690_v34  ;;  %v10281_v12 = vld [vmem:[#allocation3 + $0x5a4] sm:$0xf0]  ;;  %v9763_v13 = vor.u32 %v10317_v42, %v9762_v33  ;;  %v10315_v20 = vld [vmem:[#allocation3 + $0x6b4] sm:$0xf0]  ;;  %v9978_v37 = vld [vmem:[#allocation3 + $0x870] sm:$0xf] }
 0x685   : > { %8335 = vmatpush.bf16.msra.mxu3 %v9475_v59  ;;  %8346 = vmatpush.bf16.msrb.mxu0 %v9563_v26  ;;  %v12210_v48 = vunpack.i.h.bf16 %v15872_v41  ;;  %v12209_v2 = vunpack.i.l.bf16 %v15872_v41  ;;  %v15892_v59 = vpop.permute.xlu2 %12227  ;;  %v12215_v26 = vunpack.i.h.bf16 %v15864_v21  ;;  %v12214_v41 = vunpack.i.l.bf16 %v15864_v21  ;;  %v10279_v44 = vld [vmem:[#allocation3 + $0x594] sm:$0xf0]  ;;  %v10261_v55 = vld [vmem:[#allocation3 + $0x504] sm:$0xf0]  ;;  %v8870_v33 = vld [vmem:[%s16232_s5 + $0x30] sm:$0xf] }
 0x686   : > { %8357 = vmatpush.bf16.msrb.mxu1 %v9651_v51  ;;  %v5910_v54 = vsel %vm5908_vm15, %v12185_v38, %v12189_v25  ;;  %v5911_v36 = vsel %vm5908_vm15, %v12190_v31, %v12194_v17  ;;  %8373 = vmatpush.bf16.msrb.mxu2 %v9699_v8  ;;  %v6159_v17 = vsel %vm6150_vm9, %v12199_v56, %v12200_v62  ;;  %v9674_v31 = vld [vmem:[#allocation3 + $0x610] sm:$0xf]  ;;  %v10295_v25 = vld [vmem:[#allocation3 + $0x614] sm:$0xf0]  ;;  %v15900_v8 = vld [vmem:[#allocation3 + $0x6a0] sm:$0xf] }
 0x687   : > { %v5934_v28 = vsel %vm5466_vm7, %v5910_v54, 0.0  ;;  %v5935_v49 = vsel %vm5465_vm1, %v5911_v36, 0.0  ;;  %v6162_v23 = vsel %vm6150_vm9, %v12209_v2, %v12210_v48  ;;  %v6183_v15 = vsel %vm5465_vm1, %v6159_v17, 0.0  ;;  %v9610_v56 = vld [vmem:[#allocation3 + $0x590] sm:$0xf] }
 0x688   : > { %8336 = vmatmul.bf16.vlgmr.msra.gmra.mxu3 %v15866_v3  ;;  %v5945_v38 = vpack.c.bf16 %v5934_v28, %v5933_v24  ;;  %v5946_v46 = vpack.c.bf16 %v5936_v1, %v5935_v49  ;;  %v6186_v34 = vsel %vm5466_vm7, %v6162_v23, 0.0  ;;  %v9675_v48 = vor.u32 %v10295_v25, %v9674_v31  ;;  %v10096_v17 = vld [vmem:[%s16232_s5 + $0x78] sm:$0x30] }
 0x689   : > { %8384 = vmatpush.bf16.msrb.mxu3 %v9787_v6  ;;  %v9554_v29 = vld [vmem:[#allocation3 + $0x520] sm:$0xf]  ;;  %v9611_v23 = vor.u32 %v10279_v44, %v9610_v56  ;;  %v15940_v50 = vor.u32 %v10096_v17, %v8870_v33  ;;  %v9834_v17 = vld [vmem:[#allocation3 + $0x750] sm:$0xf] }
 0x68a   : > { %8358 = vmatpush.bf16.msrb.mxu1 %v9643_v11  ;;  %5951 = vst [vmem:[#allocation3 + $0x510] sm:$0xff] %v5945_v38  ;;  %8374 = vmatpush.bf16.msrb.mxu2 %v9691_v0  ;;  %v10265_v53 = vld [vmem:[#allocation3 + $0x524] sm:$0xf0]  ;;  %v9666_v38 = vld [vmem:[#allocation3 + $0x600] sm:$0xf] }
 0x68b   : > { %5952 = vst [vmem:[#allocation3 + $0x518] sm:$0xff] %v5946_v46  ;;  %v12203_v51 = vpop.permute.xlu0 %12202  ;;  %v9555_v18 = vor.u32 %v10265_v53, %v9554_v29  ;;  %v15902_v11 = vld [vmem:[#allocation3 + $0x6a4] sm:$0xf0]  ;;  %v9538_v0 = vld [vmem:[#allocation3 + $0x500] sm:$0xf] }
 0x68c   : > { %v12205_v6 = vunpack.i.h.bf16 %v12203_v51  ;;  %v12204_v4 = vunpack.i.l.bf16 %v12203_v51  ;;  %v15895_v19 = vpop.permute.xlu1 %12222  ;;  %v10293_v46 = vld [vmem:[#allocation3 + $0x604] sm:$0xf0]  ;;  %v9747_v61 = vor.u32 %v15902_v11, %v15900_v8  ;;  %v12230_v8 = vunpack.i.h.bf16 %v15892_v59  ;;  %v9842_v33 = vld [vmem:[#allocation3 + $0x760] sm:$0xf] }
 0x68d   : > { %8385 = vmatpush.bf16.msrb.mxu3 %v9779_v22  ;;  %8347 = vmatpush.bf16.msrb.mxu0 %v9555_v18  ;;  %v12225_v1 = vunpack.i.h.bf16 %v15895_v19  ;;  %v10371_v18 = vld [vmem:[#allocation3 + $0x874] sm:$0xf0]  ;;  %v15938_v11 = vpop.permute.xlu2 %12242  ;;  %v9539_v52 = vor.u32 %v10261_v55, %v9538_v0  ;;  %v10353_v0 = vld [vmem:[#allocation3 + $0x7e4] sm:$0xf0] }
 0x68e   : > { %8359 = vmatpush.bf16.msrb.mxu1 %v9635_v30  ;;  %v6160_v24 = vsel %vm6150_vm9, %v12200_v62, %v12204_v4  ;;  %v6161_v22 = vsel %vm6150_vm9, %v12205_v6, %v12209_v2  ;;  %8375 = vmatpush.bf16.msrb.mxu2 %v9683_v45  ;;  %v12224_v62 = vunpack.i.l.bf16 %v15895_v19  ;;  %v9619_v2 = vor.u32 %v10281_v12, %v9618_v27  ;;  %v9850_v27 = vld [vmem:[#allocation3 + $0x770] sm:$0xf]  ;;  %v10339_v12 = vld [vmem:[#allocation3 + $0x774] sm:$0xf0]  ;;  %v10369_v19 = vld [vmem:[#allocation3 + $0x864] sm:$0xf0] }
 0x68f   : > { %v6184_v54 = vsel %vm5466_vm7, %v6160_v24, 0.0  ;;  %v6185_v36 = vsel %vm5465_vm1, %v6161_v22, 0.0  ;;  %v9755_v30 = vor.u32 %v10315_v20, %v9754_v32  ;;  %v9667_v45 = vor.u32 %v10293_v46, %v9666_v38  ;;  %v9970_v32 = vld [vmem:[#allocation3 + $0x860] sm:$0xf]  ;;  %v10095_v24 = vld [vmem:[%s16232_s5 + $0x70] sm:$0x30] }
 0x690   : > { %v6191_v28 = vpack.c.bf16 %v6184_v54, %v6183_v15  ;;  %v6192_v49 = vpack.c.bf16 %v6186_v34, %v6185_v36  ;;  %v6041_v42 = vsel %vm6029_vm14, %v12224_v62, %v12225_v1  ;;  %v9738_v15 = vld [vmem:[#allocation3 + $0x690] sm:$0xf]  ;;  %v12229_v22 = vunpack.i.l.bf16 %v15892_v59  ;;  %v10086_v54 = vld [vmem:[%s16232_s5 + $0x2c] sm:$0xf]  ;;  %v8864_v36 = vld [vmem:[%s16232_s5 + $0x74] sm:$0x30] }
 0x691   : > { %8386 = vmatpush.bf16.msrb.mxu3 %v9771_v5  ;;  %v9546_v14 = vld [vmem:[#allocation3 + $0x510] sm:$0xf]  ;;  %v6038_v5 = vsel %vm6029_vm14, %v12214_v41, %v12215_v26  ;;  %v8862_v41 = vld [vmem:[%s16232_s5 + $0x28] sm:$0xf]  ;;  %v6065_v56 = vsel %vm5466_vm7, %v6041_v42, 0.0  ;;  %v15970_v55 = vor.u32 %v10086_v54, %v8864_v36 }
 0x692   : > { %8360 = vmatpush.bf16.msrb.mxu1 %v9627_v57  ;;  %6197 = vst [vmem:[#allocation3 + $0x7d0] sm:$0xff] %v6191_v28  ;;  %8376 = vmatpush.bf16.msrb.mxu2 %v9675_v48  ;;  %v10263_v29 = vld [vmem:[#allocation3 + $0x514] sm:$0xf0]  ;;  %v9979_v57 = vor.u32 %v10371_v18, %v9978_v37  ;;  %v6062_v25 = vsel %vm5465_vm1, %v6038_v5, 0.0  ;;  %v9914_v1 = vld [vmem:[#allocation3 + $0x7f0] sm:$0xf]  ;;  %v9851_v48 = vor.u32 %v10339_v12, %v9850_v27 }
 0x693   : > { %6198 = vst [vmem:[#allocation3 + $0x7d8] sm:$0xff] %v6192_v49  ;;  %v12218_v53 = vpop.permute.xlu0 %12217  ;;  %v9547_v51 = vor.u32 %v10263_v29, %v9546_v14  ;;  %v9962_v38 = vld [vmem:[#allocation3 + $0x850] sm:$0xf]  ;;  %v9906_v46 = vld [vmem:[#allocation3 + $0x7e0] sm:$0xf]  ;;  %v6155_v42 = vsel %vm6150_vm9, %v12229_v22, %v12230_v8 }
 0x694   : > { %v12220_v6 = vunpack.i.h.bf16 %v12218_v53  ;;  %v12219_v4 = vunpack.i.l.bf16 %v12218_v53  ;;  %v15933_v31 = vpop.permute.xlu1 %12237  ;;  %v10337_v5 = vld [vmem:[#allocation3 + $0x764] sm:$0xf0]  ;;  %v10367_v29 = vld [vmem:[#allocation3 + $0x854] sm:$0xf0]  ;;  %v9954_v12 = vld [vmem:[#allocation3 + $0x840] sm:$0xf] }
 0x695   : > { %8387 = vmatpush.bf16.msrb.mxu3 %v9763_v13  ;;  %v10311_v13 = vld [vmem:[#allocation3 + $0x694] sm:$0xf0]  ;;  %8348 = vmatpush.bf16.msrb.mxu0 %v9547_v51  ;;  %v12240_v44 = vunpack.i.h.bf16 %v15933_v31  ;;  %v12239_v37 = vunpack.i.l.bf16 %v15933_v31  ;;  %v10365_v31 = vld [vmem:[#allocation3 + $0x844] sm:$0xf0] }
 0x696   : > { %8361 = vmatpush.bf16.msrb.mxu1 %v9619_v2  ;;  %v6039_v34 = vsel %vm6029_vm14, %v12215_v26, %v12219_v4  ;;  %v6040_v20 = vsel %vm6029_vm14, %v12220_v6, %v12224_v62  ;;  %8377 = vmatpush.bf16.msrb.mxu2 %v9667_v45  ;;  %v10355_v62 = vld [vmem:[#allocation3 + $0x7f4] sm:$0xf0]  ;;  %v15967_v2 = vor.u32 %v10095_v24, %v8862_v41  ;;  %v12244_v41 = vunpack.i.l.bf16 %v15938_v11  ;;  %v15990_v24 = vpop.permute.xlu2 %12257 }
 0x697   : > { %v6063_v21 = vsel %vm5466_vm7, %v6039_v34, 0.0  ;;  %v6064_v26 = vsel %vm5465_vm1, %v6040_v20, 0.0  ;;  %v9739_v14 = vor.u32 %v10311_v13, %v9738_v15  ;;  %v10335_v53 = vld [vmem:[#allocation3 + $0x754] sm:$0xf0]  ;;  %v9963_v45 = vor.u32 %v10367_v29, %v9962_v38  ;;  %v9826_v20 = vld [vmem:[#allocation3 + $0x740] sm:$0xf] }
 0x698   : > { %v6070_v28 = vpack.c.bf16 %v6063_v21, %v6062_v25  ;;  %v6071_v49 = vpack.c.bf16 %v6065_v56, %v6064_v26  ;;  %v9835_v27 = vor.u32 %v10335_v53, %v9834_v17  ;;  %v10333_v25 = vld [vmem:[#allocation3 + $0x744] sm:$0xf0]  ;;  %v10363_v26 = vld [vmem:[#allocation3 + $0x834] sm:$0xf0]  ;;  %v8872_v38 = vld [vmem:[%s16232_s5 + $0x7c] sm:$0x30] }
 0x699   : > { %8388 = vmatpush.bf16.msrb.mxu3 %v9755_v30  ;;  %8349 = vmatpush.bf16.msrb.mxu0 %v9539_v52  ;;  %v9971_v30 = vor.u32 %v10369_v19, %v9970_v32  ;;  %v6179_v32 = vsel %vm5465_vm1, %v6155_v42, 0.0  ;;  %v12245_v52 = vunpack.i.h.bf16 %v15938_v11  ;;  %v9946_v11 = vld [vmem:[#allocation3 + $0x830] sm:$0xf] }
 0x69a   : > { %8362 = vmatpush.bf16.msrb.mxu1 %v9611_v23  ;;  %8426 = vmatpush.bf16.msra.mxu2 %v9979_v57  ;;  %6076 = vst [vmem:[#allocation3 + $0x680] sm:$0xff] %v6070_v28  ;;  %v6158_v23 = vsel %vm6150_vm9, %v12239_v37, %v12240_v44  ;;  %v9907_v57 = vor.u32 %v10353_v0, %v9906_v46  ;;  %v10351_v34 = vld [vmem:[#allocation3 + $0x7d4] sm:$0xf0] }
 0x69b   : > { %8378 = vmatmul.bf16.vlgmr.msrb.gmra.mxu2 %v15940_v50  ;;  %6077 = vst [vmem:[#allocation3 + $0x688] sm:$0xff] %v6071_v49  ;;  %v12233_v51 = vpop.permute.xlu0 %12232  ;;  %v6182_v13 = vsel %vm5466_vm7, %v6158_v23, 0.0  ;;  %v10331_v44 = vld [vmem:[#allocation3 + $0x734] sm:$0xf0]  ;;  %v9955_v28 = vor.u32 %v10365_v31, %v9954_v12  ;;  %v9818_v23 = vld [vmem:[#allocation3 + $0x730] sm:$0xf] }
 0x69c   : > { %v12235_v18 = vunpack.i.h.bf16 %v12233_v51  ;;  %v12234_v6 = vunpack.i.l.bf16 %v12233_v51  ;;  %8350 = vmatmul.bf16.vlgmr.msrb.gmra.mxu0 %v15967_v2  ;;  %v15977_v4 = vpop.permute.xlu1 %12252 }
 0x69d   : > { %8389 = vmatpush.bf16.msrb.mxu3 %v9747_v61  ;;  %8398 = vmatpush.bf16.msra.mxu0 %v9851_v48  ;;  %v9915_v61 = vor.u32 %v10355_v62, %v9914_v1  ;;  %v12255_v36 = vunpack.i.h.bf16 %v15977_v4  ;;  %v12254_v21 = vunpack.i.l.bf16 %v15977_v4  ;;  %v10042_v1 = vld [vmem:[#allocation3 + $0x8f0] sm:$0xf]  ;;  %v10387_v62 = vld [vmem:[#allocation3 + $0x8f4] sm:$0xf0]  ;;  %v10087_v48 = vld [vmem:[%s16232_s5 + $0x34] sm:$0xf] }
 0x69e   : > { %8363 = vmatpush.bf16.msrb.mxu1 %v9603_v9  ;;  %8427 = vmatpush.bf16.msra.mxu2 %v9971_v30  ;;  %v9843_v9 = vor.u32 %v10337_v5, %v9842_v33  ;;  %v6156_v19 = vsel %vm6150_vm9, %v12230_v8, %v12234_v6  ;;  %v6157_v15 = vsel %vm6150_vm9, %v12235_v18, %v12239_v37  ;;  %v9898_v8 = vld [vmem:[#allocation3 + $0x7d0] sm:$0xf]  ;;  %v10034_v37 = vld [vmem:[#allocation3 + $0x8e0] sm:$0xf] }
 0x69f   : > { %v6180_v22 = vsel %vm5466_vm7, %v6156_v19, 0.0  ;;  %v6181_v59 = vsel %vm5465_vm1, %v6157_v15, 0.0  ;;  %v9899_v46 = vor.u32 %v10351_v34, %v9898_v8  ;;  %v9827_v30 = vor.u32 %v10333_v25, %v9826_v20  ;;  %v10361_v19 = vld [vmem:[#allocation3 + $0x824] sm:$0xf0]  ;;  %v9810_v8 = vld [vmem:[#allocation3 + $0x720] sm:$0xf] }
 0x6a0   : > { %v6189_v56 = vpack.c.bf16 %v6180_v22, %v6179_v32  ;;  %v6190_v54 = vpack.c.bf16 %v6182_v13, %v6181_v59  ;;  %v6151_v33 = vsel %vm6150_vm9, %v12244_v41, %v12245_v52  ;;  %v6154_v42 = vsel %vm6150_vm9, %v12254_v21, %v12255_v36  ;;  %v9938_v32 = vld [vmem:[#allocation3 + $0x820] sm:$0xf]  ;;  %v9930_v34 = vld [vmem:[#allocation3 + $0x810] sm:$0xf]  ;;  %v10359_v20 = vld [vmem:[#allocation3 + $0x814] sm:$0xf0] }
 0x6a1   : > { %8390 = vmatpush.bf16.msrb.mxu3 %v9739_v14  ;;  %8364 = vmatmul.bf16.vlgmr.msrb.gmra.mxu1 %v15970_v55  ;;  %v9730_v49 = vld [vmem:[#allocation3 + $0x680] sm:$0xf]  ;;  %v10385_v14 = vld [vmem:[#allocation3 + $0x8e4] sm:$0xf0]  ;;  %v16006_v51 = vor.u32 %v10087_v48, %v8872_v38  ;;  %v9947_v6 = vor.u32 %v10363_v26, %v9946_v11  ;;  %v12259_v15 = vunpack.i.l.bf16 %v15990_v24  ;;  %v6178_v25 = vsel %vm5466_vm7, %v6154_v42, 0.0 }
 0x6a2   : > { %8412 = vmatpush.bf16.msra.mxu1 %v9915_v61  ;;  %8399 = vmatpush.bf16.msra.mxu0 %v9843_v9  ;;  %6195 = vst [vmem:[#allocation3 + $0x7c0] sm:$0xff] %v6189_v56  ;;  %v10309_v0 = vld [vmem:[#allocation3 + $0x684] sm:$0xf0]  ;;  %v10043_v61 = vor.u32 %v10387_v62, %v10042_v1  ;;  %v9819_v9 = vor.u32 %v10331_v44, %v9818_v23  ;;  %v16025_v56 = vld [vmem:[#allocation3 + $0x710] sm:$0xf] }
 0x6a3   : > { %8428 = vmatpush.bf16.msra.mxu2 %v9963_v45  ;;  %6196 = vst [vmem:[#allocation3 + $0x7c8] sm:$0xff] %v6190_v54  ;;  %v12248_v5 = vpop.permute.xlu0 %12247  ;;  %v9731_v29 = vor.u32 %v10309_v0, %v9730_v49  ;;  %v10035_v4 = vor.u32 %v10385_v14, %v10034_v37  ;;  %v6175_v45 = vsel %vm5465_vm1, %v6151_v33, 0.0  ;;  %v10327_v54 = vld [vmem:[#allocation3 + $0x714] sm:$0xf0]  ;;  %v10018_v36 = vld [vmem:[#allocation3 + $0x8c0] sm:$0xf]  ;;  %v9939_v11 = vor.u32 %v10361_v19, %v9938_v32 }
 0x6a4   : > { %v12250_v17 = vunpack.i.h.bf16 %v12248_v5  ;;  %v12249_v53 = vunpack.i.l.bf16 %v12248_v5  ;;  %v16008_v18 = vpop.permute.xlu1 %12267  ;;  %v10026_v1 = vld [vmem:[#allocation3 + $0x8d0] sm:$0xf]  ;;  %v10383_v62 = vld [vmem:[#allocation3 + $0x8d4] sm:$0xf0]  ;;  %v10381_v37 = vld [vmem:[#allocation3 + $0x8c4] sm:$0xf0]  ;;  %v9931_v5 = vor.u32 %v10359_v20, %v9930_v34 }
 0x6a5   : > { %8391 = vmatpush.bf16.msrb.mxu3 %v9731_v29  ;;  %v12270_v22 = vunpack.i.h.bf16 %v16008_v18  ;;  %v12269_v59 = vunpack.i.l.bf16 %v16008_v18  ;;  %v10027_v14 = vor.u32 %v10383_v62, %v10026_v1  ;;  %v9803_v29 = vor.u32 %v10327_v54, %v16025_v56  ;;  %v9794_v42 = vld [vmem:[#allocation3 + $0x700] sm:$0xf]  ;;  %v10377_v34 = vld [vmem:[#allocation3 + $0x8a4] sm:$0xf0]  ;;  %v8886_v20 = vld [vmem:[%s16232_s5 + $0x40] sm:$0xf] }
 0x6a6   : > { %8413 = vmatpush.bf16.msra.mxu1 %v9907_v57  ;;  %8400 = vmatpush.bf16.msra.mxu0 %v9835_v27  ;;  %v12260_v57 = vunpack.i.h.bf16 %v15990_v24  ;;  %v6152_v27 = vsel %vm6150_vm9, %v12245_v52, %v12249_v53  ;;  %v6153_v12 = vsel %vm6150_vm9, %v12250_v17, %v12254_v21  ;;  %v10329_v24 = vld [vmem:[#allocation3 + $0x724] sm:$0xf0]  ;;  %v16027_v21 = vpop.permute.xlu2 %12272  ;;  %v10019_v53 = vor.u32 %v10381_v37, %v10018_v36  ;;  %v10098_v56 = vld [vmem:[%s16232_s5 + $0x88] sm:$0x30] }
 0x6a7   : > { %8429 = vmatpush.bf16.msra.mxu2 %v9955_v28  ;;  %v6176_v13 = vsel %vm5466_vm7, %v6152_v27, 0.0  ;;  %v6177_v31 = vsel %vm5465_vm1, %v6153_v12, 0.0  ;;  %v9811_v38 = vor.u32 %v10329_v24, %v9810_v8  ;;  %v10357_v17 = vld [vmem:[#allocation3 + $0x804] sm:$0xf0]  ;;  %v12275_v18 = vunpack.i.h.bf16 %v16027_v21  ;;  %v9874_v8 = vld [vmem:[#allocation3 + $0x7a0] sm:$0xf] }
 0x6a8   : > { %v6187_v41 = vpack.c.bf16 %v6176_v13, %v6175_v45  ;;  %v6188_v52 = vpack.c.bf16 %v6178_v25, %v6177_v31  ;;  %8392 = vmatmul.bf16.vlgmr.msrb.gmra.mxu3 %v16006_v51  ;;  %v6280_v28 = vsel %vm6271_vm10, %v12259_v15, %v12260_v57  ;;  %v10325_v45 = vld [vmem:[#allocation3 + $0x704] sm:$0xf0]  ;;  %v12274_v27 = vunpack.i.l.bf16 %v16027_v21  ;;  %v9020_v15 = vld [vmem:[#allocation3 + $0xf8] sm:$0xf0]  ;;  %v10379_v13 = vld [vmem:[#allocation3 + $0x8b4] sm:$0xf0] }
 0x6a9   : > { %8440 = vmatpush.bf16.msra.mxu3 %v10043_v61  ;;  %v9890_v26 = vld [vmem:[#allocation3 + $0x7c0] sm:$0xf]  ;;  %v6304_v23 = vsel %vm5465_vm1, %v6280_v28, 0.0  ;;  %v8878_v21 = vld [vmem:[%s16232_s5 + $0x38] sm:$0xf]  ;;  %v9795_v62 = vor.u32 %v10325_v45, %v9794_v42 }
 0x6aa   : > { %8414 = vmatpush.bf16.msra.mxu1 %v9899_v46  ;;  %8401 = vmatpush.bf16.msra.mxu0 %v9827_v30  ;;  %6193 = vst [vmem:[#allocation3 + $0x7b0] sm:$0xff] %v6187_v41  ;;  %v10349_v44 = vld [vmem:[#allocation3 + $0x7c4] sm:$0xf0]  ;;  %v6283_v30 = vsel %vm6271_vm10, %v12269_v59, %v12270_v22  ;;  %v9922_v61 = vld [vmem:[#allocation3 + $0x800] sm:$0xf]  ;;  %v6276_v37 = vsel %vm6271_vm10, %v12274_v27, %v12275_v18 }
 0x6ab   : > { %8430 = vmatpush.bf16.msra.mxu2 %v9947_v6  ;;  %6194 = vst [vmem:[#allocation3 + $0x7b8] sm:$0xff] %v6188_v52  ;;  %v12263_v49 = vpop.permute.xlu0 %12262  ;;  %v9891_v48 = vor.u32 %v10349_v44, %v9890_v26  ;;  %v6307_v19 = vsel %vm5466_vm7, %v6283_v30, 0.0  ;;  %v10128_v22 = vld [vmem:[#allocation3 + $0xe4] sm:$0xf]  ;;  %v10002_v24 = vld [vmem:[#allocation3 + $0x8a0] sm:$0xf]  ;;  %v9923_v54 = vor.u32 %v10357_v17, %v9922_v61 }
 0x6ac   : > { %v12265_v46 = vunpack.i.h.bf16 %v12263_v49  ;;  %v12264_v0 = vunpack.i.l.bf16 %v12263_v49  ;;  %v16031_v33 = vpop.permute.xlu1 %12282  ;;  %v10097_v44 = vld [vmem:[%s16232_s5 + $0x80] sm:$0x30]  ;;  %v10003_v61 = vor.u32 %v10377_v34, %v10002_v24 }
 0x6ad   : > { %8441 = vmatpush.bf16.msra.mxu3 %v10035_v4  ;;  %v10130_v4 = vld [vmem:[#allocation3 + $0xf4] sm:$0xf]  ;;  %v12285_v41 = vunpack.i.h.bf16 %v16031_v33  ;;  %v12284_v52 = vunpack.i.l.bf16 %v16031_v33 }
 0x6ae   : > { %8402 = vmatpush.bf16.msra.mxu0 %v9819_v9  ;;  %8415 = vmatpush.bf16.msra.mxu1 %v9891_v48  ;;  %v6281_v6 = vsel %vm6271_vm10, %v12260_v57, %v12264_v0  ;;  %v6282_v9 = vsel %vm6271_vm10, %v12265_v46, %v12269_v59  ;;  %v10010_v57 = vld [vmem:[#allocation3 + $0x8b0] sm:$0xf]  ;;  %v9012_v59 = vld [vmem:[#allocation3 + $0xe8] sm:$0xf0]  ;;  %v9023_v26 = vor.u32 %v10130_v4, %v9020_v15  ;;  %v16061_v28 = vpop.permute.xlu2 %12287 }
 0x6af   : > { %8431 = vmatpush.bf16.msra.mxu2 %v9939_v11  ;;  %v6305_v12 = vsel %vm5466_vm7, %v6281_v6, 0.0  ;;  %v6306_v32 = vsel %vm5465_vm1, %v6282_v9, 0.0  ;;  %v10345_v11 = vld [vmem:[#allocation3 + $0x7a4] sm:$0xf0]  ;;  %v6279_v30 = vsel %vm6271_vm10, %v12284_v52, %v12285_v41  ;;  %v9015_v33 = vor.u32 %v10128_v22, %v9012_v59  ;;  %v10126_v9 = vld [vmem:[#allocation3 + $0xd4] sm:$0xf] }
 0x6b0   : > { %v6312_v31 = vpack.c.bf16 %v6305_v12, %v6304_v23  ;;  %v6313_v25 = vpack.c.bf16 %v6307_v19, %v6306_v32  ;;  %v12290_v42 = vunpack.i.h.bf16 %v16061_v28  ;;  %v12289_v4 = vunpack.i.l.bf16 %v16061_v28  ;;  %v9004_v32 = vld [vmem:[#allocation3 + $0xd8] sm:$0xf0]  ;;  %v10114_v41 = vld [vmem:[#allocation3 + $0x74] sm:$0xf]  ;;  %v9994_v59 = vld [vmem:[#allocation3 + $0x890] sm:$0xf] }
 0x6b1   : > { %8442 = vmatpush.bf16.msra.mxu3 %v10027_v14  ;;  %v9882_v36 = vld [vmem:[#allocation3 + $0x7b0] sm:$0xf]  ;;  %v10011_v14 = vor.u32 %v10379_v13, %v10010_v57  ;;  %v6303_v12 = vsel %vm5466_vm7, %v6279_v30, 0.0  ;;  %v9007_v24 = vor.u32 %v10126_v9, %v9004_v32  ;;  %v10146_v28 = vld [vmem:[#allocation3 + $0x174] sm:$0xf] }
 0x6b2   : > { %8403 = vmatpush.bf16.msra.mxu0 %v9811_v38  ;;  %6318 = vst [vmem:[#allocation3 + $0x920] sm:$0xff] %v6312_v31  ;;  %v10347_v1 = vld [vmem:[#allocation3 + $0x7b4] sm:$0xf0]  ;;  %v16063_v38 = vor.u32 %v10098_v56, %v8886_v20  ;;  %v9866_v13 = vld [vmem:[#allocation3 + $0x790] sm:$0xf] }
 0x6b3   : > { %8432 = vmatpush.bf16.msra.mxu2 %v9931_v5  ;;  %6319 = vst [vmem:[#allocation3 + $0x928] sm:$0xff] %v6313_v25  ;;  %v12278_v49 = vpop.permute.xlu0 %12277  ;;  %v9883_v48 = vor.u32 %v10347_v1, %v9882_v36  ;;  %v16066_v5 = vor.u32 %v10097_v44, %v8878_v21  ;;  %v10343_v31 = vld [vmem:[#allocation3 + $0x794] sm:$0xf0]  ;;  %v8996_v20 = vld [vmem:[#allocation3 + $0xc8] sm:$0xf0]  ;;  %v6272_v1 = vsel %vm6271_vm10, %v12289_v4, %v12290_v42 }
 0x6b4   : > { %v12280_v46 = vunpack.i.h.bf16 %v12278_v49  ;;  %v12279_v0 = vunpack.i.l.bf16 %v12278_v49  ;;  %v12298_v17 = vpop.permute.xlu1 %12297  ;;  %v10375_v25 = vld [vmem:[#allocation3 + $0x894] sm:$0xf0]  ;;  %v9084_v49 = vld [vmem:[#allocation3 + $0x178] sm:$0xf0] }
 0x6b5   : > { %8443 = vmatpush.bf16.msra.mxu3 %v10019_v53  ;;  %8416 = vmatpush.bf16.msra.mxu1 %v9883_v48  ;;  %v6300_v53 = vsel %vm5465_vm1, %v6276_v37, 0.0  ;;  %v12300_v15 = vunpack.i.h.bf16 %v12298_v17  ;;  %v12299_v57 = vunpack.i.l.bf16 %v12298_v17  ;;  %v9995_v21 = vor.u32 %v10375_v25, %v9994_v59  ;;  %v10373_v48 = vld [vmem:[#allocation3 + $0x884] sm:$0xf0]  ;;  %v8880_v30 = vld [vmem:[%s16232_s5 + $0x84] sm:$0x30] }
 0x6b6   : > { %8404 = vmatpush.bf16.msra.mxu0 %v9803_v29  ;;  %v9875_v29 = vor.u32 %v10345_v11, %v9874_v8  ;;  %v6277_v23 = vsel %vm6271_vm10, %v12275_v18, %v12279_v0  ;;  %v6278_v6 = vsel %vm6271_vm10, %v12280_v46, %v12284_v52  ;;  %v8956_v52 = vld [vmem:[#allocation3 + $0x78] sm:$0xf0]  ;;  %v10124_v8 = vld [vmem:[#allocation3 + $0xc4] sm:$0xf]  ;;  %v9858_v11 = vld [vmem:[#allocation3 + $0x780] sm:$0xf] }
 0x6b7   : > { %8433 = vmatpush.bf16.msra.mxu2 %v9923_v54  ;;  %v6301_v45 = vsel %vm5466_vm7, %v6277_v23, 0.0  ;;  %v6302_v27 = vsel %vm5465_vm1, %v6278_v6, 0.0  ;;  %v9867_v54 = vor.u32 %v10343_v31, %v9866_v13  ;;  %v6275_v37 = vsel %vm6271_vm10, %v12299_v57, %v12300_v15  ;;  %v10088_v0 = vld [vmem:[%s16232_s5 + $0x3c] sm:$0xf]  ;;  %v8988_v17 = vld [vmem:[#allocation3 + $0xb8] sm:$0xf0] }
 0x6b8   : > { %v6310_v18 = vpack.c.bf16 %v6301_v45, %v6300_v53  ;;  %v6311_v19 = vpack.c.bf16 %v6303_v12, %v6302_v27  ;;  %v8959_v46 = vor.u32 %v10114_v41, %v8956_v52  ;;  %v10089_v53 = vld [vmem:[%s16232_s5 + $0x44] sm:$0xf]  ;;  %v8888_v23 = vld [vmem:[%s16232_s5 + $0x8c] sm:$0x30]  ;;  %v6296_v6 = vsel %vm5465_vm1, %v6272_v1, 0.0 }
 0x6b9   : > { %8444 = vmatpush.bf16.msra.mxu3 %v10011_v14  ;;  %8417 = vmatpush.bf16.msra.mxu1 %v9875_v29  ;;  %v10066_v22 = vld [vmem:[#allocation3 + $0x920] sm:$0xf]  ;;  %v8999_v29 = vor.u32 %v10124_v8, %v8996_v20  ;;  %v6299_v4 = vsel %vm5466_vm7, %v6275_v37, 0.0  ;;  %v8948_v15 = vld [vmem:[#allocation3 + $0x68] sm:$0xf0]  ;;  %v9087_v13 = vor.u32 %v10146_v28, %v9084_v49  ;;  %v16108_v31 = vor.u32 %v10089_v53, %v8888_v23 }
 0x6ba   : > { %8405 = vmatpush.bf16.msra.mxu0 %v9795_v62  ;;  %8434 = vmatmul.bf16.vlgmr.msra.gmra.mxu2 %v16063_v38  ;;  %6316 = vst [vmem:[#allocation3 + $0x910] sm:$0xff] %v6310_v18  ;;  %v10393_v34 = vld [vmem:[#allocation3 + $0x924] sm:$0xf0]  ;;  %v9986_v45 = vld [vmem:[#allocation3 + $0x880] sm:$0xf]  ;;  %v16106_v18 = vor.u32 %v10088_v0, %v8880_v30 }
 0x6bb   : > { %8482 = vmatpush.bf16.msrb.mxu2 %v9023_v26  ;;  %6317 = vst [vmem:[#allocation3 + $0x918] sm:$0xff] %v6311_v19  ;;  %v12293_v56 = vpop.permute.xlu0 %12292  ;;  %v10067_v36 = vor.u32 %v10393_v34, %v10066_v22  ;;  %v10341_v26 = vld [vmem:[#allocation3 + $0x784] sm:$0xf0]  ;;  %v9987_v32 = vor.u32 %v10373_v48, %v9986_v45  ;;  %v10112_v19 = vld [vmem:[#allocation3 + $0x64] sm:$0xf] }
 0x6bc   : > { %v12295_v62 = vunpack.i.h.bf16 %v12293_v56  ;;  %v12294_v44 = vunpack.i.l.bf16 %v12293_v56  ;;  %v9076_v52 = vld [vmem:[#allocation3 + $0x168] sm:$0xf0]  ;;  %v8951_v8 = vor.u32 %v10112_v19, %v8948_v15  ;;  %v10110_v20 = vld [vmem:[#allocation3 + $0x54] sm:$0xf]  ;;  %v8940_v56 = vld [vmem:[#allocation3 + $0x58] sm:$0xf0] }
 0x6bd   : > { %8406 = vmatmul.bf16.vlgmr.msra.gmra.mxu0 %v16066_v5  ;;  %8445 = vmatpush.bf16.msra.mxu3 %v10003_v61  ;;  %v9859_v61 = vor.u32 %v10341_v26, %v9858_v11  ;;  %v8980_v59 = vld [vmem:[#allocation3 + $0xa8] sm:$0xf0]  ;;  %v9079_v34 = vor.u32 %v10144_v16, %v9076_v52  ;;  %v10118_v11 = vld [vmem:[#allocation3 + $0x94] sm:$0xf]  ;;  %v10108_v26 = vld [vmem:[#allocation3 + $0x44] sm:$0xf]  ;;  %v8943_v1 = vor.u32 %v10110_v20, %v8940_v56 }
 0x6be   : > { %8418 = vmatpush.bf16.msra.mxu1 %v9867_v54  ;;  %8459 = vmatpush.bf16.msrb.mxu0 %v10067_v36  ;;  %v6273_v14 = vsel %vm6271_vm10, %v12290_v42, %v12294_v44  ;;  %v10142_v36 = vld [vmem:[#allocation3 + $0x154] sm:$0xf]  ;;  %v8932_v44 = vld [vmem:[#allocation3 + $0x48] sm:$0xf0]  ;;  %v9148_v37 = vld [vmem:[#allocation3 + $0x1f8] sm:$0xf0] }
 0x6bf   : > { %8483 = vmatpush.bf16.msrb.mxu2 %v9015_v33  ;;  %v6274_v33 = vsel %vm6271_vm10, %v12295_v62, %v12299_v57  ;;  %v6297_v42 = vsel %vm5466_vm7, %v6273_v14, 0.0  ;;  %v10122_v57 = vld [vmem:[#allocation3 + $0xb4] sm:$0xf]  ;;  %v8972_v62 = vld [vmem:[#allocation3 + $0x98] sm:$0xf0]  ;;  %v8935_v53 = vor.u32 %v10108_v26, %v8932_v44 }
 0x6c0   : > { %v6298_v9 = vsel %vm5465_vm1, %v6274_v33, 0.0  ;;  %v6308_v27 = vpack.c.bf16 %v6297_v42, %v6296_v6  ;;  %v8991_v7 = vor.u32 %v10122_v57, %v8988_v17  ;;  %v8894_v48 = vld [vmem:[%s16232_s5 + $0x48] sm:$0xf]  ;;  %v8975_v0 = vor.u32 %v10118_v11, %v8972_v62  ;;  %v10140_v14 = vld [vmem:[#allocation3 + $0x144] sm:$0xf] }
 0x6c1   : > { %8446 = vmatpush.bf16.msra.mxu3 %v9995_v21  ;;  %v6309_v12 = vpack.c.bf16 %v6299_v4, %v6298_v9  ;;  %v10058_v25 = vld [vmem:[#allocation3 + $0x910] sm:$0xf]  ;;  %v9068_v21 = vld [vmem:[#allocation3 + $0x158] sm:$0xf0]  ;;  %v8964_v17 = vld [vmem:[#allocation3 + $0x88] sm:$0xf0] }
 0x6c2   : > { %8419 = vmatpush.bf16.msra.mxu1 %v9859_v61  ;;  %6314 = vst [vmem:[#allocation3 + $0x900] sm:$0xff] %v6308_v27  ;;  %v10391_v41 = vld [vmem:[#allocation3 + $0x914] sm:$0xf0]  ;;  %v9071_v28 = vor.u32 %v10142_v36, %v9068_v21  ;;  %v10116_v61 = vld [vmem:[#allocation3 + $0x84] sm:$0xf] }
 0x6c3   : > { %8484 = vmatpush.bf16.msrb.mxu2 %v9007_v24  ;;  %6315 = vst [vmem:[#allocation3 + $0x908] sm:$0xff] %v6309_v12  ;;  %v10059_v22 = vor.u32 %v10391_v41, %v10058_v25  ;;  %v10120_v24 = vld [vmem:[#allocation3 + $0xa4] sm:$0xf]  ;;  %v9060_v6 = vld [vmem:[#allocation3 + $0x148] sm:$0xf0]  ;;  %v8967_v19 = vor.u32 %v10116_v61, %v8964_v17 }
 0x6c4   : > { %v8983_v54 = vor.u32 %v10120_v24, %v8980_v59  ;;  %v10194_v9 = vld [vmem:[#allocation3 + $0x2f4] sm:$0xf]  ;;  %v9276_v4 = vld [vmem:[#allocation3 + $0x2f8] sm:$0xf0]  ;;  %v9063_v45 = vor.u32 %v10140_v14, %v9060_v6  ;;  %v9140_v25 = vld [vmem:[#allocation3 + $0x1e8] sm:$0xf0] }
 0x6c5   : > { %8447 = vmatpush.bf16.msra.mxu3 %v9987_v32  ;;  %8420 = vmatmul.bf16.vlgmr.msra.gmra.mxu1 %v16106_v18  ;;  %v10106_v27 = vld [vmem:[#allocation3 + $0x34] sm:$0xf]  ;;  %v8924_v12 = vld [vmem:[#allocation3 + $0x38] sm:$0xf0]  ;;  %v10160_v32 = vld [vmem:[#allocation3 + $0x1e4] sm:$0xf] }
 0x6c6   : > { %8468 = vmatpush.bf16.msrb.mxu1 %v8959_v46  ;;  %8460 = vmatpush.bf16.msrb.mxu0 %v10059_v22  ;;  %v10099_v46 = vld [vmem:[%s16232_s5 + $0x90] sm:$0x30]  ;;  %v10138_v15 = vld [vmem:[#allocation3 + $0x134] sm:$0xf]  ;;  %v9052_v57 = vld [vmem:[#allocation3 + $0x138] sm:$0xf0]  ;;  %v8927_v16 = vor.u32 %v10106_v27, %v8924_v12 }
 0x6c7   : > { %8485 = vmatpush.bf16.msrb.mxu2 %v8999_v29  ;;  %v10162_v29 = vld [vmem:[#allocation3 + $0x1f4] sm:$0xf]  ;;  %v16118_v42 = vor.u32 %v10099_v46, %v8894_v48  ;;  %v10192_v41 = vld [vmem:[#allocation3 + $0x2e4] sm:$0xf]  ;;  %v9268_v52 = vld [vmem:[#allocation3 + $0x2e8] sm:$0xf0]  ;;  %v9055_v22 = vor.u32 %v10138_v15, %v9052_v57 }
 0x6c8   : > { %8448 = vmatmul.bf16.vlgmr.msra.gmra.mxu3 %v16108_v31  ;;  %v9151_v23 = vor.u32 %v10162_v29, %v9148_v37  ;;  %v8916_v59 = vld [vmem:[#allocation3 + $0x28] sm:$0xf0]  ;;  %v9132_v24 = vld [vmem:[#allocation3 + $0x1d8] sm:$0xf0]  ;;  %v9271_v56 = vor.u32 %v10192_v41, %v9268_v52  ;;  %v10190_v11 = vld [vmem:[#allocation3 + $0x2d4] sm:$0xf] }
 0x6c9   : > { %8496 = vmatpush.bf16.msrb.mxu3 %v9087_v13  ;;  %v10050_v49 = vld [vmem:[#allocation3 + $0x900] sm:$0xf]  ;;  %v9279_v13 = vor.u32 %v10194_v9, %v9276_v4  ;;  %v9044_v20 = vld [vmem:[#allocation3 + $0x128] sm:$0xf0]  ;;  %v9260_v26 = vld [vmem:[#allocation3 + $0x2d8] sm:$0xf0] }
 0x6ca   : > { %8469 = vmatpush.bf16.msrb.mxu1 %v8951_v8  ;;  %v10389_v30 = vld [vmem:[#allocation3 + $0x904] sm:$0xf0]  ;;  %v10158_v8 = vld [vmem:[#allocation3 + $0x1d4] sm:$0xf]  ;;  %v8908_v44 = vld [vmem:[#allocation3 + $0x18] sm:$0xf0]  ;;  %v9263_v46 = vor.u32 %v10190_v11, %v9260_v26 }
 0x6cb   : > { %8486 = vmatpush.bf16.msrb.mxu2 %v8991_v7  ;;  %v10051_v33 = vor.u32 %v10389_v30, %v10050_v49  ;;  %v9143_v7 = vor.u32 %v10160_v32, %v9140_v25  ;;  %v9135_v21 = vor.u32 %v10158_v8, %v9132_v24  ;;  %v10156_v37 = vld [vmem:[#allocation3 + $0x1c4] sm:$0xf]  ;;  %v10134_v49 = vld [vmem:[#allocation3 + $0x114] sm:$0xf]  ;;  %v9036_v48 = vld [vmem:[#allocation3 + $0x118] sm:$0xf0] }
 0x6cc   : > { %v10188_v14 = vld [vmem:[#allocation3 + $0x2c4] sm:$0xf]  ;;  %v8900_v29 = vld [vmem:[#allocation3 + $0x8] sm:$0xf0]  ;;  %v10154_v61 = vld [vmem:[#allocation3 + $0x1b4] sm:$0xf] }
 0x6cd   : > { %8497 = vmatpush.bf16.msrb.mxu3 %v9079_v34  ;;  %8461 = vmatpush.bf16.msrb.mxu0 %v10051_v33  ;;  %v10136_v34 = vld [vmem:[#allocation3 + $0x124] sm:$0xf]  ;;  %v9039_v33 = vor.u32 %v10134_v49, %v9036_v48  ;;  %v9116_v17 = vld [vmem:[#allocation3 + $0x1b8] sm:$0xf0]  ;;  %v10178_v6 = vld [vmem:[#allocation3 + $0x274] sm:$0xf] }
 0x6ce   : > { %8470 = vmatpush.bf16.msrb.mxu1 %v8943_v1  ;;  %v10102_v1 = vld [vmem:[#allocation3 + $0x14] sm:$0xf]  ;;  %v9047_v62 = vor.u32 %v10136_v34, %v9044_v20  ;;  %v10100_v4 = vld [vmem:[#allocation3 + $0x4] sm:$0xf]  ;;  %v9340_v27 = vld [vmem:[#allocation3 + $0x378] sm:$0xf0]  ;;  %v9119_v32 = vor.u32 %v10154_v61, %v9116_v17 }
 0x6cf   : > { %8487 = vmatpush.bf16.msrb.mxu2 %v8983_v54  ;;  %v10104_v54 = vld [vmem:[#allocation3 + $0x24] sm:$0xf]  ;;  %v8903_v12 = vor.u32 %v10100_v4, %v8900_v29  ;;  %v10186_v15 = vld [vmem:[#allocation3 + $0x2b4] sm:$0xf]  ;;  %v9244_v57 = vld [vmem:[#allocation3 + $0x2b8] sm:$0xf0] }
 0x6d0   : > { %10072 = vmatmul.msk.bf16.vlgmr.msrb.gmra.mxu0 %vm1133_vm11, %v16118_v42  ;;  %v8919_v36 = vor.u32 %v10104_v54, %v8916_v59  ;;  %v10176_v52 = vld [vmem:[#allocation3 + $0x264] sm:$0xf]  ;;  %v9247_v59 = vor.u32 %v10186_v15, %v9244_v57  ;;  %v9332_v24 = vld [vmem:[#allocation3 + $0x368] sm:$0xf0]  ;;  %v10174_v26 = vld [vmem:[#allocation3 + $0x254] sm:$0xf] }
 0x6d1   : > { %8498 = vmatpush.bf16.msrb.mxu3 %v9071_v28  ;;  %8510 = vmatpush.bf16.msra.mxu0 %v9151_v23  ;;  %v9124_v28 = vld [vmem:[#allocation3 + $0x1c8] sm:$0xf0]  ;;  %v10208_v8 = vld [vmem:[#allocation3 + $0x364] sm:$0xf]  ;;  %v9228_v49 = vld [vmem:[#allocation3 + $0x298] sm:$0xf0] }
 0x6d2   : > { %8471 = vmatpush.bf16.msrb.mxu1 %v8935_v53  ;;  %v9127_v30 = vor.u32 %v10156_v37, %v9124_v28  ;;  %v10132_v53 = vld [vmem:[#allocation3 + $0x104] sm:$0xf]  ;;  %v9028_v23 = vld [vmem:[#allocation3 + $0x108] sm:$0xf0]  ;;  %v9335_v11 = vor.u32 %v10208_v8, %v9332_v24  ;;  %v10182_v28 = vld [vmem:[#allocation3 + $0x294] sm:$0xf] }
 0x6d3   : > { %8488 = vmatpush.bf16.msrb.mxu2 %v8975_v0  ;;  %v8911_v0 = vor.u32 %v10102_v1, %v8908_v44  ;;  %v10184_v20 = vld [vmem:[#allocation3 + $0x2a4] sm:$0xf]  ;;  %v9196_v1 = vld [vmem:[#allocation3 + $0x258] sm:$0xf0]  ;;  %v10226_v48 = vld [vmem:[#allocation3 + $0x3f4] sm:$0xf] }
 0x6d4   : > { %v9324_v44 = vld [vmem:[#allocation3 + $0x358] sm:$0xf0]  ;;  %v9316_v61 = vld [vmem:[#allocation3 + $0x348] sm:$0xf0]  ;;  %v10224_v15 = vld [vmem:[#allocation3 + $0x3e4] sm:$0xf] }
 0x6d5   : > { %8499 = vmatpush.bf16.msrb.mxu3 %v9063_v45  ;;  %8511 = vmatpush.bf16.msra.mxu0 %v9143_v7  ;;  %v10210_v45 = vld [vmem:[#allocation3 + $0x374] sm:$0xf]  ;;  %v9108_v7 = vld [vmem:[#allocation3 + $0x1a8] sm:$0xf0]  ;;  %v9404_v29 = vld [vmem:[#allocation3 + $0x3f8] sm:$0xf0] }
 0x6d6   : > { %8472 = vmatpush.bf16.msrb.mxu1 %v8927_v16  ;;  %v10152_v16 = vld [vmem:[#allocation3 + $0x1a4] sm:$0xf]  ;;  %v9343_v41 = vor.u32 %v10210_v45, %v9340_v27  ;;  %v9407_v4 = vor.u32 %v10226_v48, %v9404_v29  ;;  %v10258_v45 = vld [vmem:[#allocation3 + $0x4f4] sm:$0xf]  ;;  %v9532_v27 = vld [vmem:[#allocation3 + $0x4f8] sm:$0xf0] }
 0x6d7   : > { %8489 = vmatpush.bf16.msrb.mxu2 %v8967_v19  ;;  %v9212_v19 = vld [vmem:[#allocation3 + $0x278] sm:$0xf0]  ;;  %v9111_v34 = vor.u32 %v10152_v16, %v9108_v7  ;;  %v9396_v57 = vld [vmem:[#allocation3 + $0x3e8] sm:$0xf0]  ;;  %v9535_v16 = vor.u32 %v10258_v45, %v9532_v27  ;;  %v10168_v8 = vld [vmem:[#allocation3 + $0x224] sm:$0xf] }
 0x6d8   : > { %v9215_v25 = vor.u32 %v10178_v6, %v9212_v19  ;;  %v10204_v6 = vld [vmem:[#allocation3 + $0x344] sm:$0xf]  ;;  %v9180_v19 = vld [vmem:[#allocation3 + $0x238] sm:$0xf0]  ;;  %v10198_v48 = vld [vmem:[#allocation3 + $0x314] sm:$0xf] }
 0x6d9   : > { %8500 = vmatpush.bf16.msrb.mxu3 %v9055_v22  ;;  %8512 = vmatpush.bf16.msra.mxu0 %v9135_v21  ;;  %v9204_v22 = vld [vmem:[#allocation3 + $0x268] sm:$0xf0]  ;;  %v9100_v21 = vld [vmem:[#allocation3 + $0x198] sm:$0xf0] }
 0x6da   : > { %8490 = vmatmul.bf16.vlgmr.msrb.gmra.mxu2 %v15606_v10  ;;  %8473 = vmatpush.bf16.msrb.mxu1 %v8919_v36  ;;  %v9252_v10 = vld [vmem:[#allocation3 + $0x2c8] sm:$0xf0]  ;;  %v9207_v54 = vor.u32 %v10176_v52, %v9204_v22  ;;  %v10150_v36 = vld [vmem:[#allocation3 + $0x194] sm:$0xf]  ;;  %v9308_v7 = vld [vmem:[#allocation3 + $0x338] sm:$0xf0]  ;;  %v9399_v52 = vor.u32 %v10224_v15, %v9396_v57 }
 0x6db   : > { %8538 = vmatpush.bf16.msra.mxu2 %v9279_v13  ;;  %v9255_v9 = vor.u32 %v10188_v14, %v9252_v10  ;;  %v9031_v13 = vor.u32 %v10132_v53, %v9028_v23  ;;  %v9103_v37 = vor.u32 %v10150_v36, %v9100_v21  ;;  %v9092_v14 = vld [vmem:[#allocation3 + $0x188] sm:$0xf0]  ;;  %v10172_v10 = vld [vmem:[#allocation3 + $0x244] sm:$0xf]  ;;  %v9596_v45 = vld [vmem:[#allocation3 + $0x578] sm:$0xf0] }
 0x6dc   : > { %v10180_v53 = vld [vmem:[#allocation3 + $0x284] sm:$0xf]  ;;  %v9220_v23 = vld [vmem:[#allocation3 + $0x288] sm:$0xf0] }
 0x6dd   : > { %8501 = vmatpush.bf16.msrb.mxu3 %v9047_v62  ;;  %8513 = vmatpush.bf16.msra.mxu0 %v9127_v30  ;;  %v10148_v30 = vld [vmem:[#allocation3 + $0x184] sm:$0xf]  ;;  %v9300_v36 = vld [vmem:[#allocation3 + $0x328] sm:$0xf0] }
 0x6de   : > { %8474 = vmatpush.bf16.msrb.mxu1 %v8911_v0  ;;  %v10206_v0 = vld [vmem:[#allocation3 + $0x354] sm:$0xf]  ;;  %v9095_v17 = vor.u32 %v10148_v30, %v9092_v14  ;;  %v10256_v22 = vld [vmem:[#allocation3 + $0x4e4] sm:$0xf]  ;;  %v9156_v29 = vld [vmem:[#allocation3 + $0x208] sm:$0xf0] }
 0x6df   : > { %8539 = vmatpush.bf16.msra.mxu2 %v9271_v56  ;;  %v9236_v56 = vld [vmem:[#allocation3 + $0x2a8] sm:$0xf0] }
 0x6e0   : > { %v9239_v62 = vor.u32 %v10184_v20, %v9236_v56  ;;  %v10222_v20 = vld [vmem:[#allocation3 + $0x3d4] sm:$0xf]  ;;  %v9388_v56 = vld [vmem:[#allocation3 + $0x3d8] sm:$0xf0] }
 0x6e1   : > { %8502 = vmatpush.bf16.msrb.mxu3 %v9039_v33  ;;  %8514 = vmatpush.bf16.msra.mxu0 %v9119_v32  ;;  %v9188_v33 = vld [vmem:[#allocation3 + $0x248] sm:$0xf0]  ;;  %v9319_v32 = vor.u32 %v10204_v6, %v9316_v61  ;;  %v9372_v61 = vld [vmem:[#allocation3 + $0x3b8] sm:$0xf0] }
 0x6e2   : > { %8475 = vmatpush.bf16.msrb.mxu1 %v8903_v12  ;;  %v10170_v12 = vld [vmem:[#allocation3 + $0x234] sm:$0xf] }
 0x6e3   : > { %8540 = vmatpush.bf16.msra.mxu2 %v9263_v46  ;;  %v9199_v46 = vor.u32 %v10174_v26, %v9196_v1  ;;  %v9391_v26 = vor.u32 %v10222_v20, %v9388_v56  ;;  %v10254_v1 = vld [vmem:[#allocation3 + $0x4d4] sm:$0xf]  ;;  %v16129_v20 = vpop.f32.mrf.mxu3 }
 0x6e5   : > { %8503 = vmatpush.bf16.msrb.mxu3 %v9031_v13  ;;  %8476 = vmatmul.bf16.vlgmr.msrb.gmra.mxu1 %v15575_v35  ;;  %v9327_v35 = vor.u32 %v10206_v0, %v9324_v44  ;;  %v9223_v13 = vor.u32 %v10180_v53, %v9220_v23  ;;  %v10166_v44 = vld [vmem:[#allocation3 + $0x214] sm:$0xf]  ;;  %v9468_v23 = vld [vmem:[#allocation3 + $0x478] sm:$0xf0] }
 0x6e6   : > { %8524 = vmatpush.bf16.msra.mxu1 %v9215_v25  ;;  %8515 = vmatpush.bf16.msra.mxu0 %v9111_v34  ;;  %v10202_v25 = vld [vmem:[#allocation3 + $0x334] sm:$0xf]  ;;  %v9172_v34 = vld [vmem:[#allocation3 + $0x228] sm:$0xf0] }
 0x6e7   : > { %8541 = vmatpush.bf16.msra.mxu2 %v9255_v9  ;;  %v9191_v9 = vor.u32 %v10172_v10, %v9188_v33  ;;  %v9311_v24 = vor.u32 %v10202_v25, %v9308_v7  ;;  %v10196_v10 = vld [vmem:[#allocation3 + $0x304] sm:$0xf]  ;;  %v10242_v53 = vld [vmem:[#allocation3 + $0x474] sm:$0xf]  ;;  %v9364_v25 = vld [vmem:[#allocation3 + $0x3a8] sm:$0xf0] }
 0x6e8   : > { %8504 = vmatmul.bf16.vlgmr.msrb.gmra.mxu3 %v15691_v58  ;;  %v9231_v58 = vor.u32 %v10182_v28, %v9228_v49  ;;  %v10220_v28 = vld [vmem:[#allocation3 + $0x3c4] sm:$0xf]  ;;  %v9380_v49 = vld [vmem:[#allocation3 + $0x3c8] sm:$0xf0]  ;;  %v9471_v57 = vor.u32 %v10242_v53, %v9468_v23 }
 0x6e9   : > { %8552 = vmatpush.bf16.msra.mxu3 %v9343_v41  ;;  %v9183_v41 = vor.u32 %v10170_v12, %v9180_v19  ;;  %v9383_v14 = vor.u32 %v10220_v28, %v9380_v49  ;;  %v9500_v19 = vld [vmem:[#allocation3 + $0x4b8] sm:$0xf0] }
 0x6ea   : > { %8525 = vmatpush.bf16.msra.mxu1 %v9207_v54  ;;  %8516 = vmatpush.bf16.msra.mxu0 %v9103_v37  ;;  %v10200_v54 = vld [vmem:[#allocation3 + $0x324] sm:$0xf]  ;;  %v9164_v37 = vld [vmem:[#allocation3 + $0x218] sm:$0xf0] }
 0x6eb   : > { %8542 = vmatpush.bf16.msra.mxu2 %v9247_v59  ;;  %v9524_v59 = vld [vmem:[#allocation3 + $0x4e8] sm:$0xf0]  ;;  %v9167_v30 = vor.u32 %v10166_v44, %v9164_v37  ;;  %v10270_v44 = vld [vmem:[#allocation3 + $0x554] sm:$0xf]  ;;  %v9484_v28 = vld [vmem:[#allocation3 + $0x498] sm:$0xf0] }
 0x6ec   : > { %v9527_v21 = vor.u32 %v10256_v22, %v9524_v59  ;;  %v10272_v59 = vld [vmem:[#allocation3 + $0x564] sm:$0xf] }
 0x6ed   : > { %8553 = vmatpush.bf16.msra.mxu3 %v9335_v11  ;;  %v9175_v11 = vor.u32 %v10168_v8, %v9172_v34  ;;  %v9588_v8 = vld [vmem:[#allocation3 + $0x568] sm:$0xf0] }
 0x6ee   : > { %8526 = vmatpush.bf16.msra.mxu1 %v9199_v46  ;;  %8517 = vmatpush.bf16.msra.mxu0 %v9095_v17  ;;  %v9292_v46 = vld [vmem:[#allocation3 + $0x318] sm:$0xf0]  ;;  %v9284_v17 = vld [vmem:[#allocation3 + $0x308] sm:$0xf0] }
 0x6ef   : > { %8543 = vmatpush.bf16.msra.mxu2 %v9239_v62  ;;  %v9516_v62 = vld [vmem:[#allocation3 + $0x4d8] sm:$0xf0]  ;;  %v9295_v33 = vor.u32 %v10198_v48, %v9292_v46  ;;  %v9287_v15 = vor.u32 %v10196_v10, %v9284_v17  ;;  %v9492_v34 = vld [vmem:[#allocation3 + $0x4a8] sm:$0xf0]  ;;  %v10236_v46 = vld [vmem:[#allocation3 + $0x444] sm:$0xf] }
 0x6f0   : > { %v9519_v0 = vor.u32 %v10254_v1, %v9516_v62  ;;  %v9452_v1 = vld [vmem:[#allocation3 + $0x458] sm:$0xf0]  ;;  %v9348_v48 = vld [vmem:[#allocation3 + $0x388] sm:$0xf0]  ;;  %v10268_v10 = vld [vmem:[#allocation3 + $0x544] sm:$0xf] }
 0x6f1   : > { %8554 = vmatpush.bf16.msra.mxu3 %v9327_v35  ;;  %8518 = vmatmul.bf16.vlgmr.msra.gmra.mxu0 %v15689_v39  ;;  %v9303_v39 = vor.u32 %v10200_v54, %v9300_v36  ;;  %v10252_v35 = vld [vmem:[#allocation3 + $0x4c4] sm:$0xf]  ;;  %v10214_v54 = vld [vmem:[#allocation3 + $0x394] sm:$0xf]  ;;  %v9356_v36 = vld [vmem:[#allocation3 + $0x398] sm:$0xf0] }
 0x6f2   : > { %8527 = vmatpush.bf16.msra.mxu1 %v9191_v9  ;;  %8566 = vmatpush.bf16.msrb.mxu0 %v9407_v4  ;;  %v10164_v9 = vld [vmem:[#allocation3 + $0x204] sm:$0xf]  ;;  %v10274_v4 = vld [vmem:[#allocation3 + $0x574] sm:$0xf]  ;;  %v9359_v37 = vor.u32 %v10214_v54, %v9356_v36 }
 0x6f3   : > { %8544 = vmatpush.bf16.msra.mxu2 %v9231_v58  ;;  %v10218_v58 = vld [vmem:[#allocation3 + $0x3b4] sm:$0xf]  ;;  %v9159_v27 = vor.u32 %v10164_v9, %v9156_v29  ;;  %v9599_v7 = vor.u32 %v10274_v4, %v9596_v45  ;;  %v10244_v17 = vld [vmem:[#allocation3 + $0x484] sm:$0xf]  ;;  %v9788_v9 = vld [vmem:[#allocation3 + $0x6f8] sm:$0xf0] }
 0x6f4   : > { %v9375_v12 = vor.u32 %v10218_v58, %v9372_v61  ;;  %v10290_v61 = vld [vmem:[#allocation3 + $0x5f4] sm:$0xf]  ;;  %v9476_v45 = vld [vmem:[#allocation3 + $0x488] sm:$0xf0]  ;;  %v10264_v36 = vld [vmem:[#allocation3 + $0x524] sm:$0xf] }
 0x6f5   : > { %8555 = vmatpush.bf16.msra.mxu3 %v9319_v32  ;;  %v10250_v32 = vld [vmem:[#allocation3 + $0x4b4] sm:$0xf] }
 0x6f6   : > { %8528 = vmatpush.bf16.msra.mxu1 %v9183_v41  ;;  %8567 = vmatpush.bf16.msrb.mxu0 %v9399_v52  ;;  %v10240_v41 = vld [vmem:[#allocation3 + $0x464] sm:$0xf]  ;;  %v9460_v52 = vld [vmem:[#allocation3 + $0x468] sm:$0xf0]  ;;  %v9503_v22 = vor.u32 %v10250_v32, %v9500_v19  ;;  %v10234_v4 = vld [vmem:[#allocation3 + $0x434] sm:$0xf]  ;;  %v16137_v19 = vpop.f32.mrf.mxu3 }
 0x6f7   : > { %8545 = vmatpush.bf16.msra.mxu2 %v9223_v13  ;;  %v10216_v13 = vld [vmem:[#allocation3 + $0x3a4] sm:$0xf]  ;;  %v9463_v56 = vor.u32 %v10240_v41, %v9460_v52  ;;  %v9652_v32 = vld [vmem:[#allocation3 + $0x5e8] sm:$0xf0]  ;;  %v10286_v54 = vld [vmem:[#allocation3 + $0x5d4] sm:$0xf] }
 0x6f9   : > { %8556 = vmatpush.bf16.msra.mxu3 %v9311_v24  ;;  %v9367_v24 = vor.u32 %v10216_v13, %v9364_v25  ;;  %v9564_v13 = vld [vmem:[#allocation3 + $0x538] sm:$0xf0] }
 0x6fa   : > { %8546 = vmatmul.bf16.vlgmr.msra.gmra.mxu2 %v15740_v60  ;;  %8529 = vmatpush.bf16.msra.mxu1 %v9175_v11  ;;  %v9508_v60 = vld [vmem:[#allocation3 + $0x4c8] sm:$0xf0]  ;;  %v9591_v11 = vor.u32 %v10272_v59, %v9588_v8  ;;  %v16140_v8 = vpop.f32.mrf.mxu1 }
 0x6fb   : > { %8594 = vmatpush.bf16.msrb.mxu2 %v9535_v16  ;;  %8568 = vmatpush.bf16.msrb.mxu0 %v9391_v26  ;;  %v9511_v6 = vor.u32 %v10252_v35, %v9508_v60  ;;  %v16127_v16 = vpop.f32.mrf.mxu2  ;;  %v10238_v26 = vld [vmem:[#allocation3 + $0x454] sm:$0xf]  ;;  %v9660_v35 = vld [vmem:[#allocation3 + $0x5f8] sm:$0xf0]  ;;  %v9780_v59 = vld [vmem:[#allocation3 + $0x6e8] sm:$0xf0] }
 0x6fc   : > { %v9455_v49 = vor.u32 %v10238_v26, %v9452_v1  ;;  %v9663_v23 = vor.u32 %v10290_v61, %v9660_v35  ;;  %v10316_v35 = vld [vmem:[#allocation3 + $0x6c4] sm:$0xf]  ;;  %v9412_v61 = vld [vmem:[#allocation3 + $0x408] sm:$0xf0] }
 0x6fd   : > { %8557 = vmatpush.bf16.msra.mxu3 %v9303_v39  ;;  %v9580_v39 = vld [vmem:[#allocation3 + $0x558] sm:$0xf0] }
 0x6fe   : > { %8530 = vmatpush.bf16.msra.mxu1 %v9167_v30  ;;  %v9583_v30 = vor.u32 %v10270_v44, %v9580_v39  ;;  %v10318_v44 = vld [vmem:[#allocation3 + $0x6d4] sm:$0xf]  ;;  %v9772_v39 = vld [vmem:[#allocation3 + $0x6d8] sm:$0xf0] }
 0x6ff   : > { %8595 = vmatpush.bf16.msrb.mxu2 %v9527_v21  ;;  %8569 = vmatpush.bf16.msrb.mxu0 %v9383_v14  ;;  %v10248_v21 = vld [vmem:[#allocation3 + $0x4a4] sm:$0xf]  ;;  %v9444_v14 = vld [vmem:[#allocation3 + $0x448] sm:$0xf0] }
 0x700   : > { %v9495_v62 = vor.u32 %v10248_v21, %v9492_v34  ;;  %v9447_v53 = vor.u32 %v10236_v46, %v9444_v14  ;;  %v10232_v34 = vld [vmem:[#allocation3 + $0x424] sm:$0xf]  ;;  %v9556_v21 = vld [vmem:[#allocation3 + $0x528] sm:$0xf0]  ;;  %v9775_v14 = vor.u32 %v10318_v44, %v9772_v39 }
 0x701   : > { %8558 = vmatpush.bf16.msra.mxu3 %v9295_v33  ;;  %v9572_v33 = vld [vmem:[#allocation3 + $0x548] sm:$0xf0]  ;;  %v10312_v44 = vld [vmem:[#allocation3 + $0x6a4] sm:$0xf] }
 0x702   : > { %8531 = vmatpush.bf16.msra.mxu1 %v9159_v27  ;;  %v9575_v27 = vor.u32 %v10268_v10, %v9572_v33  ;;  %v9636_v46 = vld [vmem:[#allocation3 + $0x5c8] sm:$0xf0] }
 0x703   : > { %8596 = vmatpush.bf16.msrb.mxu2 %v9519_v0  ;;  %8570 = vmatpush.bf16.msrb.mxu0 %v9375_v12  ;;  %v16133_v0 = vpop.f32.mrf.mxu0  ;;  %v16135_v29 = vpop.f32.mrf.mxu2  ;;  %v9436_v12 = vld [vmem:[#allocation3 + $0x438] sm:$0xf0]  ;;  %v9764_v33 = vld [vmem:[#allocation3 + $0x6c8] sm:$0xf0] }
 0x704   : > { %v9439_v41 = vor.u32 %v10234_v4, %v9436_v12  ;;  %v10306_v4 = vld [vmem:[#allocation3 + $0x674] sm:$0xf]  ;;  %v9767_v12 = vor.u32 %v10316_v35, %v9764_v33  ;;  %v9748_v39 = vld [vmem:[#allocation3 + $0x6a8] sm:$0xf0]  ;;  %v9836_v35 = vld [vmem:[#allocation3 + $0x758] sm:$0xf0] }
 0x705   : > { %8559 = vmatpush.bf16.msra.mxu3 %v9287_v15  ;;  %8532 = vmatmul.bf16.vlgmr.msra.gmra.mxu1 %v15681_v63  ;;  %v10212_v63 = vld [vmem:[#allocation3 + $0x384] sm:$0xf]  ;;  %v9479_v15 = vor.u32 %v10244_v17, %v9476_v45  ;;  %v9724_v45 = vld [vmem:[#allocation3 + $0x678] sm:$0xf0] }
 0x706   : > { %8580 = vmatpush.bf16.msrb.mxu1 %v9471_v57  ;;  %v9351_v58 = vor.u32 %v10212_v63, %v9348_v48  ;;  %v10266_v57 = vld [vmem:[#allocation3 + $0x534] sm:$0xf]  ;;  %v9420_v63 = vld [vmem:[#allocation3 + $0x418] sm:$0xf0]  ;;  %v10284_v48 = vld [vmem:[#allocation3 + $0x5c4] sm:$0xf] }
 0x707   : > { %8597 = vmatpush.bf16.msrb.mxu2 %v9511_v6  ;;  %8571 = vmatpush.bf16.msrb.mxu0 %v9367_v24  ;;  %v10322_v6 = vld [vmem:[#allocation3 + $0x6f4] sm:$0xf]  ;;  %v9567_v24 = vor.u32 %v10266_v57, %v9564_v13  ;;  %v9639_v10 = vor.u32 %v10284_v48, %v9636_v46  ;;  %v9740_v33 = vld [vmem:[#allocation3 + $0x698] sm:$0xf0] }
 0x708   : > { %8560 = vmatmul.bf16.vlgmr.msra.gmra.mxu3 %v15790_v43  ;;  %v10246_v43 = vld [vmem:[#allocation3 + $0x494] sm:$0xf]  ;;  %v9791_v25 = vor.u32 %v10322_v6, %v9788_v9  ;;  %v10260_v6 = vld [vmem:[#allocation3 + $0x504] sm:$0xf]  ;;  %v9540_v9 = vld [vmem:[#allocation3 + $0x508] sm:$0xf0] }
 0x709   : > { %8608 = vmatpush.bf16.msrb.mxu3 %v9599_v7  ;;  %v9487_v60 = vor.u32 %v10246_v43, %v9484_v28  ;;  %v10288_v7 = vld [vmem:[#allocation3 + $0x5e4] sm:$0xf]  ;;  %v10262_v43 = vld [vmem:[#allocation3 + $0x514] sm:$0xf] }
 0x70a   : > { %8581 = vmatpush.bf16.msrb.mxu1 %v9463_v56  ;;  %v9655_v52 = vor.u32 %v10288_v7, %v9652_v32  ;;  %v9428_v56 = vld [vmem:[#allocation3 + $0x428] sm:$0xf0]  ;;  %v10338_v32 = vld [vmem:[#allocation3 + $0x774] sm:$0xf]  ;;  %v9756_v7 = vld [vmem:[#allocation3 + $0x6b8] sm:$0xf0] }
 0x70b   : > { %8598 = vmatpush.bf16.msrb.mxu2 %v9503_v22  ;;  %8572 = vmatpush.bf16.msrb.mxu0 %v9359_v37  ;;  %v10320_v22 = vld [vmem:[#allocation3 + $0x6e4] sm:$0xf]  ;;  %v9431_v1 = vor.u32 %v10232_v34, %v9428_v56  ;;  %v10230_v37 = vld [vmem:[#allocation3 + $0x414] sm:$0xf]  ;;  %v16145_v28 = vpop.f32.mrf.mxu2 }
 0x70c   : > { %v9783_v26 = vor.u32 %v10320_v22, %v9780_v59  ;;  %v9727_v22 = vor.u32 %v10306_v4, %v9724_v45  ;;  %v10280_v59 = vld [vmem:[#allocation3 + $0x5a4] sm:$0xf] }
 0x70d   : > { %8609 = vmatpush.bf16.msrb.mxu3 %v9591_v11  ;;  %v16142_v11 = vpop.f32.mrf.mxu0  ;;  %v10304_v56 = vld [vmem:[#allocation3 + $0x664] sm:$0xf] }
 0x70e   : > { %8582 = vmatpush.bf16.msrb.mxu1 %v9455_v49  ;;  %v9559_v49 = vor.u32 %v10264_v36, %v9556_v21 }
 0x70f   : > { %8599 = vmatpush.bf16.msrb.mxu2 %v9495_v62  ;;  %8573 = vmatpush.bf16.msrb.mxu0 %v9351_v58  ;;  %v10228_v58 = vld [vmem:[#allocation3 + $0x404] sm:$0xf] }
 0x710   : > { %v9415_v57 = vor.u32 %v10228_v58, %v9412_v61  ;;  %v10276_v61 = vld [vmem:[#allocation3 + $0x584] sm:$0xf] }
 0x711   : > { %8610 = vmatpush.bf16.msrb.mxu3 %v9583_v30  ;;  %v9548_v30 = vld [vmem:[#allocation3 + $0x518] sm:$0xf0] }
 0x712   : > { %8583 = vmatpush.bf16.msrb.mxu1 %v9447_v53  ;;  %8574 = vmatmul.bf16.vlgmr.msrb.gmra.mxu0 %v15837_v47  ;;  %v9644_v47 = vld [vmem:[#allocation3 + $0x5d8] sm:$0xf0]  ;;  %v9551_v17 = vor.u32 %v10262_v43, %v9548_v30  ;;  %v10282_v53 = vld [vmem:[#allocation3 + $0x5b4] sm:$0xf] }
 0x713   : > { %8600 = vmatpush.bf16.msrb.mxu2 %v9487_v60  ;;  %8622 = vmatpush.bf16.msra.mxu0 %v9663_v23  ;;  %v9647_v62 = vor.u32 %v10286_v54, %v9644_v47  ;;  %v9423_v60 = vor.u32 %v10230_v37, %v9420_v63  ;;  %v9628_v23 = vld [vmem:[#allocation3 + $0x5b8] sm:$0xf0]  ;;  %v9716_v54 = vld [vmem:[#allocation3 + $0x668] sm:$0xf0]  ;;  %v16153_v36 = vpop.f32.mrf.mxu2  ;;  %v10302_v43 = vld [vmem:[#allocation3 + $0x654] sm:$0xf] }
 0x714   : > { %v9631_v13 = vor.u32 %v10282_v53, %v9628_v23  ;;  %v9844_v47 = vld [vmem:[#allocation3 + $0x768] sm:$0xf0]  ;;  %v9719_v37 = vor.u32 %v10304_v56, %v9716_v54  ;;  %v9612_v63 = vld [vmem:[#allocation3 + $0x598] sm:$0xf0]  ;;  %v10300_v23 = vld [vmem:[#allocation3 + $0x644] sm:$0xf] }
 0x715   : > { %8611 = vmatpush.bf16.msrb.mxu3 %v9575_v27  ;;  %v16149_v27 = vpop.f32.mrf.mxu1  ;;  %v9708_v30 = vld [vmem:[#allocation3 + $0x658] sm:$0xf0] }
 0x716   : > { %8584 = vmatpush.bf16.msrb.mxu1 %v9439_v41  ;;  %v16151_v41 = vpop.f32.mrf.mxu0  ;;  %v9711_v58 = vor.u32 %v10302_v43, %v9708_v30  ;;  %v10296_v43 = vld [vmem:[#allocation3 + $0x624] sm:$0xf] }
 0x717   : > { %8601 = vmatpush.bf16.msrb.mxu2 %v9479_v15  ;;  %8623 = vmatpush.bf16.msra.mxu0 %v9655_v52  ;;  %v9852_v15 = vld [vmem:[#allocation3 + $0x778] sm:$0xf0]  ;;  %v9543_v52 = vor.u32 %v10260_v6, %v9540_v9  ;;  %v9700_v6 = vld [vmem:[#allocation3 + $0x648] sm:$0xf0] }
 0x718   : > { %v9855_v34 = vor.u32 %v10338_v32, %v9852_v15  ;;  %v9916_v9 = vld [vmem:[#allocation3 + $0x7f8] sm:$0xf0]  ;;  %v8228_v32 = vadd.f32 %v16137_v19, %v16135_v29  ;;  %v9908_v29 = vld [vmem:[#allocation3 + $0x7e8] sm:$0xf0] }
 0x719   : > { %8612 = vmatpush.bf16.msrb.mxu3 %v9567_v24  ;;  %v9620_v24 = vld [vmem:[#allocation3 + $0x5a8] sm:$0xf0] }
 0x71a   : > { %8602 = vmatmul.bf16.vlgmr.msrb.gmra.mxu2 %v15866_v3  ;;  %8585 = vmatpush.bf16.msrb.mxu1 %v9431_v1  ;;  %v16147_v3 = vpop.f32.mrf.mxu3  ;;  %v8226_v1 = vadd.f32 %v16129_v20, %v16127_v16  ;;  %v9751_v16 = vor.u32 %v10312_v44, %v9748_v39  ;;  %v10334_v20 = vld [vmem:[#allocation3 + $0x754] sm:$0xf] }
 0x71b   : > { %8650 = vmatpush.bf16.msra.mxu2 %v9791_v25  ;;  %8624 = vmatpush.bf16.msra.mxu0 %v9647_v62  ;;  %v10314_v25 = vld [vmem:[#allocation3 + $0x6b4] sm:$0xf]  ;;  %v9623_v62 = vor.u32 %v10280_v59, %v9620_v24  ;;  %v9839_v53 = vor.u32 %v10334_v20, %v9836_v35  ;;  %v16166_v45 = vpop.f32.mrf.mxu2  ;;  %v10332_v59 = vld [vmem:[#allocation3 + $0x744] sm:$0xf] }
 0x71c   : > { %v9759_v21 = vor.u32 %v10314_v25, %v9756_v7  ;;  %v9732_v25 = vld [vmem:[#allocation3 + $0x688] sm:$0xf0]  ;;  %v10352_v7 = vld [vmem:[#allocation3 + $0x7e4] sm:$0xf]  ;;  %v10386_v24 = vld [vmem:[#allocation3 + $0x8f4] sm:$0xf] }
 0x71d   : > { %8613 = vmatpush.bf16.msrb.mxu3 %v9559_v49  ;;  %v10278_v49 = vld [vmem:[#allocation3 + $0x594] sm:$0xf] }
 0x71e   : > { %8586 = vmatpush.bf16.msrb.mxu1 %v9423_v60  ;;  %v8240_v60 = vadd.f32 %v16133_v0, %v8226_v1  ;;  %v16164_v4 = vpop.f32.mrf.mxu0  ;;  %v10330_v44 = vld [vmem:[#allocation3 + $0x734] sm:$0xf] }
 0x71f   : > { %8651 = vmatpush.bf16.msra.mxu2 %v9783_v26  ;;  %8625 = vmatpush.bf16.msra.mxu0 %v9639_v10  ;;  %v10336_v26 = vld [vmem:[#allocation3 + $0x764] sm:$0xf]  ;;  %v10310_v10 = vld [vmem:[#allocation3 + $0x694] sm:$0xf] }
 0x720   : > { %v9847_v46 = vor.u32 %v10336_v26, %v9844_v47  ;;  %v9743_v0 = vor.u32 %v10310_v10, %v9740_v33  ;;  %v8254_v15 = vadd.f32 %v16140_v8, %v8240_v60  ;;  %v9692_v26 = vld [vmem:[#allocation3 + $0x638] sm:$0xf0]  ;;  %v8242_v47 = vadd.f32 %v16142_v11, %v8228_v32  ;;  %v10350_v20 = vld [vmem:[#allocation3 + $0x7d4] sm:$0xf]  ;;  %v9812_v10 = vld [vmem:[#allocation3 + $0x728] sm:$0xf0] }
 0x721   : > { %8614 = vmatpush.bf16.msrb.mxu3 %v9551_v17  ;;  %v10354_v17 = vld [vmem:[#allocation3 + $0x7f4] sm:$0xf]  ;;  %v9820_v8 = vld [vmem:[#allocation3 + $0x738] sm:$0xf0] }
 0x722   : > { %8587 = vmatpush.bf16.msrb.mxu1 %v9415_v57  ;;  %v16158_v48 = vpop.f32.mrf.mxu3  ;;  %v8268_v1 = vadd.f32 %v16145_v28, %v8254_v15  ;;  %v9823_v30 = vor.u32 %v10330_v44, %v9820_v8  ;;  %v9900_v11 = vld [vmem:[#allocation3 + $0x7d8] sm:$0xf0]  ;;  %v10328_v28 = vld [vmem:[#allocation3 + $0x724] sm:$0xf] }
 0x723   : > { %8652 = vmatpush.bf16.msra.mxu2 %v9775_v14  ;;  %8626 = vmatpush.bf16.msra.mxu0 %v9631_v13  ;;  %v16161_v14 = vpop.f32.mrf.mxu1  ;;  %v10308_v13 = vld [vmem:[#allocation3 + $0x684] sm:$0xf]  ;;  %v16183_v33 = vpop.f32.mrf.mxu2 }
 0x724   : > { %v9735_v19 = vor.u32 %v10308_v13, %v9732_v25  ;;  %v8282_v60 = vadd.f32 %v16147_v3, %v8268_v1  ;;  %v10326_v3 = vld [vmem:[#allocation3 + $0x714] sm:$0xf]  ;;  %v10392_v8 = vld [vmem:[#allocation3 + $0x924] sm:$0xf] }
 0x725   : > { %8615 = vmatpush.bf16.msrb.mxu3 %v9543_v52  ;;  %8588 = vmatmul.bf16.vlgmr.msrb.gmra.mxu1 %v15783_v40  ;;  %v9615_v40 = vor.u32 %v10278_v49, %v9612_v63  ;;  %v9703_v52 = vor.u32 %v10300_v23, %v9700_v6  ;;  %v9911_v49 = vor.u32 %v10352_v7, %v9908_v29  ;;  %v10384_v63 = vld [vmem:[#allocation3 + $0x8e4] sm:$0xf]  ;;  %v9676_v6 = vld [vmem:[#allocation3 + $0x618] sm:$0xf0] }
 0x726   : > { %8636 = vmatpush.bf16.msra.mxu1 %v9727_v22  ;;  %v9919_v22 = vor.u32 %v10354_v17, %v9916_v9  ;;  %v16178_v35 = vpop.f32.mrf.mxu0  ;;  %v10028_v17 = vld [vmem:[#allocation3 + $0x8d8] sm:$0xf0]  ;;  %v9815_v23 = vor.u32 %v10328_v28, %v9812_v10  ;;  %v10348_v9 = vld [vmem:[#allocation3 + $0x7c4] sm:$0xf]  ;;  %v9972_v28 = vld [vmem:[#allocation3 + $0x868] sm:$0xf0] }
 0x727   : > { %8653 = vmatpush.bf16.msra.mxu2 %v9767_v12  ;;  %8627 = vmatpush.bf16.msra.mxu0 %v9623_v62  ;;  %v9828_v12 = vld [vmem:[#allocation3 + $0x748] sm:$0xf0]  ;;  %v10380_v7 = vld [vmem:[#allocation3 + $0x8c4] sm:$0xf] }
 0x728   : > { %8616 = vmatmul.bf16.vlgmr.msrb.gmra.mxu3 %v15967_v2  ;;  %v9604_v2 = vld [vmem:[#allocation3 + $0x588] sm:$0xf0]  ;;  %v9831_v54 = vor.u32 %v10332_v59, %v9828_v12  ;;  %v8296_v12 = vadd.f32 %v16151_v41, %v8282_v60  ;;  %v9884_v41 = vld [vmem:[#allocation3 + $0x7b8] sm:$0xf0] }
 0x729   : > { %8664 = vmatpush.bf16.msra.mxu3 %v9855_v34  ;;  %v9607_v57 = vor.u32 %v10276_v61, %v9604_v2  ;;  %v10044_v34 = vld [vmem:[#allocation3 + $0x8f8] sm:$0xf0]  ;;  %v9903_v61 = vor.u32 %v10350_v20, %v9900_v11  ;;  %v10382_v2 = vld [vmem:[#allocation3 + $0x8d4] sm:$0xf]  ;;  %v10368_v11 = vld [vmem:[#allocation3 + $0x864] sm:$0xf] }
 0x72a   : > { %8637 = vmatpush.bf16.msra.mxu1 %v9719_v37  ;;  %v16171_v56 = vpop.f32.mrf.mxu3  ;;  %v10047_v62 = vor.u32 %v10386_v24, %v10044_v34  ;;  %v10031_v15 = vor.u32 %v10382_v2, %v10028_v17  ;;  %v8310_v59 = vadd.f32 %v16161_v14, %v8296_v12  ;;  %v9668_v34 = vld [vmem:[#allocation3 + $0x608] sm:$0xf0]  ;;  %v10376_v2 = vld [vmem:[#allocation3 + $0x8a4] sm:$0xf] }
 0x72b   : > { %8654 = vmatpush.bf16.msra.mxu2 %v9759_v21  ;;  %8628 = vmatpush.bf16.msra.mxu0 %v9615_v40  ;;  %v10298_v21 = vld [vmem:[#allocation3 + $0x634] sm:$0xf]  ;;  %v16175_v39 = vpop.f32.mrf.mxu1  ;;  %v8256_v40 = vadd.f32 %v16149_v27, %v8242_v47  ;;  %v9804_v27 = vld [vmem:[#allocation3 + $0x718] sm:$0xf0]  ;;  %v10068_v47 = vld [vmem:[#allocation3 + $0x928] sm:$0xf0]  ;;  %v16193_v1 = vpop.f32.mrf.mxu2 }
 0x72c   : > { %v9695_v37 = vor.u32 %v10298_v21, %v9692_v26  ;;  %v9807_v24 = vor.u32 %v10326_v3, %v9804_v27  ;;  %v9796_v21 = vld [vmem:[#allocation3 + $0x708] sm:$0xf0]  ;;  %v10370_v26 = vld [vmem:[#allocation3 + $0x874] sm:$0xf]  ;;  %v10071_v20 = vor.u32 %v10392_v8, %v10068_v47  ;;  %v9964_v27 = vld [vmem:[#allocation3 + $0x858] sm:$0xf0] }
 0x72d   : > { %8665 = vmatpush.bf16.msra.mxu3 %v9847_v46  ;;  %v10036_v46 = vld [vmem:[#allocation3 + $0x8e8] sm:$0xf0]  ;;  %v10366_v3 = vld [vmem:[#allocation3 + $0x854] sm:$0xf]  ;;  %v10372_v47 = vld [vmem:[#allocation3 + $0x884] sm:$0xf] }
 0x72e   : > { %8638 = vmatpush.bf16.msra.mxu1 %v9711_v58  ;;  %v10004_v17 = vld [vmem:[#allocation3 + $0x8a8] sm:$0xf0] }
 0x72f   : > { %8655 = vmatpush.bf16.msra.mxu2 %v9751_v16  ;;  %8629 = vmatpush.bf16.msra.mxu0 %v9607_v57  ;;  %v9684_v16 = vld [vmem:[#allocation3 + $0x628] sm:$0xf0]  ;;  %v10007_v12 = vor.u32 %v10376_v2, %v10004_v17 }
 0x730   : > { %v9687_v58 = vor.u32 %v10296_v43, %v9684_v16  ;;  %v10344_v16 = vld [vmem:[#allocation3 + $0x7a4] sm:$0xf] }
 0x731   : > { %8666 = vmatpush.bf16.msra.mxu3 %v9839_v53  ;;  %v10294_v53 = vld [vmem:[#allocation3 + $0x614] sm:$0xf] }
 0x732   : > { %8639 = vmatpush.bf16.msra.mxu1 %v9703_v52  ;;  %8630 = vmatmul.bf16.vlgmr.msra.gmra.mxu0 %v15970_v55  ;;  %v10039_v55 = vor.u32 %v10384_v63, %v10036_v46  ;;  %v16187_v32 = vpop.f32.mrf.mxu3  ;;  %v9679_v13 = vor.u32 %v10294_v53, %v9676_v6  ;;  %v10020_v52 = vld [vmem:[#allocation3 + $0x8c8] sm:$0xf0]  ;;  %v10012_v63 = vld [vmem:[#allocation3 + $0x8b8] sm:$0xf0]  ;;  %v8324_v46 = vadd.f32 %v16166_v45, %v8310_v59  ;;  %v10342_v6 = vld [vmem:[#allocation3 + $0x794] sm:$0xf] }
 0x733   : > { %8656 = vmatpush.bf16.msra.mxu2 %v9743_v0  ;;  %8678 = vmatpush.bf16.msrb.mxu0 %v9919_v22  ;;  %v9892_v0 = vld [vmem:[#allocation3 + $0x7c8] sm:$0xf0]  ;;  %v16189_v57 = vpop.f32.mrf.mxu1  ;;  %v10292_v22 = vld [vmem:[#allocation3 + $0x604] sm:$0xf]  ;;  %v10060_v45 = vld [vmem:[#allocation3 + $0x918] sm:$0xf0] }
 0x734   : > { %v9895_v25 = vor.u32 %v10348_v9, %v9892_v0  ;;  %v9671_v14 = vor.u32 %v10292_v22, %v9668_v34  ;;  %v8381_v22 = vpop.f32.mrf.mxu2  ;;  %v10374_v59 = vld [vmem:[#allocation3 + $0x894] sm:$0xf]  ;;  %v10364_v34 = vld [vmem:[#allocation3 + $0x844] sm:$0xf] }
 0x735   : > { %8667 = vmatpush.bf16.msra.mxu3 %v9831_v54  ;;  %v10346_v54 = vld [vmem:[#allocation3 + $0x7b4] sm:$0xf] }
 0x736   : > { %8640 = vmatpush.bf16.msra.mxu1 %v9695_v37  ;;  %v9887_v44 = vor.u32 %v10346_v54, %v9884_v41  ;;  %v9980_v37 = vld [vmem:[#allocation3 + $0x878] sm:$0xf0]  ;;  %v9956_v54 = vld [vmem:[#allocation3 + $0x848] sm:$0xf0] }
 0x737   : > { %8657 = vmatpush.bf16.msra.mxu2 %v9735_v19  ;;  %8679 = vmatpush.bf16.msrb.mxu0 %v9911_v49  ;;  %v10023_v19 = vor.u32 %v10380_v7, %v10020_v52  ;;  %v10378_v49 = vld [vmem:[#allocation3 + $0x8b4] sm:$0xf]  ;;  %v9967_v7 = vor.u32 %v10366_v3, %v9964_v27  ;;  %v10340_v52 = vld [vmem:[#allocation3 + $0x784] sm:$0xf] }
 0x738   : > { %v10015_v10 = vor.u32 %v10378_v49, %v10012_v63 }
 0x739   : > { %8668 = vmatpush.bf16.msra.mxu3 %v9823_v30  ;;  %v9983_v30 = vor.u32 %v10370_v26, %v9980_v37  ;;  %v9988_v26 = vld [vmem:[#allocation3 + $0x888] sm:$0xf0] }
 0x73a   : > { %8658 = vmatmul.bf16.vlgmr.msra.gmra.mxu2 %v16006_v51  ;;  %8641 = vmatpush.bf16.msra.mxu1 %v9687_v58  ;;  %v8270_v51 = vadd.f32 %v16153_v36, %v8256_v40  ;;  %v10324_v36 = vld [vmem:[#allocation3 + $0x704] sm:$0xf]  ;;  %v8338_v40 = vadd.f32 %v16171_v56, %v8324_v46  ;;  %v10390_v58 = vld [vmem:[#allocation3 + $0x914] sm:$0xf]  ;;  %v9868_v56 = vld [vmem:[#allocation3 + $0x798] sm:$0xf0] }
 0x73b   : > { %8706 = vmatpush.bf16.msrb.mxu2 %v10047_v62  ;;  %8680 = vmatpush.bf16.msrb.mxu0 %v9903_v61  ;;  %v16195_v62 = vpop.f32.mrf.mxu0  ;;  %v9799_v43 = vor.u32 %v10324_v36, %v9796_v21  ;;  %v8367_v9 = vpop.f32.mrf.mxu1  ;;  %v10063_v0 = vor.u32 %v10390_v58, %v10060_v45 }
 0x73c   : > { %v8284_v29 = vadd.f32 %v16158_v48, %v8270_v51  ;;  %v9876_v48 = vld [vmem:[#allocation3 + $0x7a8] sm:$0xf0]  ;;  %v10388_v51 = vld [vmem:[#allocation3 + $0x904] sm:$0xf] }
 0x73d   : > { %8669 = vmatpush.bf16.msra.mxu3 %v9815_v23  ;;  %v9879_v61 = vor.u32 %v10344_v16, %v9876_v48  ;;  %v8352_v23 = vadd.f32 %v16178_v35, %v8338_v40  ;;  %v9871_v35 = vor.u32 %v10342_v6, %v9868_v56 }
 0x73e   : > { %8642 = vmatpush.bf16.msra.mxu1 %v9679_v13  ;;  %v8298_v60 = vadd.f32 %v16164_v4, %v8284_v29  ;;  %v9975_v4 = vor.u32 %v10368_v11, %v9972_v28  ;;  %v9996_v13 = vld [vmem:[#allocation3 + $0x898] sm:$0xf0]  ;;  %v10358_v28 = vld [vmem:[#allocation3 + $0x814] sm:$0xf] }
 0x73f   : > { %8707 = vmatpush.bf16.msrb.mxu2 %v10039_v55  ;;  %8681 = vmatpush.bf16.msrb.mxu0 %v9895_v25  ;;  %v8393_v55 = vpop.f32.mrf.mxu3  ;;  %v8366_v25 = vadd.f32 %v16189_v57, %v8352_v23  ;;  %v9999_v36 = vor.u32 %v10374_v59, %v9996_v13 }
 0x740   : > { %v8312_v53 = vadd.f32 %v16175_v39, %v8298_v60  ;;  %v9932_v60 = vld [vmem:[#allocation3 + $0x818] sm:$0xf0] }
 0x741   : > { %8670 = vmatpush.bf16.msra.mxu3 %v9807_v24  ;;  %v9935_v45 = vor.u32 %v10358_v28, %v9932_v60 }
 0x742   : > { %8643 = vmatpush.bf16.msra.mxu1 %v9671_v14  ;;  %v10362_v14 = vld [vmem:[#allocation3 + $0x834] sm:$0xf] }
 0x743   : > { %8708 = vmatpush.bf16.msrb.mxu2 %v10031_v15  ;;  %8682 = vmatpush.bf16.msrb.mxu0 %v9887_v44  ;;  %v10052_v15 = vld [vmem:[#allocation3 + $0x908] sm:$0xf0]  ;;  %v8407_v39 = vpop.f32.mrf.mxu0  ;;  %v8421_v8 = vpop.f32.mrf.mxu1  ;;  %v9948_v44 = vld [vmem:[#allocation3 + $0x838] sm:$0xf0] }
 0x744   : > { %v10055_v24 = vor.u32 %v10388_v51, %v10052_v15  ;;  %v9951_v46 = vor.u32 %v10362_v14, %v9948_v44 }
 0x745   : > { %8671 = vmatpush.bf16.msra.mxu3 %v9799_v43  ;;  %8644 = vmatmul.bf16.vlgmr.msra.gmra.mxu1 %v15940_v50  ;;  %v8326_v50 = vadd.f32 %v16183_v33, %v8312_v53  ;;  %v8380_v33 = vadd.f32 %v16193_v1, %v8366_v25  ;;  %v10360_v43 = vld [vmem:[#allocation3 + $0x824] sm:$0xf] }
 0x746   : > { %8692 = vmatpush.bf16.msrb.mxu1 %v9983_v30  ;;  %v9940_v30 = vld [vmem:[#allocation3 + $0x828] sm:$0xf0] }
 0x747   : > { %8709 = vmatpush.bf16.msrb.mxu2 %v10023_v19  ;;  %8683 = vmatpush.bf16.msrb.mxu0 %v9879_v61  ;;  %v8340_v41 = vadd.f32 %v16187_v32, %v8326_v50  ;;  %v8395_v29 = vpop.f32.mrf.mxu3  ;;  %v9959_v19 = vor.u32 %v10364_v34, %v9956_v54  ;;  %v8394_v37 = vadd.f32 %v8393_v55, %v8380_v33  ;;  %v10356_v61 = vld [vmem:[#allocation3 + $0x804] sm:$0xf] }
 0x748   : > { %8672 = vmatmul.bf16.vlgmr.msra.gmra.mxu3 %v16066_v5  ;;  %v9860_v5 = vld [vmem:[#allocation3 + $0x788] sm:$0xf0]  ;;  %v9991_v32 = vor.u32 %v10372_v47, %v9988_v26  ;;  %v9943_v11 = vor.u32 %v10360_v43, %v9940_v30 }
 0x749   : > { %8725 = vmatpush.bf16.msrb.mxu3 %v10071_v20  ;;  %v9863_v21 = vor.u32 %v10340_v52, %v9860_v5  ;;  %v8354_v57 = vadd.f32 %v16195_v62, %v8340_v41  ;;  %v8408_v63 = vadd.f32 %v8407_v39, %v8394_v37  ;;  %v8435_v62 = vpop.f32.mrf.mxu2 }
 0x74a   : > { %8693 = vmatpush.bf16.msrb.mxu1 %v9975_v4 }
 0x74b   : > { %8710 = vmatpush.bf16.msrb.mxu2 %v10015_v10  ;;  %8684 = vmatpush.bf16.msrb.mxu0 %v9871_v35  ;;  %v8368_v49 = vadd.f32 %v8367_v9, %v8354_v57  ;;  %v8409_v1 = vpop.f32.mrf.mxu0  ;;  %v8422_v16 = vadd.f32 %v8421_v8, %v8408_v63  ;;  %v8423_v55 = vpop.f32.mrf.mxu1 }
 0x74d   : > { %8726 = vmatpush.bf16.msrb.mxu3 %v10063_v0  ;;  %v8382_v48 = vadd.f32 %v8381_v22, %v8368_v49 }
 0x74e   : > { %8694 = vmatpush.bf16.msrb.mxu1 %v9967_v7 }
 0x74f   : > { %8711 = vmatpush.bf16.msrb.mxu2 %v10007_v12  ;;  %8685 = vmatpush.bf16.msrb.mxu0 %v9863_v21  ;;  %v8449_v20 = vpop.f32.mrf.mxu3  ;;  %v8396_v40 = vadd.f32 %v8395_v29, %v8382_v48 }
 0x751   : > { %8727 = vmatpush.bf16.msrb.mxu3 %v10055_v24  ;;  %v8410_v10 = vadd.f32 %v8409_v1, %v8396_v40  ;;  %v8437_v53 = vpop.f32.mrf.mxu2 }
 0x752   : > { %8695 = vmatpush.bf16.msrb.mxu1 %v9959_v19  ;;  %8686 = vmatmul.bf16.vlgmr.msrb.gmra.mxu0 %v16106_v18  ;;  %v8436_v18 = vadd.f32 %v8435_v62, %v8422_v16 }
 0x753   : > { %8712 = vmatpush.bf16.msrb.mxu2 %v9999_v36  ;;  %v8424_v2 = vadd.f32 %v8423_v55, %v8410_v10 }
 0x754   : > { %v8450_v58 = vadd.f32 %v8449_v20, %v8436_v18 }
 0x755   : > { %v8438_v6 = vadd.f32 %v8437_v53, %v8424_v2 }
 0x756   : > { %8696 = vmatpush.bf16.msrb.mxu1 %v9951_v46 }
 0x757   : > { %8713 = vmatpush.bf16.msrb.mxu2 %v9991_v32  ;;  %v8451_v4 = vpop.f32.mrf.mxu3 }
 0x758   : > { %10073 = vmatmul.msk.bf16.vlgmr.msrb.gmra.mxu3 %vm1133_vm11, %v16118_v42  ;;  %v9924_v42 = vld [vmem:[#allocation3 + $0x808] sm:$0xf0]  ;;  %v8452_v56 = vadd.f32 %v8451_v4, %v8438_v6 }
 0x759   : > { %v9927_v23 = vor.u32 %v10356_v61, %v9924_v42 }
 0x75a   : > { %8714 = vmatmul.bf16.vlgmr.msrb.gmra.mxu2 %v16108_v31  ;;  %8697 = vmatpush.bf16.msrb.mxu1 %v9943_v11  ;;  %v8463_v31 = vpop.f32.mrf.mxu0 }
 0x75b   : > { %v8464_v17 = vadd.f32 %v8463_v31, %v8450_v58 }
 0x75d   : > { %8734 = vst [vmem:[%s16217_s23] sm:$0xff] %v8464_v17  ;;  %v8491_v27 = vpop.f32.mrf.mxu2 }
 0x75e   : > { %8698 = vmatpush.bf16.msrb.mxu1 %v9935_v45 }
 0x762   : > { %8699 = vmatpush.bf16.msrb.mxu1 %v9927_v23  ;;  %v8465_v9 = vpop.f32.mrf.mxu0  ;;  %v8477_v3 = vpop.f32.mrf.mxu1 }
 0x763   : > { %v8466_v0 = vadd.f32 %v8465_v9, %v8452_v56  ;;  %v8492_v22 = vadd.f32 %v8491_v27, %v8477_v3 }
 0x765   : > { %8700 = vmatmul.bf16.vlgmr.msrb.gmra.mxu1 %v16063_v38  ;;  %8736 = vst [vmem:[%s16217_s23 + $0x10] sm:$0xf] %v8466_v0  ;;  %v8493_v15 = vpop.f32.mrf.mxu2 }
 0x76a   : > { %v8479_v51 = vpop.f32.mrf.mxu1 }
 0x76b   : > { %v8505_v12 = vpop.f32.mrf.mxu3  ;;  %v8494_v26 = vadd.f32 %v8493_v15, %v8479_v51 }
 0x76c   : > { %v8506_v34 = vadd.f32 %v8505_v12, %v8492_v22 }
 0x76e   : > { %v8519_v35 = vpop.f32.mrf.mxu0 }
 0x76f   : > { %v8520_v41 = vadd.f32 %v8519_v35, %v8506_v34 }
 0x773   : > { %v8507_v39 = vpop.f32.mrf.mxu3 }
 0x774   : > { %v8508_v57 = vadd.f32 %v8507_v39, %v8494_v26 }
 0x776   : > { %v8521_v7 = vpop.f32.mrf.mxu0 }
 0x777   : > { %v8522_v44 = vadd.f32 %v8521_v7, %v8508_v57 }
 0x77d   : > { %v8547_v50 = vpop.f32.mrf.mxu2 }
 0x782   : > { %v8533_v13 = vpop.f32.mrf.mxu1 }
 0x783   : > { %v8534_v33 = vadd.f32 %v8533_v13, %v8520_v41 }
 0x785   : > { %v8549_v5 = vpop.f32.mrf.mxu2  ;;  %v8548_v29 = vadd.f32 %v8547_v50, %v8534_v33 }
 0x78a   : > { %v8535_v52 = vpop.f32.mrf.mxu1 }
 0x78b   : > { %v8561_v25 = vpop.f32.mrf.mxu3  ;;  %v8536_v32 = vadd.f32 %v8535_v52, %v8522_v44 }
 0x78c   : > { %v8562_v37 = vadd.f32 %v8561_v25, %v8548_v29 }
 0x78d   : > { %v8550_v62 = vadd.f32 %v8549_v5, %v8536_v32 }
 0x78f   : > { %v8575_v59 = vpop.f32.mrf.mxu0 }
 0x790   : > { %v8576_v49 = vadd.f32 %v8575_v59, %v8562_v37 }
 0x793   : > { %v8563_v24 = vpop.f32.mrf.mxu3 }
 0x794   : > { %v8564_v30 = vadd.f32 %v8563_v24, %v8550_v62 }
 0x797   : > { %v8577_v21 = vpop.f32.mrf.mxu0 }
 0x798   : > { %v8578_v20 = vadd.f32 %v8577_v21, %v8564_v30 }
 0x79d   : > { %v8603_v54 = vpop.f32.mrf.mxu2 }
 0x7a2   : > { %v8589_v38 = vpop.f32.mrf.mxu1 }
 0x7a3   : > { %v8590_v63 = vadd.f32 %v8589_v38, %v8576_v49 }
 0x7a5   : > { %v8605_v8 = vpop.f32.mrf.mxu2  ;;  %v8604_v16 = vadd.f32 %v8603_v54, %v8590_v63 }
 0x7aa   : > { %v8591_v19 = vpop.f32.mrf.mxu1 }
 0x7ab   : > { %v8617_v36 = vpop.f32.mrf.mxu3  ;;  %v8592_v28 = vadd.f32 %v8591_v19, %v8578_v20 }
 0x7ac   : > { %v8618_v11 = vadd.f32 %v8617_v36, %v8604_v16 }
 0x7ad   : > { %v8606_v10 = vadd.f32 %v8605_v8, %v8592_v28 }
 0x7af   : > { %v8631_v47 = vpop.f32.mrf.mxu0 }
 0x7b0   : > { %v8632_v60 = vadd.f32 %v8631_v47, %v8618_v11 }
 0x7b3   : > { %v8619_v14 = vpop.f32.mrf.mxu3 }
 0x7b4   : > { %v8620_v31 = vadd.f32 %v8619_v14, %v8606_v10 }
 0x7b7   : > { %v8633_v48 = vpop.f32.mrf.mxu0 }
 0x7b8   : > { %v8634_v42 = vadd.f32 %v8633_v48, %v8620_v31 }
 0x7bd   : > { %v8659_v1 = vpop.f32.mrf.mxu2 }
 0x7c2   : > { %v8645_v46 = vpop.f32.mrf.mxu1 }
 0x7c3   : > { %v8646_v40 = vadd.f32 %v8645_v46, %v8632_v60 }
 0x7c5   : > { %v8661_v55 = vpop.f32.mrf.mxu2  ;;  %v8660_v61 = vadd.f32 %v8659_v1, %v8646_v40 }
 0x7ca   : > { %v8647_v18 = vpop.f32.mrf.mxu1 }
 0x7cb   : > { %v8673_v43 = vpop.f32.mrf.mxu3  ;;  %v8648_v17 = vadd.f32 %v8647_v18, %v8634_v42 }
 0x7cc   : > { %v8674_v2 = vadd.f32 %v8673_v43, %v8660_v61 }
 0x7cd   : > { %v8662_v9 = vadd.f32 %v8661_v55, %v8648_v17 }
 0x7cf   : > { %v8687_v58 = vpop.f32.mrf.mxu0 }
 0x7d0   : > { %v8688_v53 = vadd.f32 %v8687_v58, %v8674_v2 }
 0x7d3   : > { %v8675_v45 = vpop.f32.mrf.mxu3 }
 0x7d4   : > { %v8676_v27 = vadd.f32 %v8675_v45, %v8662_v9 }
 0x7d7   : > { %v8689_v3 = vpop.f32.mrf.mxu0 }
 0x7d8   : > { %v8690_v51 = vadd.f32 %v8689_v3, %v8676_v27 }
 0x7db   : > { %v8729_v56 = vpop.f32.mrf.mxu3 }
 0x7dd   : > { %v8715_v23 = vpop.f32.mrf.mxu2 }
 0x7e2   : > { %v8701_v4 = vpop.f32.mrf.mxu1 }
 0x7e3   : > { %v8702_v6 = vadd.f32 %v8701_v4, %v8688_v53  ;;  %v8731_v50 = vpop.f32.mrf.mxu3 }
 0x7e5   : > { %v8716_v0 = vadd.f32 %v8715_v23, %v8702_v6  ;;  %v8717_v35 = vpop.f32.mrf.mxu2 }
 0x7e7   : > { %v8730_v12 = vadd.f32 %v8729_v56, %v8716_v0 }
 0x7e9   : > { %8735 = vst [vmem:[%s16217_s23 + $0x8] sm:$0xff] %v8730_v12 }
 0x7ea   : > { %v8703_v15 = vpop.f32.mrf.mxu1 }
 0x7eb   : > { %v8704_v39 = vadd.f32 %v8703_v15, %v8690_v51 }
 0x7ed   : > { %v8718_v13 = vadd.f32 %v8717_v35, %v8704_v39 }
 0x7ef   : > { %v8732_v25 = vadd.f32 %v8731_v50, %v8718_v13 }
 0x7f1   : > { %8737 = vst [vmem:[%s16217_s23 + $0x18] sm:$0xf] %v8732_v25 }
 0x7f2 PF: > { %s16_s21 = sadd.s32 1, %s12315_s21  }
 0x7f3   : > { %p13_p4 = scmp.ge.s32.totalorder %s16_s21, 4  }
 0x7f5   :  { %15 = sbr.rel (!%p13_p4) target bundleno = 1 (0x1), region = 74 }

</bundles_post_ra>
